<compile_context>
chip_gen: v5e
topology: v5e:2x2
jax: 0.10.0
libtpu: 0.0.40
codegen_flags: <defaults>
</compile_context>

<pallas_src>
import jax
import jax.numpy as jnp
from jax.experimental import pallas as pl
from jax.experimental.pallas import tpu as pltpu

VOCAB = 21
EMBED = 24
HIDDEN = 64
SEQ = 18       # linear2 = nn.Linear(18, 128) -> sequence length must be 18
BATCH = 2


def _lstm_kernel(x_ref,                          # (T*B, E) embedded, time-major, flattened
                 wih_f_ref, whh_f_ref, b_f_ref,  # fwd dir: (E,4H), (H,4H), (1,4H); gates (i,f,o,g)
                 wih_b_ref, whh_b_ref, b_b_ref,  # bwd dir
                 w1f_ref, w1b_ref, b1_ref,       # linear1 split halves: (1,H), (1,H), (1,1)
                 w2_ref, b2_ref,                 # linear2: (128,T), (128,1)
                 w3_ref, b3_ref,                 # linear3: (1,128), (1,1)
                 out_ref,                        # (1, B)
                 gxf_ref, gxb_ref,               # scratch: (T*B, 4H) hoisted input gates
                 sf_ref, sb_ref):                # scratch: (T, B, 1) fused linear1 outputs
    TB, _ = x_ref.shape
    B = out_ref.shape[1]
    T = TB // B
    H = HIDDEN
    H3 = 3 * H

    # ---- hoisted input projection (bias folded in; off the recurrent critical path) ----
    x = x_ref[...]
    gxf_ref[...] = (jnp.dot(x, wih_f_ref[...], preferred_element_type=jnp.float32)
                    + b_f_ref[...])
    gxb_ref[...] = (jnp.dot(x, wih_b_ref[...], preferred_element_type=jnp.float32)
                    + b_b_ref[...])

    whh_f = whh_f_ref[...]
    whh_b = whh_b_ref[...]
    w1f = w1f_ref[...]
    w1b = w1b_ref[...]

    def cell(gx, h, c, whh):
        # gate columns pre-permuted to (i, f, o, g)
        gates = jnp.dot(h, whh, preferred_element_type=jnp.float32) + gx   # (B, 4H)
        sig = jax.nn.sigmoid(gates[:, :H3])       # i | f | o in a single EUP call
        g_t = jnp.tanh(gates[:, H3:])
        c_new = sig[:, H:2 * H] * c + sig[:, :H] * g_t
        h_new = sig[:, 2 * H:H3] * jnp.tanh(c_new)
        return h_new, c_new

    def body(t, carry):
        h_f, c_f, h_b, c_b = carry
        tb = T - 1 - t
        gx_f = gxf_ref[pl.ds(t * B, B), :]
        gx_b = gxb_ref[pl.ds(tb * B, B), :]
        h_f, c_f = cell(gx_f, h_f, c_f, whh_f)
        h_b, c_b = cell(gx_b, h_b, c_b, whh_b)
        # fused linear1 contributions (dead-ends of the carry chain -> overlap freely)
        sf_ref[t] = jnp.sum(h_f * w1f, axis=-1, keepdims=True)     # (B, 1)
        sb_ref[tb] = jnp.sum(h_b * w1b, axis=-1, keepdims=True)    # (B, 1)
        return h_f, c_f, h_b, c_b

    z0 = jnp.zeros((B, H), jnp.float32)
    jax.lax.fori_loop(0, T, body, (z0, z0, z0, z0), unroll=True)

    # ---- heads ----
    # linear1 (+tanh): s[t,b] = tanh(h_f[t,b].w1_f + h_b[t,b].w1_b + b1)
    s = jnp.tanh(jnp.sum(sf_ref[...] + sb_ref[...], axis=-1) + b1_ref[0, 0])   # (T, B)
    # linear2 (18 -> 128) + tanh; batch stays on the lane axis
    z2 = jnp.tanh(jnp.dot(w2_ref[...], s, preferred_element_type=jnp.float32)
                  + b2_ref[...])                                               # (128, B)
    # linear3 (128 -> 1) + tanh
    z3 = jnp.tanh(jnp.dot(w3_ref[...], z2, preferred_element_type=jnp.float32)
                  + b3_ref[...])                                               # (1, B)
    out_ref[...] = z3


def _prep_direction(w_ih, w_hh, b_ih, b_hh):
    """PyTorch layout -> kernel layout: permute gates (i,f,g,o)->(i,f,o,g),
    pre-transpose for x @ W, and fold the two biases."""
    def perm(m):
        i, f, g, o = jnp.split(m, 4, axis=0)
        return jnp.concatenate([i, f, o, g], axis=0)
    return perm(w_ih).T, perm(w_hh).T, perm(b_ih + b_hh).reshape(1, -1)


def lstm_pallas(tokens, params):
    B, T = tokens.shape
    emb = params["embedding"][tokens]                           # (B, T, E) gather = glue
    x = jnp.transpose(emb, (1, 0, 2)).reshape(T * B, EMBED)     # time-major, flattened

    wih_f, whh_f, b_f = _prep_direction(params["w_ih_f"], params["w_hh_f"],
                                        params["b_ih_f"], params["b_hh_f"])
    wih_b, whh_b, b_b = _prep_direction(params["w_ih_b"], params["w_hh_b"],
                                        params["b_ih_b"], params["b_hh_b"])

    w1f = params["w1"][:, :HIDDEN]                              # (1, H)  forward half
    w1b = params["w1"][:, HIDDEN:]                              # (1, H)  backward half
    b1 = params["b1"].reshape(1, 1)
    w2 = params["w2"]                                           # (128, 18)
    b2 = params["b2"].reshape(-1, 1)                            # (128, 1)
    w3 = params["w3"]                                           # (1, 128)
    b3 = params["b3"].reshape(1, 1)

    args = (x, wih_f, whh_f, b_f, wih_b, whh_b, b_b,
            w1f, w1b, b1, w2, b2, w3, b3)

    def full_spec(a):
        nd = a.ndim
        return pl.BlockSpec(a.shape, (lambda n: (lambda i: (0,) * n))(nd))

    out = pl.pallas_call(
        _lstm_kernel,
        out_shape=jax.ShapeDtypeStruct((1, B), jnp.float32),
        grid=(1,),
        in_specs=[full_spec(a) for a in args],
        out_specs=pl.BlockSpec((1, B), lambda i: (0, 0)),
        scratch_shapes=[pltpu.VMEM((T * B, 4 * HIDDEN), jnp.float32),
                        pltpu.VMEM((T * B, 4 * HIDDEN), jnp.float32),
                        pltpu.VMEM((T, B, 1), jnp.float32),
                        pltpu.VMEM((T, B, 1), jnp.float32)],
        compiler_params=pltpu.CompilerParams(
            dimension_semantics=("arbitrary",)),
    )(*args)
    return out[0]                                               # (B,)


def lstm_reference(tokens, params):
    """Pure-JAX reference with PyTorch semantics/layout (for correctness check)."""
    emb = params["embedding"][tokens]                           # (B, T, E)
    B, T = tokens.shape
    H = HIDDEN

    def run(w_ih, w_hh, b_ih, b_hh, xs):
        h = jnp.zeros((B, H), jnp.float32)
        c = jnp.zeros((B, H), jnp.float32)
        outs = []
        for t in range(T):
            g = xs[:, t] @ w_ih.T + h @ w_hh.T + b_ih + b_hh
            i = jax.nn.sigmoid(g[:, :H])
            f = jax.nn.sigmoid(g[:, H:2 * H])
            gg = jnp.tanh(g[:, 2 * H:3 * H])
            o = jax.nn.sigmoid(g[:, 3 * H:])
            c = f * c + i * gg
            h = o * jnp.tanh(c)
            outs.append(h)
        return jnp.stack(outs, axis=1)                          # (B, T, H)

    hf = run(params["w_ih_f"], params["w_hh_f"], params["b_ih_f"], params["b_hh_f"], emb)
    hb = run(params["w_ih_b"], params["w_hh_b"], params["b_ih_b"], params["b_hh_b"],
             emb[:, ::-1])[:, ::-1]
    out = jnp.concatenate([hf, hb], axis=-1)                    # (B, T, 2H)
    s = jnp.tanh(out @ params["w1"][0] + params["b1"][0])       # (B, T)
    z2 = jnp.tanh(s @ params["w2"].T + params["b2"])            # (B, 128)
    z3 = jnp.tanh(z2 @ params["w3"].T + params["b3"])           # (B, 1)
    return z3[:, 0]


def init_params(key):
    ks = jax.random.split(key, 16)
    H, E = HIDDEN, EMBED
    k_lstm = 1.0 / jnp.sqrt(H)

    def uni(k, shape, bound):
        return jax.random.uniform(k, shape, jnp.float32, -bound, bound)

    # embedding ~ N(0,1), padding_idx=0 row zeroed
    emb = jax.random.normal(ks[0], (VOCAB, E), jnp.float32).at[0].set(0.0)

    p = dict(embedding=emb)
    for d, base in (("f", 1), ("b", 5)):                        # PyTorch-layout LSTM weights
        p[f"w_ih_{d}"] = uni(ks[base], (4 * H, E), k_lstm)      # rows ordered (i,f,g,o)
        p[f"w_hh_{d}"] = uni(ks[base + 1], (4 * H, H), k_lstm)
        p[f"b_ih_{d}"] = uni(ks[base + 2], (4 * H,), k_lstm)
        p[f"b_hh_{d}"] = uni(ks[base + 3], (4 * H,), k_lstm)

    k1 = 1.0 / jnp.sqrt(2 * H)
    k2 = 1.0 / jnp.sqrt(SEQ)
    k3 = 1.0 / jnp.sqrt(128)
    p["w1"] = uni(ks[9], (1, 2 * H), k1)
    p["b1"] = uni(ks[10], (1,), k1)
    p["w2"] = uni(ks[11], (128, SEQ), k2)
    p["b2"] = uni(ks[12], (128,), k2)
    p["w3"] = uni(ks[13], (1, 128), k3)
    p["b3"] = uni(ks[14], (1,), k3)
    return p


if __name__ == "__main__":
    key = jax.random.PRNGKey(0)
    k_params, k_tokens = jax.random.split(key)
    params = init_params(k_params)

    # tokens in [0, VOCAB); shape (B, 18) as required by linear2 (18 -> 128)
    tokens = jax.random.randint(k_tokens, (BATCH, SEQ), 0, VOCAB, dtype=jnp.int32)

    out = jax.block_until_ready(jax.jit(lstm_pallas)(tokens, params))
    ref = jax.block_until_ready(lstm_reference(tokens, params))

    assert out.shape == (BATCH,), out.shape
    assert jnp.allclose(out, ref, rtol=1e-3, atol=1e-3), (out, ref)

    print("KERNEL_OK")
</pallas_src>

<mosaic_0001>
module attributes {stable_mosaic.version = 11 : i64} {
  func.func @_lstm_kernel(%arg0: i32, %arg1: memref<36x24xf32, #tpu.memory_space<vmem>>, %arg2: memref<24x256xf32, #tpu.memory_space<vmem>>, %arg3: memref<64x256xf32, #tpu.memory_space<vmem>>, %arg4: memref<1x256xf32, #tpu.memory_space<vmem>>, %arg5: memref<24x256xf32, #tpu.memory_space<vmem>>, %arg6: memref<64x256xf32, #tpu.memory_space<vmem>>, %arg7: memref<1x256xf32, #tpu.memory_space<vmem>>, %arg8: memref<1x64xf32, #tpu.memory_space<vmem>>, %arg9: memref<1x64xf32, #tpu.memory_space<vmem>>, %arg10: memref<1x1xf32, #tpu.memory_space<vmem>>, %arg11: memref<128x18xf32, #tpu.memory_space<vmem>>, %arg12: memref<128x1xf32, #tpu.memory_space<vmem>>, %arg13: memref<1x128xf32, #tpu.memory_space<vmem>>, %arg14: memref<1x1xf32, #tpu.memory_space<vmem>>, %arg15: memref<1x2xf32, #tpu.memory_space<vmem>>, %arg16: memref<36x256xf32, #tpu.memory_space<vmem>>, %arg17: memref<36x256xf32, #tpu.memory_space<vmem>>, %arg18: memref<18x2x1xf32, #tpu.memory_space<vmem>>, %arg19: memref<18x2x1xf32, #tpu.memory_space<vmem>>) attributes {dimension_semantics = [#tpu.dimension_semantics<arbitrary>], iteration_bounds = array<i64: 1>, scalar_prefetch = 0 : i64, scratch_operands = 4 : i64, tpu.core_type = #tpu.core_type<tc>, window_params = [{pipeline_mode = #tpu.pipeline_mode<synchronous>, transform_indices = @transform_0, window_bounds = array<i64: 36, 24>}, {pipeline_mode = #tpu.pipeline_mode<synchronous>, transform_indices = @transform_1, window_bounds = array<i64: 24, 256>}, {pipeline_mode = #tpu.pipeline_mode<synchronous>, transform_indices = @transform_2, window_bounds = array<i64: 64, 256>}, {pipeline_mode = #tpu.pipeline_mode<synchronous>, transform_indices = @transform_3, window_bounds = array<i64: 1, 256>}, {pipeline_mode = #tpu.pipeline_mode<synchronous>, transform_indices = @transform_4, window_bounds = array<i64: 24, 256>}, {pipeline_mode = #tpu.pipeline_mode<synchronous>, transform_indices = @transform_5, window_bounds = array<i64: 64, 256>}, {pipeline_mode = #tpu.pipeline_mode<synchronous>, transform_indices = @transform_6, window_bounds = array<i64: 1, 256>}, {pipeline_mode = #tpu.pipeline_mode<synchronous>, transform_indices = @transform_7, window_bounds = array<i64: 1, 64>}, {pipeline_mode = #tpu.pipeline_mode<synchronous>, transform_indices = @transform_8, window_bounds = array<i64: 1, 64>}, {pipeline_mode = #tpu.pipeline_mode<synchronous>, transform_indices = @transform_9, window_bounds = array<i64: 1, 1>}, {pipeline_mode = #tpu.pipeline_mode<synchronous>, transform_indices = @transform_10, window_bounds = array<i64: 128, 18>}, {pipeline_mode = #tpu.pipeline_mode<synchronous>, transform_indices = @transform_11, window_bounds = array<i64: 128, 1>}, {pipeline_mode = #tpu.pipeline_mode<synchronous>, transform_indices = @transform_12, window_bounds = array<i64: 1, 128>}, {pipeline_mode = #tpu.pipeline_mode<synchronous>, transform_indices = @transform_13, window_bounds = array<i64: 1, 1>}, {pipeline_mode = #tpu.pipeline_mode<synchronous>, transform_indices = @transform_14, window_bounds = array<i64: 1, 2>}]} {
    %c0 = arith.constant 0 : index
    %c0_0 = arith.constant 0 : index
    %0 = vector.load %arg1[%c0, %c0_0] : memref<36x24xf32, #tpu.memory_space<vmem>>, vector<36x24xf32>
    %c0_1 = arith.constant 0 : index
    %c0_2 = arith.constant 0 : index
    %1 = vector.load %arg2[%c0_1, %c0_2] : memref<24x256xf32, #tpu.memory_space<vmem>>, vector<24x256xf32>
    %cst = arith.constant dense<0.000000e+00> : vector<36x256xf32>
    %2 = tpu.matmul %0, %1, %cst {dimension_numbers = #tpu.dot_dimension_numbers<[1], [0], [0], [1], [0, 0, 1, 1], [], []>} : vector<36x24xf32>, vector<24x256xf32>, vector<36x256xf32> -> vector<36x256xf32>
    %c0_3 = arith.constant 0 : index
    %c0_4 = arith.constant 0 : index
    %3 = vector.load %arg4[%c0_3, %c0_4] : memref<1x256xf32, #tpu.memory_space<vmem>>, vector<1x256xf32>
    %4 = vector.broadcast %3 : vector<1x256xf32> to vector<36x256xf32>
    %5 = arith.addf %2, %4 : vector<36x256xf32>
    %c0_5 = arith.constant 0 : index
    %c0_6 = arith.constant 0 : index
    %6 = vector.load %arg16[%c0_5, %c0_6] : memref<36x256xf32, #tpu.memory_space<vmem>>, vector<36x256xf32>
    tpu.vector_store %arg16[%c0_5, %c0_6], %5 {strides = array<i32>} : memref<36x256xf32, #tpu.memory_space<vmem>>, vector<36x256xf32>,
    %c0_7 = arith.constant 0 : index
    %c0_8 = arith.constant 0 : index
    %7 = vector.load %arg5[%c0_7, %c0_8] : memref<24x256xf32, #tpu.memory_space<vmem>>, vector<24x256xf32>
    %cst_9 = arith.constant dense<0.000000e+00> : vector<36x256xf32>
    %8 = tpu.matmul %0, %7, %cst_9 {dimension_numbers = #tpu.dot_dimension_numbers<[1], [0], [0], [1], [0, 0, 1, 1], [], []>} : vector<36x24xf32>, vector<24x256xf32>, vector<36x256xf32> -> vector<36x256xf32>
    %c0_10 = arith.constant 0 : index
    %c0_11 = arith.constant 0 : index
    %9 = vector.load %arg7[%c0_10, %c0_11] : memref<1x256xf32, #tpu.memory_space<vmem>>, vector<1x256xf32>
    %10 = vector.broadcast %9 : vector<1x256xf32> to vector<36x256xf32>
    %11 = arith.addf %8, %10 : vector<36x256xf32>
    %c0_12 = arith.constant 0 : index
    %c0_13 = arith.constant 0 : index
    %12 = vector.load %arg17[%c0_12, %c0_13] : memref<36x256xf32, #tpu.memory_space<vmem>>, vector<36x256xf32>
    tpu.vector_store %arg17[%c0_12, %c0_13], %11 {strides = array<i32>} : memref<36x256xf32, #tpu.memory_space<vmem>>, vector<36x256xf32>,
    %c0_14 = arith.constant 0 : index
    %c0_15 = arith.constant 0 : index
    %13 = vector.load %arg3[%c0_14, %c0_15] : memref<64x256xf32, #tpu.memory_space<vmem>>, vector<64x256xf32>
    %c0_16 = arith.constant 0 : index
    %c0_17 = arith.constant 0 : index
    %14 = vector.load %arg6[%c0_16, %c0_17] : memref<64x256xf32, #tpu.memory_space<vmem>>, vector<64x256xf32>
    %c0_18 = arith.constant 0 : index
    %c0_19 = arith.constant 0 : index
    %15 = vector.load %arg8[%c0_18, %c0_19] : memref<1x64xf32, #tpu.memory_space<vmem>>, vector<1x64xf32>
    %c0_20 = arith.constant 0 : index
    %c0_21 = arith.constant 0 : index
    %16 = vector.load %arg9[%c0_20, %c0_21] : memref<1x64xf32, #tpu.memory_space<vmem>>, vector<1x64xf32>
    %cst_22 = arith.constant 0.000000e+00 : f32
    %17 = vector.broadcast %cst_22 : f32 to vector<2x64xf32>
    %c0_i32 = arith.constant 0 : i32
    %c17_i32 = arith.constant 17 : i32
    %18 = arith.subi %c17_i32, %c0_i32 : i32
    %c2_i32 = arith.constant 2 : i32
    %19 = arith.muli %c0_i32, %c2_i32 : i32
    %20 = arith.index_cast %19 : i32 to index
    %c0_23 = arith.constant 0 : index
    %21 = vector.load %arg16[%20, %c0_23] : memref<36x256xf32, #tpu.memory_space<vmem>>, vector<2x256xf32>
    %c2_i32_24 = arith.constant 2 : i32
    %22 = arith.muli %18, %c2_i32_24 : i32
    %23 = arith.index_cast %22 : i32 to index
    %c0_25 = arith.constant 0 : index
    %24 = vector.load %arg17[%23, %c0_25] : memref<36x256xf32, #tpu.memory_space<vmem>>, vector<2x256xf32>
    %cst_26 = arith.constant dense<0.000000e+00> : vector<2x256xf32>
    %25 = tpu.matmul %17, %13, %cst_26 {dimension_numbers = #tpu.dot_dimension_numbers<[1], [0], [0], [1], [0, 0, 1, 1], [], []>} : vector<2x64xf32>, vector<64x256xf32>, vector<2x256xf32> -> vector<2x256xf32>
    %26 = arith.addf %25, %21 : vector<2x256xf32>
    %27 = vector.extract_strided_slice %26 {offsets = [0, 0], sizes = [2, 192], strides = [1, 1]} : vector<2x256xf32> to vector<2x192xf32>
    %28 = arith.negf %27 : vector<2x192xf32>
    %29 = math.exp %28 : vector<2x192xf32>
    %cst_27 = arith.constant 1.000000e+00 : f32
    %30 = vector.broadcast %cst_27 : f32 to vector<2x192xf32>
    %31 = arith.addf %30, %29 : vector<2x192xf32>
    %32 = arith.divf %30, %31 : vector<2x192xf32>
    %33 = vector.extract_strided_slice %26 {offsets = [0, 192], sizes = [2, 64], strides = [1, 1]} : vector<2x256xf32> to vector<2x64xf32>
    %34 = math.tanh %33 : vector<2x64xf32>
    %35 = vector.extract_strided_slice %32 {offsets = [0, 64], sizes = [2, 64], strides = [1, 1]} : vector<2x192xf32> to vector<2x64xf32>
    %36 = arith.mulf %35, %17 : vector<2x64xf32>
    %37 = vector.extract_strided_slice %32 {offsets = [0, 0], sizes = [2, 64], strides = [1, 1]} : vector<2x192xf32> to vector<2x64xf32>
    %38 = arith.mulf %37, %34 : vector<2x64xf32>
    %39 = arith.addf %36, %38 : vector<2x64xf32>
    %40 = vector.extract_strided_slice %32 {offsets = [0, 128], sizes = [2, 64], strides = [1, 1]} : vector<2x192xf32> to vector<2x64xf32>
    %41 = math.tanh %39 : vector<2x64xf32>
    %42 = arith.mulf %40, %41 : vector<2x64xf32>
    %cst_28 = arith.constant dense<0.000000e+00> : vector<2x256xf32>
    %43 = tpu.matmul %17, %14, %cst_28 {dimension_numbers = #tpu.dot_dimension_numbers<[1], [0], [0], [1], [0, 0, 1, 1], [], []>} : vector<2x64xf32>, vector<64x256xf32>, vector<2x256xf32> -> vector<2x256xf32>
    %44 = arith.addf %43, %24 : vector<2x256xf32>
    %45 = vector.extract_strided_slice %44 {offsets = [0, 0], sizes = [2, 192], strides = [1, 1]} : vector<2x256xf32> to vector<2x192xf32>
    %46 = arith.negf %45 : vector<2x192xf32>
    %47 = math.exp %46 : vector<2x192xf32>
    %cst_29 = arith.constant 1.000000e+00 : f32
    %48 = vector.broadcast %cst_29 : f32 to vector<2x192xf32>
    %49 = arith.addf %48, %47 : vector<2x192xf32>
    %50 = arith.divf %48, %49 : vector<2x192xf32>
    %51 = vector.extract_strided_slice %44 {offsets = [0, 192], sizes = [2, 64], strides = [1, 1]} : vector<2x256xf32> to vector<2x64xf32>
    %52 = math.tanh %51 : vector<2x64xf32>
    %53 = vector.extract_strided_slice %50 {offsets = [0, 64], sizes = [2, 64], strides = [1, 1]} : vector<2x192xf32> to vector<2x64xf32>
    %54 = arith.mulf %53, %17 : vector<2x64xf32>
    %55 = vector.extract_strided_slice %50 {offsets = [0, 0], sizes = [2, 64], strides = [1, 1]} : vector<2x192xf32> to vector<2x64xf32>
    %56 = arith.mulf %55, %52 : vector<2x64xf32>
    %57 = arith.addf %54, %56 : vector<2x64xf32>
    %58 = vector.extract_strided_slice %50 {offsets = [0, 128], sizes = [2, 64], strides = [1, 1]} : vector<2x192xf32> to vector<2x64xf32>
    %59 = math.tanh %57 : vector<2x64xf32>
    %60 = arith.mulf %58, %59 : vector<2x64xf32>
    %61 = vector.broadcast %15 : vector<1x64xf32> to vector<2x64xf32>
    %62 = arith.mulf %42, %61 : vector<2x64xf32>
    %cst_30 = arith.constant dense<0.000000e+00> : vector<2xf32>
    %63 = vector.multi_reduction <add>, %62, %cst_30 [1] : vector<2x64xf32> to vector<2xf32>
    %64 = vector.shape_cast %63 : vector<2xf32> to vector<2x1xf32>
    %65 = arith.index_cast %c0_i32 : i32 to index
    %c0_31 = arith.constant 0 : index
    %c0_32 = arith.constant 0 : index
    %66 = vector.load %arg18[%65, %c0_31, %c0_32] : memref<18x2x1xf32, #tpu.memory_space<vmem>>, vector<1x2x1xf32>
    %67 = vector.shape_cast %66 : vector<1x2x1xf32> to vector<2x1xf32>
    %68 = vector.shape_cast %64 : vector<2x1xf32> to vector<1x2x1xf32>
    tpu.vector_store %arg18[%65, %c0_31, %c0_32], %68 {strides = array<i32>} : memref<18x2x1xf32, #tpu.memory_space<vmem>>, vector<1x2x1xf32>,
    %69 = vector.broadcast %16 : vector<1x64xf32> to vector<2x64xf32>
    %70 = arith.mulf %60, %69 : vector<2x64xf32>
    %cst_33 = arith.constant dense<0.000000e+00> : vector<2xf32>
    %71 = vector.multi_reduction <add>, %70, %cst_33 [1] : vector<2x64xf32> to vector<2xf32>
    %72 = vector.shape_cast %71 : vector<2xf32> to vector<2x1xf32>
    %73 = arith.index_cast %18 : i32 to index
    %c0_34 = arith.constant 0 : index
    %c0_35 = arith.constant 0 : index
    %74 = vector.load %arg19[%73, %c0_34, %c0_35] : memref<18x2x1xf32, #tpu.memory_space<vmem>>, vector<1x2x1xf32>
    %75 = vector.shape_cast %74 : vector<1x2x1xf32> to vector<2x1xf32>
    %76 = vector.shape_cast %72 : vector<2x1xf32> to vector<1x2x1xf32>
    tpu.vector_store %arg19[%73, %c0_34, %c0_35], %76 {strides = array<i32>} : memref<18x2x1xf32, #tpu.memory_space<vmem>>, vector<1x2x1xf32>,
    %c1_i32 = arith.constant 1 : i32
    %c17_i32_36 = arith.constant 17 : i32
    %77 = arith.subi %c17_i32_36, %c1_i32 : i32
    %c2_i32_37 = arith.constant 2 : i32
    %78 = arith.muli %c1_i32, %c2_i32_37 : i32
    %79 = arith.index_cast %78 : i32 to index
    %c0_38 = arith.constant 0 : index
    %80 = vector.load %arg16[%79, %c0_38] : memref<36x256xf32, #tpu.memory_space<vmem>>, vector<2x256xf32>
    %c2_i32_39 = arith.constant 2 : i32
    %81 = arith.muli %77, %c2_i32_39 : i32
    %82 = arith.index_cast %81 : i32 to index
    %c0_40 = arith.constant 0 : index
    %83 = vector.load %arg17[%82, %c0_40] : memref<36x256xf32, #tpu.memory_space<vmem>>, vector<2x256xf32>
    %cst_41 = arith.constant dense<0.000000e+00> : vector<2x256xf32>
    %84 = tpu.matmul %42, %13, %cst_41 {dimension_numbers = #tpu.dot_dimension_numbers<[1], [0], [0], [1], [0, 0, 1, 1], [], []>} : vector<2x64xf32>, vector<64x256xf32>, vector<2x256xf32> -> vector<2x256xf32>
    %85 = arith.addf %84, %80 : vector<2x256xf32>
    %86 = vector.extract_strided_slice %85 {offsets = [0, 0], sizes = [2, 192], strides = [1, 1]} : vector<2x256xf32> to vector<2x192xf32>
    %87 = arith.negf %86 : vector<2x192xf32>
    %88 = math.exp %87 : vector<2x192xf32>
    %cst_42 = arith.constant 1.000000e+00 : f32
    %89 = vector.broadcast %cst_42 : f32 to vector<2x192xf32>
    %90 = arith.addf %89, %88 : vector<2x192xf32>
    %91 = arith.divf %89, %90 : vector<2x192xf32>
    %92 = vector.extract_strided_slice %85 {offsets = [0, 192], sizes = [2, 64], strides = [1, 1]} : vector<2x256xf32> to vector<2x64xf32>
    %93 = math.tanh %92 : vector<2x64xf32>
    %94 = vector.extract_strided_slice %91 {offsets = [0, 64], sizes = [2, 64], strides = [1, 1]} : vector<2x192xf32> to vector<2x64xf32>
    %95 = arith.mulf %94, %39 : vector<2x64xf32>
    %96 = vector.extract_strided_slice %91 {offsets = [0, 0], sizes = [2, 64], strides = [1, 1]} : vector<2x192xf32> to vector<2x64xf32>
    %97 = arith.mulf %96, %93 : vector<2x64xf32>
    %98 = arith.addf %95, %97 : vector<2x64xf32>
    %99 = vector.extract_strided_slice %91 {offsets = [0, 128], sizes = [2, 64], strides = [1, 1]} : vector<2x192xf32> to vector<2x64xf32>
    %100 = math.tanh %98 : vector<2x64xf32>
    %101 = arith.mulf %99, %100 : vector<2x64xf32>
    %cst_43 = arith.constant dense<0.000000e+00> : vector<2x256xf32>
    %102 = tpu.matmul %60, %14, %cst_43 {dimension_numbers = #tpu.dot_dimension_numbers<[1], [0], [0], [1], [0, 0, 1, 1], [], []>} : vector<2x64xf32>, vector<64x256xf32>, vector<2x256xf32> -> vector<2x256xf32>
    %103 = arith.addf %102, %83 : vector<2x256xf32>
    %104 = vector.extract_strided_slice %103 {offsets = [0, 0], sizes = [2, 192], strides = [1, 1]} : vector<2x256xf32> to vector<2x192xf32>
    %105 = arith.negf %104 : vector<2x192xf32>
    %106 = math.exp %105 : vector<2x192xf32>
    %cst_44 = arith.constant 1.000000e+00 : f32
    %107 = vector.broadcast %cst_44 : f32 to vector<2x192xf32>
    %108 = arith.addf %107, %106 : vector<2x192xf32>
    %109 = arith.divf %107, %108 : vector<2x192xf32>
    %110 = vector.extract_strided_slice %103 {offsets = [0, 192], sizes = [2, 64], strides = [1, 1]} : vector<2x256xf32> to vector<2x64xf32>
    %111 = math.tanh %110 : vector<2x64xf32>
    %112 = vector.extract_strided_slice %109 {offsets = [0, 64], sizes = [2, 64], strides = [1, 1]} : vector<2x192xf32> to vector<2x64xf32>
    %113 = arith.mulf %112, %57 : vector<2x64xf32>
    %114 = vector.extract_strided_slice %109 {offsets = [0, 0], sizes = [2, 64], strides = [1, 1]} : vector<2x192xf32> to vector<2x64xf32>
    %115 = arith.mulf %114, %111 : vector<2x64xf32>
    %116 = arith.addf %113, %115 : vector<2x64xf32>
    %117 = vector.extract_strided_slice %109 {offsets = [0, 128], sizes = [2, 64], strides = [1, 1]} : vector<2x192xf32> to vector<2x64xf32>
    %118 = math.tanh %116 : vector<2x64xf32>
    %119 = arith.mulf %117, %118 : vector<2x64xf32>
    %120 = vector.broadcast %15 : vector<1x64xf32> to vector<2x64xf32>
    %121 = arith.mulf %101, %120 : vector<2x64xf32>
    %cst_45 = arith.constant dense<0.000000e+00> : vector<2xf32>
    %122 = vector.multi_reduction <add>, %121, %cst_45 [1] : vector<2x64xf32> to vector<2xf32>
    %123 = vector.shape_cast %122 : vector<2xf32> to vector<2x1xf32>
    %124 = arith.index_cast %c1_i32 : i32 to index
    %c0_46 = arith.constant 0 : index
    %c0_47 = arith.constant 0 : index
    %125 = vector.load %arg18[%124, %c0_46, %c0_47] : memref<18x2x1xf32, #tpu.memory_space<vmem>>, vector<1x2x1xf32>
    %126 = vector.shape_cast %125 : vector<1x2x1xf32> to vector<2x1xf32>
    %127 = vector.shape_cast %123 : vector<2x1xf32> to vector<1x2x1xf32>
    tpu.vector_store %arg18[%124, %c0_46, %c0_47], %127 {strides = array<i32>} : memref<18x2x1xf32, #tpu.memory_space<vmem>>, vector<1x2x1xf32>,
    %128 = vector.broadcast %16 : vector<1x64xf32> to vector<2x64xf32>
    %129 = arith.mulf %119, %128 : vector<2x64xf32>
    %cst_48 = arith.constant dense<0.000000e+00> : vector<2xf32>
    %130 = vector.multi_reduction <add>, %129, %cst_48 [1] : vector<2x64xf32> to vector<2xf32>
    %131 = vector.shape_cast %130 : vector<2xf32> to vector<2x1xf32>
    %132 = arith.index_cast %77 : i32 to index
    %c0_49 = arith.constant 0 : index
    %c0_50 = arith.constant 0 : index
    %133 = vector.load %arg19[%132, %c0_49, %c0_50] : memref<18x2x1xf32, #tpu.memory_space<vmem>>, vector<1x2x1xf32>
    %134 = vector.shape_cast %133 : vector<1x2x1xf32> to vector<2x1xf32>
    %135 = vector.shape_cast %131 : vector<2x1xf32> to vector<1x2x1xf32>
    tpu.vector_store %arg19[%132, %c0_49, %c0_50], %135 {strides = array<i32>} : memref<18x2x1xf32, #tpu.memory_space<vmem>>, vector<1x2x1xf32>,
    %c2_i32_51 = arith.constant 2 : i32
    %c17_i32_52 = arith.constant 17 : i32
    %136 = arith.subi %c17_i32_52, %c2_i32_51 : i32
    %c2_i32_53 = arith.constant 2 : i32
    %137 = arith.muli %c2_i32_51, %c2_i32_53 : i32
    %138 = arith.index_cast %137 : i32 to index
    %c0_54 = arith.constant 0 : index
    %139 = vector.load %arg16[%138, %c0_54] : memref<36x256xf32, #tpu.memory_space<vmem>>, vector<2x256xf32>
    %c2_i32_55 = arith.constant 2 : i32
    %140 = arith.muli %136, %c2_i32_55 : i32
    %141 = arith.index_cast %140 : i32 to index
    %c0_56 = arith.constant 0 : index
    %142 = vector.load %arg17[%141, %c0_56] : memref<36x256xf32, #tpu.memory_space<vmem>>, vector<2x256xf32>
    %cst_57 = arith.constant dense<0.000000e+00> : vector<2x256xf32>
    %143 = tpu.matmul %101, %13, %cst_57 {dimension_numbers = #tpu.dot_dimension_numbers<[1], [0], [0], [1], [0, 0, 1, 1], [], []>} : vector<2x64xf32>, vector<64x256xf32>, vector<2x256xf32> -> vector<2x256xf32>
    %144 = arith.addf %143, %139 : vector<2x256xf32>
    %145 = vector.extract_strided_slice %144 {offsets = [0, 0], sizes = [2, 192], strides = [1, 1]} : vector<2x256xf32> to vector<2x192xf32>
    %146 = arith.negf %145 : vector<2x192xf32>
    %147 = math.exp %146 : vector<2x192xf32>
    %cst_58 = arith.constant 1.000000e+00 : f32
    %148 = vector.broadcast %cst_58 : f32 to vector<2x192xf32>
    %149 = arith.addf %148, %147 : vector<2x192xf32>
    %150 = arith.divf %148, %149 : vector<2x192xf32>
    %151 = vector.extract_strided_slice %144 {offsets = [0, 192], sizes = [2, 64], strides = [1, 1]} : vector<2x256xf32> to vector<2x64xf32>
    %152 = math.tanh %151 : vector<2x64xf32>
    %153 = vector.extract_strided_slice %150 {offsets = [0, 64], sizes = [2, 64], strides = [1, 1]} : vector<2x192xf32> to vector<2x64xf32>
    %154 = arith.mulf %153, %98 : vector<2x64xf32>
    %155 = vector.extract_strided_slice %150 {offsets = [0, 0], sizes = [2, 64], strides = [1, 1]} : vector<2x192xf32> to vector<2x64xf32>
    %156 = arith.mulf %155, %152 : vector<2x64xf32>
    %157 = arith.addf %154, %156 : vector<2x64xf32>
    %158 = vector.extract_strided_slice %150 {offsets = [0, 128], sizes = [2, 64], strides = [1, 1]} : vector<2x192xf32> to vector<2x64xf32>
    %159 = math.tanh %157 : vector<2x64xf32>
    %160 = arith.mulf %158, %159 : vector<2x64xf32>
    %cst_59 = arith.constant dense<0.000000e+00> : vector<2x256xf32>
    %161 = tpu.matmul %119, %14, %cst_59 {dimension_numbers = #tpu.dot_dimension_numbers<[1], [0], [0], [1], [0, 0, 1, 1], [], []>} : vector<2x64xf32>, vector<64x256xf32>, vector<2x256xf32> -> vector<2x256xf32>
    %162 = arith.addf %161, %142 : vector<2x256xf32>
    %163 = vector.extract_strided_slice %162 {offsets = [0, 0], sizes = [2, 192], strides = [1, 1]} : vector<2x256xf32> to vector<2x192xf32>
    %164 = arith.negf %163 : vector<2x192xf32>
    %165 = math.exp %164 : vector<2x192xf32>
    %cst_60 = arith.constant 1.000000e+00 : f32
    %166 = vector.broadcast %cst_60 : f32 to vector<2x192xf32>
    %167 = arith.addf %166, %165 : vector<2x192xf32>
    %168 = arith.divf %166, %167 : vector<2x192xf32>
    %169 = vector.extract_strided_slice %162 {offsets = [0, 192], sizes = [2, 64], strides = [1, 1]} : vector<2x256xf32> to vector<2x64xf32>
    %170 = math.tanh %169 : vector<2x64xf32>
    %171 = vector.extract_strided_slice %168 {offsets = [0, 64], sizes = [2, 64], strides = [1, 1]} : vector<2x192xf32> to vector<2x64xf32>
    %172 = arith.mulf %171, %116 : vector<2x64xf32>
    %173 = vector.extract_strided_slice %168 {offsets = [0, 0], sizes = [2, 64], strides = [1, 1]} : vector<2x192xf32> to vector<2x64xf32>
    %174 = arith.mulf %173, %170 : vector<2x64xf32>
    %175 = arith.addf %172, %174 : vector<2x64xf32>
    %176 = vector.extract_strided_slice %168 {offsets = [0, 128], sizes = [2, 64], strides = [1, 1]} : vector<2x192xf32> to vector<2x64xf32>
    %177 = math.tanh %175 : vector<2x64xf32>
    %178 = arith.mulf %176, %177 : vector<2x64xf32>
    %179 = vector.broadcast %15 : vector<1x64xf32> to vector<2x64xf32>
    %180 = arith.mulf %160, %179 : vector<2x64xf32>
    %cst_61 = arith.constant dense<0.000000e+00> : vector<2xf32>
    %181 = vector.multi_reduction <add>, %180, %cst_61 [1] : vector<2x64xf32> to vector<2xf32>
    %182 = vector.shape_cast %181 : vector<2xf32> to vector<2x1xf32>
    %183 = arith.index_cast %c2_i32_51 : i32 to index
    %c0_62 = arith.constant 0 : index
    %c0_63 = arith.constant 0 : index
    %184 = vector.load %arg18[%183, %c0_62, %c0_63] : memref<18x2x1xf32, #tpu.memory_space<vmem>>, vector<1x2x1xf32>
    %185 = vector.shape_cast %184 : vector<1x2x1xf32> to vector<2x1xf32>
    %186 = vector.shape_cast %182 : vector<2x1xf32> to vector<1x2x1xf32>
    tpu.vector_store %arg18[%183, %c0_62, %c0_63], %186 {strides = array<i32>} : memref<18x2x1xf32, #tpu.memory_space<vmem>>, vector<1x2x1xf32>,
    %187 = vector.broadcast %16 : vector<1x64xf32> to vector<2x64xf32>
    %188 = arith.mulf %178, %187 : vector<2x64xf32>
    %cst_64 = arith.constant dense<0.000000e+00> : vector<2xf32>
    %189 = vector.multi_reduction <add>, %188, %cst_64 [1] : vector<2x64xf32> to vector<2xf32>
    %190 = vector.shape_cast %189 : vector<2xf32> to vector<2x1xf32>
    %191 = arith.index_cast %136 : i32 to index
    %c0_65 = arith.constant 0 : index
    %c0_66 = arith.constant 0 : index
    %192 = vector.load %arg19[%191, %c0_65, %c0_66] : memref<18x2x1xf32, #tpu.memory_space<vmem>>, vector<1x2x1xf32>
    %193 = vector.shape_cast %192 : vector<1x2x1xf32> to vector<2x1xf32>
    %194 = vector.shape_cast %190 : vector<2x1xf32> to vector<1x2x1xf32>
    tpu.vector_store %arg19[%191, %c0_65, %c0_66], %194 {strides = array<i32>} : memref<18x2x1xf32, #tpu.memory_space<vmem>>, vector<1x2x1xf32>,
    %c3_i32 = arith.constant 3 : i32
    %c17_i32_67 = arith.constant 17 : i32
    %195 = arith.subi %c17_i32_67, %c3_i32 : i32
    %c2_i32_68 = arith.constant 2 : i32
    %196 = arith.muli %c3_i32, %c2_i32_68 : i32
    %197 = arith.index_cast %196 : i32 to index
    %c0_69 = arith.constant 0 : index
    %198 = vector.load %arg16[%197, %c0_69] : memref<36x256xf32, #tpu.memory_space<vmem>>, vector<2x256xf32>
    %c2_i32_70 = arith.constant 2 : i32
    %199 = arith.muli %195, %c2_i32_70 : i32
    %200 = arith.index_cast %199 : i32 to index
    %c0_71 = arith.constant 0 : index
    %201 = vector.load %arg17[%200, %c0_71] : memref<36x256xf32, #tpu.memory_space<vmem>>, vector<2x256xf32>
    %cst_72 = arith.constant dense<0.000000e+00> : vector<2x256xf32>
    %202 = tpu.matmul %160, %13, %cst_72 {dimension_numbers = #tpu.dot_dimension_numbers<[1], [0], [0], [1], [0, 0, 1, 1], [], []>} : vector<2x64xf32>, vector<64x256xf32>, vector<2x256xf32> -> vector<2x256xf32>
    %203 = arith.addf %202, %198 : vector<2x256xf32>
    %204 = vector.extract_strided_slice %203 {offsets = [0, 0], sizes = [2, 192], strides = [1, 1]} : vector<2x256xf32> to vector<2x192xf32>
    %205 = arith.negf %204 : vector<2x192xf32>
    %206 = math.exp %205 : vector<2x192xf32>
    %cst_73 = arith.constant 1.000000e+00 : f32
    %207 = vector.broadcast %cst_73 : f32 to vector<2x192xf32>
    %208 = arith.addf %207, %206 : vector<2x192xf32>
    %209 = arith.divf %207, %208 : vector<2x192xf32>
    %210 = vector.extract_strided_slice %203 {offsets = [0, 192], sizes = [2, 64], strides = [1, 1]} : vector<2x256xf32> to vector<2x64xf32>
    %211 = math.tanh %210 : vector<2x64xf32>
    %212 = vector.extract_strided_slice %209 {offsets = [0, 64], sizes = [2, 64], strides = [1, 1]} : vector<2x192xf32> to vector<2x64xf32>
    %213 = arith.mulf %212, %157 : vector<2x64xf32>
    %214 = vector.extract_strided_slice %209 {offsets = [0, 0], sizes = [2, 64], strides = [1, 1]} : vector<2x192xf32> to vector<2x64xf32>
    %215 = arith.mulf %214, %211 : vector<2x64xf32>
    %216 = arith.addf %213, %215 : vector<2x64xf32>
    %217 = vector.extract_strided_slice %209 {offsets = [0, 128], sizes = [2, 64], strides = [1, 1]} : vector<2x192xf32> to vector<2x64xf32>
    %218 = math.tanh %216 : vector<2x64xf32>
    %219 = arith.mulf %217, %218 : vector<2x64xf32>
    %cst_74 = arith.constant dense<0.000000e+00> : vector<2x256xf32>
    %220 = tpu.matmul %178, %14, %cst_74 {dimension_numbers = #tpu.dot_dimension_numbers<[1], [0], [0], [1], [0, 0, 1, 1], [], []>} : vector<2x64xf32>, vector<64x256xf32>, vector<2x256xf32> -> vector<2x256xf32>
    %221 = arith.addf %220, %201 : vector<2x256xf32>
    %222 = vector.extract_strided_slice %221 {offsets = [0, 0], sizes = [2, 192], strides = [1, 1]} : vector<2x256xf32> to vector<2x192xf32>
    %223 = arith.negf %222 : vector<2x192xf32>
    %224 = math.exp %223 : vector<2x192xf32>
    %cst_75 = arith.constant 1.000000e+00 : f32
    %225 = vector.broadcast %cst_75 : f32 to vector<2x192xf32>
    %226 = arith.addf %225, %224 : vector<2x192xf32>
    %227 = arith.divf %225, %226 : vector<2x192xf32>
    %228 = vector.extract_strided_slice %221 {offsets = [0, 192], sizes = [2, 64], strides = [1, 1]} : vector<2x256xf32> to vector<2x64xf32>
    %229 = math.tanh %228 : vector<2x64xf32>
    %230 = vector.extract_strided_slice %227 {offsets = [0, 64], sizes = [2, 64], strides = [1, 1]} : vector<2x192xf32> to vector<2x64xf32>
    %231 = arith.mulf %230, %175 : vector<2x64xf32>
    %232 = vector.extract_strided_slice %227 {offsets = [0, 0], sizes = [2, 64], strides = [1, 1]} : vector<2x192xf32> to vector<2x64xf32>
    %233 = arith.mulf %232, %229 : vector<2x64xf32>
    %234 = arith.addf %231, %233 : vector<2x64xf32>
    %235 = vector.extract_strided_slice %227 {offsets = [0, 128], sizes = [2, 64], strides = [1, 1]} : vector<2x192xf32> to vector<2x64xf32>
    %236 = math.tanh %234 : vector<2x64xf32>
    %237 = arith.mulf %235, %236 : vector<2x64xf32>
    %238 = vector.broadcast %15 : vector<1x64xf32> to vector<2x64xf32>
    %239 = arith.mulf %219, %238 : vector<2x64xf32>
    %cst_76 = arith.constant dense<0.000000e+00> : vector<2xf32>
    %240 = vector.multi_reduction <add>, %239, %cst_76 [1] : vector<2x64xf32> to vector<2xf32>
    %241 = vector.shape_cast %240 : vector<2xf32> to vector<2x1xf32>
    %242 = arith.index_cast %c3_i32 : i32 to index
    %c0_77 = arith.constant 0 : index
    %c0_78 = arith.constant 0 : index
    %243 = vector.load %arg18[%242, %c0_77, %c0_78] : memref<18x2x1xf32, #tpu.memory_space<vmem>>, vector<1x2x1xf32>
    %244 = vector.shape_cast %243 : vector<1x2x1xf32> to vector<2x1xf32>
    %245 = vector.shape_cast %241 : vector<2x1xf32> to vector<1x2x1xf32>
    tpu.vector_store %arg18[%242, %c0_77, %c0_78], %245 {strides = array<i32>} : memref<18x2x1xf32, #tpu.memory_space<vmem>>, vector<1x2x1xf32>,
    %246 = vector.broadcast %16 : vector<1x64xf32> to vector<2x64xf32>
    %247 = arith.mulf %237, %246 : vector<2x64xf32>
    %cst_79 = arith.constant dense<0.000000e+00> : vector<2xf32>
    %248 = vector.multi_reduction <add>, %247, %cst_79 [1] : vector<2x64xf32> to vector<2xf32>
    %249 = vector.shape_cast %248 : vector<2xf32> to vector<2x1xf32>
    %250 = arith.index_cast %195 : i32 to index
    %c0_80 = arith.constant 0 : index
    %c0_81 = arith.constant 0 : index
    %251 = vector.load %arg19[%250, %c0_80, %c0_81] : memref<18x2x1xf32, #tpu.memory_space<vmem>>, vector<1x2x1xf32>
    %252 = vector.shape_cast %251 : vector<1x2x1xf32> to vector<2x1xf32>
    %253 = vector.shape_cast %249 : vector<2x1xf32> to vector<1x2x1xf32>
    tpu.vector_store %arg19[%250, %c0_80, %c0_81], %253 {strides = array<i32>} : memref<18x2x1xf32, #tpu.memory_space<vmem>>, vector<1x2x1xf32>,
    %c4_i32 = arith.constant 4 : i32
    %c17_i32_82 = arith.constant 17 : i32
    %254 = arith.subi %c17_i32_82, %c4_i32 : i32
    %c2_i32_83 = arith.constant 2 : i32
    %255 = arith.muli %c4_i32, %c2_i32_83 : i32
    %256 = arith.index_cast %255 : i32 to index
    %c0_84 = arith.constant 0 : index
    %257 = vector.load %arg16[%256, %c0_84] : memref<36x256xf32, #tpu.memory_space<vmem>>, vector<2x256xf32>
    %c2_i32_85 = arith.constant 2 : i32
    %258 = arith.muli %254, %c2_i32_85 : i32
    %259 = arith.index_cast %258 : i32 to index
    %c0_86 = arith.constant 0 : index
    %260 = vector.load %arg17[%259, %c0_86] : memref<36x256xf32, #tpu.memory_space<vmem>>, vector<2x256xf32>
    %cst_87 = arith.constant dense<0.000000e+00> : vector<2x256xf32>
    %261 = tpu.matmul %219, %13, %cst_87 {dimension_numbers = #tpu.dot_dimension_numbers<[1], [0], [0], [1], [0, 0, 1, 1], [], []>} : vector<2x64xf32>, vector<64x256xf32>, vector<2x256xf32> -> vector<2x256xf32>
    %262 = arith.addf %261, %257 : vector<2x256xf32>
    %263 = vector.extract_strided_slice %262 {offsets = [0, 0], sizes = [2, 192], strides = [1, 1]} : vector<2x256xf32> to vector<2x192xf32>
    %264 = arith.negf %263 : vector<2x192xf32>
    %265 = math.exp %264 : vector<2x192xf32>
    %cst_88 = arith.constant 1.000000e+00 : f32
    %266 = vector.broadcast %cst_88 : f32 to vector<2x192xf32>
    %267 = arith.addf %266, %265 : vector<2x192xf32>
    %268 = arith.divf %266, %267 : vector<2x192xf32>
    %269 = vector.extract_strided_slice %262 {offsets = [0, 192], sizes = [2, 64], strides = [1, 1]} : vector<2x256xf32> to vector<2x64xf32>
    %270 = math.tanh %269 : vector<2x64xf32>
    %271 = vector.extract_strided_slice %268 {offsets = [0, 64], sizes = [2, 64], strides = [1, 1]} : vector<2x192xf32> to vector<2x64xf32>
    %272 = arith.mulf %271, %216 : vector<2x64xf32>
    %273 = vector.extract_strided_slice %268 {offsets = [0, 0], sizes = [2, 64], strides = [1, 1]} : vector<2x192xf32> to vector<2x64xf32>
    %274 = arith.mulf %273, %270 : vector<2x64xf32>
    %275 = arith.addf %272, %274 : vector<2x64xf32>
    %276 = vector.extract_strided_slice %268 {offsets = [0, 128], sizes = [2, 64], strides = [1, 1]} : vector<2x192xf32> to vector<2x64xf32>
    %277 = math.tanh %275 : vector<2x64xf32>
    %278 = arith.mulf %276, %277 : vector<2x64xf32>
    %cst_89 = arith.constant dense<0.000000e+00> : vector<2x256xf32>
    %279 = tpu.matmul %237, %14, %cst_89 {dimension_numbers = #tpu.dot_dimension_numbers<[1], [0], [0], [1], [0, 0, 1, 1], [], []>} : vector<2x64xf32>, vector<64x256xf32>, vector<2x256xf32> -> vector<2x256xf32>
    %280 = arith.addf %279, %260 : vector<2x256xf32>
    %281 = vector.extract_strided_slice %280 {offsets = [0, 0], sizes = [2, 192], strides = [1, 1]} : vector<2x256xf32> to vector<2x192xf32>
    %282 = arith.negf %281 : vector<2x192xf32>
    %283 = math.exp %282 : vector<2x192xf32>
    %cst_90 = arith.constant 1.000000e+00 : f32
    %284 = vector.broadcast %cst_90 : f32 to vector<2x192xf32>
    %285 = arith.addf %284, %283 : vector<2x192xf32>
    %286 = arith.divf %284, %285 : vector<2x192xf32>
    %287 = vector.extract_strided_slice %280 {offsets = [0, 192], sizes = [2, 64], strides = [1, 1]} : vector<2x256xf32> to vector<2x64xf32>
    %288 = math.tanh %287 : vector<2x64xf32>
    %289 = vector.extract_strided_slice %286 {offsets = [0, 64], sizes = [2, 64], strides = [1, 1]} : vector<2x192xf32> to vector<2x64xf32>
    %290 = arith.mulf %289, %234 : vector<2x64xf32>
    %291 = vector.extract_strided_slice %286 {offsets = [0, 0], sizes = [2, 64], strides = [1, 1]} : vector<2x192xf32> to vector<2x64xf32>
    %292 = arith.mulf %291, %288 : vector<2x64xf32>
    %293 = arith.addf %290, %292 : vector<2x64xf32>
    %294 = vector.extract_strided_slice %286 {offsets = [0, 128], sizes = [2, 64], strides = [1, 1]} : vector<2x192xf32> to vector<2x64xf32>
    %295 = math.tanh %293 : vector<2x64xf32>
    %296 = arith.mulf %294, %295 : vector<2x64xf32>
    %297 = vector.broadcast %15 : vector<1x64xf32> to vector<2x64xf32>
    %298 = arith.mulf %278, %297 : vector<2x64xf32>
    %cst_91 = arith.constant dense<0.000000e+00> : vector<2xf32>
    %299 = vector.multi_reduction <add>, %298, %cst_91 [1] : vector<2x64xf32> to vector<2xf32>
    %300 = vector.shape_cast %299 : vector<2xf32> to vector<2x1xf32>
    %301 = arith.index_cast %c4_i32 : i32 to index
    %c0_92 = arith.constant 0 : index
    %c0_93 = arith.constant 0 : index
    %302 = vector.load %arg18[%301, %c0_92, %c0_93] : memref<18x2x1xf32, #tpu.memory_space<vmem>>, vector<1x2x1xf32>
    %303 = vector.shape_cast %302 : vector<1x2x1xf32> to vector<2x1xf32>
    %304 = vector.shape_cast %300 : vector<2x1xf32> to vector<1x2x1xf32>
    tpu.vector_store %arg18[%301, %c0_92, %c0_93], %304 {strides = array<i32>} : memref<18x2x1xf32, #tpu.memory_space<vmem>>, vector<1x2x1xf32>,
    %305 = vector.broadcast %16 : vector<1x64xf32> to vector<2x64xf32>
    %306 = arith.mulf %296, %305 : vector<2x64xf32>
    %cst_94 = arith.constant dense<0.000000e+00> : vector<2xf32>
    %307 = vector.multi_reduction <add>, %306, %cst_94 [1] : vector<2x64xf32> to vector<2xf32>
    %308 = vector.shape_cast %307 : vector<2xf32> to vector<2x1xf32>
    %309 = arith.index_cast %254 : i32 to index
    %c0_95 = arith.constant 0 : index
    %c0_96 = arith.constant 0 : index
    %310 = vector.load %arg19[%309, %c0_95, %c0_96] : memref<18x2x1xf32, #tpu.memory_space<vmem>>, vector<1x2x1xf32>
    %311 = vector.shape_cast %310 : vector<1x2x1xf32> to vector<2x1xf32>
    %312 = vector.shape_cast %308 : vector<2x1xf32> to vector<1x2x1xf32>
    tpu.vector_store %arg19[%309, %c0_95, %c0_96], %312 {strides = array<i32>} : memref<18x2x1xf32, #tpu.memory_space<vmem>>, vector<1x2x1xf32>,
    %c5_i32 = arith.constant 5 : i32
    %c17_i32_97 = arith.constant 17 : i32
    %313 = arith.subi %c17_i32_97, %c5_i32 : i32
    %c2_i32_98 = arith.constant 2 : i32
    %314 = arith.muli %c5_i32, %c2_i32_98 : i32
    %315 = arith.index_cast %314 : i32 to index
    %c0_99 = arith.constant 0 : index
    %316 = vector.load %arg16[%315, %c0_99] : memref<36x256xf32, #tpu.memory_space<vmem>>, vector<2x256xf32>
    %c2_i32_100 = arith.constant 2 : i32
    %317 = arith.muli %313, %c2_i32_100 : i32
    %318 = arith.index_cast %317 : i32 to index
    %c0_101 = arith.constant 0 : index
    %319 = vector.load %arg17[%318, %c0_101] : memref<36x256xf32, #tpu.memory_space<vmem>>, vector<2x256xf32>
    %cst_102 = arith.constant dense<0.000000e+00> : vector<2x256xf32>
    %320 = tpu.matmul %278, %13, %cst_102 {dimension_numbers = #tpu.dot_dimension_numbers<[1], [0], [0], [1], [0, 0, 1, 1], [], []>} : vector<2x64xf32>, vector<64x256xf32>, vector<2x256xf32> -> vector<2x256xf32>
    %321 = arith.addf %320, %316 : vector<2x256xf32>
    %322 = vector.extract_strided_slice %321 {offsets = [0, 0], sizes = [2, 192], strides = [1, 1]} : vector<2x256xf32> to vector<2x192xf32>
    %323 = arith.negf %322 : vector<2x192xf32>
    %324 = math.exp %323 : vector<2x192xf32>
    %cst_103 = arith.constant 1.000000e+00 : f32
    %325 = vector.broadcast %cst_103 : f32 to vector<2x192xf32>
    %326 = arith.addf %325, %324 : vector<2x192xf32>
    %327 = arith.divf %325, %326 : vector<2x192xf32>
    %328 = vector.extract_strided_slice %321 {offsets = [0, 192], sizes = [2, 64], strides = [1, 1]} : vector<2x256xf32> to vector<2x64xf32>
    %329 = math.tanh %328 : vector<2x64xf32>
    %330 = vector.extract_strided_slice %327 {offsets = [0, 64], sizes = [2, 64], strides = [1, 1]} : vector<2x192xf32> to vector<2x64xf32>
    %331 = arith.mulf %330, %275 : vector<2x64xf32>
    %332 = vector.extract_strided_slice %327 {offsets = [0, 0], sizes = [2, 64], strides = [1, 1]} : vector<2x192xf32> to vector<2x64xf32>
    %333 = arith.mulf %332, %329 : vector<2x64xf32>
    %334 = arith.addf %331, %333 : vector<2x64xf32>
    %335 = vector.extract_strided_slice %327 {offsets = [0, 128], sizes = [2, 64], strides = [1, 1]} : vector<2x192xf32> to vector<2x64xf32>
    %336 = math.tanh %334 : vector<2x64xf32>
    %337 = arith.mulf %335, %336 : vector<2x64xf32>
    %cst_104 = arith.constant dense<0.000000e+00> : vector<2x256xf32>
    %338 = tpu.matmul %296, %14, %cst_104 {dimension_numbers = #tpu.dot_dimension_numbers<[1], [0], [0], [1], [0, 0, 1, 1], [], []>} : vector<2x64xf32>, vector<64x256xf32>, vector<2x256xf32> -> vector<2x256xf32>
    %339 = arith.addf %338, %319 : vector<2x256xf32>
    %340 = vector.extract_strided_slice %339 {offsets = [0, 0], sizes = [2, 192], strides = [1, 1]} : vector<2x256xf32> to vector<2x192xf32>
    %341 = arith.negf %340 : vector<2x192xf32>
    %342 = math.exp %341 : vector<2x192xf32>
    %cst_105 = arith.constant 1.000000e+00 : f32
    %343 = vector.broadcast %cst_105 : f32 to vector<2x192xf32>
    %344 = arith.addf %343, %342 : vector<2x192xf32>
    %345 = arith.divf %343, %344 : vector<2x192xf32>
    %346 = vector.extract_strided_slice %339 {offsets = [0, 192], sizes = [2, 64], strides = [1, 1]} : vector<2x256xf32> to vector<2x64xf32>
    %347 = math.tanh %346 : vector<2x64xf32>
    %348 = vector.extract_strided_slice %345 {offsets = [0, 64], sizes = [2, 64], strides = [1, 1]} : vector<2x192xf32> to vector<2x64xf32>
    %349 = arith.mulf %348, %293 : vector<2x64xf32>
    %350 = vector.extract_strided_slice %345 {offsets = [0, 0], sizes = [2, 64], strides = [1, 1]} : vector<2x192xf32> to vector<2x64xf32>
    %351 = arith.mulf %350, %347 : vector<2x64xf32>
    %352 = arith.addf %349, %351 : vector<2x64xf32>
    %353 = vector.extract_strided_slice %345 {offsets = [0, 128], sizes = [2, 64], strides = [1, 1]} : vector<2x192xf32> to vector<2x64xf32>
    %354 = math.tanh %352 : vector<2x64xf32>
    %355 = arith.mulf %353, %354 : vector<2x64xf32>
    %356 = vector.broadcast %15 : vector<1x64xf32> to vector<2x64xf32>
    %357 = arith.mulf %337, %356 : vector<2x64xf32>
    %cst_106 = arith.constant dense<0.000000e+00> : vector<2xf32>
    %358 = vector.multi_reduction <add>, %357, %cst_106 [1] : vector<2x64xf32> to vector<2xf32>
    %359 = vector.shape_cast %358 : vector<2xf32> to vector<2x1xf32>
    %360 = arith.index_cast %c5_i32 : i32 to index
    %c0_107 = arith.constant 0 : index
    %c0_108 = arith.constant 0 : index
    %361 = vector.load %arg18[%360, %c0_107, %c0_108] : memref<18x2x1xf32, #tpu.memory_space<vmem>>, vector<1x2x1xf32>
    %362 = vector.shape_cast %361 : vector<1x2x1xf32> to vector<2x1xf32>
    %363 = vector.shape_cast %359 : vector<2x1xf32> to vector<1x2x1xf32>
    tpu.vector_store %arg18[%360, %c0_107, %c0_108], %363 {strides = array<i32>} : memref<18x2x1xf32, #tpu.memory_space<vmem>>, vector<1x2x1xf32>,
    %364 = vector.broadcast %16 : vector<1x64xf32> to vector<2x64xf32>
    %365 = arith.mulf %355, %364 : vector<2x64xf32>
    %cst_109 = arith.constant dense<0.000000e+00> : vector<2xf32>
    %366 = vector.multi_reduction <add>, %365, %cst_109 [1] : vector<2x64xf32> to vector<2xf32>
    %367 = vector.shape_cast %366 : vector<2xf32> to vector<2x1xf32>
    %368 = arith.index_cast %313 : i32 to index
    %c0_110 = arith.constant 0 : index
    %c0_111 = arith.constant 0 : index
    %369 = vector.load %arg19[%368, %c0_110, %c0_111] : memref<18x2x1xf32, #tpu.memory_space<vmem>>, vector<1x2x1xf32>
    %370 = vector.shape_cast %369 : vector<1x2x1xf32> to vector<2x1xf32>
    %371 = vector.shape_cast %367 : vector<2x1xf32> to vector<1x2x1xf32>
    tpu.vector_store %arg19[%368, %c0_110, %c0_111], %371 {strides = array<i32>} : memref<18x2x1xf32, #tpu.memory_space<vmem>>, vector<1x2x1xf32>,
    %c6_i32 = arith.constant 6 : i32
    %c17_i32_112 = arith.constant 17 : i32
    %372 = arith.subi %c17_i32_112, %c6_i32 : i32
    %c2_i32_113 = arith.constant 2 : i32
    %373 = arith.muli %c6_i32, %c2_i32_113 : i32
    %374 = arith.index_cast %373 : i32 to index
    %c0_114 = arith.constant 0 : index
    %375 = vector.load %arg16[%374, %c0_114] : memref<36x256xf32, #tpu.memory_space<vmem>>, vector<2x256xf32>
    %c2_i32_115 = arith.constant 2 : i32
    %376 = arith.muli %372, %c2_i32_115 : i32
    %377 = arith.index_cast %376 : i32 to index
    %c0_116 = arith.constant 0 : index
    %378 = vector.load %arg17[%377, %c0_116] : memref<36x256xf32, #tpu.memory_space<vmem>>, vector<2x256xf32>
    %cst_117 = arith.constant dense<0.000000e+00> : vector<2x256xf32>
    %379 = tpu.matmul %337, %13, %cst_117 {dimension_numbers = #tpu.dot_dimension_numbers<[1], [0], [0], [1], [0, 0, 1, 1], [], []>} : vector<2x64xf32>, vector<64x256xf32>, vector<2x256xf32> -> vector<2x256xf32>
    %380 = arith.addf %379, %375 : vector<2x256xf32>
    %381 = vector.extract_strided_slice %380 {offsets = [0, 0], sizes = [2, 192], strides = [1, 1]} : vector<2x256xf32> to vector<2x192xf32>
    %382 = arith.negf %381 : vector<2x192xf32>
    %383 = math.exp %382 : vector<2x192xf32>
    %cst_118 = arith.constant 1.000000e+00 : f32
    %384 = vector.broadcast %cst_118 : f32 to vector<2x192xf32>
    %385 = arith.addf %384, %383 : vector<2x192xf32>
    %386 = arith.divf %384, %385 : vector<2x192xf32>
    %387 = vector.extract_strided_slice %380 {offsets = [0, 192], sizes = [2, 64], strides = [1, 1]} : vector<2x256xf32> to vector<2x64xf32>
    %388 = math.tanh %387 : vector<2x64xf32>
    %389 = vector.extract_strided_slice %386 {offsets = [0, 64], sizes = [2, 64], strides = [1, 1]} : vector<2x192xf32> to vector<2x64xf32>
    %390 = arith.mulf %389, %334 : vector<2x64xf32>
    %391 = vector.extract_strided_slice %386 {offsets = [0, 0], sizes = [2, 64], strides = [1, 1]} : vector<2x192xf32> to vector<2x64xf32>
    %392 = arith.mulf %391, %388 : vector<2x64xf32>
    %393 = arith.addf %390, %392 : vector<2x64xf32>
    %394 = vector.extract_strided_slice %386 {offsets = [0, 128], sizes = [2, 64], strides = [1, 1]} : vector<2x192xf32> to vector<2x64xf32>
    %395 = math.tanh %393 : vector<2x64xf32>
    %396 = arith.mulf %394, %395 : vector<2x64xf32>
    %cst_119 = arith.constant dense<0.000000e+00> : vector<2x256xf32>
    %397 = tpu.matmul %355, %14, %cst_119 {dimension_numbers = #tpu.dot_dimension_numbers<[1], [0], [0], [1], [0, 0, 1, 1], [], []>} : vector<2x64xf32>, vector<64x256xf32>, vector<2x256xf32> -> vector<2x256xf32>
    %398 = arith.addf %397, %378 : vector<2x256xf32>
    %399 = vector.extract_strided_slice %398 {offsets = [0, 0], sizes = [2, 192], strides = [1, 1]} : vector<2x256xf32> to vector<2x192xf32>
    %400 = arith.negf %399 : vector<2x192xf32>
    %401 = math.exp %400 : vector<2x192xf32>
    %cst_120 = arith.constant 1.000000e+00 : f32
    %402 = vector.broadcast %cst_120 : f32 to vector<2x192xf32>
    %403 = arith.addf %402, %401 : vector<2x192xf32>
    %404 = arith.divf %402, %403 : vector<2x192xf32>
    %405 = vector.extract_strided_slice %398 {offsets = [0, 192], sizes = [2, 64], strides = [1, 1]} : vector<2x256xf32> to vector<2x64xf32>
    %406 = math.tanh %405 : vector<2x64xf32>
    %407 = vector.extract_strided_slice %404 {offsets = [0, 64], sizes = [2, 64], strides = [1, 1]} : vector<2x192xf32> to vector<2x64xf32>
    %408 = arith.mulf %407, %352 : vector<2x64xf32>
    %409 = vector.extract_strided_slice %404 {offsets = [0, 0], sizes = [2, 64], strides = [1, 1]} : vector<2x192xf32> to vector<2x64xf32>
    %410 = arith.mulf %409, %406 : vector<2x64xf32>
    %411 = arith.addf %408, %410 : vector<2x64xf32>
    %412 = vector.extract_strided_slice %404 {offsets = [0, 128], sizes = [2, 64], strides = [1, 1]} : vector<2x192xf32> to vector<2x64xf32>
    %413 = math.tanh %411 : vector<2x64xf32>
    %414 = arith.mulf %412, %413 : vector<2x64xf32>
    %415 = vector.broadcast %15 : vector<1x64xf32> to vector<2x64xf32>
    %416 = arith.mulf %396, %415 : vector<2x64xf32>
    %cst_121 = arith.constant dense<0.000000e+00> : vector<2xf32>
    %417 = vector.multi_reduction <add>, %416, %cst_121 [1] : vector<2x64xf32> to vector<2xf32>
    %418 = vector.shape_cast %417 : vector<2xf32> to vector<2x1xf32>
    %419 = arith.index_cast %c6_i32 : i32 to index
    %c0_122 = arith.constant 0 : index
    %c0_123 = arith.constant 0 : index
    %420 = vector.load %arg18[%419, %c0_122, %c0_123] : memref<18x2x1xf32, #tpu.memory_space<vmem>>, vector<1x2x1xf32>
    %421 = vector.shape_cast %420 : vector<1x2x1xf32> to vector<2x1xf32>
    %422 = vector.shape_cast %418 : vector<2x1xf32> to vector<1x2x1xf32>
    tpu.vector_store %arg18[%419, %c0_122, %c0_123], %422 {strides = array<i32>} : memref<18x2x1xf32, #tpu.memory_space<vmem>>, vector<1x2x1xf32>,
    %423 = vector.broadcast %16 : vector<1x64xf32> to vector<2x64xf32>
    %424 = arith.mulf %414, %423 : vector<2x64xf32>
    %cst_124 = arith.constant dense<0.000000e+00> : vector<2xf32>
    %425 = vector.multi_reduction <add>, %424, %cst_124 [1] : vector<2x64xf32> to vector<2xf32>
    %426 = vector.shape_cast %425 : vector<2xf32> to vector<2x1xf32>
    %427 = arith.index_cast %372 : i32 to index
    %c0_125 = arith.constant 0 : index
    %c0_126 = arith.constant 0 : index
    %428 = vector.load %arg19[%427, %c0_125, %c0_126] : memref<18x2x1xf32, #tpu.memory_space<vmem>>, vector<1x2x1xf32>
    %429 = vector.shape_cast %428 : vector<1x2x1xf32> to vector<2x1xf32>
    %430 = vector.shape_cast %426 : vector<2x1xf32> to vector<1x2x1xf32>
    tpu.vector_store %arg19[%427, %c0_125, %c0_126], %430 {strides = array<i32>} : memref<18x2x1xf32, #tpu.memory_space<vmem>>, vector<1x2x1xf32>,
    %c7_i32 = arith.constant 7 : i32
    %c17_i32_127 = arith.constant 17 : i32
    %431 = arith.subi %c17_i32_127, %c7_i32 : i32
    %c2_i32_128 = arith.constant 2 : i32
    %432 = arith.muli %c7_i32, %c2_i32_128 : i32
    %433 = arith.index_cast %432 : i32 to index
    %c0_129 = arith.constant 0 : index
    %434 = vector.load %arg16[%433, %c0_129] : memref<36x256xf32, #tpu.memory_space<vmem>>, vector<2x256xf32>
    %c2_i32_130 = arith.constant 2 : i32
    %435 = arith.muli %431, %c2_i32_130 : i32
    %436 = arith.index_cast %435 : i32 to index
    %c0_131 = arith.constant 0 : index
    %437 = vector.load %arg17[%436, %c0_131] : memref<36x256xf32, #tpu.memory_space<vmem>>, vector<2x256xf32>
    %cst_132 = arith.constant dense<0.000000e+00> : vector<2x256xf32>
    %438 = tpu.matmul %396, %13, %cst_132 {dimension_numbers = #tpu.dot_dimension_numbers<[1], [0], [0], [1], [0, 0, 1, 1], [], []>} : vector<2x64xf32>, vector<64x256xf32>, vector<2x256xf32> -> vector<2x256xf32>
    %439 = arith.addf %438, %434 : vector<2x256xf32>
    %440 = vector.extract_strided_slice %439 {offsets = [0, 0], sizes = [2, 192], strides = [1, 1]} : vector<2x256xf32> to vector<2x192xf32>
    %441 = arith.negf %440 : vector<2x192xf32>
    %442 = math.exp %441 : vector<2x192xf32>
    %cst_133 = arith.constant 1.000000e+00 : f32
    %443 = vector.broadcast %cst_133 : f32 to vector<2x192xf32>
    %444 = arith.addf %443, %442 : vector<2x192xf32>
    %445 = arith.divf %443, %444 : vector<2x192xf32>
    %446 = vector.extract_strided_slice %439 {offsets = [0, 192], sizes = [2, 64], strides = [1, 1]} : vector<2x256xf32> to vector<2x64xf32>
    %447 = math.tanh %446 : vector<2x64xf32>
    %448 = vector.extract_strided_slice %445 {offsets = [0, 64], sizes = [2, 64], strides = [1, 1]} : vector<2x192xf32> to vector<2x64xf32>
    %449 = arith.mulf %448, %393 : vector<2x64xf32>
    %450 = vector.extract_strided_slice %445 {offsets = [0, 0], sizes = [2, 64], strides = [1, 1]} : vector<2x192xf32> to vector<2x64xf32>
    %451 = arith.mulf %450, %447 : vector<2x64xf32>
    %452 = arith.addf %449, %451 : vector<2x64xf32>
    %453 = vector.extract_strided_slice %445 {offsets = [0, 128], sizes = [2, 64], strides = [1, 1]} : vector<2x192xf32> to vector<2x64xf32>
    %454 = math.tanh %452 : vector<2x64xf32>
    %455 = arith.mulf %453, %454 : vector<2x64xf32>
    %cst_134 = arith.constant dense<0.000000e+00> : vector<2x256xf32>
    %456 = tpu.matmul %414, %14, %cst_134 {dimension_numbers = #tpu.dot_dimension_numbers<[1], [0], [0], [1], [0, 0, 1, 1], [], []>} : vector<2x64xf32>, vector<64x256xf32>, vector<2x256xf32> -> vector<2x256xf32>
    %457 = arith.addf %456, %437 : vector<2x256xf32>
    %458 = vector.extract_strided_slice %457 {offsets = [0, 0], sizes = [2, 192], strides = [1, 1]} : vector<2x256xf32> to vector<2x192xf32>
    %459 = arith.negf %458 : vector<2x192xf32>
    %460 = math.exp %459 : vector<2x192xf32>
    %cst_135 = arith.constant 1.000000e+00 : f32
    %461 = vector.broadcast %cst_135 : f32 to vector<2x192xf32>
    %462 = arith.addf %461, %460 : vector<2x192xf32>
    %463 = arith.divf %461, %462 : vector<2x192xf32>
    %464 = vector.extract_strided_slice %457 {offsets = [0, 192], sizes = [2, 64], strides = [1, 1]} : vector<2x256xf32> to vector<2x64xf32>
    %465 = math.tanh %464 : vector<2x64xf32>
    %466 = vector.extract_strided_slice %463 {offsets = [0, 64], sizes = [2, 64], strides = [1, 1]} : vector<2x192xf32> to vector<2x64xf32>
    %467 = arith.mulf %466, %411 : vector<2x64xf32>
    %468 = vector.extract_strided_slice %463 {offsets = [0, 0], sizes = [2, 64], strides = [1, 1]} : vector<2x192xf32> to vector<2x64xf32>
    %469 = arith.mulf %468, %465 : vector<2x64xf32>
    %470 = arith.addf %467, %469 : vector<2x64xf32>
    %471 = vector.extract_strided_slice %463 {offsets = [0, 128], sizes = [2, 64], strides = [1, 1]} : vector<2x192xf32> to vector<2x64xf32>
    %472 = math.tanh %470 : vector<2x64xf32>
    %473 = arith.mulf %471, %472 : vector<2x64xf32>
    %474 = vector.broadcast %15 : vector<1x64xf32> to vector<2x64xf32>
    %475 = arith.mulf %455, %474 : vector<2x64xf32>
    %cst_136 = arith.constant dense<0.000000e+00> : vector<2xf32>
    %476 = vector.multi_reduction <add>, %475, %cst_136 [1] : vector<2x64xf32> to vector<2xf32>
    %477 = vector.shape_cast %476 : vector<2xf32> to vector<2x1xf32>
    %478 = arith.index_cast %c7_i32 : i32 to index
    %c0_137 = arith.constant 0 : index
    %c0_138 = arith.constant 0 : index
    %479 = vector.load %arg18[%478, %c0_137, %c0_138] : memref<18x2x1xf32, #tpu.memory_space<vmem>>, vector<1x2x1xf32>
    %480 = vector.shape_cast %479 : vector<1x2x1xf32> to vector<2x1xf32>
    %481 = vector.shape_cast %477 : vector<2x1xf32> to vector<1x2x1xf32>
    tpu.vector_store %arg18[%478, %c0_137, %c0_138], %481 {strides = array<i32>} : memref<18x2x1xf32, #tpu.memory_space<vmem>>, vector<1x2x1xf32>,
    %482 = vector.broadcast %16 : vector<1x64xf32> to vector<2x64xf32>
    %483 = arith.mulf %473, %482 : vector<2x64xf32>
    %cst_139 = arith.constant dense<0.000000e+00> : vector<2xf32>
    %484 = vector.multi_reduction <add>, %483, %cst_139 [1] : vector<2x64xf32> to vector<2xf32>
    %485 = vector.shape_cast %484 : vector<2xf32> to vector<2x1xf32>
    %486 = arith.index_cast %431 : i32 to index
    %c0_140 = arith.constant 0 : index
    %c0_141 = arith.constant 0 : index
    %487 = vector.load %arg19[%486, %c0_140, %c0_141] : memref<18x2x1xf32, #tpu.memory_space<vmem>>, vector<1x2x1xf32>
    %488 = vector.shape_cast %487 : vector<1x2x1xf32> to vector<2x1xf32>
    %489 = vector.shape_cast %485 : vector<2x1xf32> to vector<1x2x1xf32>
    tpu.vector_store %arg19[%486, %c0_140, %c0_141], %489 {strides = array<i32>} : memref<18x2x1xf32, #tpu.memory_space<vmem>>, vector<1x2x1xf32>,
    %c8_i32 = arith.constant 8 : i32
    %c17_i32_142 = arith.constant 17 : i32
    %490 = arith.subi %c17_i32_142, %c8_i32 : i32
    %c2_i32_143 = arith.constant 2 : i32
    %491 = arith.muli %c8_i32, %c2_i32_143 : i32
    %492 = arith.index_cast %491 : i32 to index
    %c0_144 = arith.constant 0 : index
    %493 = vector.load %arg16[%492, %c0_144] : memref<36x256xf32, #tpu.memory_space<vmem>>, vector<2x256xf32>
    %c2_i32_145 = arith.constant 2 : i32
    %494 = arith.muli %490, %c2_i32_145 : i32
    %495 = arith.index_cast %494 : i32 to index
    %c0_146 = arith.constant 0 : index
    %496 = vector.load %arg17[%495, %c0_146] : memref<36x256xf32, #tpu.memory_space<vmem>>, vector<2x256xf32>
    %cst_147 = arith.constant dense<0.000000e+00> : vector<2x256xf32>
    %497 = tpu.matmul %455, %13, %cst_147 {dimension_numbers = #tpu.dot_dimension_numbers<[1], [0], [0], [1], [0, 0, 1, 1], [], []>} : vector<2x64xf32>, vector<64x256xf32>, vector<2x256xf32> -> vector<2x256xf32>
    %498 = arith.addf %497, %493 : vector<2x256xf32>
    %499 = vector.extract_strided_slice %498 {offsets = [0, 0], sizes = [2, 192], strides = [1, 1]} : vector<2x256xf32> to vector<2x192xf32>
    %500 = arith.negf %499 : vector<2x192xf32>
    %501 = math.exp %500 : vector<2x192xf32>
    %cst_148 = arith.constant 1.000000e+00 : f32
    %502 = vector.broadcast %cst_148 : f32 to vector<2x192xf32>
    %503 = arith.addf %502, %501 : vector<2x192xf32>
    %504 = arith.divf %502, %503 : vector<2x192xf32>
    %505 = vector.extract_strided_slice %498 {offsets = [0, 192], sizes = [2, 64], strides = [1, 1]} : vector<2x256xf32> to vector<2x64xf32>
    %506 = math.tanh %505 : vector<2x64xf32>
    %507 = vector.extract_strided_slice %504 {offsets = [0, 64], sizes = [2, 64], strides = [1, 1]} : vector<2x192xf32> to vector<2x64xf32>
    %508 = arith.mulf %507, %452 : vector<2x64xf32>
    %509 = vector.extract_strided_slice %504 {offsets = [0, 0], sizes = [2, 64], strides = [1, 1]} : vector<2x192xf32> to vector<2x64xf32>
    %510 = arith.mulf %509, %506 : vector<2x64xf32>
    %511 = arith.addf %508, %510 : vector<2x64xf32>
    %512 = vector.extract_strided_slice %504 {offsets = [0, 128], sizes = [2, 64], strides = [1, 1]} : vector<2x192xf32> to vector<2x64xf32>
    %513 = math.tanh %511 : vector<2x64xf32>
    %514 = arith.mulf %512, %513 : vector<2x64xf32>
    %cst_149 = arith.constant dense<0.000000e+00> : vector<2x256xf32>
    %515 = tpu.matmul %473, %14, %cst_149 {dimension_numbers = #tpu.dot_dimension_numbers<[1], [0], [0], [1], [0, 0, 1, 1], [], []>} : vector<2x64xf32>, vector<64x256xf32>, vector<2x256xf32> -> vector<2x256xf32>
    %516 = arith.addf %515, %496 : vector<2x256xf32>
    %517 = vector.extract_strided_slice %516 {offsets = [0, 0], sizes = [2, 192], strides = [1, 1]} : vector<2x256xf32> to vector<2x192xf32>
    %518 = arith.negf %517 : vector<2x192xf32>
    %519 = math.exp %518 : vector<2x192xf32>
    %cst_150 = arith.constant 1.000000e+00 : f32
    %520 = vector.broadcast %cst_150 : f32 to vector<2x192xf32>
    %521 = arith.addf %520, %519 : vector<2x192xf32>
    %522 = arith.divf %520, %521 : vector<2x192xf32>
    %523 = vector.extract_strided_slice %516 {offsets = [0, 192], sizes = [2, 64], strides = [1, 1]} : vector<2x256xf32> to vector<2x64xf32>
    %524 = math.tanh %523 : vector<2x64xf32>
    %525 = vector.extract_strided_slice %522 {offsets = [0, 64], sizes = [2, 64], strides = [1, 1]} : vector<2x192xf32> to vector<2x64xf32>
    %526 = arith.mulf %525, %470 : vector<2x64xf32>
    %527 = vector.extract_strided_slice %522 {offsets = [0, 0], sizes = [2, 64], strides = [1, 1]} : vector<2x192xf32> to vector<2x64xf32>
    %528 = arith.mulf %527, %524 : vector<2x64xf32>
    %529 = arith.addf %526, %528 : vector<2x64xf32>
    %530 = vector.extract_strided_slice %522 {offsets = [0, 128], sizes = [2, 64], strides = [1, 1]} : vector<2x192xf32> to vector<2x64xf32>
    %531 = math.tanh %529 : vector<2x64xf32>
    %532 = arith.mulf %530, %531 : vector<2x64xf32>
    %533 = vector.broadcast %15 : vector<1x64xf32> to vector<2x64xf32>
    %534 = arith.mulf %514, %533 : vector<2x64xf32>
    %cst_151 = arith.constant dense<0.000000e+00> : vector<2xf32>
    %535 = vector.multi_reduction <add>, %534, %cst_151 [1] : vector<2x64xf32> to vector<2xf32>
    %536 = vector.shape_cast %535 : vector<2xf32> to vector<2x1xf32>
    %537 = arith.index_cast %c8_i32 : i32 to index
    %c0_152 = arith.constant 0 : index
    %c0_153 = arith.constant 0 : index
    %538 = vector.load %arg18[%537, %c0_152, %c0_153] : memref<18x2x1xf32, #tpu.memory_space<vmem>>, vector<1x2x1xf32>
    %539 = vector.shape_cast %538 : vector<1x2x1xf32> to vector<2x1xf32>
    %540 = vector.shape_cast %536 : vector<2x1xf32> to vector<1x2x1xf32>
    tpu.vector_store %arg18[%537, %c0_152, %c0_153], %540 {strides = array<i32>} : memref<18x2x1xf32, #tpu.memory_space<vmem>>, vector<1x2x1xf32>,
    %541 = vector.broadcast %16 : vector<1x64xf32> to vector<2x64xf32>
    %542 = arith.mulf %532, %541 : vector<2x64xf32>
    %cst_154 = arith.constant dense<0.000000e+00> : vector<2xf32>
    %543 = vector.multi_reduction <add>, %542, %cst_154 [1] : vector<2x64xf32> to vector<2xf32>
    %544 = vector.shape_cast %543 : vector<2xf32> to vector<2x1xf32>
    %545 = arith.index_cast %490 : i32 to index
    %c0_155 = arith.constant 0 : index
    %c0_156 = arith.constant 0 : index
    %546 = vector.load %arg19[%545, %c0_155, %c0_156] : memref<18x2x1xf32, #tpu.memory_space<vmem>>, vector<1x2x1xf32>
    %547 = vector.shape_cast %546 : vector<1x2x1xf32> to vector<2x1xf32>
    %548 = vector.shape_cast %544 : vector<2x1xf32> to vector<1x2x1xf32>
    tpu.vector_store %arg19[%545, %c0_155, %c0_156], %548 {strides = array<i32>} : memref<18x2x1xf32, #tpu.memory_space<vmem>>, vector<1x2x1xf32>,
    %c9_i32 = arith.constant 9 : i32
    %c17_i32_157 = arith.constant 17 : i32
    %549 = arith.subi %c17_i32_157, %c9_i32 : i32
    %c2_i32_158 = arith.constant 2 : i32
    %550 = arith.muli %c9_i32, %c2_i32_158 : i32
    %551 = arith.index_cast %550 : i32 to index
    %c0_159 = arith.constant 0 : index
    %552 = vector.load %arg16[%551, %c0_159] : memref<36x256xf32, #tpu.memory_space<vmem>>, vector<2x256xf32>
    %c2_i32_160 = arith.constant 2 : i32
    %553 = arith.muli %549, %c2_i32_160 : i32
    %554 = arith.index_cast %553 : i32 to index
    %c0_161 = arith.constant 0 : index
    %555 = vector.load %arg17[%554, %c0_161] : memref<36x256xf32, #tpu.memory_space<vmem>>, vector<2x256xf32>
    %cst_162 = arith.constant dense<0.000000e+00> : vector<2x256xf32>
    %556 = tpu.matmul %514, %13, %cst_162 {dimension_numbers = #tpu.dot_dimension_numbers<[1], [0], [0], [1], [0, 0, 1, 1], [], []>} : vector<2x64xf32>, vector<64x256xf32>, vector<2x256xf32> -> vector<2x256xf32>
    %557 = arith.addf %556, %552 : vector<2x256xf32>
    %558 = vector.extract_strided_slice %557 {offsets = [0, 0], sizes = [2, 192], strides = [1, 1]} : vector<2x256xf32> to vector<2x192xf32>
    %559 = arith.negf %558 : vector<2x192xf32>
    %560 = math.exp %559 : vector<2x192xf32>
    %cst_163 = arith.constant 1.000000e+00 : f32
    %561 = vector.broadcast %cst_163 : f32 to vector<2x192xf32>
    %562 = arith.addf %561, %560 : vector<2x192xf32>
    %563 = arith.divf %561, %562 : vector<2x192xf32>
    %564 = vector.extract_strided_slice %557 {offsets = [0, 192], sizes = [2, 64], strides = [1, 1]} : vector<2x256xf32> to vector<2x64xf32>
    %565 = math.tanh %564 : vector<2x64xf32>
    %566 = vector.extract_strided_slice %563 {offsets = [0, 64], sizes = [2, 64], strides = [1, 1]} : vector<2x192xf32> to vector<2x64xf32>
    %567 = arith.mulf %566, %511 : vector<2x64xf32>
    %568 = vector.extract_strided_slice %563 {offsets = [0, 0], sizes = [2, 64], strides = [1, 1]} : vector<2x192xf32> to vector<2x64xf32>
    %569 = arith.mulf %568, %565 : vector<2x64xf32>
    %570 = arith.addf %567, %569 : vector<2x64xf32>
    %571 = vector.extract_strided_slice %563 {offsets = [0, 128], sizes = [2, 64], strides = [1, 1]} : vector<2x192xf32> to vector<2x64xf32>
    %572 = math.tanh %570 : vector<2x64xf32>
    %573 = arith.mulf %571, %572 : vector<2x64xf32>
    %cst_164 = arith.constant dense<0.000000e+00> : vector<2x256xf32>
    %574 = tpu.matmul %532, %14, %cst_164 {dimension_numbers = #tpu.dot_dimension_numbers<[1], [0], [0], [1], [0, 0, 1, 1], [], []>} : vector<2x64xf32>, vector<64x256xf32>, vector<2x256xf32> -> vector<2x256xf32>
    %575 = arith.addf %574, %555 : vector<2x256xf32>
    %576 = vector.extract_strided_slice %575 {offsets = [0, 0], sizes = [2, 192], strides = [1, 1]} : vector<2x256xf32> to vector<2x192xf32>
    %577 = arith.negf %576 : vector<2x192xf32>
    %578 = math.exp %577 : vector<2x192xf32>
    %cst_165 = arith.constant 1.000000e+00 : f32
    %579 = vector.broadcast %cst_165 : f32 to vector<2x192xf32>
    %580 = arith.addf %579, %578 : vector<2x192xf32>
    %581 = arith.divf %579, %580 : vector<2x192xf32>
    %582 = vector.extract_strided_slice %575 {offsets = [0, 192], sizes = [2, 64], strides = [1, 1]} : vector<2x256xf32> to vector<2x64xf32>
    %583 = math.tanh %582 : vector<2x64xf32>
    %584 = vector.extract_strided_slice %581 {offsets = [0, 64], sizes = [2, 64], strides = [1, 1]} : vector<2x192xf32> to vector<2x64xf32>
    %585 = arith.mulf %584, %529 : vector<2x64xf32>
    %586 = vector.extract_strided_slice %581 {offsets = [0, 0], sizes = [2, 64], strides = [1, 1]} : vector<2x192xf32> to vector<2x64xf32>
    %587 = arith.mulf %586, %583 : vector<2x64xf32>
    %588 = arith.addf %585, %587 : vector<2x64xf32>
    %589 = vector.extract_strided_slice %581 {offsets = [0, 128], sizes = [2, 64], strides = [1, 1]} : vector<2x192xf32> to vector<2x64xf32>
    %590 = math.tanh %588 : vector<2x64xf32>
    %591 = arith.mulf %589, %590 : vector<2x64xf32>
    %592 = vector.broadcast %15 : vector<1x64xf32> to vector<2x64xf32>
    %593 = arith.mulf %573, %592 : vector<2x64xf32>
    %cst_166 = arith.constant dense<0.000000e+00> : vector<2xf32>
    %594 = vector.multi_reduction <add>, %593, %cst_166 [1] : vector<2x64xf32> to vector<2xf32>
    %595 = vector.shape_cast %594 : vector<2xf32> to vector<2x1xf32>
    %596 = arith.index_cast %c9_i32 : i32 to index
    %c0_167 = arith.constant 0 : index
    %c0_168 = arith.constant 0 : index
    %597 = vector.load %arg18[%596, %c0_167, %c0_168] : memref<18x2x1xf32, #tpu.memory_space<vmem>>, vector<1x2x1xf32>
    %598 = vector.shape_cast %597 : vector<1x2x1xf32> to vector<2x1xf32>
    %599 = vector.shape_cast %595 : vector<2x1xf32> to vector<1x2x1xf32>
    tpu.vector_store %arg18[%596, %c0_167, %c0_168], %599 {strides = array<i32>} : memref<18x2x1xf32, #tpu.memory_space<vmem>>, vector<1x2x1xf32>,
    %600 = vector.broadcast %16 : vector<1x64xf32> to vector<2x64xf32>
    %601 = arith.mulf %591, %600 : vector<2x64xf32>
    %cst_169 = arith.constant dense<0.000000e+00> : vector<2xf32>
    %602 = vector.multi_reduction <add>, %601, %cst_169 [1] : vector<2x64xf32> to vector<2xf32>
    %603 = vector.shape_cast %602 : vector<2xf32> to vector<2x1xf32>
    %604 = arith.index_cast %549 : i32 to index
    %c0_170 = arith.constant 0 : index
    %c0_171 = arith.constant 0 : index
    %605 = vector.load %arg19[%604, %c0_170, %c0_171] : memref<18x2x1xf32, #tpu.memory_space<vmem>>, vector<1x2x1xf32>
    %606 = vector.shape_cast %605 : vector<1x2x1xf32> to vector<2x1xf32>
    %607 = vector.shape_cast %603 : vector<2x1xf32> to vector<1x2x1xf32>
    tpu.vector_store %arg19[%604, %c0_170, %c0_171], %607 {strides = array<i32>} : memref<18x2x1xf32, #tpu.memory_space<vmem>>, vector<1x2x1xf32>,
    %c10_i32 = arith.constant 10 : i32
    %c17_i32_172 = arith.constant 17 : i32
    %608 = arith.subi %c17_i32_172, %c10_i32 : i32
    %c2_i32_173 = arith.constant 2 : i32
    %609 = arith.muli %c10_i32, %c2_i32_173 : i32
    %610 = arith.index_cast %609 : i32 to index
    %c0_174 = arith.constant 0 : index
    %611 = vector.load %arg16[%610, %c0_174] : memref<36x256xf32, #tpu.memory_space<vmem>>, vector<2x256xf32>
    %c2_i32_175 = arith.constant 2 : i32
    %612 = arith.muli %608, %c2_i32_175 : i32
    %613 = arith.index_cast %612 : i32 to index
    %c0_176 = arith.constant 0 : index
    %614 = vector.load %arg17[%613, %c0_176] : memref<36x256xf32, #tpu.memory_space<vmem>>, vector<2x256xf32>
    %cst_177 = arith.constant dense<0.000000e+00> : vector<2x256xf32>
    %615 = tpu.matmul %573, %13, %cst_177 {dimension_numbers = #tpu.dot_dimension_numbers<[1], [0], [0], [1], [0, 0, 1, 1], [], []>} : vector<2x64xf32>, vector<64x256xf32>, vector<2x256xf32> -> vector<2x256xf32>
    %616 = arith.addf %615, %611 : vector<2x256xf32>
    %617 = vector.extract_strided_slice %616 {offsets = [0, 0], sizes = [2, 192], strides = [1, 1]} : vector<2x256xf32> to vector<2x192xf32>
    %618 = arith.negf %617 : vector<2x192xf32>
    %619 = math.exp %618 : vector<2x192xf32>
    %cst_178 = arith.constant 1.000000e+00 : f32
    %620 = vector.broadcast %cst_178 : f32 to vector<2x192xf32>
    %621 = arith.addf %620, %619 : vector<2x192xf32>
    %622 = arith.divf %620, %621 : vector<2x192xf32>
    %623 = vector.extract_strided_slice %616 {offsets = [0, 192], sizes = [2, 64], strides = [1, 1]} : vector<2x256xf32> to vector<2x64xf32>
    %624 = math.tanh %623 : vector<2x64xf32>
    %625 = vector.extract_strided_slice %622 {offsets = [0, 64], sizes = [2, 64], strides = [1, 1]} : vector<2x192xf32> to vector<2x64xf32>
    %626 = arith.mulf %625, %570 : vector<2x64xf32>
    %627 = vector.extract_strided_slice %622 {offsets = [0, 0], sizes = [2, 64], strides = [1, 1]} : vector<2x192xf32> to vector<2x64xf32>
    %628 = arith.mulf %627, %624 : vector<2x64xf32>
    %629 = arith.addf %626, %628 : vector<2x64xf32>
    %630 = vector.extract_strided_slice %622 {offsets = [0, 128], sizes = [2, 64], strides = [1, 1]} : vector<2x192xf32> to vector<2x64xf32>
    %631 = math.tanh %629 : vector<2x64xf32>
    %632 = arith.mulf %630, %631 : vector<2x64xf32>
    %cst_179 = arith.constant dense<0.000000e+00> : vector<2x256xf32>
    %633 = tpu.matmul %591, %14, %cst_179 {dimension_numbers = #tpu.dot_dimension_numbers<[1], [0], [0], [1], [0, 0, 1, 1], [], []>} : vector<2x64xf32>, vector<64x256xf32>, vector<2x256xf32> -> vector<2x256xf32>
    %634 = arith.addf %633, %614 : vector<2x256xf32>
    %635 = vector.extract_strided_slice %634 {offsets = [0, 0], sizes = [2, 192], strides = [1, 1]} : vector<2x256xf32> to vector<2x192xf32>
    %636 = arith.negf %635 : vector<2x192xf32>
    %637 = math.exp %636 : vector<2x192xf32>
    %cst_180 = arith.constant 1.000000e+00 : f32
    %638 = vector.broadcast %cst_180 : f32 to vector<2x192xf32>
    %639 = arith.addf %638, %637 : vector<2x192xf32>
    %640 = arith.divf %638, %639 : vector<2x192xf32>
    %641 = vector.extract_strided_slice %634 {offsets = [0, 192], sizes = [2, 64], strides = [1, 1]} : vector<2x256xf32> to vector<2x64xf32>
    %642 = math.tanh %641 : vector<2x64xf32>
    %643 = vector.extract_strided_slice %640 {offsets = [0, 64], sizes = [2, 64], strides = [1, 1]} : vector<2x192xf32> to vector<2x64xf32>
    %644 = arith.mulf %643, %588 : vector<2x64xf32>
    %645 = vector.extract_strided_slice %640 {offsets = [0, 0], sizes = [2, 64], strides = [1, 1]} : vector<2x192xf32> to vector<2x64xf32>
    %646 = arith.mulf %645, %642 : vector<2x64xf32>
    %647 = arith.addf %644, %646 : vector<2x64xf32>
    %648 = vector.extract_strided_slice %640 {offsets = [0, 128], sizes = [2, 64], strides = [1, 1]} : vector<2x192xf32> to vector<2x64xf32>
    %649 = math.tanh %647 : vector<2x64xf32>
    %650 = arith.mulf %648, %649 : vector<2x64xf32>
    %651 = vector.broadcast %15 : vector<1x64xf32> to vector<2x64xf32>
    %652 = arith.mulf %632, %651 : vector<2x64xf32>
    %cst_181 = arith.constant dense<0.000000e+00> : vector<2xf32>
    %653 = vector.multi_reduction <add>, %652, %cst_181 [1] : vector<2x64xf32> to vector<2xf32>
    %654 = vector.shape_cast %653 : vector<2xf32> to vector<2x1xf32>
    %655 = arith.index_cast %c10_i32 : i32 to index
    %c0_182 = arith.constant 0 : index
    %c0_183 = arith.constant 0 : index
    %656 = vector.load %arg18[%655, %c0_182, %c0_183] : memref<18x2x1xf32, #tpu.memory_space<vmem>>, vector<1x2x1xf32>
    %657 = vector.shape_cast %656 : vector<1x2x1xf32> to vector<2x1xf32>
    %658 = vector.shape_cast %654 : vector<2x1xf32> to vector<1x2x1xf32>
    tpu.vector_store %arg18[%655, %c0_182, %c0_183], %658 {strides = array<i32>} : memref<18x2x1xf32, #tpu.memory_space<vmem>>, vector<1x2x1xf32>,
    %659 = vector.broadcast %16 : vector<1x64xf32> to vector<2x64xf32>
    %660 = arith.mulf %650, %659 : vector<2x64xf32>
    %cst_184 = arith.constant dense<0.000000e+00> : vector<2xf32>
    %661 = vector.multi_reduction <add>, %660, %cst_184 [1] : vector<2x64xf32> to vector<2xf32>
    %662 = vector.shape_cast %661 : vector<2xf32> to vector<2x1xf32>
    %663 = arith.index_cast %608 : i32 to index
    %c0_185 = arith.constant 0 : index
    %c0_186 = arith.constant 0 : index
    %664 = vector.load %arg19[%663, %c0_185, %c0_186] : memref<18x2x1xf32, #tpu.memory_space<vmem>>, vector<1x2x1xf32>
    %665 = vector.shape_cast %664 : vector<1x2x1xf32> to vector<2x1xf32>
    %666 = vector.shape_cast %662 : vector<2x1xf32> to vector<1x2x1xf32>
    tpu.vector_store %arg19[%663, %c0_185, %c0_186], %666 {strides = array<i32>} : memref<18x2x1xf32, #tpu.memory_space<vmem>>, vector<1x2x1xf32>,
    %c11_i32 = arith.constant 11 : i32
    %c17_i32_187 = arith.constant 17 : i32
    %667 = arith.subi %c17_i32_187, %c11_i32 : i32
    %c2_i32_188 = arith.constant 2 : i32
    %668 = arith.muli %c11_i32, %c2_i32_188 : i32
    %669 = arith.index_cast %668 : i32 to index
    %c0_189 = arith.constant 0 : index
    %670 = vector.load %arg16[%669, %c0_189] : memref<36x256xf32, #tpu.memory_space<vmem>>, vector<2x256xf32>
    %c2_i32_190 = arith.constant 2 : i32
    %671 = arith.muli %667, %c2_i32_190 : i32
    %672 = arith.index_cast %671 : i32 to index
    %c0_191 = arith.constant 0 : index
    %673 = vector.load %arg17[%672, %c0_191] : memref<36x256xf32, #tpu.memory_space<vmem>>, vector<2x256xf32>
    %cst_192 = arith.constant dense<0.000000e+00> : vector<2x256xf32>
    %674 = tpu.matmul %632, %13, %cst_192 {dimension_numbers = #tpu.dot_dimension_numbers<[1], [0], [0], [1], [0, 0, 1, 1], [], []>} : vector<2x64xf32>, vector<64x256xf32>, vector<2x256xf32> -> vector<2x256xf32>
    %675 = arith.addf %674, %670 : vector<2x256xf32>
    %676 = vector.extract_strided_slice %675 {offsets = [0, 0], sizes = [2, 192], strides = [1, 1]} : vector<2x256xf32> to vector<2x192xf32>
    %677 = arith.negf %676 : vector<2x192xf32>
    %678 = math.exp %677 : vector<2x192xf32>
    %cst_193 = arith.constant 1.000000e+00 : f32
    %679 = vector.broadcast %cst_193 : f32 to vector<2x192xf32>
    %680 = arith.addf %679, %678 : vector<2x192xf32>
    %681 = arith.divf %679, %680 : vector<2x192xf32>
    %682 = vector.extract_strided_slice %675 {offsets = [0, 192], sizes = [2, 64], strides = [1, 1]} : vector<2x256xf32> to vector<2x64xf32>
    %683 = math.tanh %682 : vector<2x64xf32>
    %684 = vector.extract_strided_slice %681 {offsets = [0, 64], sizes = [2, 64], strides = [1, 1]} : vector<2x192xf32> to vector<2x64xf32>
    %685 = arith.mulf %684, %629 : vector<2x64xf32>
    %686 = vector.extract_strided_slice %681 {offsets = [0, 0], sizes = [2, 64], strides = [1, 1]} : vector<2x192xf32> to vector<2x64xf32>
    %687 = arith.mulf %686, %683 : vector<2x64xf32>
    %688 = arith.addf %685, %687 : vector<2x64xf32>
    %689 = vector.extract_strided_slice %681 {offsets = [0, 128], sizes = [2, 64], strides = [1, 1]} : vector<2x192xf32> to vector<2x64xf32>
    %690 = math.tanh %688 : vector<2x64xf32>
    %691 = arith.mulf %689, %690 : vector<2x64xf32>
    %cst_194 = arith.constant dense<0.000000e+00> : vector<2x256xf32>
    %692 = tpu.matmul %650, %14, %cst_194 {dimension_numbers = #tpu.dot_dimension_numbers<[1], [0], [0], [1], [0, 0, 1, 1], [], []>} : vector<2x64xf32>, vector<64x256xf32>, vector<2x256xf32> -> vector<2x256xf32>
    %693 = arith.addf %692, %673 : vector<2x256xf32>
    %694 = vector.extract_strided_slice %693 {offsets = [0, 0], sizes = [2, 192], strides = [1, 1]} : vector<2x256xf32> to vector<2x192xf32>
    %695 = arith.negf %694 : vector<2x192xf32>
    %696 = math.exp %695 : vector<2x192xf32>
    %cst_195 = arith.constant 1.000000e+00 : f32
    %697 = vector.broadcast %cst_195 : f32 to vector<2x192xf32>
    %698 = arith.addf %697, %696 : vector<2x192xf32>
    %699 = arith.divf %697, %698 : vector<2x192xf32>
    %700 = vector.extract_strided_slice %693 {offsets = [0, 192], sizes = [2, 64], strides = [1, 1]} : vector<2x256xf32> to vector<2x64xf32>
    %701 = math.tanh %700 : vector<2x64xf32>
    %702 = vector.extract_strided_slice %699 {offsets = [0, 64], sizes = [2, 64], strides = [1, 1]} : vector<2x192xf32> to vector<2x64xf32>
    %703 = arith.mulf %702, %647 : vector<2x64xf32>
    %704 = vector.extract_strided_slice %699 {offsets = [0, 0], sizes = [2, 64], strides = [1, 1]} : vector<2x192xf32> to vector<2x64xf32>
    %705 = arith.mulf %704, %701 : vector<2x64xf32>
    %706 = arith.addf %703, %705 : vector<2x64xf32>
    %707 = vector.extract_strided_slice %699 {offsets = [0, 128], sizes = [2, 64], strides = [1, 1]} : vector<2x192xf32> to vector<2x64xf32>
    %708 = math.tanh %706 : vector<2x64xf32>
    %709 = arith.mulf %707, %708 : vector<2x64xf32>
    %710 = vector.broadcast %15 : vector<1x64xf32> to vector<2x64xf32>
    %711 = arith.mulf %691, %710 : vector<2x64xf32>
    %cst_196 = arith.constant dense<0.000000e+00> : vector<2xf32>
    %712 = vector.multi_reduction <add>, %711, %cst_196 [1] : vector<2x64xf32> to vector<2xf32>
    %713 = vector.shape_cast %712 : vector<2xf32> to vector<2x1xf32>
    %714 = arith.index_cast %c11_i32 : i32 to index
    %c0_197 = arith.constant 0 : index
    %c0_198 = arith.constant 0 : index
    %715 = vector.load %arg18[%714, %c0_197, %c0_198] : memref<18x2x1xf32, #tpu.memory_space<vmem>>, vector<1x2x1xf32>
    %716 = vector.shape_cast %715 : vector<1x2x1xf32> to vector<2x1xf32>
    %717 = vector.shape_cast %713 : vector<2x1xf32> to vector<1x2x1xf32>
    tpu.vector_store %arg18[%714, %c0_197, %c0_198], %717 {strides = array<i32>} : memref<18x2x1xf32, #tpu.memory_space<vmem>>, vector<1x2x1xf32>,
    %718 = vector.broadcast %16 : vector<1x64xf32> to vector<2x64xf32>
    %719 = arith.mulf %709, %718 : vector<2x64xf32>
    %cst_199 = arith.constant dense<0.000000e+00> : vector<2xf32>
    %720 = vector.multi_reduction <add>, %719, %cst_199 [1] : vector<2x64xf32> to vector<2xf32>
    %721 = vector.shape_cast %720 : vector<2xf32> to vector<2x1xf32>
    %722 = arith.index_cast %667 : i32 to index
    %c0_200 = arith.constant 0 : index
    %c0_201 = arith.constant 0 : index
    %723 = vector.load %arg19[%722, %c0_200, %c0_201] : memref<18x2x1xf32, #tpu.memory_space<vmem>>, vector<1x2x1xf32>
    %724 = vector.shape_cast %723 : vector<1x2x1xf32> to vector<2x1xf32>
    %725 = vector.shape_cast %721 : vector<2x1xf32> to vector<1x2x1xf32>
    tpu.vector_store %arg19[%722, %c0_200, %c0_201], %725 {strides = array<i32>} : memref<18x2x1xf32, #tpu.memory_space<vmem>>, vector<1x2x1xf32>,
    %c12_i32 = arith.constant 12 : i32
    %c17_i32_202 = arith.constant 17 : i32
    %726 = arith.subi %c17_i32_202, %c12_i32 : i32
    %c2_i32_203 = arith.constant 2 : i32
    %727 = arith.muli %c12_i32, %c2_i32_203 : i32
    %728 = arith.index_cast %727 : i32 to index
    %c0_204 = arith.constant 0 : index
    %729 = vector.load %arg16[%728, %c0_204] : memref<36x256xf32, #tpu.memory_space<vmem>>, vector<2x256xf32>
    %c2_i32_205 = arith.constant 2 : i32
    %730 = arith.muli %726, %c2_i32_205 : i32
    %731 = arith.index_cast %730 : i32 to index
    %c0_206 = arith.constant 0 : index
    %732 = vector.load %arg17[%731, %c0_206] : memref<36x256xf32, #tpu.memory_space<vmem>>, vector<2x256xf32>
    %cst_207 = arith.constant dense<0.000000e+00> : vector<2x256xf32>
    %733 = tpu.matmul %691, %13, %cst_207 {dimension_numbers = #tpu.dot_dimension_numbers<[1], [0], [0], [1], [0, 0, 1, 1], [], []>} : vector<2x64xf32>, vector<64x256xf32>, vector<2x256xf32> -> vector<2x256xf32>
    %734 = arith.addf %733, %729 : vector<2x256xf32>
    %735 = vector.extract_strided_slice %734 {offsets = [0, 0], sizes = [2, 192], strides = [1, 1]} : vector<2x256xf32> to vector<2x192xf32>
    %736 = arith.negf %735 : vector<2x192xf32>
    %737 = math.exp %736 : vector<2x192xf32>
    %cst_208 = arith.constant 1.000000e+00 : f32
    %738 = vector.broadcast %cst_208 : f32 to vector<2x192xf32>
    %739 = arith.addf %738, %737 : vector<2x192xf32>
    %740 = arith.divf %738, %739 : vector<2x192xf32>
    %741 = vector.extract_strided_slice %734 {offsets = [0, 192], sizes = [2, 64], strides = [1, 1]} : vector<2x256xf32> to vector<2x64xf32>
    %742 = math.tanh %741 : vector<2x64xf32>
    %743 = vector.extract_strided_slice %740 {offsets = [0, 64], sizes = [2, 64], strides = [1, 1]} : vector<2x192xf32> to vector<2x64xf32>
    %744 = arith.mulf %743, %688 : vector<2x64xf32>
    %745 = vector.extract_strided_slice %740 {offsets = [0, 0], sizes = [2, 64], strides = [1, 1]} : vector<2x192xf32> to vector<2x64xf32>
    %746 = arith.mulf %745, %742 : vector<2x64xf32>
    %747 = arith.addf %744, %746 : vector<2x64xf32>
    %748 = vector.extract_strided_slice %740 {offsets = [0, 128], sizes = [2, 64], strides = [1, 1]} : vector<2x192xf32> to vector<2x64xf32>
    %749 = math.tanh %747 : vector<2x64xf32>
    %750 = arith.mulf %748, %749 : vector<2x64xf32>
    %cst_209 = arith.constant dense<0.000000e+00> : vector<2x256xf32>
    %751 = tpu.matmul %709, %14, %cst_209 {dimension_numbers = #tpu.dot_dimension_numbers<[1], [0], [0], [1], [0, 0, 1, 1], [], []>} : vector<2x64xf32>, vector<64x256xf32>, vector<2x256xf32> -> vector<2x256xf32>
    %752 = arith.addf %751, %732 : vector<2x256xf32>
    %753 = vector.extract_strided_slice %752 {offsets = [0, 0], sizes = [2, 192], strides = [1, 1]} : vector<2x256xf32> to vector<2x192xf32>
    %754 = arith.negf %753 : vector<2x192xf32>
    %755 = math.exp %754 : vector<2x192xf32>
    %cst_210 = arith.constant 1.000000e+00 : f32
    %756 = vector.broadcast %cst_210 : f32 to vector<2x192xf32>
    %757 = arith.addf %756, %755 : vector<2x192xf32>
    %758 = arith.divf %756, %757 : vector<2x192xf32>
    %759 = vector.extract_strided_slice %752 {offsets = [0, 192], sizes = [2, 64], strides = [1, 1]} : vector<2x256xf32> to vector<2x64xf32>
    %760 = math.tanh %759 : vector<2x64xf32>
    %761 = vector.extract_strided_slice %758 {offsets = [0, 64], sizes = [2, 64], strides = [1, 1]} : vector<2x192xf32> to vector<2x64xf32>
    %762 = arith.mulf %761, %706 : vector<2x64xf32>
    %763 = vector.extract_strided_slice %758 {offsets = [0, 0], sizes = [2, 64], strides = [1, 1]} : vector<2x192xf32> to vector<2x64xf32>
    %764 = arith.mulf %763, %760 : vector<2x64xf32>
    %765 = arith.addf %762, %764 : vector<2x64xf32>
    %766 = vector.extract_strided_slice %758 {offsets = [0, 128], sizes = [2, 64], strides = [1, 1]} : vector<2x192xf32> to vector<2x64xf32>
    %767 = math.tanh %765 : vector<2x64xf32>
    %768 = arith.mulf %766, %767 : vector<2x64xf32>
    %769 = vector.broadcast %15 : vector<1x64xf32> to vector<2x64xf32>
    %770 = arith.mulf %750, %769 : vector<2x64xf32>
    %cst_211 = arith.constant dense<0.000000e+00> : vector<2xf32>
    %771 = vector.multi_reduction <add>, %770, %cst_211 [1] : vector<2x64xf32> to vector<2xf32>
    %772 = vector.shape_cast %771 : vector<2xf32> to vector<2x1xf32>
    %773 = arith.index_cast %c12_i32 : i32 to index
    %c0_212 = arith.constant 0 : index
    %c0_213 = arith.constant 0 : index
    %774 = vector.load %arg18[%773, %c0_212, %c0_213] : memref<18x2x1xf32, #tpu.memory_space<vmem>>, vector<1x2x1xf32>
    %775 = vector.shape_cast %774 : vector<1x2x1xf32> to vector<2x1xf32>
    %776 = vector.shape_cast %772 : vector<2x1xf32> to vector<1x2x1xf32>
    tpu.vector_store %arg18[%773, %c0_212, %c0_213], %776 {strides = array<i32>} : memref<18x2x1xf32, #tpu.memory_space<vmem>>, vector<1x2x1xf32>,
    %777 = vector.broadcast %16 : vector<1x64xf32> to vector<2x64xf32>
    %778 = arith.mulf %768, %777 : vector<2x64xf32>
    %cst_214 = arith.constant dense<0.000000e+00> : vector<2xf32>
    %779 = vector.multi_reduction <add>, %778, %cst_214 [1] : vector<2x64xf32> to vector<2xf32>
    %780 = vector.shape_cast %779 : vector<2xf32> to vector<2x1xf32>
    %781 = arith.index_cast %726 : i32 to index
    %c0_215 = arith.constant 0 : index
    %c0_216 = arith.constant 0 : index
    %782 = vector.load %arg19[%781, %c0_215, %c0_216] : memref<18x2x1xf32, #tpu.memory_space<vmem>>, vector<1x2x1xf32>
    %783 = vector.shape_cast %782 : vector<1x2x1xf32> to vector<2x1xf32>
    %784 = vector.shape_cast %780 : vector<2x1xf32> to vector<1x2x1xf32>
    tpu.vector_store %arg19[%781, %c0_215, %c0_216], %784 {strides = array<i32>} : memref<18x2x1xf32, #tpu.memory_space<vmem>>, vector<1x2x1xf32>,
    %c13_i32 = arith.constant 13 : i32
    %c17_i32_217 = arith.constant 17 : i32
    %785 = arith.subi %c17_i32_217, %c13_i32 : i32
    %c2_i32_218 = arith.constant 2 : i32
    %786 = arith.muli %c13_i32, %c2_i32_218 : i32
    %787 = arith.index_cast %786 : i32 to index
    %c0_219 = arith.constant 0 : index
    %788 = vector.load %arg16[%787, %c0_219] : memref<36x256xf32, #tpu.memory_space<vmem>>, vector<2x256xf32>
    %c2_i32_220 = arith.constant 2 : i32
    %789 = arith.muli %785, %c2_i32_220 : i32
    %790 = arith.index_cast %789 : i32 to index
    %c0_221 = arith.constant 0 : index
    %791 = vector.load %arg17[%790, %c0_221] : memref<36x256xf32, #tpu.memory_space<vmem>>, vector<2x256xf32>
    %cst_222 = arith.constant dense<0.000000e+00> : vector<2x256xf32>
    %792 = tpu.matmul %750, %13, %cst_222 {dimension_numbers = #tpu.dot_dimension_numbers<[1], [0], [0], [1], [0, 0, 1, 1], [], []>} : vector<2x64xf32>, vector<64x256xf32>, vector<2x256xf32> -> vector<2x256xf32>
    %793 = arith.addf %792, %788 : vector<2x256xf32>
    %794 = vector.extract_strided_slice %793 {offsets = [0, 0], sizes = [2, 192], strides = [1, 1]} : vector<2x256xf32> to vector<2x192xf32>
    %795 = arith.negf %794 : vector<2x192xf32>
    %796 = math.exp %795 : vector<2x192xf32>
    %cst_223 = arith.constant 1.000000e+00 : f32
    %797 = vector.broadcast %cst_223 : f32 to vector<2x192xf32>
    %798 = arith.addf %797, %796 : vector<2x192xf32>
    %799 = arith.divf %797, %798 : vector<2x192xf32>
    %800 = vector.extract_strided_slice %793 {offsets = [0, 192], sizes = [2, 64], strides = [1, 1]} : vector<2x256xf32> to vector<2x64xf32>
    %801 = math.tanh %800 : vector<2x64xf32>
    %802 = vector.extract_strided_slice %799 {offsets = [0, 64], sizes = [2, 64], strides = [1, 1]} : vector<2x192xf32> to vector<2x64xf32>
    %803 = arith.mulf %802, %747 : vector<2x64xf32>
    %804 = vector.extract_strided_slice %799 {offsets = [0, 0], sizes = [2, 64], strides = [1, 1]} : vector<2x192xf32> to vector<2x64xf32>
    %805 = arith.mulf %804, %801 : vector<2x64xf32>
    %806 = arith.addf %803, %805 : vector<2x64xf32>
    %807 = vector.extract_strided_slice %799 {offsets = [0, 128], sizes = [2, 64], strides = [1, 1]} : vector<2x192xf32> to vector<2x64xf32>
    %808 = math.tanh %806 : vector<2x64xf32>
    %809 = arith.mulf %807, %808 : vector<2x64xf32>
    %cst_224 = arith.constant dense<0.000000e+00> : vector<2x256xf32>
    %810 = tpu.matmul %768, %14, %cst_224 {dimension_numbers = #tpu.dot_dimension_numbers<[1], [0], [0], [1], [0, 0, 1, 1], [], []>} : vector<2x64xf32>, vector<64x256xf32>, vector<2x256xf32> -> vector<2x256xf32>
    %811 = arith.addf %810, %791 : vector<2x256xf32>
    %812 = vector.extract_strided_slice %811 {offsets = [0, 0], sizes = [2, 192], strides = [1, 1]} : vector<2x256xf32> to vector<2x192xf32>
    %813 = arith.negf %812 : vector<2x192xf32>
    %814 = math.exp %813 : vector<2x192xf32>
    %cst_225 = arith.constant 1.000000e+00 : f32
    %815 = vector.broadcast %cst_225 : f32 to vector<2x192xf32>
    %816 = arith.addf %815, %814 : vector<2x192xf32>
    %817 = arith.divf %815, %816 : vector<2x192xf32>
    %818 = vector.extract_strided_slice %811 {offsets = [0, 192], sizes = [2, 64], strides = [1, 1]} : vector<2x256xf32> to vector<2x64xf32>
    %819 = math.tanh %818 : vector<2x64xf32>
    %820 = vector.extract_strided_slice %817 {offsets = [0, 64], sizes = [2, 64], strides = [1, 1]} : vector<2x192xf32> to vector<2x64xf32>
    %821 = arith.mulf %820, %765 : vector<2x64xf32>
    %822 = vector.extract_strided_slice %817 {offsets = [0, 0], sizes = [2, 64], strides = [1, 1]} : vector<2x192xf32> to vector<2x64xf32>
    %823 = arith.mulf %822, %819 : vector<2x64xf32>
    %824 = arith.addf %821, %823 : vector<2x64xf32>
    %825 = vector.extract_strided_slice %817 {offsets = [0, 128], sizes = [2, 64], strides = [1, 1]} : vector<2x192xf32> to vector<2x64xf32>
    %826 = math.tanh %824 : vector<2x64xf32>
    %827 = arith.mulf %825, %826 : vector<2x64xf32>
    %828 = vector.broadcast %15 : vector<1x64xf32> to vector<2x64xf32>
    %829 = arith.mulf %809, %828 : vector<2x64xf32>
    %cst_226 = arith.constant dense<0.000000e+00> : vector<2xf32>
    %830 = vector.multi_reduction <add>, %829, %cst_226 [1] : vector<2x64xf32> to vector<2xf32>
    %831 = vector.shape_cast %830 : vector<2xf32> to vector<2x1xf32>
    %832 = arith.index_cast %c13_i32 : i32 to index
    %c0_227 = arith.constant 0 : index
    %c0_228 = arith.constant 0 : index
    %833 = vector.load %arg18[%832, %c0_227, %c0_228] : memref<18x2x1xf32, #tpu.memory_space<vmem>>, vector<1x2x1xf32>
    %834 = vector.shape_cast %833 : vector<1x2x1xf32> to vector<2x1xf32>
    %835 = vector.shape_cast %831 : vector<2x1xf32> to vector<1x2x1xf32>
    tpu.vector_store %arg18[%832, %c0_227, %c0_228], %835 {strides = array<i32>} : memref<18x2x1xf32, #tpu.memory_space<vmem>>, vector<1x2x1xf32>,
    %836 = vector.broadcast %16 : vector<1x64xf32> to vector<2x64xf32>
    %837 = arith.mulf %827, %836 : vector<2x64xf32>
    %cst_229 = arith.constant dense<0.000000e+00> : vector<2xf32>
    %838 = vector.multi_reduction <add>, %837, %cst_229 [1] : vector<2x64xf32> to vector<2xf32>
    %839 = vector.shape_cast %838 : vector<2xf32> to vector<2x1xf32>
    %840 = arith.index_cast %785 : i32 to index
    %c0_230 = arith.constant 0 : index
    %c0_231 = arith.constant 0 : index
    %841 = vector.load %arg19[%840, %c0_230, %c0_231] : memref<18x2x1xf32, #tpu.memory_space<vmem>>, vector<1x2x1xf32>
    %842 = vector.shape_cast %841 : vector<1x2x1xf32> to vector<2x1xf32>
    %843 = vector.shape_cast %839 : vector<2x1xf32> to vector<1x2x1xf32>
    tpu.vector_store %arg19[%840, %c0_230, %c0_231], %843 {strides = array<i32>} : memref<18x2x1xf32, #tpu.memory_space<vmem>>, vector<1x2x1xf32>,
    %c14_i32 = arith.constant 14 : i32
    %c17_i32_232 = arith.constant 17 : i32
    %844 = arith.subi %c17_i32_232, %c14_i32 : i32
    %c2_i32_233 = arith.constant 2 : i32
    %845 = arith.muli %c14_i32, %c2_i32_233 : i32
    %846 = arith.index_cast %845 : i32 to index
    %c0_234 = arith.constant 0 : index
    %847 = vector.load %arg16[%846, %c0_234] : memref<36x256xf32, #tpu.memory_space<vmem>>, vector<2x256xf32>
    %c2_i32_235 = arith.constant 2 : i32
    %848 = arith.muli %844, %c2_i32_235 : i32
    %849 = arith.index_cast %848 : i32 to index
    %c0_236 = arith.constant 0 : index
    %850 = vector.load %arg17[%849, %c0_236] : memref<36x256xf32, #tpu.memory_space<vmem>>, vector<2x256xf32>
    %cst_237 = arith.constant dense<0.000000e+00> : vector<2x256xf32>
    %851 = tpu.matmul %809, %13, %cst_237 {dimension_numbers = #tpu.dot_dimension_numbers<[1], [0], [0], [1], [0, 0, 1, 1], [], []>} : vector<2x64xf32>, vector<64x256xf32>, vector<2x256xf32> -> vector<2x256xf32>
    %852 = arith.addf %851, %847 : vector<2x256xf32>
    %853 = vector.extract_strided_slice %852 {offsets = [0, 0], sizes = [2, 192], strides = [1, 1]} : vector<2x256xf32> to vector<2x192xf32>
    %854 = arith.negf %853 : vector<2x192xf32>
    %855 = math.exp %854 : vector<2x192xf32>
    %cst_238 = arith.constant 1.000000e+00 : f32
    %856 = vector.broadcast %cst_238 : f32 to vector<2x192xf32>
    %857 = arith.addf %856, %855 : vector<2x192xf32>
    %858 = arith.divf %856, %857 : vector<2x192xf32>
    %859 = vector.extract_strided_slice %852 {offsets = [0, 192], sizes = [2, 64], strides = [1, 1]} : vector<2x256xf32> to vector<2x64xf32>
    %860 = math.tanh %859 : vector<2x64xf32>
    %861 = vector.extract_strided_slice %858 {offsets = [0, 64], sizes = [2, 64], strides = [1, 1]} : vector<2x192xf32> to vector<2x64xf32>
    %862 = arith.mulf %861, %806 : vector<2x64xf32>
    %863 = vector.extract_strided_slice %858 {offsets = [0, 0], sizes = [2, 64], strides = [1, 1]} : vector<2x192xf32> to vector<2x64xf32>
    %864 = arith.mulf %863, %860 : vector<2x64xf32>
    %865 = arith.addf %862, %864 : vector<2x64xf32>
    %866 = vector.extract_strided_slice %858 {offsets = [0, 128], sizes = [2, 64], strides = [1, 1]} : vector<2x192xf32> to vector<2x64xf32>
    %867 = math.tanh %865 : vector<2x64xf32>
    %868 = arith.mulf %866, %867 : vector<2x64xf32>
    %cst_239 = arith.constant dense<0.000000e+00> : vector<2x256xf32>
    %869 = tpu.matmul %827, %14, %cst_239 {dimension_numbers = #tpu.dot_dimension_numbers<[1], [0], [0], [1], [0, 0, 1, 1], [], []>} : vector<2x64xf32>, vector<64x256xf32>, vector<2x256xf32> -> vector<2x256xf32>
    %870 = arith.addf %869, %850 : vector<2x256xf32>
    %871 = vector.extract_strided_slice %870 {offsets = [0, 0], sizes = [2, 192], strides = [1, 1]} : vector<2x256xf32> to vector<2x192xf32>
    %872 = arith.negf %871 : vector<2x192xf32>
    %873 = math.exp %872 : vector<2x192xf32>
    %cst_240 = arith.constant 1.000000e+00 : f32
    %874 = vector.broadcast %cst_240 : f32 to vector<2x192xf32>
    %875 = arith.addf %874, %873 : vector<2x192xf32>
    %876 = arith.divf %874, %875 : vector<2x192xf32>
    %877 = vector.extract_strided_slice %870 {offsets = [0, 192], sizes = [2, 64], strides = [1, 1]} : vector<2x256xf32> to vector<2x64xf32>
    %878 = math.tanh %877 : vector<2x64xf32>
    %879 = vector.extract_strided_slice %876 {offsets = [0, 64], sizes = [2, 64], strides = [1, 1]} : vector<2x192xf32> to vector<2x64xf32>
    %880 = arith.mulf %879, %824 : vector<2x64xf32>
    %881 = vector.extract_strided_slice %876 {offsets = [0, 0], sizes = [2, 64], strides = [1, 1]} : vector<2x192xf32> to vector<2x64xf32>
    %882 = arith.mulf %881, %878 : vector<2x64xf32>
    %883 = arith.addf %880, %882 : vector<2x64xf32>
    %884 = vector.extract_strided_slice %876 {offsets = [0, 128], sizes = [2, 64], strides = [1, 1]} : vector<2x192xf32> to vector<2x64xf32>
    %885 = math.tanh %883 : vector<2x64xf32>
    %886 = arith.mulf %884, %885 : vector<2x64xf32>
    %887 = vector.broadcast %15 : vector<1x64xf32> to vector<2x64xf32>
    %888 = arith.mulf %868, %887 : vector<2x64xf32>
    %cst_241 = arith.constant dense<0.000000e+00> : vector<2xf32>
    %889 = vector.multi_reduction <add>, %888, %cst_241 [1] : vector<2x64xf32> to vector<2xf32>
    %890 = vector.shape_cast %889 : vector<2xf32> to vector<2x1xf32>
    %891 = arith.index_cast %c14_i32 : i32 to index
    %c0_242 = arith.constant 0 : index
    %c0_243 = arith.constant 0 : index
    %892 = vector.load %arg18[%891, %c0_242, %c0_243] : memref<18x2x1xf32, #tpu.memory_space<vmem>>, vector<1x2x1xf32>
    %893 = vector.shape_cast %892 : vector<1x2x1xf32> to vector<2x1xf32>
    %894 = vector.shape_cast %890 : vector<2x1xf32> to vector<1x2x1xf32>
    tpu.vector_store %arg18[%891, %c0_242, %c0_243], %894 {strides = array<i32>} : memref<18x2x1xf32, #tpu.memory_space<vmem>>, vector<1x2x1xf32>,
    %895 = vector.broadcast %16 : vector<1x64xf32> to vector<2x64xf32>
    %896 = arith.mulf %886, %895 : vector<2x64xf32>
    %cst_244 = arith.constant dense<0.000000e+00> : vector<2xf32>
    %897 = vector.multi_reduction <add>, %896, %cst_244 [1] : vector<2x64xf32> to vector<2xf32>
    %898 = vector.shape_cast %897 : vector<2xf32> to vector<2x1xf32>
    %899 = arith.index_cast %844 : i32 to index
    %c0_245 = arith.constant 0 : index
    %c0_246 = arith.constant 0 : index
    %900 = vector.load %arg19[%899, %c0_245, %c0_246] : memref<18x2x1xf32, #tpu.memory_space<vmem>>, vector<1x2x1xf32>
    %901 = vector.shape_cast %900 : vector<1x2x1xf32> to vector<2x1xf32>
    %902 = vector.shape_cast %898 : vector<2x1xf32> to vector<1x2x1xf32>
    tpu.vector_store %arg19[%899, %c0_245, %c0_246], %902 {strides = array<i32>} : memref<18x2x1xf32, #tpu.memory_space<vmem>>, vector<1x2x1xf32>,
    %c15_i32 = arith.constant 15 : i32
    %c17_i32_247 = arith.constant 17 : i32
    %903 = arith.subi %c17_i32_247, %c15_i32 : i32
    %c2_i32_248 = arith.constant 2 : i32
    %904 = arith.muli %c15_i32, %c2_i32_248 : i32
    %905 = arith.index_cast %904 : i32 to index
    %c0_249 = arith.constant 0 : index
    %906 = vector.load %arg16[%905, %c0_249] : memref<36x256xf32, #tpu.memory_space<vmem>>, vector<2x256xf32>
    %c2_i32_250 = arith.constant 2 : i32
    %907 = arith.muli %903, %c2_i32_250 : i32
    %908 = arith.index_cast %907 : i32 to index
    %c0_251 = arith.constant 0 : index
    %909 = vector.load %arg17[%908, %c0_251] : memref<36x256xf32, #tpu.memory_space<vmem>>, vector<2x256xf32>
    %cst_252 = arith.constant dense<0.000000e+00> : vector<2x256xf32>
    %910 = tpu.matmul %868, %13, %cst_252 {dimension_numbers = #tpu.dot_dimension_numbers<[1], [0], [0], [1], [0, 0, 1, 1], [], []>} : vector<2x64xf32>, vector<64x256xf32>, vector<2x256xf32> -> vector<2x256xf32>
    %911 = arith.addf %910, %906 : vector<2x256xf32>
    %912 = vector.extract_strided_slice %911 {offsets = [0, 0], sizes = [2, 192], strides = [1, 1]} : vector<2x256xf32> to vector<2x192xf32>
    %913 = arith.negf %912 : vector<2x192xf32>
    %914 = math.exp %913 : vector<2x192xf32>
    %cst_253 = arith.constant 1.000000e+00 : f32
    %915 = vector.broadcast %cst_253 : f32 to vector<2x192xf32>
    %916 = arith.addf %915, %914 : vector<2x192xf32>
    %917 = arith.divf %915, %916 : vector<2x192xf32>
    %918 = vector.extract_strided_slice %911 {offsets = [0, 192], sizes = [2, 64], strides = [1, 1]} : vector<2x256xf32> to vector<2x64xf32>
    %919 = math.tanh %918 : vector<2x64xf32>
    %920 = vector.extract_strided_slice %917 {offsets = [0, 64], sizes = [2, 64], strides = [1, 1]} : vector<2x192xf32> to vector<2x64xf32>
    %921 = arith.mulf %920, %865 : vector<2x64xf32>
    %922 = vector.extract_strided_slice %917 {offsets = [0, 0], sizes = [2, 64], strides = [1, 1]} : vector<2x192xf32> to vector<2x64xf32>
    %923 = arith.mulf %922, %919 : vector<2x64xf32>
    %924 = arith.addf %921, %923 : vector<2x64xf32>
    %925 = vector.extract_strided_slice %917 {offsets = [0, 128], sizes = [2, 64], strides = [1, 1]} : vector<2x192xf32> to vector<2x64xf32>
    %926 = math.tanh %924 : vector<2x64xf32>
    %927 = arith.mulf %925, %926 : vector<2x64xf32>
    %cst_254 = arith.constant dense<0.000000e+00> : vector<2x256xf32>
    %928 = tpu.matmul %886, %14, %cst_254 {dimension_numbers = #tpu.dot_dimension_numbers<[1], [0], [0], [1], [0, 0, 1, 1], [], []>} : vector<2x64xf32>, vector<64x256xf32>, vector<2x256xf32> -> vector<2x256xf32>
    %929 = arith.addf %928, %909 : vector<2x256xf32>
    %930 = vector.extract_strided_slice %929 {offsets = [0, 0], sizes = [2, 192], strides = [1, 1]} : vector<2x256xf32> to vector<2x192xf32>
    %931 = arith.negf %930 : vector<2x192xf32>
    %932 = math.exp %931 : vector<2x192xf32>
    %cst_255 = arith.constant 1.000000e+00 : f32
    %933 = vector.broadcast %cst_255 : f32 to vector<2x192xf32>
    %934 = arith.addf %933, %932 : vector<2x192xf32>
    %935 = arith.divf %933, %934 : vector<2x192xf32>
    %936 = vector.extract_strided_slice %929 {offsets = [0, 192], sizes = [2, 64], strides = [1, 1]} : vector<2x256xf32> to vector<2x64xf32>
    %937 = math.tanh %936 : vector<2x64xf32>
    %938 = vector.extract_strided_slice %935 {offsets = [0, 64], sizes = [2, 64], strides = [1, 1]} : vector<2x192xf32> to vector<2x64xf32>
    %939 = arith.mulf %938, %883 : vector<2x64xf32>
    %940 = vector.extract_strided_slice %935 {offsets = [0, 0], sizes = [2, 64], strides = [1, 1]} : vector<2x192xf32> to vector<2x64xf32>
    %941 = arith.mulf %940, %937 : vector<2x64xf32>
    %942 = arith.addf %939, %941 : vector<2x64xf32>
    %943 = vector.extract_strided_slice %935 {offsets = [0, 128], sizes = [2, 64], strides = [1, 1]} : vector<2x192xf32> to vector<2x64xf32>
    %944 = math.tanh %942 : vector<2x64xf32>
    %945 = arith.mulf %943, %944 : vector<2x64xf32>
    %946 = vector.broadcast %15 : vector<1x64xf32> to vector<2x64xf32>
    %947 = arith.mulf %927, %946 : vector<2x64xf32>
    %cst_256 = arith.constant dense<0.000000e+00> : vector<2xf32>
    %948 = vector.multi_reduction <add>, %947, %cst_256 [1] : vector<2x64xf32> to vector<2xf32>
    %949 = vector.shape_cast %948 : vector<2xf32> to vector<2x1xf32>
    %950 = arith.index_cast %c15_i32 : i32 to index
    %c0_257 = arith.constant 0 : index
    %c0_258 = arith.constant 0 : index
    %951 = vector.load %arg18[%950, %c0_257, %c0_258] : memref<18x2x1xf32, #tpu.memory_space<vmem>>, vector<1x2x1xf32>
    %952 = vector.shape_cast %951 : vector<1x2x1xf32> to vector<2x1xf32>
    %953 = vector.shape_cast %949 : vector<2x1xf32> to vector<1x2x1xf32>
    tpu.vector_store %arg18[%950, %c0_257, %c0_258], %953 {strides = array<i32>} : memref<18x2x1xf32, #tpu.memory_space<vmem>>, vector<1x2x1xf32>,
    %954 = vector.broadcast %16 : vector<1x64xf32> to vector<2x64xf32>
    %955 = arith.mulf %945, %954 : vector<2x64xf32>
    %cst_259 = arith.constant dense<0.000000e+00> : vector<2xf32>
    %956 = vector.multi_reduction <add>, %955, %cst_259 [1] : vector<2x64xf32> to vector<2xf32>
    %957 = vector.shape_cast %956 : vector<2xf32> to vector<2x1xf32>
    %958 = arith.index_cast %903 : i32 to index
    %c0_260 = arith.constant 0 : index
    %c0_261 = arith.constant 0 : index
    %959 = vector.load %arg19[%958, %c0_260, %c0_261] : memref<18x2x1xf32, #tpu.memory_space<vmem>>, vector<1x2x1xf32>
    %960 = vector.shape_cast %959 : vector<1x2x1xf32> to vector<2x1xf32>
    %961 = vector.shape_cast %957 : vector<2x1xf32> to vector<1x2x1xf32>
    tpu.vector_store %arg19[%958, %c0_260, %c0_261], %961 {strides = array<i32>} : memref<18x2x1xf32, #tpu.memory_space<vmem>>, vector<1x2x1xf32>,
    %c16_i32 = arith.constant 16 : i32
    %c17_i32_262 = arith.constant 17 : i32
    %962 = arith.subi %c17_i32_262, %c16_i32 : i32
    %c2_i32_263 = arith.constant 2 : i32
    %963 = arith.muli %c16_i32, %c2_i32_263 : i32
    %964 = arith.index_cast %963 : i32 to index
    %c0_264 = arith.constant 0 : index
    %965 = vector.load %arg16[%964, %c0_264] : memref<36x256xf32, #tpu.memory_space<vmem>>, vector<2x256xf32>
    %c2_i32_265 = arith.constant 2 : i32
    %966 = arith.muli %962, %c2_i32_265 : i32
    %967 = arith.index_cast %966 : i32 to index
    %c0_266 = arith.constant 0 : index
    %968 = vector.load %arg17[%967, %c0_266] : memref<36x256xf32, #tpu.memory_space<vmem>>, vector<2x256xf32>
    %cst_267 = arith.constant dense<0.000000e+00> : vector<2x256xf32>
    %969 = tpu.matmul %927, %13, %cst_267 {dimension_numbers = #tpu.dot_dimension_numbers<[1], [0], [0], [1], [0, 0, 1, 1], [], []>} : vector<2x64xf32>, vector<64x256xf32>, vector<2x256xf32> -> vector<2x256xf32>
    %970 = arith.addf %969, %965 : vector<2x256xf32>
    %971 = vector.extract_strided_slice %970 {offsets = [0, 0], sizes = [2, 192], strides = [1, 1]} : vector<2x256xf32> to vector<2x192xf32>
    %972 = arith.negf %971 : vector<2x192xf32>
    %973 = math.exp %972 : vector<2x192xf32>
    %cst_268 = arith.constant 1.000000e+00 : f32
    %974 = vector.broadcast %cst_268 : f32 to vector<2x192xf32>
    %975 = arith.addf %974, %973 : vector<2x192xf32>
    %976 = arith.divf %974, %975 : vector<2x192xf32>
    %977 = vector.extract_strided_slice %970 {offsets = [0, 192], sizes = [2, 64], strides = [1, 1]} : vector<2x256xf32> to vector<2x64xf32>
    %978 = math.tanh %977 : vector<2x64xf32>
    %979 = vector.extract_strided_slice %976 {offsets = [0, 64], sizes = [2, 64], strides = [1, 1]} : vector<2x192xf32> to vector<2x64xf32>
    %980 = arith.mulf %979, %924 : vector<2x64xf32>
    %981 = vector.extract_strided_slice %976 {offsets = [0, 0], sizes = [2, 64], strides = [1, 1]} : vector<2x192xf32> to vector<2x64xf32>
    %982 = arith.mulf %981, %978 : vector<2x64xf32>
    %983 = arith.addf %980, %982 : vector<2x64xf32>
    %984 = vector.extract_strided_slice %976 {offsets = [0, 128], sizes = [2, 64], strides = [1, 1]} : vector<2x192xf32> to vector<2x64xf32>
    %985 = math.tanh %983 : vector<2x64xf32>
    %986 = arith.mulf %984, %985 : vector<2x64xf32>
    %cst_269 = arith.constant dense<0.000000e+00> : vector<2x256xf32>
    %987 = tpu.matmul %945, %14, %cst_269 {dimension_numbers = #tpu.dot_dimension_numbers<[1], [0], [0], [1], [0, 0, 1, 1], [], []>} : vector<2x64xf32>, vector<64x256xf32>, vector<2x256xf32> -> vector<2x256xf32>
    %988 = arith.addf %987, %968 : vector<2x256xf32>
    %989 = vector.extract_strided_slice %988 {offsets = [0, 0], sizes = [2, 192], strides = [1, 1]} : vector<2x256xf32> to vector<2x192xf32>
    %990 = arith.negf %989 : vector<2x192xf32>
    %991 = math.exp %990 : vector<2x192xf32>
    %cst_270 = arith.constant 1.000000e+00 : f32
    %992 = vector.broadcast %cst_270 : f32 to vector<2x192xf32>
    %993 = arith.addf %992, %991 : vector<2x192xf32>
    %994 = arith.divf %992, %993 : vector<2x192xf32>
    %995 = vector.extract_strided_slice %988 {offsets = [0, 192], sizes = [2, 64], strides = [1, 1]} : vector<2x256xf32> to vector<2x64xf32>
    %996 = math.tanh %995 : vector<2x64xf32>
    %997 = vector.extract_strided_slice %994 {offsets = [0, 64], sizes = [2, 64], strides = [1, 1]} : vector<2x192xf32> to vector<2x64xf32>
    %998 = arith.mulf %997, %942 : vector<2x64xf32>
    %999 = vector.extract_strided_slice %994 {offsets = [0, 0], sizes = [2, 64], strides = [1, 1]} : vector<2x192xf32> to vector<2x64xf32>
    %1000 = arith.mulf %999, %996 : vector<2x64xf32>
    %1001 = arith.addf %998, %1000 : vector<2x64xf32>
    %1002 = vector.extract_strided_slice %994 {offsets = [0, 128], sizes = [2, 64], strides = [1, 1]} : vector<2x192xf32> to vector<2x64xf32>
    %1003 = math.tanh %1001 : vector<2x64xf32>
    %1004 = arith.mulf %1002, %1003 : vector<2x64xf32>
    %1005 = vector.broadcast %15 : vector<1x64xf32> to vector<2x64xf32>
    %1006 = arith.mulf %986, %1005 : vector<2x64xf32>
    %cst_271 = arith.constant dense<0.000000e+00> : vector<2xf32>
    %1007 = vector.multi_reduction <add>, %1006, %cst_271 [1] : vector<2x64xf32> to vector<2xf32>
    %1008 = vector.shape_cast %1007 : vector<2xf32> to vector<2x1xf32>
    %1009 = arith.index_cast %c16_i32 : i32 to index
    %c0_272 = arith.constant 0 : index
    %c0_273 = arith.constant 0 : index
    %1010 = vector.load %arg18[%1009, %c0_272, %c0_273] : memref<18x2x1xf32, #tpu.memory_space<vmem>>, vector<1x2x1xf32>
    %1011 = vector.shape_cast %1010 : vector<1x2x1xf32> to vector<2x1xf32>
    %1012 = vector.shape_cast %1008 : vector<2x1xf32> to vector<1x2x1xf32>
    tpu.vector_store %arg18[%1009, %c0_272, %c0_273], %1012 {strides = array<i32>} : memref<18x2x1xf32, #tpu.memory_space<vmem>>, vector<1x2x1xf32>,
    %1013 = vector.broadcast %16 : vector<1x64xf32> to vector<2x64xf32>
    %1014 = arith.mulf %1004, %1013 : vector<2x64xf32>
    %cst_274 = arith.constant dense<0.000000e+00> : vector<2xf32>
    %1015 = vector.multi_reduction <add>, %1014, %cst_274 [1] : vector<2x64xf32> to vector<2xf32>
    %1016 = vector.shape_cast %1015 : vector<2xf32> to vector<2x1xf32>
    %1017 = arith.index_cast %962 : i32 to index
    %c0_275 = arith.constant 0 : index
    %c0_276 = arith.constant 0 : index
    %1018 = vector.load %arg19[%1017, %c0_275, %c0_276] : memref<18x2x1xf32, #tpu.memory_space<vmem>>, vector<1x2x1xf32>
    %1019 = vector.shape_cast %1018 : vector<1x2x1xf32> to vector<2x1xf32>
    %1020 = vector.shape_cast %1016 : vector<2x1xf32> to vector<1x2x1xf32>
    tpu.vector_store %arg19[%1017, %c0_275, %c0_276], %1020 {strides = array<i32>} : memref<18x2x1xf32, #tpu.memory_space<vmem>>, vector<1x2x1xf32>,
    %c17_i32_277 = arith.constant 17 : i32
    %c17_i32_278 = arith.constant 17 : i32
    %1021 = arith.subi %c17_i32_278, %c17_i32_277 : i32
    %c2_i32_279 = arith.constant 2 : i32
    %1022 = arith.muli %c17_i32_277, %c2_i32_279 : i32
    %1023 = arith.index_cast %1022 : i32 to index
    %c0_280 = arith.constant 0 : index
    %1024 = vector.load %arg16[%1023, %c0_280] : memref<36x256xf32, #tpu.memory_space<vmem>>, vector<2x256xf32>
    %c2_i32_281 = arith.constant 2 : i32
    %1025 = arith.muli %1021, %c2_i32_281 : i32
    %1026 = arith.index_cast %1025 : i32 to index
    %c0_282 = arith.constant 0 : index
    %1027 = vector.load %arg17[%1026, %c0_282] : memref<36x256xf32, #tpu.memory_space<vmem>>, vector<2x256xf32>
    %cst_283 = arith.constant dense<0.000000e+00> : vector<2x256xf32>
    %1028 = tpu.matmul %986, %13, %cst_283 {dimension_numbers = #tpu.dot_dimension_numbers<[1], [0], [0], [1], [0, 0, 1, 1], [], []>} : vector<2x64xf32>, vector<64x256xf32>, vector<2x256xf32> -> vector<2x256xf32>
    %1029 = arith.addf %1028, %1024 : vector<2x256xf32>
    %1030 = vector.extract_strided_slice %1029 {offsets = [0, 0], sizes = [2, 192], strides = [1, 1]} : vector<2x256xf32> to vector<2x192xf32>
    %1031 = arith.negf %1030 : vector<2x192xf32>
    %1032 = math.exp %1031 : vector<2x192xf32>
    %cst_284 = arith.constant 1.000000e+00 : f32
    %1033 = vector.broadcast %cst_284 : f32 to vector<2x192xf32>
    %1034 = arith.addf %1033, %1032 : vector<2x192xf32>
    %1035 = arith.divf %1033, %1034 : vector<2x192xf32>
    %1036 = vector.extract_strided_slice %1029 {offsets = [0, 192], sizes = [2, 64], strides = [1, 1]} : vector<2x256xf32> to vector<2x64xf32>
    %1037 = math.tanh %1036 : vector<2x64xf32>
    %1038 = vector.extract_strided_slice %1035 {offsets = [0, 64], sizes = [2, 64], strides = [1, 1]} : vector<2x192xf32> to vector<2x64xf32>
    %1039 = arith.mulf %1038, %983 : vector<2x64xf32>
    %1040 = vector.extract_strided_slice %1035 {offsets = [0, 0], sizes = [2, 64], strides = [1, 1]} : vector<2x192xf32> to vector<2x64xf32>
    %1041 = arith.mulf %1040, %1037 : vector<2x64xf32>
    %1042 = arith.addf %1039, %1041 : vector<2x64xf32>
    %1043 = vector.extract_strided_slice %1035 {offsets = [0, 128], sizes = [2, 64], strides = [1, 1]} : vector<2x192xf32> to vector<2x64xf32>
    %1044 = math.tanh %1042 : vector<2x64xf32>
    %1045 = arith.mulf %1043, %1044 : vector<2x64xf32>
    %cst_285 = arith.constant dense<0.000000e+00> : vector<2x256xf32>
    %1046 = tpu.matmul %1004, %14, %cst_285 {dimension_numbers = #tpu.dot_dimension_numbers<[1], [0], [0], [1], [0, 0, 1, 1], [], []>} : vector<2x64xf32>, vector<64x256xf32>, vector<2x256xf32> -> vector<2x256xf32>
    %1047 = arith.addf %1046, %1027 : vector<2x256xf32>
    %1048 = vector.extract_strided_slice %1047 {offsets = [0, 0], sizes = [2, 192], strides = [1, 1]} : vector<2x256xf32> to vector<2x192xf32>
    %1049 = arith.negf %1048 : vector<2x192xf32>
    %1050 = math.exp %1049 : vector<2x192xf32>
    %cst_286 = arith.constant 1.000000e+00 : f32
    %1051 = vector.broadcast %cst_286 : f32 to vector<2x192xf32>
    %1052 = arith.addf %1051, %1050 : vector<2x192xf32>
    %1053 = arith.divf %1051, %1052 : vector<2x192xf32>
    %1054 = vector.extract_strided_slice %1047 {offsets = [0, 192], sizes = [2, 64], strides = [1, 1]} : vector<2x256xf32> to vector<2x64xf32>
    %1055 = math.tanh %1054 : vector<2x64xf32>
    %1056 = vector.extract_strided_slice %1053 {offsets = [0, 64], sizes = [2, 64], strides = [1, 1]} : vector<2x192xf32> to vector<2x64xf32>
    %1057 = arith.mulf %1056, %1001 : vector<2x64xf32>
    %1058 = vector.extract_strided_slice %1053 {offsets = [0, 0], sizes = [2, 64], strides = [1, 1]} : vector<2x192xf32> to vector<2x64xf32>
    %1059 = arith.mulf %1058, %1055 : vector<2x64xf32>
    %1060 = arith.addf %1057, %1059 : vector<2x64xf32>
    %1061 = vector.extract_strided_slice %1053 {offsets = [0, 128], sizes = [2, 64], strides = [1, 1]} : vector<2x192xf32> to vector<2x64xf32>
    %1062 = math.tanh %1060 : vector<2x64xf32>
    %1063 = arith.mulf %1061, %1062 : vector<2x64xf32>
    %1064 = vector.broadcast %15 : vector<1x64xf32> to vector<2x64xf32>
    %1065 = arith.mulf %1045, %1064 : vector<2x64xf32>
    %cst_287 = arith.constant dense<0.000000e+00> : vector<2xf32>
    %1066 = vector.multi_reduction <add>, %1065, %cst_287 [1] : vector<2x64xf32> to vector<2xf32>
    %1067 = vector.shape_cast %1066 : vector<2xf32> to vector<2x1xf32>
    %1068 = arith.index_cast %c17_i32_277 : i32 to index
    %c0_288 = arith.constant 0 : index
    %c0_289 = arith.constant 0 : index
    %1069 = vector.load %arg18[%1068, %c0_288, %c0_289] : memref<18x2x1xf32, #tpu.memory_space<vmem>>, vector<1x2x1xf32>
    %1070 = vector.shape_cast %1069 : vector<1x2x1xf32> to vector<2x1xf32>
    %1071 = vector.shape_cast %1067 : vector<2x1xf32> to vector<1x2x1xf32>
    tpu.vector_store %arg18[%1068, %c0_288, %c0_289], %1071 {strides = array<i32>} : memref<18x2x1xf32, #tpu.memory_space<vmem>>, vector<1x2x1xf32>,
    %1072 = vector.broadcast %16 : vector<1x64xf32> to vector<2x64xf32>
    %1073 = arith.mulf %1063, %1072 : vector<2x64xf32>
    %cst_290 = arith.constant dense<0.000000e+00> : vector<2xf32>
    %1074 = vector.multi_reduction <add>, %1073, %cst_290 [1] : vector<2x64xf32> to vector<2xf32>
    %1075 = vector.shape_cast %1074 : vector<2xf32> to vector<2x1xf32>
    %1076 = arith.index_cast %1021 : i32 to index
    %c0_291 = arith.constant 0 : index
    %c0_292 = arith.constant 0 : index
    %1077 = vector.load %arg19[%1076, %c0_291, %c0_292] : memref<18x2x1xf32, #tpu.memory_space<vmem>>, vector<1x2x1xf32>
    %1078 = vector.shape_cast %1077 : vector<1x2x1xf32> to vector<2x1xf32>
    %1079 = vector.shape_cast %1075 : vector<2x1xf32> to vector<1x2x1xf32>
    tpu.vector_store %arg19[%1076, %c0_291, %c0_292], %1079 {strides = array<i32>} : memref<18x2x1xf32, #tpu.memory_space<vmem>>, vector<1x2x1xf32>,
    %c18_i32 = arith.constant 18 : i32
    %c0_293 = arith.constant 0 : index
    %c0_294 = arith.constant 0 : index
    %c0_295 = arith.constant 0 : index
    %1080 = vector.load %arg18[%c0_293, %c0_294, %c0_295] : memref<18x2x1xf32, #tpu.memory_space<vmem>>, vector<18x2x1xf32>
    %c0_296 = arith.constant 0 : index
    %c0_297 = arith.constant 0 : index
    %c0_298 = arith.constant 0 : index
    %1081 = vector.load %arg19[%c0_296, %c0_297, %c0_298] : memref<18x2x1xf32, #tpu.memory_space<vmem>>, vector<18x2x1xf32>
    %1082 = arith.addf %1080, %1081 : vector<18x2x1xf32>
    %cst_299 = arith.constant dense<0.000000e+00> : vector<18x2xf32>
    %1083 = vector.multi_reduction <add>, %1082, %cst_299 [2] : vector<18x2x1xf32> to vector<18x2xf32>
    %c0_300 = arith.constant 0 : index
    %c0_301 = arith.constant 0 : index
    %1084 = vector.load %arg10[%c0_300, %c0_301] : memref<1x1xf32, #tpu.memory_space<vmem>>, vector<1x1xf32>
    %1085 = vector.extract %1084[0, 0] : f32 from vector<1x1xf32>
    %1086 = vector.broadcast %1085 : f32 to vector<18x2xf32>
    %1087 = arith.addf %1083, %1086 : vector<18x2xf32>
    %1088 = math.tanh %1087 : vector<18x2xf32>
    %c0_302 = arith.constant 0 : index
    %c0_303 = arith.constant 0 : index
    %1089 = vector.load %arg11[%c0_302, %c0_303] : memref<128x18xf32, #tpu.memory_space<vmem>>, vector<128x18xf32>
    %cst_304 = arith.constant dense<0.000000e+00> : vector<128x2xf32>
    %1090 = tpu.matmul %1089, %1088, %cst_304 {dimension_numbers = #tpu.dot_dimension_numbers<[1], [0], [0], [1], [0, 0, 1, 1], [], []>} : vector<128x18xf32>, vector<18x2xf32>, vector<128x2xf32> -> vector<128x2xf32>
    %c0_305 = arith.constant 0 : index
    %c0_306 = arith.constant 0 : index
    %1091 = vector.load %arg12[%c0_305, %c0_306] : memref<128x1xf32, #tpu.memory_space<vmem>>, vector<128x1xf32>
    %1092 = vector.broadcast %1091 : vector<128x1xf32> to vector<128x2xf32>
    %1093 = arith.addf %1090, %1092 : vector<128x2xf32>
    %1094 = math.tanh %1093 : vector<128x2xf32>
    %c0_307 = arith.constant 0 : index
    %c0_308 = arith.constant 0 : index
    %1095 = vector.load %arg13[%c0_307, %c0_308] : memref<1x128xf32, #tpu.memory_space<vmem>>, vector<1x128xf32>
    %cst_309 = arith.constant dense<0.000000e+00> : vector<1x2xf32>
    %1096 = tpu.matmul %1095, %1094, %cst_309 {dimension_numbers = #tpu.dot_dimension_numbers<[1], [0], [0], [1], [0, 0, 1, 1], [], []>} : vector<1x128xf32>, vector<128x2xf32>, vector<1x2xf32> -> vector<1x2xf32>
    %c0_310 = arith.constant 0 : index
    %c0_311 = arith.constant 0 : index
    %1097 = vector.load %arg14[%c0_310, %c0_311] : memref<1x1xf32, #tpu.memory_space<vmem>>, vector<1x1xf32>
    %1098 = vector.broadcast %1097 : vector<1x1xf32> to vector<1x2xf32>
    %1099 = arith.addf %1096, %1098 : vector<1x2xf32>
    %1100 = math.tanh %1099 : vector<1x2xf32>
    %c0_312 = arith.constant 0 : index
    %c0_313 = arith.constant 0 : index
    %1101 = vector.load %arg15[%c0_312, %c0_313] : memref<1x2xf32, #tpu.memory_space<vmem>>, vector<1x2xf32>
    tpu.vector_store %arg15[%c0_312, %c0_313], %1100 {strides = array<i32>} : memref<1x2xf32, #tpu.memory_space<vmem>>, vector<1x2xf32>,
    return
  }
  func.func @transform_0(%arg0: i32) -> (i32, i32) {
    %c0_i32 = arith.constant 0 : i32
    %c0_i32_0 = arith.constant 0 : i32
    %c0_i32_1 = arith.constant 0 : i32
    return %c0_i32, %c0_i32_0 : i32, i32
  }
  func.func @transform_1(%arg0: i32) -> (i32, i32) {
    %c0_i32 = arith.constant 0 : i32
    %c0_i32_0 = arith.constant 0 : i32
    %c0_i32_1 = arith.constant 0 : i32
    return %c0_i32, %c0_i32_0 : i32, i32
  }
  func.func @transform_2(%arg0: i32) -> (i32, i32) {
    %c0_i32 = arith.constant 0 : i32
    %c0_i32_0 = arith.constant 0 : i32
    %c0_i32_1 = arith.constant 0 : i32
    return %c0_i32, %c0_i32_0 : i32, i32
  }
  func.func @transform_3(%arg0: i32) -> (i32, i32) {
    %c0_i32 = arith.constant 0 : i32
    %c0_i32_0 = arith.constant 0 : i32
    %c0_i32_1 = arith.constant 0 : i32
    return %c0_i32, %c0_i32_0 : i32, i32
  }
  func.func @transform_4(%arg0: i32) -> (i32, i32) {
    %c0_i32 = arith.constant 0 : i32
    %c0_i32_0 = arith.constant 0 : i32
    %c0_i32_1 = arith.constant 0 : i32
    return %c0_i32, %c0_i32_0 : i32, i32
  }
  func.func @transform_5(%arg0: i32) -> (i32, i32) {
    %c0_i32 = arith.constant 0 : i32
    %c0_i32_0 = arith.constant 0 : i32
    %c0_i32_1 = arith.constant 0 : i32
    return %c0_i32, %c0_i32_0 : i32, i32
  }
  func.func @transform_6(%arg0: i32) -> (i32, i32) {
    %c0_i32 = arith.constant 0 : i32
    %c0_i32_0 = arith.constant 0 : i32
    %c0_i32_1 = arith.constant 0 : i32
    return %c0_i32, %c0_i32_0 : i32, i32
  }
  func.func @transform_7(%arg0: i32) -> (i32, i32) {
    %c0_i32 = arith.constant 0 : i32
    %c0_i32_0 = arith.constant 0 : i32
    %c0_i32_1 = arith.constant 0 : i32
    return %c0_i32, %c0_i32_0 : i32, i32
  }
  func.func @transform_8(%arg0: i32) -> (i32, i32) {
    %c0_i32 = arith.constant 0 : i32
    %c0_i32_0 = arith.constant 0 : i32
    %c0_i32_1 = arith.constant 0 : i32
    return %c0_i32, %c0_i32_0 : i32, i32
  }
  func.func @transform_9(%arg0: i32) -> (i32, i32) {
    %c0_i32 = arith.constant 0 : i32
    %c0_i32_0 = arith.constant 0 : i32
    %c0_i32_1 = arith.constant 0 : i32
    return %c0_i32, %c0_i32_0 : i32, i32
  }
  func.func @transform_10(%arg0: i32) -> (i32, i32) {
    %c0_i32 = arith.constant 0 : i32
    %c0_i32_0 = arith.constant 0 : i32
    %c0_i32_1 = arith.constant 0 : i32
    return %c0_i32, %c0_i32_0 : i32, i32
  }
  func.func @transform_11(%arg0: i32) -> (i32, i32) {
    %c0_i32 = arith.constant 0 : i32
    %c0_i32_0 = arith.constant 0 : i32
    %c0_i32_1 = arith.constant 0 : i32
    return %c0_i32, %c0_i32_0 : i32, i32
  }
  func.func @transform_12(%arg0: i32) -> (i32, i32) {
    %c0_i32 = arith.constant 0 : i32
    %c0_i32_0 = arith.constant 0 : i32
    %c0_i32_1 = arith.constant 0 : i32
    return %c0_i32, %c0_i32_0 : i32, i32
  }
  func.func @transform_13(%arg0: i32) -> (i32, i32) {
    %c0_i32 = arith.constant 0 : i32
    %c0_i32_0 = arith.constant 0 : i32
    %c0_i32_1 = arith.constant 0 : i32
    return %c0_i32, %c0_i32_0 : i32, i32
  }
  func.func @transform_14(%arg0: i32) -> (i32, i32) {
    %c0_i32 = arith.constant 0 : i32
    %c0_i32_0 = arith.constant 0 : i32
    %c0_i32_1 = arith.constant 0 : i32
    return %c0_i32, %c0_i32_0 : i32, i32
  }
}

</mosaic_0001>

<bundles_post_ra>
// kernel: lstm_pallas.1
= control target key start
LH: loop header
LB: loop body
LE: loop exit
PB: predicated region body
PF: predicated region fallthrough
CT: control target
= control target key end

     0   :  { %s8084_s0 = inlined_call_operand.vmem [shape: f32[36,24], index: 0, kind: input, shape index: {}]   ;;  %s8085_s1 = inlined_call_operand.vmem [shape: f32[24,256], index: 1, kind: input, shape index: {}]   ;;  %s8086_s2 = inlined_call_operand.vmem [shape: f32[64,256], index: 2, kind: input, shape index: {}]   ;;  %s8087_s3 = inlined_call_operand.vmem [shape: f32[1,256], index: 3, kind: input, shape index: {}]   ;;  %s8088_s4 = inlined_call_operand.vmem [shape: f32[24,256], index: 4, kind: input, shape index: {}]   ;;  %s8089_s5 = inlined_call_operand.vmem [shape: f32[64,256], index: 5, kind: input, shape index: {}]   ;;  %s8090_s6 = inlined_call_operand.vmem [shape: f32[1,256], index: 6, kind: input, shape index: {}]   ;;  %s8091_s7 = inlined_call_operand.vmem [shape: f32[1,64], index: 7, kind: input, shape index: {}]   ;;  %s8092_s8 = inlined_call_operand.vmem [shape: f32[1,64], index: 8, kind: input, shape index: {}]   ;;  %s8093_s9 = inlined_call_operand.<no memory space> [shape: f32[1,1], index: 9, kind: input, shape index: {}]   ;;  %s8094_s10 = inlined_call_operand.vmem [shape: f32[128,18], index: 10, kind: input, shape index: {}]   ;;  %s8095_s11 = inlined_call_operand.vmem [shape: f32[128,1], index: 11, kind: input, shape index: {}]   ;;  %s8096_s12 = inlined_call_operand.vmem [shape: f32[1,128], index: 12, kind: input, shape index: {}]   ;;  %s8097_s14 = inlined_call_operand.hbm [shape: f32[1,2], index: 14, kind: output, shape index: {}]   ;;  %s8098_s13 = inlined_call_operand.<no memory space> [shape: f32[1,1], index: 13, kind: input, shape index: {}]  }
   0x1   :  { %v19_v0 = vstv %s8093_s9  ;;  %v21_v1 = vstv %s8098_s13 }
   0x2   :  { %20 = vst [vmem:[#allocation6] sm:$0x1] %v19_v0 }
   0x3   :  { %22 = vst [vmem:[#allocation7] sm:$0x1] %v21_v1 }
   0x4   :  { %v164_v2 = vld [vmem:[%s8088_s4 + $0x28] sm:$0xff]  ;;  %v162_v3 = vld [vmem:[%s8088_s4 + $0x18] sm:$0xff]  ;;  %v5790_v5 = vld [vmem:[%s8084_s0] sm:$0xff]  ;;  %vm69_vm0 = vcmask 195584  }
   0x5   :  { %216 = vmatpush.msra.mxu3 %v164_v2  ;;  %v160_v4 = vld [vmem:[%s8088_s4 + $0x8] sm:$0xff]  ;;  %v5795_v6 = vld [vmem:[%s8089_s5 + $0x78] sm:$0xff] }
   0x7   :  { %217 = vmatpush.msra.mxu3 %v162_v3 }
   0x9   :  { %218 = vmatpush.msra.mxu3 %v160_v4 }
   0xa   :  { %23 = vsyncpa [#allocation9], 0  ;;  %4825 = vmatmul.msk.f32.vlgmr.msra.gmra.mxu3 %vm69_vm0, %v5790_v5  ;;  %v5802_v7 = vld [vmem:[%s8089_s5 + $0x68] sm:$0xff]  ;;  %v5808_v8 = vld [vmem:[%s8089_s5 + $0x58] sm:$0xff]  ;;  %v5693_v29 = vmov 0.0   ;;  %s5694_s9 = smov 64  }
   0xb   :  { %417 = vmatpush.msrb.mxu3 %v5795_v6  ;;  %v5814_v9 = vld [vmem:[%s8089_s5 + $0x48] sm:$0xff]  ;;  %v5825_v11 = vld [vmem:[%s8089_s5 + $0x38] sm:$0xff]  ;;  %v163_v13 = vld [vmem:[%s8088_s4 + $0x20] sm:$0xff]  ;;  %vm283_vm11 = vcmask 523264   ;;  %s5696_s26 = smov [#allocation8]  }
   0xc   :  { %v5819_v10 = vld [vmem:[%s8084_s0 + $0x8] sm:$0xff]  ;;  %v161_v14 = vld [vmem:[%s8088_s4 + $0x10] sm:$0xff]  ;;  %184 = vmatpush.msra.mxu2 %v163_v13  ;;  %v5845_v15 = vld [vmem:[%s8089_s5 + $0x18] sm:$0xff] }
   0xd   :  { %418 = vmatpush.msrb.mxu3 %v5802_v7  ;;  %v5833_v12 = vld [vmem:[%s8089_s5 + $0x28] sm:$0xff]  ;;  %v159_v16 = vld [vmem:[%s8088_s4] sm:$0xff]  ;;  %v5859_v18 = vld [vmem:[%s8089_s5 + $0x70] sm:$0xff] }
   0xe   :  { %185 = vmatpush.msra.mxu2 %v161_v14  ;;  %v5854_v17 = vld [vmem:[%s8089_s5 + $0x8] sm:$0xff]  ;;  %v5864_v19 = vld [vmem:[%s8084_s0 + $0x10] sm:$0xff]  ;;  %v5872_v20 = vld [vmem:[%s8089_s5 + $0x60] sm:$0xff] }
   0xf   :  { %419 = vmatpush.msrb.mxu3 %v5808_v8  ;;  %v5881_v21 = vld [vmem:[%s8089_s5 + $0x50] sm:$0xff]  ;;  %v5888_v22 = vld [vmem:[%s8089_s5 + $0x40] sm:$0xff]  ;;  %v5900_v24 = vld [vmem:[%s8084_s0 + $0x18] sm:$0xff] }
  0x10   :  { %186 = vmatpush.msra.mxu2 %v159_v16  ;;  %v5895_v23 = vld [vmem:[%s8089_s5 + $0x30] sm:$0xff]  ;;  %v5909_v25 = vld [vmem:[%s8089_s5 + $0x20] sm:$0xff]  ;;  %v62_v43 = vld [vmem:[%s8085_s1 + $0x28] sm:$0xff] }
  0x11   :  { %420 = vmatpush.msrb.mxu3 %v5814_v9  ;;  %4820 = vmatmul.msk.f32.vlgmr.msra.gmra.mxu2 %vm69_vm0, %v5790_v5  ;;  %v5918_v26 = vld [vmem:[%s8089_s5 + $0x10] sm:$0xff]  ;;  %v5925_v27 = vld [vmem:[%s8089_s5] sm:$0xff]  ;;  %v60_v44 = vld [vmem:[%s8085_s1 + $0x18] sm:$0xff] }
  0x12   :  { %4826 = vmatmul.msk.f32.gmra.mxu3 %vm69_vm0, %v5819_v10  ;;  %397 = vmatpush.msrb.mxu2 %v5859_v18  ;;  %v5932_v28 = vld [vmem:[%s8084_s0 + $0x20] sm:$0xf]  ;;  %v58_v57 = vld [vmem:[%s8085_s1 + $0x8] sm:$0xff]  ;;  %v5989_v58 = vld [vmem:[%s8086_s2 + $0x78] sm:$0xff] }
  0x13   :  { %421 = vmatpush.msrb.mxu3 %v5825_v11  ;;  %v165_v30 = vld [vmem:[%s8090_s6] sm:$0x3]  ;;  %130 = vmatpush.msra.mxu1 %v62_v43  ;;  %v5997_v60 = vld [vmem:[%s8086_s2 + $0x68] sm:$0xff]  ;;  %v6003_v61 = vld [vmem:[%s8086_s2 + $0x58] sm:$0xff] }
  0x14   :  { %398 = vmatpush.msrb.mxu2 %v5872_v20  ;;  %v168_v31 = vperm.slane %v165_v30, 1  ;;  %v167_v40 = vperm.slane %v165_v30, 0  ;;  %v6009_v63 = vld [vmem:[%s8086_s2 + $0x48] sm:$0xff]  ;;  %v6015_v1 = vld [vmem:[%s8086_s2 + $0x38] sm:$0xff] }
  0x15   :  { %422 = vmatpush.msrb.mxu3 %v5833_v12  ;;  %131 = vmatpush.msra.mxu1 %v60_v44  ;;  %v6023_v2 = vld [vmem:[%s8086_s2 + $0x28] sm:$0xff]  ;;  %v6029_v3 = vld [vmem:[%s8086_s2 + $0x18] sm:$0xff]  ;;  %v6107_v44 = vld [vmem:[%s8086_s2 + $0x20] sm:$0xff] }
  0x16   :  { %399 = vmatpush.msrb.mxu2 %v5881_v21  ;;  %v6035_v4 = vld [vmem:[%s8086_s2 + $0x8] sm:$0xff] }
  0x17   :  { %423 = vmatpush.msrb.mxu3 %v5845_v15  ;;  %132 = vmatpush.msra.mxu1 %v58_v57 }
  0x18   :  { %400 = vmatpush.msrb.mxu2 %v5888_v22  ;;  %4815 = vmatmul.msk.f32.vlgmr.msra.gmra.mxu1 %vm69_vm0, %v5790_v5 }
  0x19   :  { %424 = vmatpush.msrb.mxu3 %v5854_v17  ;;  %4821 = vmatmul.msk.f32.gmra.mxu2 %vm69_vm0, %v5819_v10 }
  0x1a   :  { %4827 = vmatmul.msk.f32.gmra.mxu3 %vm69_vm0, %v5864_v19  ;;  %401 = vmatpush.msrb.mxu2 %v5895_v23 }
  0x1b   :  { %644 = vmatpush.msra.mxu3 %v5795_v6  ;;  %315 = vmatpush.msrb.mxu1 %v5989_v58 }
  0x1c   :  { %402 = vmatpush.msrb.mxu2 %v5909_v25 }
  0x1d   :  { %645 = vmatpush.msra.mxu3 %v5802_v7  ;;  %316 = vmatpush.msrb.mxu1 %v5997_v60 }
  0x1e   :  { %403 = vmatpush.msrb.mxu2 %v5918_v26 }
  0x1f   :  { %646 = vmatpush.msra.mxu3 %v5808_v8  ;;  %317 = vmatpush.msrb.mxu1 %v6003_v61 }
  0x20   :  { %404 = vmatpush.msrb.mxu2 %v5925_v27  ;;  %4816 = vmatmul.msk.f32.gmra.mxu1 %vm69_vm0, %v5819_v10 }
  0x21   :  { %647 = vmatpush.msra.mxu3 %v5814_v9  ;;  %4822 = vmatmul.msk.f32.gmra.mxu2 %vm69_vm0, %v5864_v19 }
  0x22   :  { %4828 = vmatmul.msk.f32.gmra.mxu3 %vm69_vm0, %v5900_v24  ;;  %624 = vmatpush.msra.mxu2 %v5859_v18 }
  0x23   :  { %648 = vmatpush.msra.mxu3 %v5825_v11  ;;  %318 = vmatpush.msrb.mxu1 %v6009_v63 }
  0x24   :  { %625 = vmatpush.msra.mxu2 %v5872_v20 }
  0x25   :  { %649 = vmatpush.msra.mxu3 %v5833_v12  ;;  %319 = vmatpush.msrb.mxu1 %v6015_v1 }
  0x26   :  { %626 = vmatpush.msra.mxu2 %v5881_v21 }
  0x27   :  { %650 = vmatpush.msra.mxu3 %v5845_v15  ;;  %320 = vmatpush.msrb.mxu1 %v6023_v2 }
  0x28   :  { %627 = vmatpush.msra.mxu2 %v5888_v22  ;;  %4817 = vmatmul.msk.f32.gmra.mxu1 %vm69_vm0, %v5864_v19 }
  0x29   :  { %651 = vmatpush.msra.mxu3 %v5854_v17  ;;  %4823 = vmatmul.msk.f32.gmra.mxu2 %vm69_vm0, %v5900_v24 }
  0x2a   :  { %4829 = vmatmul.msk.f32.gmra.mxu3 %vm69_vm0, %v5932_v28  ;;  %628 = vmatpush.msra.mxu2 %v5895_v23 }
  0x2b   :  { %321 = vmatpush.msrb.mxu1 %v6029_v3 }
  0x2c   :  { %629 = vmatpush.msra.mxu2 %v5909_v25 }
  0x2d   :  { %322 = vmatpush.msrb.mxu1 %v6035_v4 }
  0x2e   :  { %630 = vmatpush.msra.mxu2 %v5918_v26 }
  0x2f   :  { %545 = vmatpush.msra.mxu1 %v5989_v58 }
  0x30   :  { %631 = vmatpush.msra.mxu2 %v5925_v27  ;;  %4818 = vmatmul.msk.f32.gmra.mxu1 %vm69_vm0, %v5900_v24 }
  0x31   :  { %4824 = vmatmul.msk.f32.gmra.mxu2 %vm69_vm0, %v5932_v28  ;;  %546 = vmatpush.msra.mxu1 %v5997_v60 }
  0x32   :  { %425 = vmatmul.f32.vlgmr.msrb.gmra.mxu3 %v5693_v29 }
  0x33   :  { %870 = vmatpush.msrb.mxu3 %v5795_v6  ;;  %547 = vmatpush.msra.mxu1 %v6003_v61 }
  0x35   :  { %871 = vmatpush.msrb.mxu3 %v5802_v7  ;;  %548 = vmatpush.msra.mxu1 %v6009_v63 }
  0x37   :  { %872 = vmatpush.msrb.mxu3 %v5808_v8  ;;  %549 = vmatpush.msra.mxu1 %v6015_v1 }
  0x38   :  { %4819 = vmatmul.msk.f32.gmra.mxu1 %vm69_vm0, %v5932_v28 }
  0x39   :  { %873 = vmatpush.msrb.mxu3 %v5814_v9  ;;  %405 = vmatmul.f32.vlgmr.msrb.gmra.mxu2 %v5693_v29 }
  0x3a   :  { %850 = vmatpush.msrb.mxu2 %v5859_v18  ;;  %550 = vmatpush.msra.mxu1 %v6023_v2 }
  0x3b   :  { %874 = vmatpush.msrb.mxu3 %v5825_v11 }
  0x3c   :  { %851 = vmatpush.msrb.mxu2 %v5872_v20  ;;  %551 = vmatpush.msra.mxu1 %v6029_v3 }
  0x3d   :  { %875 = vmatpush.msrb.mxu3 %v5833_v12 }
  0x3e   :  { %852 = vmatpush.msrb.mxu2 %v5881_v21  ;;  %552 = vmatpush.msra.mxu1 %v6035_v4 }
  0x3f   :  { %876 = vmatpush.msrb.mxu3 %v5845_v15 }
  0x40   :  { %853 = vmatpush.msrb.mxu2 %v5888_v22  ;;  %323 = vmatmul.f32.vlgmr.msrb.gmra.mxu1 %v5693_v29 }
  0x41   :  { %877 = vmatpush.msrb.mxu3 %v5854_v17  ;;  %765 = vmatpush.msrb.mxu1 %v5989_v58 }
  0x42   :  { %854 = vmatpush.msrb.mxu2 %v5895_v23 }
  0x43   :  { %766 = vmatpush.msrb.mxu1 %v5997_v60 }
  0x44   :  { %855 = vmatpush.msrb.mxu2 %v5909_v25 }
  0x45   :  { %767 = vmatpush.msrb.mxu1 %v6003_v61 }
  0x46   :  { %856 = vmatpush.msrb.mxu2 %v5918_v26 }
  0x47   :  { %768 = vmatpush.msrb.mxu1 %v6009_v63 }
  0x48   :  { %857 = vmatpush.msrb.mxu2 %v5925_v27 }
  0x49   :  { %769 = vmatpush.msrb.mxu1 %v6015_v1 }
  0x4b   :  { %770 = vmatpush.msrb.mxu1 %v6023_v2 }
  0x4d   :  { %771 = vmatpush.msrb.mxu1 %v6029_v3 }
  0x4f   :  { %772 = vmatpush.msrb.mxu1 %v6035_v4 }
  0x8d   :  { %v220_v32 = vpop.f32.mrf.mxu3 }
  0x8e   :  { %v221_v33 = vadd.f32 %v220_v32, %v168_v31 }
  0x90   :  { %236 = vst [vmem:[#allocation3] sm:$0xff] %v221_v33 }
  0x94   :  { %v188_v41 = vpop.f32.mrf.mxu2 }
  0x95   :  { %v223_v34 = vpop.f32.mrf.mxu3  ;;  %v189_v42 = vadd.f32 %v188_v41, %v167_v40  ;;  %v134_v57 = vpop.f32.mrf.mxu1 }
  0x96   :  { %v224_v35 = vadd.f32 %v223_v34, %v168_v31  ;;  %v61_v34 = vld [vmem:[%s8085_s1 + $0x20] sm:$0xff] }
  0x97   :  { %235 = vst [vmem:[#allocation3 + $0x48] sm:$0xff] %v189_v42  ;;  %98 = vmatpush.msra.mxu0 %v61_v34  ;;  %v6099_v42 = vld [vmem:[%s8086_s2 + $0x30] sm:$0xff] }
  0x98   :  { %238 = vst [vmem:[#allocation3 + $0x40] sm:$0xff] %v224_v35  ;;  %v59_v35 = vld [vmem:[%s8085_s1 + $0x10] sm:$0xff] }
  0x99   :  { %99 = vmatpush.msra.mxu0 %v59_v35 }
  0x9c   :  { %v191_v47 = vpop.f32.mrf.mxu2 }
  0x9d   :  { %v226_v36 = vpop.f32.mrf.mxu3  ;;  %v192_v48 = vadd.f32 %v191_v47, %v167_v40 }
  0x9e   :  { %v227_v37 = vadd.f32 %v226_v36, %v168_v31  ;;  %v57_v36 = vld [vmem:[%s8085_s1] sm:$0xff]  ;;  %s4799_s1 = sshll.u32 %s5696_s26, 4  ;;  %s4800_s1 = int_to_ptr.vmem [resolvable:$true] %s4799_s1 }
  0x9f   :  { %237 = vst [vmem:[#allocation3 + $0x10] sm:$0xff] %v192_v48  ;;  %100 = vmatpush.msra.mxu0 %v57_v36 }
  0xa0   :  { %240 = vst [vmem:[#allocation3 + $0x8] sm:$0xff] %v227_v37  ;;  %v6074_v37 = vld [vmem:[%s8086_s2 + $0x70] sm:$0xff]  ;;  %4810 = vmatmul.msk.f32.vlgmr.msra.gmra.mxu0 %vm69_vm0, %v5790_v5  ;;  %v6094_v5 = vld [vmem:[%s8086_s2 + $0x40] sm:$0xff] }
  0xa1   :  { %295 = vmatpush.msrb.mxu0 %v6074_v37 }
  0xa4   :  { %v194_v51 = vpop.f32.mrf.mxu2 }
  0xa5   :  { %v229_v38 = vpop.f32.mrf.mxu3  ;;  %v195_v53 = vadd.f32 %v194_v51, %v167_v40 }
  0xa6   :  { %v230_v39 = vadd.f32 %v229_v38, %v168_v31  ;;  %v6081_v38 = vld [vmem:[%s8086_s2 + $0x60] sm:$0xff] }
  0xa7   :  { %239 = vst [vmem:[#allocation3 + $0x38] sm:$0xff] %v195_v53  ;;  %296 = vmatpush.msrb.mxu0 %v6081_v38 }
  0xa8   :  { %242 = vst [vmem:[#allocation3 + $0x18] sm:$0xff] %v230_v39  ;;  %4811 = vmatmul.msk.f32.gmra.mxu0 %vm69_vm0, %v5819_v10  ;;  %v6120_v10 = vld [vmem:[%s8086_s2] sm:$0xff] }
  0xac   :  { %v197_v55 = vpop.f32.mrf.mxu2 }
  0xad   :  { %v232_v45 = vpop.f32.mrf.mxu3  ;;  %v198_v56 = vadd.f32 %v197_v55, %v167_v40 }
  0xae   :  { %v233_v46 = vadd.f32 %v232_v45, %v168_v31  ;;  %v6113_v45 = vld [vmem:[%s8086_s2 + $0x10] sm:$0xff] }
  0xaf   :  { %241 = vst [vmem:[#allocation3 + $0x30] sm:$0xff] %v198_v56 }
  0xb0   :  { %244 = vst [vmem:[#allocation3 + $0x20] sm:$0xf] %v233_v46  ;;  %4812 = vmatmul.msk.f32.gmra.mxu0 %vm69_vm0, %v5864_v19  ;;  %v63_v19 = vld [vmem:[%s8087_s3] sm:$0x3] }
  0xb1   :  { %v66_v56 = vperm.slane %v63_v19, 1 }
  0xb4   :  { %v200_v62 = vpop.f32.mrf.mxu2 }
  0xb5   :  { %v426_v50 = vpop.f32.mrf.mxu3  ;;  %v201_v0 = vadd.f32 %v200_v62, %v167_v40  ;;  %v6087_v40 = vld [vmem:[%s8086_s2 + $0x50] sm:$0xff] }
  0xb6   :  { %297 = vmatpush.msrb.mxu0 %v6087_v40 }
  0xb7   :  { %v282_v49 = vld [vmem:[#allocation3 + $0x20] sm:$0xc]  ;;  %243 = vst [vmem:[#allocation3 + $0x28] sm:$0xf] %v201_v0 }
  0xb8   :  { %v386_v52 = vrot.slane %v282_v49, 2  ;;  %298 = vmatpush.msrb.mxu0 %v6094_v5 }
  0xb9   :  { %4813 = vmatmul.msk.f32.gmra.mxu0 %vm69_vm0, %v5900_v24  ;;  %v135_v24 = vadd.f32 %v134_v57, %v66_v56 }
  0xba   :  { %v5980_v54 = vadd.f32 %v426_v50, %v386_v52  ;;  %299 = vmatpush.msrb.mxu0 %v6099_v42 }
  0xbb   :  { %150 = vst [vmem:[#allocation2] sm:$0xff] %v135_v24 }
  0xbc   :  { %5044 = vtanh.f32 %v5980_v54  ;;  %v406_v16 = vpop.f32.mrf.mxu2  ;;  %300 = vmatpush.msrb.mxu0 %v6107_v44  ;;  %v4833_v57 = vmul.f32 -1.442695, %v5980_v54 }
  0xbe   :  { %v281_v13 = vld [vmem:[#allocation3 + $0x28] sm:$0xc]  ;;  %301 = vmatpush.msrb.mxu0 %v6113_v45 }
  0xbf   :  { %v385_v14 = vrot.slane %v281_v13, 2 }
  0xc0   :  { %302 = vmatpush.msrb.mxu0 %v6120_v10 }
  0xc1   :  { %v407_v30 = vadd.f32 %v406_v16, %v385_v14  ;;  %4814 = vmatmul.msk.f32.gmra.mxu0 %vm69_vm0, %v5932_v28 }
  0xc2   :  { %v5045_v59 = vpop.eup %5044  ;;  %525 = vmatpush.msra.mxu0 %v6074_v37 }
  0xc3   :  { %470 = vrot.lane.b32.xlu0 %v5045_v59, %s5694_s9  ;;  %v4832_v31 = vmul.f32 -1.442695, %v407_v30  ;;  %v137_v59 = vpop.f32.mrf.mxu1  ;;  %v65_v30 = vperm.slane %v63_v19, 0 }
  0xc4   :  { %526 = vmatpush.msra.mxu0 %v6081_v38  ;;  %v138_v62 = vadd.f32 %v137_v59, %v66_v56 }
  0xc5   :  { %5046 = vpow2.f32 %v4832_v31 }
  0xc6   :  { %527 = vmatpush.msra.mxu0 %v6087_v40  ;;  %152 = vst [vmem:[#allocation2 + $0x10] sm:$0xff] %v138_v62 }
  0xc8   :  { %528 = vmatpush.msra.mxu0 %v6094_v5 }
  0xc9   :  { %303 = vmatmul.f32.vlgmr.msrb.gmra.mxu0 %v5693_v29 }
  0xca   :  { %529 = vmatpush.msra.mxu0 %v6099_v42 }
  0xcb   :  { %v5047_v32 = vpop.eup %5046  ;;  %v140_v0 = vpop.f32.mrf.mxu1 }
  0xcc   :  { %v435_v33 = vadd.f32 1.0, %v5047_v32  ;;  %530 = vmatpush.msra.mxu0 %v6107_v44  ;;  %v141_v28 = vadd.f32 %v140_v0, %v66_v56 }
  0xce   :  { %5048 = vrcp.f32 %v435_v33  ;;  %vm442_vm1 = vweird.f32 %v435_v33  ;;  %v448_v47 = vand.u32 2147483648, %v435_v33  ;;  %v446_v49 = vand.u32 2147483647, %v435_v33  ;;  %531 = vmatpush.msra.mxu0 %v6113_v45  ;;  %154 = vst [vmem:[#allocation2 + $0x28] sm:$0xff] %v141_v28 }
  0xd0   :  { %v449_v50 = vor.u32 1.1754944e-38, %v448_v47  ;;  %vm447_vm4 = vcmp.eq.f32.partialorder %v446_v49, 8.507059e+37  ;;  %532 = vmatpush.msra.mxu0 %v6120_v10 }
  0xd2   :  { %745 = vmatpush.msrb.mxu0 %v6074_v37 }
  0xd3   :  { %v143_v29 = vpop.f32.mrf.mxu1 }
  0xd4   :  { %v5049_v39 = vpop.eup %5048  ;;  %746 = vmatpush.msrb.mxu0 %v6081_v38  ;;  %v144_v13 = vadd.f32 %v143_v29, %v66_v56 }
  0xd5   :  { %v438_v41 = vmul.f32 %v5049_v39, %v435_v33  ;;  %vm443_vm2 = vweird.f32 %v5049_v39 }
  0xd6   :  { %vm444_vm3 = vmor %vm442_vm1, %vm443_vm2  ;;  %747 = vmatpush.msrb.mxu0 %v6087_v40  ;;  %156 = vst [vmem:[#allocation2 + $0x20] sm:$0xff] %v144_v13 }
  0xd7   :  { %v439_v43 = vsub.f32 1.0, %v438_v41  ;;  %v280_v41 = vld [vmem:[#allocation2] sm:$0x3] }
  0xd8   :  { %748 = vmatpush.msrb.mxu0 %v6094_v5 }
  0xd9   :  { %v440_v46 = vmul.f32 %v5049_v39, %v439_v43 }
  0xda   :  { %749 = vmatpush.msrb.mxu0 %v6099_v42 }
  0xdb   :  { %v441_v48 = vadd.f32 %v5049_v39, %v440_v46  ;;  %v146_v14 = vpop.f32.mrf.mxu1 }
  0xdc   :  { %750 = vmatpush.msrb.mxu0 %v6107_v44  ;;  %v147_v16 = vadd.f32 %v146_v14, %v66_v56 }
  0xdd   :  { %v445_v51 = vsel %vm444_vm3, %v5049_v39, %v441_v48 }
  0xde   :  { %v450_v53 = vsel %vm447_vm4, %v449_v50, %v445_v51  ;;  %751 = vmatpush.msrb.mxu0 %v6113_v45  ;;  %158 = vst [vmem:[#allocation2 + $0x38] sm:$0xf] %v147_v16 }
  0xdf   :  { %v468_v35 = vmul.f32 0.0, %v450_v53 }
  0xe0   :  { %752 = vmatpush.msrb.mxu0 %v6120_v10 }
  0xe3   :  { %v324_v43 = vpop.f32.mrf.mxu1 }
  0xe4   :  { %v6153_v48 = vadd.f32 %v324_v43, %v280_v41 }
 0x11d   :  { %v102_v31 = vpop.f32.mrf.mxu0 }
 0x11e   :  { %v103_v32 = vadd.f32 %v102_v31, %v65_v30 }
 0x120   :  { %149 = vst [vmem:[#allocation2 + $0x30] sm:$0xff] %v103_v32 }
 0x125   :  { %v105_v33 = vpop.f32.mrf.mxu0 }
 0x126   :  { %v106_v34 = vadd.f32 %v105_v33, %v65_v30 }
 0x127   :  { %v279_v19 = vld [vmem:[#allocation2 + $0x30] sm:$0x3] }
 0x128   :  { %151 = vst [vmem:[#allocation2 + $0x18] sm:$0xff] %v106_v34 }
 0x12d   :  { %v108_v46 = vpop.f32.mrf.mxu0 }
 0x12e   :  { %v109_v47 = vadd.f32 %v108_v46, %v65_v30 }
 0x130   :  { %153 = vst [vmem:[#allocation2 + $0x48] sm:$0xff] %v109_v47 }
 0x135   :  { %v471_v52 = vpop.permute.xlu0 %470 }
 0x136   :  { %v473_v55 = vmul.f32 %v471_v52, %v450_v53  ;;  %v111_v50 = vpop.f32.mrf.mxu0 }
 0x137   :  { %v112_v51 = vadd.f32 %v111_v50, %v65_v30 }
 0x138   :  { %475 = vrot.lane.b32.xlu0 %v473_v55, %s5694_s9 }
 0x139   :  { %155 = vst [vmem:[#allocation2 + $0x8] sm:$0xff] %v112_v51 }
 0x13e   :  { %v114_v53 = vpop.f32.mrf.mxu0 }
 0x13f   :  { %v115_v55 = vadd.f32 %v114_v53, %v65_v30 }
 0x141   :  { %157 = vst [vmem:[#allocation2 + $0x40] sm:$0xf] %v115_v55 }
 0x146   :  { %v304_v56 = vpop.f32.mrf.mxu0 }
 0x147   :  { %v305_v24 = vadd.f32 %v304_v56, %v279_v19 }
 0x149   :  { %v4830_v59 = vmul.f32 -1.442695, %v305_v24 }
 0x1aa   :  { %v476_v36 = vpop.permute.xlu0 %475 }
 0x1ab   :  { %v6150_v39 = vadd.f32 %v476_v36, %v468_v35 }
 0x1ad   :  { %5050 = vtanh.f32 %v6150_v39 }
 0x1ae   :  { %5052 = vtanh.f32 %v6153_v48 }
 0x1af   :  { %5054 = vpow2.f32 %v4833_v57 }
 0x1b0   :  { %5056 = vpow2.f32 %v4830_v59 }
 0x1b3   :  { %v5051_v49 = vpop.eup %5050 }
 0x1b4   :  { %481 = vrot.lane.b32.xlu1 %v5051_v49, %s5694_s9  ;;  %v5053_v52 = vpop.eup %5052 }
 0x1b5   :  { %v5055_v62 = vpop.eup %5054 }
 0x1b6   :  { %v436_v0 = vadd.f32 1.0, %v5055_v62  ;;  %v5057_v28 = vpop.eup %5056 }
 0x1b7   :  { %v333_v29 = vadd.f32 1.0, %v5057_v28  ;;  %v507_v28 = vld [vmem:[#allocation3 + $0x20] sm:$0x3] }
 0x1b8   :  { %5058 = vrcp.f32 %v436_v0  ;;  %v463_v54 = vand.u32 2147483648, %v436_v0  ;;  %vm457_vm6 = vweird.f32 %v436_v0  ;;  %v461_v35 = vand.u32 2147483647, %v436_v0 }
 0x1b9   :  { %5060 = vrcp.f32 %v333_v29  ;;  %vm340_vm8 = vweird.f32 %v333_v29  ;;  %v346_v46 = vand.u32 2147483648, %v333_v29  ;;  %v344_v49 = vand.u32 2147483647, %v333_v29 }
 0x1ba   :  { %v464_v43 = vor.u32 1.1754944e-38, %v463_v54  ;;  %vm462_vm10 = vcmp.eq.f32.partialorder %v461_v35, 8.507059e+37 }
 0x1bb   :  { %v347_v53 = vor.u32 1.1754944e-38, %v346_v46  ;;  %vm345_vm13 = vcmp.eq.f32.partialorder %v344_v49, 8.507059e+37 }
 0x1bc   :  { %368 = vrot.lane.b32.xlu1 %v5053_v52, %s5694_s9 }
 0x1be   :  { %v5059_v13 = vpop.eup %5058 }
 0x1bf   :  { %v453_v14 = vmul.f32 %v5059_v13, %v436_v0  ;;  %v5061_v16 = vpop.eup %5060  ;;  %vm458_vm5 = vweird.f32 %v5059_v13 }
 0x1c0   :  { %v336_v30 = vmul.f32 %v5061_v16, %v333_v29  ;;  %vm459_vm7 = vmor %vm457_vm6, %vm458_vm5  ;;  %vm341_vm9 = vweird.f32 %v5061_v16 }
 0x1c1   :  { %v454_v31 = vsub.f32 1.0, %v453_v14  ;;  %vm342_vm12 = vmor %vm340_vm8, %vm341_vm9 }
 0x1c2   :  { %v337_v33 = vsub.f32 1.0, %v336_v30 }
 0x1c3   :  { %v455_v32 = vmul.f32 %v5059_v13, %v454_v31 }
 0x1c4   :  { %v338_v36 = vmul.f32 %v5061_v16, %v337_v33 }
 0x1c5   :  { %v456_v34 = vadd.f32 %v5059_v13, %v455_v32 }
 0x1c6   :  { %v339_v47 = vadd.f32 %v5061_v16, %v338_v36 }
 0x1c7   :  { %v460_v41 = vsel %vm459_vm7, %v5059_v13, %v456_v34 }
 0x1c8   :  { %v465_v50 = vsel %vm462_vm10, %v464_v43, %v460_v41  ;;  %v343_v55 = vsel %vm342_vm12, %v5061_v16, %v339_v47  ;;  %v4831_v16 = vmul.f32 -1.442695, %v6153_v48 }
 0x1c9   :  { %v348_v19 = vsel %vm345_vm13, %v347_v53, %v343_v55 }
 0x1ca   :  { %v366_v24 = vmul.f32 0.0, %v348_v19 }
 0x226   :  { %v482_v51 = vpop.permute.xlu1 %481 }
 0x227   :  { %v6159_v52 = vmul.f32 %v482_v51, %v465_v50  ;;  %v506_v51 = vld [vmem:[#allocation3 + $0x28] sm:$0x3] }
 0x229   :  { %8116 = vst [vmem:[#allocation11_spill] sm:$0xff] %v6159_v52  ;;  %4838 = vmatmul.msk.f32.vlgmr.msra.gmra.mxu2 %vm283_vm11, %v6159_v52  ;;  %4839 = vmatmul.msk.f32.vlgmr.msra.gmra.mxu3 %vm283_vm11, %v6159_v52 }
 0x22a   :  { %1076 = vmatpush.msra.mxu2 %v5859_v18  ;;  %1096 = vmatpush.msra.mxu3 %v5795_v6 }
 0x22c   :  { %1077 = vmatpush.msra.mxu2 %v5872_v20  ;;  %1097 = vmatpush.msra.mxu3 %v5802_v7 }
 0x22e   :  { %v369_v56 = vpop.permute.xlu1 %368  ;;  %1078 = vmatpush.msra.mxu2 %v5881_v21  ;;  %1098 = vmatpush.msra.mxu3 %v5808_v8 }
 0x22f   :  { %v371_v57 = vmul.f32 %v369_v56, %v348_v19 }
 0x230   :  { %1079 = vmatpush.msra.mxu2 %v5888_v22  ;;  %1099 = vmatpush.msra.mxu3 %v5814_v9 }
 0x231   :  { %373 = vrot.lane.b32.xlu2 %v371_v57, %s5694_s9 }
 0x232   :  { %1080 = vmatpush.msra.mxu2 %v5895_v23  ;;  %1100 = vmatpush.msra.mxu3 %v5825_v11 }
 0x234   :  { %1081 = vmatpush.msra.mxu2 %v5909_v25  ;;  %1101 = vmatpush.msra.mxu3 %v5833_v12 }
 0x236   :  { %1082 = vmatpush.msra.mxu2 %v5918_v26  ;;  %1102 = vmatpush.msra.mxu3 %v5845_v15 }
 0x238   :  { %1083 = vmatpush.msra.mxu2 %v5925_v27  ;;  %1103 = vmatpush.msra.mxu3 %v5854_v17 }
 0x28b   :  { %v374_v59 = vpop.permute.xlu2 %373 }
 0x28c   :  { %v6182_v62 = vadd.f32 %v374_v59, %v366_v24 }
 0x28e   :  { %5062 = vtanh.f32 %v6182_v62 }
 0x294   :  { %v5063_v0 = vpop.eup %5062 }
 0x295   :  { %379 = vrot.lane.b32.xlu2 %v5063_v0, %s5694_s9 }
 0x2ac   :  { %v653_v29 = vpop.f32.mrf.mxu3  ;;  %v633_v50 = vpop.f32.mrf.mxu2 }
 0x2ad   :  { %v6186_v13 = vadd.f32 %v653_v29, %v507_v28  ;;  %v634_v53 = vadd.f32 %v633_v50, %v506_v51  ;;  %v504_v50 = vld [vmem:[#allocation2 + $0x30] sm:$0xc] }
 0x2af   :  { %5064 = vtanh.f32 %v6186_v13  ;;  %v4840_v55 = vmul.f32 -1.442695, %v634_v53  ;;  %v510_v53 = vrot.slane %v504_v50, 2 }
 0x2b0   :  { %5066 = vpow2.f32 %v4831_v16 }
 0x2b5   :  { %v5065_v14 = vpop.eup %5064 }
 0x2b6   :  { %697 = vrot.lane.b32.xlu0 %v5065_v14, %s5694_s9  ;;  %v5067_v31 = vpop.eup %5066 }
 0x2b7   :  { %v334_v30 = vadd.f32 1.0, %v5067_v31 }
 0x2b9   :  { %5068 = vrcp.f32 %v334_v30  ;;  %vm355_vm14 = vweird.f32 %v334_v30  ;;  %v361_v35 = vand.u32 2147483648, %v334_v30  ;;  %v359_v41 = vand.u32 2147483647, %v334_v30 }
 0x2ba   :  { %5070 = vpow2.f32 %v4840_v55 }
 0x2bb   :  { %v362_v43 = vor.u32 1.1754944e-38, %v361_v35  ;;  %vm360_vm1 = vcmp.eq.f32.partialorder %v359_v41, 8.507059e+37 }
 0x2bf   :  { %v5069_v32 = vpop.eup %5068 }
 0x2c0   :  { %v351_v33 = vmul.f32 %v5069_v32, %v334_v30  ;;  %vm356_vm15 = vweird.f32 %v5069_v32  ;;  %v5071_v19 = vpop.eup %5070 }
 0x2c1   :  { %vm357_vm0 = vmor %vm355_vm14, %vm356_vm15  ;;  %v662_v56 = vadd.f32 1.0, %v5071_v19 }
 0x2c2   :  { %v352_v34 = vsub.f32 1.0, %v351_v33 }
 0x2c3   :  { %5072 = vrcp.f32 %v662_v56  ;;  %v675_v29 = vand.u32 2147483648, %v662_v56  ;;  %vm669_vm3 = vweird.f32 %v662_v56  ;;  %v673_v14 = vand.u32 2147483647, %v662_v56 }
 0x2c4   :  { %v353_v54 = vmul.f32 %v5069_v32, %v352_v34  ;;  %v505_v34 = vld [vmem:[#allocation2] sm:$0xc] }
 0x2c5   :  { %v676_v31 = vor.u32 1.1754944e-38, %v675_v29  ;;  %vm674_vm5 = vcmp.eq.f32.partialorder %v673_v14, 8.507059e+37 }
 0x2c6   :  { %v354_v36 = vadd.f32 %v5069_v32, %v353_v54  ;;  %v511_v54 = vrot.slane %v505_v34, 2 }
 0x2c8   :  { %v358_v46 = vsel %vm357_vm0, %v5069_v32, %v354_v36 }
 0x2c9   :  { %v363_v47 = vsel %vm360_vm1, %v362_v43, %v358_v46  ;;  %v5073_v57 = vpop.eup %5072 }
 0x2ca   :  { %v665_v24 = vmul.f32 %v5073_v57, %v662_v56  ;;  %vm670_vm2 = vweird.f32 %v5073_v57 }
 0x2cb   :  { %vm671_vm4 = vmor %vm669_vm3, %vm670_vm2 }
 0x2cc   :  { %v666_v59 = vsub.f32 1.0, %v665_v24  ;;  %v4841_v24 = vmul.f32 -1.442695, %v6186_v13 }
 0x2ce   :  { %v667_v0 = vmul.f32 %v5073_v57, %v666_v59 }
 0x2d0   :  { %v668_v28 = vadd.f32 %v5073_v57, %v667_v0 }
 0x2d2   :  { %v672_v16 = vsel %vm671_vm4, %v5073_v57, %v668_v28 }
 0x2d3   :  { %v677_v32 = vsel %vm674_vm5, %v676_v31, %v672_v16 }
 0x2d4   :  { %v695_v43 = vmul.f32 %v677_v32, %v6150_v39 }
 0x2ef   :  { %v380_v49 = vpop.permute.xlu2 %379 }
 0x2f0   :  { %v6191_v48 = vmul.f32 %v380_v49, %v363_v47 }
 0x2f2   :  { %4834 = vmatmul.msk.f32.vlgmr.msra.gmra.mxu0 %vm283_vm11, %v6191_v48  ;;  %4835 = vmatmul.msk.f32.vlgmr.msra.gmra.mxu1 %vm283_vm11, %v6191_v48 }
 0x2f3   :  { %971 = vmatpush.msra.mxu0 %v6074_v37  ;;  %991 = vmatpush.msra.mxu1 %v5989_v58 }
 0x2f5   :  { %972 = vmatpush.msra.mxu0 %v6081_v38  ;;  %992 = vmatpush.msra.mxu1 %v5997_v60 }
 0x2f7   :  { %973 = vmatpush.msra.mxu0 %v6087_v40  ;;  %993 = vmatpush.msra.mxu1 %v6003_v61 }
 0x2f9   :  { %974 = vmatpush.msra.mxu0 %v6094_v5  ;;  %994 = vmatpush.msra.mxu1 %v6009_v63 }
 0x2fb   :  { %975 = vmatpush.msra.mxu0 %v6099_v42  ;;  %995 = vmatpush.msra.mxu1 %v6015_v1 }
 0x2fd   :  { %976 = vmatpush.msra.mxu0 %v6107_v44  ;;  %996 = vmatpush.msra.mxu1 %v6023_v2 }
 0x2ff   :  { %977 = vmatpush.msra.mxu0 %v6113_v45  ;;  %997 = vmatpush.msra.mxu1 %v6029_v3 }
 0x301   :  { %978 = vmatpush.msra.mxu0 %v6120_v10  ;;  %998 = vmatpush.msra.mxu1 %v6035_v4 }
 0x328   :  { %v698_v30 = vpop.permute.xlu0 %697 }
 0x329   :  { %v700_v33 = vmul.f32 %v698_v30, %v677_v32 }
 0x32b   :  { %702 = vrot.lane.b32.xlu1 %v700_v33, %s5694_s9 }
 0x36f   :  { %v554_v35 = vpop.f32.mrf.mxu1  ;;  %v534_v51 = vpop.f32.mrf.mxu0 }
 0x370   :  { %v6214_v36 = vadd.f32 %v554_v35, %v511_v54  ;;  %v535_v55 = vadd.f32 %v534_v51, %v510_v53 }
 0x372   :  { %5074 = vtanh.f32 %v6214_v36  ;;  %v4836_v19 = vmul.f32 -1.442695, %v535_v55 }
 0x378   :  { %v5075_v41 = vpop.eup %5074 }
 0x379   :  { %598 = vrot.lane.b32.xlu0 %v5075_v41, %s5694_s9 }
 0x39d   :  { %v703_v46 = vpop.permute.xlu1 %702 }
 0x39e   :  { %v6219_v47 = vadd.f32 %v703_v46, %v695_v43 }
 0x3a0   :  { %5076 = vtanh.f32 %v6219_v47 }
 0x3a1   :  { %5078 = vpow2.f32 %v4836_v19 }
 0x3a6   :  { %v5077_v49 = vpop.eup %5076 }
 0x3a7   :  { %708 = vrot.lane.b32.xlu2 %v5077_v49, %s5694_s9  ;;  %v5079_v56 = vpop.eup %5078 }
 0x3a8   :  { %v563_v57 = vadd.f32 1.0, %v5079_v56 }
 0x3aa   :  { %5080 = vrcp.f32 %v563_v57  ;;  %v576_v31 = vand.u32 2147483648, %v563_v57  ;;  %vm570_vm7 = vweird.f32 %v563_v57  ;;  %v574_v30 = vand.u32 2147483647, %v563_v57 }
 0x3ab   :  { %5082 = vpow2.f32 %v4841_v24 }
 0x3ac   :  { %v577_v33 = vor.u32 1.1754944e-38, %v576_v31  ;;  %vm575_vm9 = vcmp.eq.f32.partialorder %v574_v30, 8.507059e+37 }
 0x3b0   :  { %v5081_v39 = vpop.eup %5080 }
 0x3b1   :  { %v566_v59 = vmul.f32 %v5081_v39, %v563_v57  ;;  %v5083_v28 = vpop.eup %5082  ;;  %vm571_vm6 = vweird.f32 %v5081_v39 }
 0x3b2   :  { %v663_v14 = vadd.f32 1.0, %v5083_v28  ;;  %vm572_vm8 = vmor %vm570_vm7, %vm571_vm6 }
 0x3b3   :  { %v567_v0 = vsub.f32 1.0, %v566_v59 }
 0x3b4   :  { %5084 = vrcp.f32 %v663_v14  ;;  %v690_v50 = vand.u32 2147483648, %v663_v14  ;;  %vm684_vm12 = vweird.f32 %v663_v14  ;;  %v688_v51 = vand.u32 2147483647, %v663_v14 }
 0x3b5   :  { %v568_v29 = vmul.f32 %v5081_v39, %v567_v0 }
 0x3b6   :  { %v691_v55 = vor.u32 1.1754944e-38, %v690_v50  ;;  %vm689_vm14 = vcmp.eq.f32.partialorder %v688_v51, 8.507059e+37 }
 0x3b7   :  { %v569_v16 = vadd.f32 %v5081_v39, %v568_v29 }
 0x3b9   :  { %v573_v32 = vsel %vm572_vm8, %v5081_v39, %v569_v16 }
 0x3ba   :  { %v5085_v34 = vpop.eup %5084  ;;  %v578_v13 = vsel %vm575_vm9, %v577_v33, %v573_v32 }
 0x3bb   :  { %v680_v41 = vmul.f32 %v5085_v34, %v663_v14  ;;  %vm685_vm10 = vweird.f32 %v5085_v34  ;;  %v726_v14 = vld [vmem:[#allocation3 + $0x30] sm:$0xc0] }
 0x3bc   :  { %vm686_vm13 = vmor %vm684_vm12, %vm685_vm10  ;;  %v835_v31 = vrot.slane %v726_v14, 6 }
 0x3bd   :  { %v681_v43 = vsub.f32 1.0, %v680_v41  ;;  %v725_v41 = vld [vmem:[#allocation2] sm:$0x30] }
 0x3bf   :  { %v682_v46 = vmul.f32 %v5085_v34, %v681_v43  ;;  %v731_v43 = vrot.slane %v725_v41, 4  ;;  %v6354_v41 = vld [vmem:[%s8089_s5 + $0x38] sm:$0xff] }
 0x3c1   :  { %v683_v49 = vadd.f32 %v5085_v34, %v682_v46 }
 0x3c3   :  { %v687_v53 = vsel %vm686_vm13, %v5085_v34, %v683_v49 }
 0x3c4   :  { %v692_v19 = vsel %vm689_vm14, %v691_v55, %v687_v53 }
 0x3eb   :  { %v599_v54 = vpop.permute.xlu0 %598 }
 0x3ec   :  { %v601_v35 = vmul.f32 %v599_v54, %v578_v13 }
 0x3ee   :  { %603 = vrot.lane.b32.xlu1 %v601_v35, %s5694_s9 }
 0x401   :  { %v709_v56 = vpop.permute.xlu2 %708 }
 0x402   :  { %v6225_v57 = vmul.f32 %v709_v56, %v692_v19  ;;  %v724_v56 = vld [vmem:[#allocation2 + $0x30] sm:$0x30] }
 0x404   :  { %4846 = vmatmul.msk.f32.vlgmr.msrb.gmra.mxu2 %vm283_vm11, %v6225_v57  ;;  %4847 = vmatmul.msk.f32.vlgmr.msrb.gmra.mxu3 %vm283_vm11, %v6225_v57 }
 0x405   :  { %1296 = vmatpush.msrb.mxu2 %v5859_v18  ;;  %1316 = vmatpush.msrb.mxu3 %v5795_v6  ;;  %v596_v6 = vmul.f32 %v578_v13, %v6182_v62 }
 0x407   :  { %1297 = vmatpush.msrb.mxu2 %v5872_v20  ;;  %1317 = vmatpush.msrb.mxu3 %v5802_v7 }
 0x409   :  { %1298 = vmatpush.msrb.mxu2 %v5881_v21  ;;  %1318 = vmatpush.msrb.mxu3 %v5808_v8 }
 0x40b   :  { %1299 = vmatpush.msrb.mxu2 %v5888_v22  ;;  %1319 = vmatpush.msrb.mxu3 %v5814_v9 }
 0x40d   :  { %1300 = vmatpush.msrb.mxu2 %v5895_v23  ;;  %1320 = vmatpush.msrb.mxu3 %v5825_v11  ;;  %v727_v11 = vld [vmem:[#allocation3 + $0x18] sm:$0xc0] }
 0x40f   :  { %1301 = vmatpush.msrb.mxu2 %v5909_v25  ;;  %1321 = vmatpush.msrb.mxu3 %v5833_v12  ;;  %v836_v12 = vrot.slane %v727_v11, 6 }
 0x411   :  { %1302 = vmatpush.msrb.mxu2 %v5918_v26  ;;  %1322 = vmatpush.msrb.mxu3 %v5845_v15 }
 0x413   :  { %1303 = vmatpush.msrb.mxu2 %v5925_v27  ;;  %1323 = vmatpush.msrb.mxu3 %v5854_v17  ;;  %v4837_v17 = vmul.f32 -1.442695, %v6214_v36 }
 0x460   :  { %v604_v7 = vpop.permute.xlu1 %603 }
 0x461   :  { %v6248_v8 = vadd.f32 %v604_v7, %v596_v6  ;;  %v730_v7 = vrot.slane %v724_v56, 4 }
 0x463   :  { %5086 = vtanh.f32 %v6248_v8 }
 0x469   :  { %v5087_v9 = vpop.eup %5086 }
 0x46a   :  { %609 = vrot.lane.b32.xlu2 %v5087_v9, %s5694_s9 }
 0x487   :  { %v879_v18 = vpop.f32.mrf.mxu3  ;;  %v859_v16 = vpop.f32.mrf.mxu2 }
 0x488   :  { %v6252_v20 = vadd.f32 %v879_v18, %v836_v12 }
 0x48a   :  { %5088 = vtanh.f32 %v6252_v20 }
 0x48b   :  { %5090 = vpow2.f32 %v4837_v17 }
 0x490   :  { %v5089_v15 = vpop.eup %5088 }
 0x491   :  { %923 = vrot.lane.b32.xlu0 %v5089_v15, %s5694_s9  ;;  %v5091_v21 = vpop.eup %5090 }
 0x492   :  { %v564_v22 = vadd.f32 1.0, %v5091_v21 }
 0x494   :  { %5092 = vrcp.f32 %v564_v22  ;;  %v591_v24 = vand.u32 2147483648, %v564_v22  ;;  %vm585_vm0 = vweird.f32 %v564_v22  ;;  %v589_v39 = vand.u32 2147483647, %v564_v22 }
 0x496   :  { %v592_v0 = vor.u32 1.1754944e-38, %v591_v24  ;;  %vm590_vm2 = vcmp.eq.f32.partialorder %v589_v39, 8.507059e+37 }
 0x49a   :  { %v5093_v23 = vpop.eup %5092 }
 0x49b   :  { %v581_v25 = vmul.f32 %v5093_v23, %v564_v22  ;;  %vm586_vm15 = vweird.f32 %v5093_v23 }
 0x49c   :  { %vm587_vm1 = vmor %vm585_vm0, %vm586_vm15 }
 0x49d   :  { %v582_v26 = vsub.f32 1.0, %v581_v25 }
 0x49f   :  { %v583_v27 = vmul.f32 %v5093_v23, %v582_v26 }
 0x4a1   :  { %v584_v62 = vadd.f32 %v5093_v23, %v583_v27 }
 0x4a3   :  { %v588_v59 = vsel %vm587_vm1, %v5093_v23, %v584_v62 }
 0x4a4   :  { %v593_v28 = vsel %vm590_vm2, %v592_v0, %v588_v59 }
 0x4c4   :  { %v610_v29 = vpop.permute.xlu2 %609 }
 0x4c5   :  { %v6257_v36 = vmul.f32 %v610_v29, %v593_v28 }
 0x4c7   :  { %4842 = vmatmul.msk.f32.vlgmr.msrb.gmra.mxu0 %vm283_vm11, %v6257_v36  ;;  %4843 = vmatmul.msk.f32.vlgmr.msrb.gmra.mxu1 %vm283_vm11, %v6257_v36 }
 0x4c8   :  { %1191 = vmatpush.msrb.mxu0 %v6074_v37  ;;  %1211 = vmatpush.msrb.mxu1 %v5989_v58  ;;  %v860_v58 = vadd.f32 %v859_v16, %v835_v31 }
 0x4ca   :  { %1192 = vmatpush.msrb.mxu0 %v6081_v38  ;;  %1212 = vmatpush.msrb.mxu1 %v5997_v60  ;;  %v4848_v60 = vmul.f32 -1.442695, %v860_v58 }
 0x4cc   :  { %1193 = vmatpush.msrb.mxu0 %v6087_v40  ;;  %1213 = vmatpush.msrb.mxu1 %v6003_v61  ;;  %5094 = vpow2.f32 %v4848_v60 }
 0x4ce   :  { %1194 = vmatpush.msrb.mxu0 %v6094_v5  ;;  %1214 = vmatpush.msrb.mxu1 %v6009_v63 }
 0x4d0   :  { %1195 = vmatpush.msrb.mxu0 %v6099_v42  ;;  %1215 = vmatpush.msrb.mxu1 %v6015_v1 }
 0x4d2   :  { %1196 = vmatpush.msrb.mxu0 %v6107_v44  ;;  %1216 = vmatpush.msrb.mxu1 %v6023_v2  ;;  %v5095_v61 = vpop.eup %5094 }
 0x4d3   :  { %v888_v63 = vadd.f32 1.0, %v5095_v61 }
 0x4d4   :  { %1197 = vmatpush.msrb.mxu0 %v6113_v45  ;;  %1217 = vmatpush.msrb.mxu1 %v6029_v3 }
 0x4d5   :  { %5096 = vrcp.f32 %v888_v63  ;;  %v901_v2 = vand.u32 2147483648, %v888_v63  ;;  %vm895_vm4 = vweird.f32 %v888_v63  ;;  %v899_v34 = vand.u32 2147483647, %v888_v63 }
 0x4d6   :  { %1198 = vmatpush.msrb.mxu0 %v6120_v10  ;;  %1218 = vmatpush.msrb.mxu1 %v6035_v4 }
 0x4d7   :  { %v902_v54 = vor.u32 1.1754944e-38, %v901_v2  ;;  %vm900_vm6 = vcmp.eq.f32.partialorder %v899_v34, 8.507059e+37  ;;  %v6312_v2 = vld [vmem:[%s8089_s5 + $0x60] sm:$0xff]  ;;  %v6318_v34 = vld [vmem:[%s8089_s5 + $0x68] sm:$0xff] }
 0x4db   :  { %v5097_v37 = vpop.eup %5096 }
 0x4dc   :  { %v891_v1 = vmul.f32 %v5097_v37, %v888_v63  ;;  %vm896_vm3 = vweird.f32 %v5097_v37 }
 0x4dd   :  { %vm897_vm5 = vmor %vm895_vm4, %vm896_vm3 }
 0x4de   :  { %v892_v30 = vsub.f32 1.0, %v891_v1 }
 0x4e0   :  { %v893_v32 = vmul.f32 %v5097_v37, %v892_v30 }
 0x4e2   :  { %v894_v33 = vadd.f32 %v5097_v37, %v893_v32  ;;  %v6300_v32 = vld [vmem:[%s8089_s5 + $0x70] sm:$0xff] }
 0x4e4   :  { %v898_v3 = vsel %vm897_vm5, %v5097_v37, %v894_v33  ;;  %v6306_v33 = vld [vmem:[%s8089_s5 + $0x78] sm:$0xff] }
 0x4e5   :  { %v903_v35 = vsel %vm900_vm6, %v902_v54, %v898_v3  ;;  %v6324_v3 = vld [vmem:[%s8089_s5 + $0x50] sm:$0xff]  ;;  %v6330_v54 = vld [vmem:[%s8089_s5 + $0x58] sm:$0xff] }
 0x4e6   :  { %v921_v51 = vmul.f32 %v903_v35, %v6219_v47  ;;  %v4849_v47 = vmul.f32 -1.442695, %v6252_v20 }
 0x503   :  { %v924_v13 = vpop.permute.xlu0 %923 }
 0x504   :  { %v926_v4 = vmul.f32 %v924_v13, %v903_v35  ;;  %v6336_v13 = vld [vmem:[%s8089_s5 + $0x40] sm:$0xff]  ;;  %v6342_v35 = vld [vmem:[%s8089_s5 + $0x48] sm:$0xff] }
 0x506   :  { %928 = vrot.lane.b32.xlu1 %v926_v4, %s5694_s9  ;;  %v6348_v4 = vld [vmem:[%s8089_s5 + $0x30] sm:$0xff] }
 0x544   :  { %v774_v46 = vpop.f32.mrf.mxu1  ;;  %v754_v6 = vpop.f32.mrf.mxu0 }
 0x545   :  { %v6280_v49 = vadd.f32 %v774_v46, %v731_v43  ;;  %v755_v9 = vadd.f32 %v754_v6, %v730_v7  ;;  %v6360_v43 = vld [vmem:[%s8089_s5 + $0x20] sm:$0xff]  ;;  %v6366_v46 = vld [vmem:[%s8089_s5 + $0x28] sm:$0xff] }
 0x547   :  { %5098 = vtanh.f32 %v6280_v49  ;;  %v4844_v11 = vmul.f32 -1.442695, %v755_v9 }
 0x54d   :  { %v5099_v50 = vpop.eup %5098 }
 0x54e   :  { %818 = vrot.lane.b32.xlu0 %v5099_v50, %s5694_s9  ;;  %v6372_v50 = vld [vmem:[%s8089_s5 + $0x10] sm:$0xff] }
 0x578   :  { %v929_v53 = vpop.permute.xlu1 %928 }
 0x579   :  { %v6285_v55 = vadd.f32 %v929_v53, %v921_v51  ;;  %v6378_v51 = vld [vmem:[%s8089_s5 + $0x18] sm:$0xff]  ;;  %v6384_v53 = vld [vmem:[%s8089_s5] sm:$0xff] }
 0x57b   :  { %5100 = vtanh.f32 %v6285_v55 }
 0x57c   :  { %5102 = vpow2.f32 %v4844_v11  ;;  %v953_v11 = vld [vmem:[#allocation3 + $0x18] sm:$0x30] }
 0x581   :  { %v5101_v19 = vpop.eup %5100 }
 0x582   :  { %934 = vrot.lane.b32.xlu2 %v5101_v19, %s5694_s9  ;;  %v5103_v12 = vpop.eup %5102  ;;  %v6390_v19 = vld [vmem:[%s8089_s5 + $0x8] sm:$0xff] }
 0x583   :  { %v783_v18 = vadd.f32 1.0, %v5103_v12  ;;  %v1062_v12 = vrot.slane %v953_v11, 4 }
 0x585   :  { %5104 = vrcp.f32 %v783_v18  ;;  %v796_v26 = vand.u32 2147483648, %v783_v18  ;;  %vm790_vm8 = vweird.f32 %v783_v18  ;;  %v794_v27 = vand.u32 2147483647, %v783_v18 }
 0x586   :  { %5106 = vpow2.f32 %v4849_v47  ;;  %v4845_v47 = vmul.f32 -1.442695, %v6280_v49 }
 0x587   :  { %v797_v39 = vor.u32 1.1754944e-38, %v796_v26  ;;  %vm795_vm10 = vcmp.eq.f32.partialorder %v794_v27, 8.507059e+37 }
 0x58b   :  { %v5105_v15 = vpop.eup %5104 }
 0x58c   :  { %v786_v17 = vmul.f32 %v5105_v15, %v783_v18  ;;  %v5107_v23 = vpop.eup %5106  ;;  %vm791_vm7 = vweird.f32 %v5105_v15 }
 0x58d   :  { %v889_v62 = vadd.f32 1.0, %v5107_v23  ;;  %vm792_vm9 = vmor %vm790_vm8, %vm791_vm7 }
 0x58e   :  { %v787_v21 = vsub.f32 1.0, %v786_v17 }
 0x58f   :  { %5108 = vrcp.f32 %v889_v62  ;;  %v916_v58 = vand.u32 2147483648, %v889_v62  ;;  %vm910_vm13 = vweird.f32 %v889_v62  ;;  %v914_v60 = vand.u32 2147483647, %v889_v62 }
 0x590   :  { %v788_v22 = vmul.f32 %v5105_v15, %v787_v21 }
 0x591   :  { %v917_v63 = vor.u32 1.1754944e-38, %v916_v58  ;;  %vm915_vm15 = vcmp.eq.f32.partialorder %v914_v60, 8.507059e+37 }
 0x592   :  { %v789_v25 = vadd.f32 %v5105_v15, %v788_v22 }
 0x594   :  { %v793_v24 = vsel %vm792_vm9, %v5105_v15, %v789_v25 }
 0x595   :  { %v798_v0 = vsel %vm795_vm10, %v797_v39, %v793_v24  ;;  %v5109_v20 = vpop.eup %5108 }
 0x596   :  { %v906_v29 = vmul.f32 %v5109_v20, %v889_v62  ;;  %vm911_vm12 = vweird.f32 %v5109_v20  ;;  %v816_v56 = vmul.f32 %v798_v0, %v6248_v8 }
 0x597   :  { %vm912_vm14 = vmor %vm910_vm13, %vm911_vm12 }
 0x598   :  { %v907_v14 = vsub.f32 1.0, %v906_v29  ;;  %v6418_v29 = vld [vmem:[%s8086_s2 + $0x78] sm:$0xff] }
 0x59a   :  { %v908_v16 = vmul.f32 %v5109_v20, %v907_v14  ;;  %v6425_v14 = vld [vmem:[%s8086_s2 + $0x68] sm:$0xff] }
 0x59c   :  { %v909_v31 = vadd.f32 %v5109_v20, %v908_v16  ;;  %v6432_v16 = vld [vmem:[%s8086_s2 + $0x58] sm:$0xff] }
 0x59e   :  { %v913_v61 = vsel %vm912_vm14, %v5109_v20, %v909_v31  ;;  %v6412_v20 = vld [vmem:[%s8086_s2 + $0x70] sm:$0xff]  ;;  %v952_v31 = vld [vmem:[#allocation3 + $0x30] sm:$0x30] }
 0x59f   :  { %v918_v37 = vsel %vm915_vm15, %v917_v63, %v913_v61  ;;  %v1061_v60 = vrot.slane %v952_v31, 4 }
 0x5c0   :  { %v819_v59 = vpop.permute.xlu0 %818 }
 0x5c1   :  { %v821_v28 = vmul.f32 %v819_v59, %v798_v0 }
 0x5c3   :  { %823 = vrot.lane.b32.xlu1 %v821_v28, %s5694_s9 }
 0x5dc   :  { %v935_v1 = vpop.permute.xlu2 %934 }
 0x5dd   :  { %v6291_v30 = vmul.f32 %v935_v1, %v918_v37 }
 0x5df   :  { %4854 = vmatmul.msk.f32.vlgmr.msra.gmra.mxu2 %vm283_vm11, %v6291_v30  ;;  %4855 = vmatmul.msk.f32.vlgmr.msra.gmra.mxu3 %vm283_vm11, %v6291_v30 }
 0x5e0   :  { %1516 = vmatpush.msra.mxu2 %v6300_v32  ;;  %1536 = vmatpush.msra.mxu3 %v6306_v33 }
 0x5e2   :  { %1517 = vmatpush.msra.mxu2 %v6312_v2  ;;  %1537 = vmatpush.msra.mxu3 %v6318_v34 }
 0x5e4   :  { %1518 = vmatpush.msra.mxu2 %v6324_v3  ;;  %1538 = vmatpush.msra.mxu3 %v6330_v54 }
 0x5e6   :  { %1519 = vmatpush.msra.mxu2 %v6336_v13  ;;  %1539 = vmatpush.msra.mxu3 %v6342_v35 }
 0x5e8   :  { %1520 = vmatpush.msra.mxu2 %v6348_v4  ;;  %1540 = vmatpush.msra.mxu3 %v6354_v41 }
 0x5ea   :  { %1521 = vmatpush.msra.mxu2 %v6360_v43  ;;  %1541 = vmatpush.msra.mxu3 %v6366_v46 }
 0x5ec   :  { %1522 = vmatpush.msra.mxu2 %v6372_v50  ;;  %1542 = vmatpush.msra.mxu3 %v6378_v51 }
 0x5ee   :  { %1523 = vmatpush.msra.mxu2 %v6384_v53  ;;  %1543 = vmatpush.msra.mxu3 %v6390_v19 }
 0x635   :  { %v824_v6 = vpop.permute.xlu1 %823 }
 0x636   :  { %v6394_v7 = vadd.f32 %v824_v6, %v816_v56 }
 0x638   :  { %5110 = vtanh.f32 %v6394_v7 }
 0x63e   :  { %v5111_v9 = vpop.eup %5110 }
 0x63f   :  { %829 = vrot.lane.b32.xlu2 %v5111_v9, %s5694_s9 }
 0x662   :  { %v1105_v18 = vpop.f32.mrf.mxu3  ;;  %v1085_v58 = vpop.f32.mrf.mxu2 }
 0x663   :  { %v6398_v15 = vadd.f32 %v1105_v18, %v1062_v12  ;;  %v1086_v61 = vadd.f32 %v1085_v58, %v1061_v60 }
 0x665   :  { %5112 = vtanh.f32 %v6398_v15 }
 0x666   :  { %5114 = vpow2.f32 %v4845_v47 }
 0x66b   :  { %v5113_v17 = vpop.eup %5112 }
 0x66c   :  { %1149 = vrot.lane.b32.xlu0 %v5113_v17, %s5694_s9  ;;  %v5115_v8 = vpop.eup %5114 }
 0x66d   :  { %v784_v21 = vadd.f32 1.0, %v5115_v8 }
 0x66f   :  { %5116 = vrcp.f32 %v784_v21  ;;  %v811_v62 = vand.u32 2147483648, %v784_v21  ;;  %vm805_vm1 = vweird.f32 %v784_v21  ;;  %v809_v24 = vand.u32 2147483647, %v784_v21 }
 0x671   :  { %v812_v59 = vor.u32 1.1754944e-38, %v811_v62  ;;  %vm810_vm3 = vcmp.eq.f32.partialorder %v809_v24, 8.507059e+37  ;;  %v950_v62 = vld [vmem:[#allocation2 + $0x30] sm:$0xc0] }
 0x675   :  { %v5117_v22 = vpop.eup %5116 }
 0x676   :  { %v801_v23 = vmul.f32 %v5117_v22, %v784_v21  ;;  %vm806_vm0 = vweird.f32 %v5117_v22 }
 0x677   :  { %vm807_vm2 = vmor %vm805_vm1, %vm806_vm0 }
 0x678   :  { %v802_v25 = vsub.f32 1.0, %v801_v23 }
 0x67a   :  { %v803_v26 = vmul.f32 %v5117_v22, %v802_v25 }
 0x67c   :  { %v804_v27 = vadd.f32 %v5117_v22, %v803_v26 }
 0x67e   :  { %v808_v39 = vsel %vm807_vm2, %v5117_v22, %v804_v27  ;;  %v951_v22 = vld [vmem:[#allocation2] sm:$0xc0] }
 0x67f   :  { %v813_v49 = vsel %vm810_vm3, %v812_v59, %v808_v39  ;;  %v957_v23 = vrot.slane %v951_v22, 6  ;;  %v956_v39 = vrot.slane %v950_v62, 6 }
 0x699   :  { %v830_v0 = vpop.permute.xlu2 %829 }
 0x69a   :  { %v6403_v28 = vmul.f32 %v830_v0, %v813_v49 }
 0x69c   :  { %4850 = vmatmul.msk.f32.vlgmr.msra.gmra.mxu0 %vm283_vm11, %v6403_v28  ;;  %4851 = vmatmul.msk.f32.vlgmr.msra.gmra.mxu1 %vm283_vm11, %v6403_v28 }
 0x69d   :  { %1417 = vmatpush.msra.mxu0 %v6412_v20  ;;  %1437 = vmatpush.msra.mxu1 %v6418_v29 }
 0x69f   :  { %1418 = vmatpush.msra.mxu0 %v6081_v38  ;;  %1438 = vmatpush.msra.mxu1 %v6425_v14  ;;  %v6439_v38 = vld [vmem:[%s8086_s2 + $0x48] sm:$0xff] }
 0x6a1   :  { %1419 = vmatpush.msra.mxu0 %v6087_v40  ;;  %1439 = vmatpush.msra.mxu1 %v6432_v16  ;;  %v6446_v40 = vld [vmem:[%s8086_s2 + $0x38] sm:$0xff] }
 0x6a3   :  { %1420 = vmatpush.msra.mxu0 %v6094_v5  ;;  %1440 = vmatpush.msra.mxu1 %v6439_v38  ;;  %v6453_v5 = vld [vmem:[%s8086_s2 + $0x28] sm:$0xff] }
 0x6a5   :  { %1421 = vmatpush.msra.mxu0 %v6099_v42  ;;  %1441 = vmatpush.msra.mxu1 %v6446_v40  ;;  %v6460_v42 = vld [vmem:[%s8086_s2 + $0x18] sm:$0xff] }
 0x6a7   :  { %1422 = vmatpush.msra.mxu0 %v6107_v44  ;;  %1442 = vmatpush.msra.mxu1 %v6453_v5  ;;  %v6467_v44 = vld [vmem:[%s8086_s2 + $0x8] sm:$0xff] }
 0x6a9   :  { %1423 = vmatpush.msra.mxu0 %v6113_v45  ;;  %1443 = vmatpush.msra.mxu1 %v6460_v42  ;;  %v4856_v45 = vmul.f32 -1.442695, %v1086_v61 }
 0x6ab   :  { %1424 = vmatpush.msra.mxu0 %v6120_v10  ;;  %1444 = vmatpush.msra.mxu1 %v6467_v44  ;;  %5118 = vpow2.f32 %v4856_v45 }
 0x6b1   :  { %v5119_v63 = vpop.eup %5118 }
 0x6b2   :  { %v1114_v37 = vadd.f32 1.0, %v5119_v63 }
 0x6b4   :  { %5120 = vrcp.f32 %v1114_v37  ;;  %v1127_v10 = vand.u32 2147483648, %v1114_v37  ;;  %vm1121_vm5 = vweird.f32 %v1114_v37  ;;  %v1125_v12 = vand.u32 2147483647, %v1114_v37 }
 0x6b6   :  { %v1128_v17 = vor.u32 1.1754944e-38, %v1127_v10  ;;  %vm1126_vm7 = vcmp.eq.f32.partialorder %v1125_v12, 8.507059e+37 }
 0x6ba   :  { %v5121_v1 = vpop.eup %5120 }
 0x6bb   :  { %v1117_v56 = vmul.f32 %v5121_v1, %v1114_v37  ;;  %vm1122_vm4 = vweird.f32 %v5121_v1 }
 0x6bc   :  { %vm1123_vm6 = vmor %vm1121_vm5, %vm1122_vm4 }
 0x6bd   :  { %v1118_v6 = vsub.f32 1.0, %v1117_v56 }
 0x6bf   :  { %v1119_v9 = vmul.f32 %v5121_v1, %v1118_v6 }
 0x6c1   :  { %v1120_v11 = vadd.f32 %v5121_v1, %v1119_v9 }
 0x6c3   :  { %v1124_v18 = vsel %vm1123_vm6, %v5121_v1, %v1120_v11 }
 0x6c4   :  { %v1129_v8 = vsel %vm1126_vm7, %v1128_v17, %v1124_v18 }
 0x6c5   :  { %v1147_v0 = vmul.f32 %v1129_v8, %v6285_v55 }
 0x6de   :  { %v1150_v47 = vpop.permute.xlu0 %1149 }
 0x6df   :  { %v1152_v21 = vmul.f32 %v1150_v47, %v1129_v8  ;;  %v4857_v47 = vmul.f32 -1.442695, %v6398_v15 }
 0x6e1   :  { %1154 = vrot.lane.b32.xlu1 %v1152_v21, %s5694_s9 }
 0x719   :  { %v1000_v25 = vpop.f32.mrf.mxu1  ;;  %v980_v24 = vpop.f32.mrf.mxu0 }
 0x71a   :  { %v6471_v26 = vadd.f32 %v1000_v25, %v957_v23  ;;  %v981_v59 = vadd.f32 %v980_v24, %v956_v39 }
 0x71c   :  { %5122 = vtanh.f32 %v6471_v26  ;;  %v4852_v49 = vmul.f32 -1.442695, %v981_v59 }
 0x71e   :  { %5124 = vpow2.f32 %v4852_v49 }
 0x722   :  { %v5123_v27 = vpop.eup %5122 }
 0x723   :  { %1044 = vrot.lane.b32.xlu2 %v5123_v27, %s5694_s9 }
 0x724   :  { %v5125_v60 = vpop.eup %5124 }
 0x725   :  { %v1009_v45 = vadd.f32 1.0, %v5125_v60 }
 0x727   :  { %v1022_v9 = vand.u32 2147483648, %v1009_v45  ;;  %vm1016_vm9 = vweird.f32 %v1009_v45  ;;  %v1020_v55 = vand.u32 2147483647, %v1009_v45 }
 0x729   :  { %v1023_v10 = vor.u32 1.1754944e-38, %v1022_v9  ;;  %vm1021_vm12 = vcmp.eq.f32.partialorder %v1020_v55, 8.507059e+37 }
 0x753   :  { %v1155_v31 = vpop.permute.xlu1 %1154 }
 0x754   :  { %v6476_v58 = vadd.f32 %v1155_v31, %v1147_v0 }
 0x756   :  { %5126 = vtanh.f32 %v6476_v58 }
 0x757   :  { %5128 = vrcp.f32 %v1009_v45 }
 0x758   :  { %5130 = vpow2.f32 %v4857_v47 }
 0x75c   :  { %v5127_v61 = vpop.eup %5126 }
 0x75d   :  { %1160 = vrot.lane.b32.xlu0 %v5127_v61, %s5694_s9  ;;  %v5129_v63 = vpop.eup %5128 }
 0x75e   :  { %v1012_v37 = vmul.f32 %v5129_v63, %v1009_v45  ;;  %vm1017_vm8 = vweird.f32 %v5129_v63  ;;  %v5131_v8 = vpop.eup %5130 }
 0x75f   :  { %vm1018_vm10 = vmor %vm1016_vm9, %vm1017_vm8  ;;  %v1115_v21 = vadd.f32 1.0, %v5131_v8 }
 0x760   :  { %v1013_v1 = vsub.f32 1.0, %v1012_v37  ;;  %v4853_v37 = vmul.f32 -1.442695, %v6471_v26 }
 0x761   :  { %5132 = vrcp.f32 %v1115_v21  ;;  %v1142_v24 = vand.u32 2147483648, %v1115_v21  ;;  %vm1136_vm14 = vweird.f32 %v1115_v21  ;;  %v1140_v39 = vand.u32 2147483647, %v1115_v21 }
 0x762   :  { %v1014_v56 = vmul.f32 %v5129_v63, %v1013_v1 }
 0x763   :  { %v1143_v49 = vor.u32 1.1754944e-38, %v1142_v24  ;;  %vm1141_vm0 = vcmp.eq.f32.partialorder %v1140_v39, 8.507059e+37  ;;  %v6531_v24 = vld [vmem:[%s8086_s2 + $0x50] sm:$0xff]  ;;  %v6539_v39 = vld [vmem:[%s8086_s2 + $0x40] sm:$0xff] }
 0x764   :  { %v1015_v6 = vadd.f32 %v5129_v63, %v1014_v56 }
 0x766   :  { %v1019_v11 = vsel %vm1018_vm10, %v5129_v63, %v1015_v6 }
 0x767   :  { %v1024_v18 = vsel %vm1021_vm12, %v1023_v10, %v1019_v11  ;;  %v5133_v22 = vpop.eup %5132 }
 0x768   :  { %v1132_v23 = vmul.f32 %v5133_v22, %v1115_v21  ;;  %vm1137_vm13 = vweird.f32 %v5133_v22  ;;  %v1042_v60 = vmul.f32 %v1024_v18, %v6394_v7 }
 0x769   :  { %vm1138_vm15 = vmor %vm1136_vm14, %vm1137_vm13 }
 0x76a   :  { %v1133_v25 = vsub.f32 1.0, %v1132_v23 }
 0x76c   :  { %v1134_v27 = vmul.f32 %v5133_v22, %v1133_v25 }
 0x76e   :  { %v1135_v62 = vadd.f32 %v5133_v22, %v1134_v27  ;;  %v6524_v27 = vld [vmem:[%s8086_s2 + $0x60] sm:$0xff] }
 0x770   :  { %v1139_v59 = vsel %vm1138_vm15, %v5133_v22, %v1135_v62 }
 0x771   :  { %v1144_v0 = vsel %vm1141_vm0, %v1143_v49, %v1139_v59  ;;  %v6546_v59 = vld [vmem:[%s8086_s2 + $0x30] sm:$0xff]  ;;  %v6553_v49 = vld [vmem:[%s8086_s2 + $0x20] sm:$0xff] }
 0x77d   :  { %v1045_v12 = vpop.permute.xlu2 %1044 }
 0x77e   :  { %v1047_v17 = vmul.f32 %v1045_v12, %v1024_v18  ;;  %v1179_v12 = vld [vmem:[#allocation3 + $0x18] sm:$0xc] }
 0x77f   :  { %v1282_v47 = vrot.slane %v1179_v12, 2 }
 0x780   :  { %1049 = vrot.lane.b32.xlu1 %v1047_v17, %s5694_s9 }
 0x7cf   :  { %v1161_v31 = vpop.permute.xlu0 %1160 }
 0x7d0   :  { %v6482_v15 = vmul.f32 %v1161_v31, %v1144_v0  ;;  %v6560_v0 = vld [vmem:[%s8086_s2 + $0x10] sm:$0xff]  ;;  %v6567_v31 = vld [vmem:[%s8086_s2] sm:$0xff] }
 0x7d2   :  { %4862 = vmatmul.msk.f32.vlgmr.msrb.gmra.mxu2 %vm283_vm11, %v6482_v15  ;;  %4863 = vmatmul.msk.f32.vlgmr.msrb.gmra.mxu3 %vm283_vm11, %v6482_v15 }
 0x7d3   :  { %1742 = vmatpush.msrb.mxu2 %v6300_v32  ;;  %1762 = vmatpush.msrb.mxu3 %v6306_v33 }
 0x7d5   :  { %1743 = vmatpush.msrb.mxu2 %v6312_v2  ;;  %1763 = vmatpush.msrb.mxu3 %v6318_v34 }
 0x7d7   :  { %1744 = vmatpush.msrb.mxu2 %v6324_v3  ;;  %1764 = vmatpush.msrb.mxu3 %v6330_v54 }
 0x7d9   :  { %1745 = vmatpush.msrb.mxu2 %v6336_v13  ;;  %1765 = vmatpush.msrb.mxu3 %v6342_v35 }
 0x7db   :  { %1746 = vmatpush.msrb.mxu2 %v6348_v4  ;;  %1766 = vmatpush.msrb.mxu3 %v6354_v41 }
 0x7dd   :  { %1747 = vmatpush.msrb.mxu2 %v6360_v43  ;;  %1767 = vmatpush.msrb.mxu3 %v6366_v46 }
 0x7df   :  { %1748 = vmatpush.msrb.mxu2 %v6372_v50  ;;  %1768 = vmatpush.msrb.mxu3 %v6378_v51 }
 0x7e1   :  { %1749 = vmatpush.msrb.mxu2 %v6384_v53  ;;  %1769 = vmatpush.msrb.mxu3 %v6390_v19 }
 0x7f2   :  { %v1050_v61 = vpop.permute.xlu1 %1049 }
 0x7f3   :  { %v6505_v45 = vadd.f32 %v1050_v61, %v1042_v60  ;;  %v1178_v60 = vld [vmem:[#allocation3 + $0x30] sm:$0xc] }
 0x7f5   :  { %5134 = vtanh.f32 %v6505_v45 }
 0x7f6   :  { %5136 = vpow2.f32 %v4853_v37 }
 0x7fb   :  { %v5135_v63 = vpop.eup %5134 }
 0x7fc   :  { %1055 = vrot.lane.b32.xlu2 %v5135_v63, %s5694_s9  ;;  %v5137_v1 = vpop.eup %5136  ;;  %v1281_v63 = vrot.slane %v1178_v60, 2 }
 0x7fd   :  { %v1010_v56 = vadd.f32 1.0, %v5137_v1 }
 0x7ff   :  { %5138 = vrcp.f32 %v1010_v56  ;;  %v1037_v7 = vand.u32 2147483648, %v1010_v56  ;;  %vm1031_vm2 = vweird.f32 %v1010_v56  ;;  %v1035_v18 = vand.u32 2147483647, %v1010_v56 }
 0x801   :  { %v1038_v8 = vor.u32 1.1754944e-38, %v1037_v7  ;;  %vm1036_vm4 = vcmp.eq.f32.partialorder %v1035_v18, 8.507059e+37 }
 0x805   :  { %v5139_v6 = vpop.eup %5138 }
 0x806   :  { %v1027_v9 = vmul.f32 %v5139_v6, %v1010_v56  ;;  %vm1032_vm1 = vweird.f32 %v5139_v6 }
 0x807   :  { %vm1033_vm3 = vmor %vm1031_vm2, %vm1032_vm1 }
 0x808   :  { %v1028_v55 = vsub.f32 1.0, %v1027_v9 }
 0x80a   :  { %v1029_v11 = vmul.f32 %v5139_v6, %v1028_v55 }
 0x80c   :  { %v1030_v10 = vadd.f32 %v5139_v6, %v1029_v11 }
 0x80e   :  { %v1034_v17 = vsel %vm1033_vm3, %v5139_v6, %v1030_v10 }
 0x80f   :  { %v1039_v22 = vsel %vm1036_vm4, %v1038_v8, %v1034_v17 }
 0x855   :  { %v1325_v21 = vpop.f32.mrf.mxu3  ;;  %v1305_v61 = vpop.f32.mrf.mxu2 }
 0x856   :  { %v6510_v26 = vadd.f32 %v1325_v21, %v1282_v47  ;;  %v1056_v23 = vpop.permute.xlu2 %1055  ;;  %v1306_v37 = vadd.f32 %v1305_v61, %v1281_v63 }
 0x857   :  { %v6512_v25 = vmul.f32 %v1056_v23, %v1039_v22  ;;  %v1177_v23 = vld [vmem:[#allocation2 + $0x10] sm:$0x3] }
 0x858   :  { %5140 = vtanh.f32 %v6510_v26  ;;  %v4864_v1 = vmul.f32 -1.442695, %v1306_v37  ;;  %v1176_v37 = vld [vmem:[#allocation2 + $0x18] sm:$0x3] }
 0x859   :  { %8117 = vst [vmem:[#allocation12_spill] sm:$0xff] %v6512_v25  ;;  %4858 = vmatmul.msk.f32.vlgmr.msrb.gmra.mxu0 %vm283_vm11, %v6512_v25  ;;  %4859 = vmatmul.msk.f32.vlgmr.msrb.gmra.mxu1 %vm283_vm11, %v6512_v25 }
 0x85a   :  { %1637 = vmatpush.msrb.mxu0 %v6412_v20  ;;  %1657 = vmatpush.msrb.mxu1 %v6418_v29  ;;  %5142 = vpow2.f32 %v4864_v1 }
 0x85c   :  { %1638 = vmatpush.msrb.mxu0 %v6524_v27  ;;  %1658 = vmatpush.msrb.mxu1 %v6425_v14 }
 0x85e   :  { %v5141_v62 = vpop.eup %5140  ;;  %1639 = vmatpush.msrb.mxu0 %v6531_v24  ;;  %1659 = vmatpush.msrb.mxu1 %v6432_v16 }
 0x85f   :  { %1369 = vrot.lane.b32.xlu0 %v5141_v62, %s5694_s9 }
 0x860   :  { %1640 = vmatpush.msrb.mxu0 %v6539_v39  ;;  %1660 = vmatpush.msrb.mxu1 %v6439_v38  ;;  %v5143_v56 = vpop.eup %5142 }
 0x861   :  { %v1334_v6 = vadd.f32 1.0, %v5143_v56 }
 0x862   :  { %1641 = vmatpush.msrb.mxu0 %v6546_v59  ;;  %1661 = vmatpush.msrb.mxu1 %v6446_v40 }
 0x863   :  { %5144 = vrcp.f32 %v1334_v6  ;;  %v1347_v12 = vand.u32 2147483648, %v1334_v6  ;;  %vm1341_vm6 = vweird.f32 %v1334_v6  ;;  %v1345_v18 = vand.u32 2147483647, %v1334_v6 }
 0x864   :  { %1642 = vmatpush.msrb.mxu0 %v6553_v49  ;;  %1662 = vmatpush.msrb.mxu1 %v6453_v5 }
 0x865   :  { %v1348_v47 = vor.u32 1.1754944e-38, %v1347_v12  ;;  %vm1346_vm8 = vcmp.eq.f32.partialorder %v1345_v18, 8.507059e+37 }
 0x866   :  { %1643 = vmatpush.msrb.mxu0 %v6560_v0  ;;  %1663 = vmatpush.msrb.mxu1 %v6460_v42 }
 0x868   :  { %1644 = vmatpush.msrb.mxu0 %v6567_v31  ;;  %1664 = vmatpush.msrb.mxu1 %v6467_v44 }
 0x869   :  { %v5145_v9 = vpop.eup %5144 }
 0x86a   :  { %v1337_v55 = vmul.f32 %v5145_v9, %v1334_v6  ;;  %vm1342_vm5 = vweird.f32 %v5145_v9 }
 0x86b   :  { %vm1343_vm7 = vmor %vm1341_vm6, %vm1342_vm5 }
 0x86c   :  { %v1338_v11 = vsub.f32 1.0, %v1337_v55 }
 0x86e   :  { %v1339_v10 = vmul.f32 %v5145_v9, %v1338_v11 }
 0x870   :  { %v1340_v7 = vadd.f32 %v5145_v9, %v1339_v10 }
 0x872   :  { %v1344_v17 = vsel %vm1343_vm7, %v5145_v9, %v1340_v7 }
 0x873   :  { %v1349_v21 = vsel %vm1346_vm8, %v1348_v47, %v1344_v17 }
 0x8d1   :  { %v1370_v8 = vpop.permute.xlu0 %1369 }
 0x8d2   :  { %v1372_v22 = vmul.f32 %v1370_v8, %v1349_v21 }
 0x8d4   :  { %1374 = vrot.lane.b32.xlu1 %v1372_v22, %s5694_s9 }
 0x8d6   :  { %v1220_v62 = vpop.f32.mrf.mxu1  ;;  %v1200_v63 = vpop.f32.mrf.mxu0 }
 0x8d7   :  { %v6572_v60 = vadd.f32 %v1220_v62, %v1177_v23  ;;  %v1201_v1 = vadd.f32 %v1200_v63, %v1176_v37 }
 0x8d9   :  { %5146 = vtanh.f32 %v6572_v60  ;;  %v4860_v56 = vmul.f32 -1.442695, %v1201_v1 }
 0x8db   :  { %5148 = vpow2.f32 %v4860_v56  ;;  %v4865_v56 = vmul.f32 -1.442695, %v6510_v26 }
 0x8df   :  { %v5147_v61 = vpop.eup %5146 }
 0x8e0   :  { %1264 = vrot.lane.b32.xlu2 %v5147_v61, %s5694_s9  ;;  %v1367_v61 = vmul.f32 %v1349_v21, %v6476_v58 }
 0x8e1   :  { %v5149_v6 = vpop.eup %5148 }
 0x8e2   :  { %v1229_v9 = vadd.f32 1.0, %v5149_v6 }
 0x8e4   :  { %5150 = vrcp.f32 %v1229_v9  ;;  %v1242_v18 = vand.u32 2147483648, %v1229_v9  ;;  %vm1236_vm10 = vweird.f32 %v1229_v9  ;;  %v1240_v17 = vand.u32 2147483647, %v1229_v9 }
 0x8e6   :  { %v1243_v8 = vor.u32 1.1754944e-38, %v1242_v18  ;;  %vm1241_vm13 = vcmp.eq.f32.partialorder %v1240_v17, 8.507059e+37 }
 0x8ea   :  { %v5151_v55 = vpop.eup %5150 }
 0x8eb   :  { %v1232_v11 = vmul.f32 %v5151_v55, %v1229_v9  ;;  %vm1237_vm9 = vweird.f32 %v5151_v55 }
 0x8ec   :  { %vm1238_vm12 = vmor %vm1236_vm10, %vm1237_vm9 }
 0x8ed   :  { %v1233_v10 = vsub.f32 1.0, %v1232_v11 }
 0x8ef   :  { %v1234_v7 = vmul.f32 %v5151_v55, %v1233_v10 }
 0x8f1   :  { %v1235_v12 = vadd.f32 %v5151_v55, %v1234_v7 }
 0x8f3   :  { %v1239_v47 = vsel %vm1238_vm12, %v5151_v55, %v1235_v12 }
 0x8f4   :  { %v1244_v23 = vsel %vm1241_vm13, %v1243_v8, %v1239_v47 }
 0x8f5   :  { %v1262_v11 = vmul.f32 %v1244_v23, %v6505_v45 }
 0x93a   :  { %v1265_v22 = vpop.permute.xlu2 %1264 }
 0x93b   :  { %v1267_v62 = vmul.f32 %v1265_v22, %v1244_v23 }
 0x93d   :  { %1269 = vrot.lane.b32.xlu1 %v1267_v62, %s5694_s9 }
 0x946   :  { %v1375_v63 = vpop.permute.xlu1 %1374 }
 0x947   :  { %v6578_v37 = vadd.f32 %v1375_v63, %v1367_v61  ;;  %v4861_v61 = vmul.f32 -1.442695, %v6572_v60 }
 0x949   :  { %5152 = vtanh.f32 %v6578_v37 }
 0x94a   :  { %5154 = vpow2.f32 %v4865_v56 }
 0x94f   :  { %v5153_v1 = vpop.eup %5152 }
 0x950   :  { %1380 = vrot.lane.b32.xlu0 %v5153_v1, %s5694_s9  ;;  %v5155_v6 = vpop.eup %5154 }
 0x951   :  { %v1335_v9 = vadd.f32 1.0, %v5155_v6 }
 0x953   :  { %5156 = vrcp.f32 %v1335_v9  ;;  %v1362_v26 = vand.u32 2147483648, %v1335_v9  ;;  %vm1356_vm15 = vweird.f32 %v1335_v9  ;;  %v1360_v47 = vand.u32 2147483647, %v1335_v9 }
 0x955   :  { %v1363_v22 = vor.u32 1.1754944e-38, %v1362_v26  ;;  %vm1361_vm1 = vcmp.eq.f32.partialorder %v1360_v47, 8.507059e+37  ;;  %v1399_v26 = vld [vmem:[#allocation3 + $0x18] sm:$0x3] }
 0x959   :  { %v5157_v55 = vpop.eup %5156 }
 0x95a   :  { %v1352_v7 = vmul.f32 %v5157_v55, %v1335_v9  ;;  %vm1357_vm14 = vweird.f32 %v5157_v55 }
 0x95b   :  { %vm1358_vm0 = vmor %vm1356_vm15, %vm1357_vm14 }
 0x95c   :  { %v1353_v21 = vsub.f32 1.0, %v1352_v7 }
 0x95e   :  { %v1354_v12 = vmul.f32 %v5157_v55, %v1353_v21 }
 0x960   :  { %v1355_v17 = vadd.f32 %v5157_v55, %v1354_v12 }
 0x962   :  { %v1359_v8 = vsel %vm1358_vm0, %v5157_v55, %v1355_v17 }
 0x963   :  { %v1364_v45 = vsel %vm1361_vm1, %v1363_v22, %v1359_v8 }
 0x9af   :  { %v1270_v10 = vpop.permute.xlu1 %1269 }
 0x9b0   :  { %v6584_v58 = vadd.f32 %v1270_v10, %v1262_v11 }
 0x9b2   :  { %5158 = vtanh.f32 %v6584_v58 }
 0x9b3   :  { %5160 = vpow2.f32 %v4861_v61  ;;  %v1398_v61 = vld [vmem:[#allocation3 + $0x30] sm:$0x3] }
 0x9b8   :  { %v5159_v18 = vpop.eup %5158 }
 0x9b9   :  { %1275 = vrot.lane.b32.xlu2 %v5159_v18, %s5694_s9  ;;  %v5161_v63 = vpop.eup %5160 }
 0x9ba   :  { %v1230_v1 = vadd.f32 1.0, %v5161_v63 }
 0x9bc   :  { %5162 = vrcp.f32 %v1230_v1  ;;  %v1257_v10 = vand.u32 2147483648, %v1230_v1  ;;  %vm1251_vm3 = vweird.f32 %v1230_v1  ;;  %v1255_v7 = vand.u32 2147483647, %v1230_v1 }
 0x9be   :  { %v1258_v12 = vor.u32 1.1754944e-38, %v1257_v10  ;;  %vm1256_vm5 = vcmp.eq.f32.partialorder %v1255_v7, 8.507059e+37 }
 0x9c2   :  { %v1381_v23 = vpop.permute.xlu0 %1380  ;;  %v5163_v56 = vpop.eup %5162 }
 0x9c3   :  { %v6588_v62 = vmul.f32 %v1381_v23, %v1364_v45  ;;  %v1247_v6 = vmul.f32 %v5163_v56, %v1230_v1  ;;  %vm1252_vm2 = vweird.f32 %v5163_v56  ;;  %v1397_v45 = vld [vmem:[#allocation2 + $0x10] sm:$0xc] }
 0x9c4   :  { %vm1253_vm4 = vmor %vm1251_vm3, %vm1252_vm2  ;;  %v1403_v63 = vrot.slane %v1397_v45, 2 }
 0x9c5   :  { %4870 = vmatmul.msk.f32.vlgmr.msra.gmra.mxu2 %vm283_vm11, %v6588_v62  ;;  %4871 = vmatmul.msk.f32.vlgmr.msra.gmra.mxu3 %vm283_vm11, %v6588_v62  ;;  %v1248_v9 = vsub.f32 1.0, %v1247_v6 }
 0x9c6   :  { %1968 = vmatpush.msra.mxu2 %v6300_v32  ;;  %1988 = vmatpush.msra.mxu3 %v6306_v33 }
 0x9c7   :  { %v1249_v55 = vmul.f32 %v5163_v56, %v1248_v9 }
 0x9c8   :  { %1969 = vmatpush.msra.mxu2 %v6312_v2  ;;  %1989 = vmatpush.msra.mxu3 %v6318_v34 }
 0x9c9   :  { %v1250_v11 = vadd.f32 %v5163_v56, %v1249_v55 }
 0x9ca   :  { %1970 = vmatpush.msra.mxu2 %v6324_v3  ;;  %1990 = vmatpush.msra.mxu3 %v6330_v54 }
 0x9cb   :  { %v1254_v21 = vsel %vm1253_vm4, %v5163_v56, %v1250_v11 }
 0x9cc   :  { %1971 = vmatpush.msra.mxu2 %v6336_v13  ;;  %1991 = vmatpush.msra.mxu3 %v6342_v35  ;;  %v1259_v18 = vsel %vm1256_vm5, %v1258_v12, %v1254_v21 }
 0x9ce   :  { %1972 = vmatpush.msra.mxu2 %v6348_v4  ;;  %1992 = vmatpush.msra.mxu3 %v6354_v41 }
 0x9d0   :  { %1973 = vmatpush.msra.mxu2 %v6360_v43  ;;  %1993 = vmatpush.msra.mxu3 %v6366_v46 }
 0x9d2   :  { %1974 = vmatpush.msra.mxu2 %v6372_v50  ;;  %1994 = vmatpush.msra.mxu3 %v6378_v51 }
 0x9d4   :  { %1975 = vmatpush.msra.mxu2 %v6384_v53  ;;  %1995 = vmatpush.msra.mxu3 %v6390_v19 }
 0xa13   :  { %v1276_v17 = vpop.permute.xlu2 %1275 }
 0xa14   :  { %v6611_v60 = vmul.f32 %v1276_v17, %v1259_v18 }
 0xa16   :  { %8118 = vst [vmem:[#allocation13_spill] sm:$0xff] %v6611_v60  ;;  %4866 = vmatmul.msk.f32.vlgmr.msra.gmra.mxu0 %vm283_vm11, %v6611_v60  ;;  %4867 = vmatmul.msk.f32.vlgmr.msra.gmra.mxu1 %vm283_vm11, %v6611_v60 }
 0xa17   :  { %1863 = vmatpush.msra.mxu0 %v6412_v20  ;;  %1883 = vmatpush.msra.mxu1 %v6418_v29 }
 0xa19   :  { %1864 = vmatpush.msra.mxu0 %v6524_v27  ;;  %1884 = vmatpush.msra.mxu1 %v6425_v14 }
 0xa1b   :  { %1865 = vmatpush.msra.mxu0 %v6531_v24  ;;  %1885 = vmatpush.msra.mxu1 %v6432_v16 }
 0xa1d   :  { %1866 = vmatpush.msra.mxu0 %v6539_v39  ;;  %1886 = vmatpush.msra.mxu1 %v6439_v38 }
 0xa1f   :  { %1867 = vmatpush.msra.mxu0 %v6546_v59  ;;  %1887 = vmatpush.msra.mxu1 %v6446_v40 }
 0xa21   :  { %1868 = vmatpush.msra.mxu0 %v6553_v49  ;;  %1888 = vmatpush.msra.mxu1 %v6453_v5 }
 0xa23   :  { %1869 = vmatpush.msra.mxu0 %v6560_v0  ;;  %1889 = vmatpush.msra.mxu1 %v6460_v42 }
 0xa25   :  { %1870 = vmatpush.msra.mxu0 %v6567_v31  ;;  %1890 = vmatpush.msra.mxu1 %v6467_v44 }
 0xa48   :  { %v1545_v47 = vpop.f32.mrf.mxu3  ;;  %v1525_v23 = vpop.f32.mrf.mxu2 }
 0xa49   :  { %v6633_v8 = vadd.f32 %v1545_v47, %v1399_v26  ;;  %v1526_v1 = vadd.f32 %v1525_v23, %v1398_v61 }
 0xa4b   :  { %5164 = vtanh.f32 %v6633_v8  ;;  %v4872_v9 = vmul.f32 -1.442695, %v1526_v1 }
 0xa51   :  { %v5165_v22 = vpop.eup %5164 }
 0xa52   :  { %1589 = vrot.lane.b32.xlu0 %v5165_v22, %s5694_s9  ;;  %v1396_v22 = vld [vmem:[#allocation2 + $0x18] sm:$0xc] }
 0xa93   :  { %v1446_v56 = vpop.f32.mrf.mxu1  ;;  %v1426_v61 = vpop.f32.mrf.mxu0 }
 0xa94   :  { %v6637_v6 = vadd.f32 %v1446_v56, %v1403_v63  ;;  %v1402_v63 = vrot.slane %v1396_v22, 2 }
 0xa96   :  { %5166 = vtanh.f32 %v6637_v6 }
 0xa97   :  { %5168 = vpow2.f32 %v4872_v9 }
 0xa9c   :  { %v5167_v55 = vpop.eup %5166 }
 0xa9d   :  { %1490 = vrot.lane.b32.xlu2 %v5167_v55, %s5694_s9  ;;  %v5169_v11 = vpop.eup %5168  ;;  %v1427_v55 = vadd.f32 %v1426_v61, %v1402_v63 }
 0xa9e   :  { %v1554_v10 = vadd.f32 1.0, %v5169_v11 }
 0xa9f   :  { %v4868_v11 = vmul.f32 -1.442695, %v1427_v55 }
 0xaa0   :  { %5170 = vrcp.f32 %v1554_v10  ;;  %v1567_v26 = vand.u32 2147483648, %v1554_v10  ;;  %vm1561_vm7 = vweird.f32 %v1554_v10  ;;  %v1565_v47 = vand.u32 2147483647, %v1554_v10 }
 0xaa1   :  { %5172 = vpow2.f32 %v4868_v11 }
 0xaa2   :  { %v1568_v23 = vor.u32 1.1754944e-38, %v1567_v26  ;;  %vm1566_vm9 = vcmp.eq.f32.partialorder %v1565_v47, 8.507059e+37 }
 0xaa6   :  { %v5171_v7 = vpop.eup %5170 }
 0xaa7   :  { %v1557_v21 = vmul.f32 %v5171_v7, %v1554_v10  ;;  %vm1562_vm6 = vweird.f32 %v5171_v7 }
 0xaa8   :  { %vm1563_vm8 = vmor %vm1561_vm7, %vm1562_vm6 }
 0xaa9   :  { %v1558_v12 = vsub.f32 1.0, %v1557_v21  ;;  %v5173_v21 = vpop.eup %5172 }
 0xaab   :  { %v1559_v18 = vmul.f32 %v5171_v7, %v1558_v12  ;;  %v1455_v12 = vadd.f32 1.0, %v5173_v21 }
 0xaad   :  { %v1560_v17 = vadd.f32 %v5171_v7, %v1559_v18  ;;  %5174 = vrcp.f32 %v1455_v12  ;;  %vm1462_vm12 = vweird.f32 %v1455_v12  ;;  %v1466_v26 = vand.u32 2147483647, %v1455_v12 }
 0xaaf   :  { %v1564_v45 = vsel %vm1563_vm8, %v5171_v7, %v1560_v17  ;;  %v1468_v17 = vand.u32 2147483648, %v1455_v12  ;;  %vm1467_vm14 = vcmp.eq.f32.partialorder %v1466_v26, 8.507059e+37 }
 0xab0   :  { %v1569_v56 = vsel %vm1566_vm9, %v1568_v23, %v1564_v45 }
 0xab1   :  { %v1469_v22 = vor.u32 1.1754944e-38, %v1468_v17  ;;  %v1587_v63 = vmul.f32 %v1569_v56, %v6578_v37  ;;  %v4873_v37 = vmul.f32 -1.442695, %v6633_v8 }
 0xab3   :  { %v5175_v18 = vpop.eup %5174 }
 0xab4   :  { %v1458_v10 = vmul.f32 %v5175_v18, %v1455_v12  ;;  %vm1463_vm10 = vweird.f32 %v5175_v18 }
 0xab5   :  { %vm1464_vm13 = vmor %vm1462_vm12, %vm1463_vm10 }
 0xab6   :  { %v1459_v25 = vsub.f32 1.0, %v1458_v10 }
 0xab8   :  { %v1460_v60 = vmul.f32 %v5175_v18, %v1459_v25 }
 0xaba   :  { %v1461_v7 = vadd.f32 %v5175_v18, %v1460_v60 }
 0xabc   :  { %v1465_v47 = vsel %vm1464_vm13, %v5175_v18, %v1461_v7  ;;  %v4869_v7 = vmul.f32 -1.442695, %v6637_v6 }
 0xabd   :  { %v1470_v23 = vsel %vm1467_vm14, %v1469_v22, %v1465_v47 }
 0xabe   :  { %v1488_v60 = vmul.f32 %v1470_v23, %v6584_v58 }
 0xac4   :  { %v1590_v1 = vpop.permute.xlu0 %1589 }
 0xac5   :  { %v1592_v9 = vmul.f32 %v1590_v1, %v1569_v56 }
 0xac7   :  { %1594 = vrot.lane.b32.xlu1 %v1592_v9, %s5694_s9 }
 0xaf7   :  { %v1491_v45 = vpop.permute.xlu2 %1490 }
 0xaf8   :  { %v1493_v61 = vmul.f32 %v1491_v45, %v1470_v23 }
 0xafa   :  { %1495 = vrot.lane.b32.xlu1 %v1493_v61, %s5694_s9 }
 0xb39   :  { %v1595_v1 = vpop.permute.xlu1 %1594 }
 0xb3a   :  { %v6644_v9 = vadd.f32 %v1595_v1, %v1587_v63 }
 0xb3c   :  { %5176 = vtanh.f32 %v6644_v9 }
 0xb42   :  { %v5177_v25 = vpop.eup %5176 }
 0xb43   :  { %1600 = vrot.lane.b32.xlu0 %v5177_v25, %s5694_s9 }
 0xb6c   :  { %v1496_v55 = vpop.permute.xlu1 %1495 }
 0xb6d   :  { %v6649_v11 = vadd.f32 %v1496_v55, %v1488_v60 }
 0xb6f   :  { %5178 = vtanh.f32 %v6649_v11 }
 0xb70   :  { %5180 = vpow2.f32 %v4873_v37 }
 0xb75   :  { %v5179_v21 = vpop.eup %5178 }
 0xb76   :  { %1501 = vrot.lane.b32.xlu2 %v5179_v21, %s5694_s9  ;;  %v5181_v56 = vpop.eup %5180 }
 0xb77   :  { %v1555_v12 = vadd.f32 1.0, %v5181_v56 }
 0xb79   :  { %5182 = vrcp.f32 %v1555_v12  ;;  %v1582_v22 = vand.u32 2147483648, %v1555_v12  ;;  %vm1576_vm0 = vweird.f32 %v1555_v12  ;;  %v1580_v23 = vand.u32 2147483647, %v1555_v12 }
 0xb7a   :  { %5184 = vpow2.f32 %v4869_v7 }
 0xb7b   :  { %v1583_v61 = vor.u32 1.1754944e-38, %v1582_v22  ;;  %vm1581_vm2 = vcmp.eq.f32.partialorder %v1580_v23, 8.507059e+37 }
 0xb7f   :  { %v5183_v18 = vpop.eup %5182 }
 0xb80   :  { %v1572_v10 = vmul.f32 %v5183_v18, %v1555_v12  ;;  %v5185_v26 = vpop.eup %5184  ;;  %vm1577_vm15 = vweird.f32 %v5183_v18 }
 0xb81   :  { %v1456_v45 = vadd.f32 1.0, %v5185_v26  ;;  %vm1578_vm1 = vmor %vm1576_vm0, %vm1577_vm15 }
 0xb82   :  { %v1573_v17 = vsub.f32 1.0, %v1572_v10 }
 0xb83   :  { %5186 = vrcp.f32 %v1456_v45  ;;  %vm1477_vm4 = vweird.f32 %v1456_v45 }
 0xb84   :  { %v1574_v58 = vmul.f32 %v5183_v18, %v1573_v17 }
 0xb86   :  { %v1575_v47 = vadd.f32 %v5183_v18, %v1574_v58 }
 0xb88   :  { %v1579_v8 = vsel %vm1578_vm1, %v5183_v18, %v1575_v47 }
 0xb89   :  { %v1584_v63 = vsel %vm1581_vm2, %v1583_v61, %v1579_v8  ;;  %v5187_v6 = vpop.eup %5186 }
 0xb8a   :  { %v1473_v60 = vmul.f32 %v5187_v6, %v1456_v45  ;;  %vm1478_vm3 = vweird.f32 %v5187_v6 }
 0xb8b   :  { %vm1479_vm5 = vmor %vm1477_vm4, %vm1478_vm3 }
 0xb8c   :  { %v1474_v55 = vsub.f32 1.0, %v1473_v60 }
 0xbb5   :  { %v1601_v1 = vpop.permute.xlu0 %1600 }
 0xbb6   :  { %v6655_v25 = vmul.f32 %v1601_v1, %v1584_v63 }
 0xbb8   :  { %8119 = vst [vmem:[#allocation14_spill] sm:$0xff] %v6655_v25  ;;  %4878 = vmatmul.msk.f32.vlgmr.msrb.gmra.mxu2 %vm283_vm11, %v6655_v25  ;;  %4879 = vmatmul.msk.f32.vlgmr.msrb.gmra.mxu3 %vm283_vm11, %v6655_v25 }
 0xbb9   :  { %2188 = vmatpush.msrb.mxu2 %v6300_v32  ;;  %2208 = vmatpush.msrb.mxu3 %v6306_v33  ;;  %v1475_v32 = vmul.f32 %v5187_v6, %v1474_v55 }
 0xbbb   :  { %2189 = vmatpush.msrb.mxu2 %v6312_v2  ;;  %2209 = vmatpush.msrb.mxu3 %v6318_v34  ;;  %v1476_v33 = vadd.f32 %v5187_v6, %v1475_v32  ;;  %v1483_v2 = vand.u32 2147483648, %v1456_v45  ;;  %v1481_v34 = vand.u32 2147483647, %v1456_v45 }
 0xbbd   :  { %2190 = vmatpush.msrb.mxu2 %v6324_v3  ;;  %2210 = vmatpush.msrb.mxu3 %v6330_v54  ;;  %v1480_v3 = vsel %vm1479_vm5, %v5187_v6, %v1476_v33  ;;  %v1484_v54 = vor.u32 1.1754944e-38, %v1483_v2  ;;  %vm1482_vm6 = vcmp.eq.f32.partialorder %v1481_v34, 8.507059e+37 }
 0xbbf   :  { %2191 = vmatpush.msrb.mxu2 %v6336_v13  ;;  %2211 = vmatpush.msrb.mxu3 %v6342_v35  ;;  %v1485_v13 = vsel %vm1482_vm6, %v1484_v54, %v1480_v3 }
 0xbc1   :  { %2192 = vmatpush.msrb.mxu2 %v6348_v4  ;;  %2212 = vmatpush.msrb.mxu3 %v6354_v41  ;;  %v1619_v41 = vld [vmem:[#allocation3 + $0x8] sm:$0xc0] }
 0xbc3   :  { %2193 = vmatpush.msrb.mxu2 %v6360_v43  ;;  %2213 = vmatpush.msrb.mxu3 %v6366_v46  ;;  %v1728_v43 = vrot.slane %v1619_v41, 6 }
 0xbc5   :  { %2194 = vmatpush.msrb.mxu2 %v6372_v50  ;;  %2214 = vmatpush.msrb.mxu3 %v6378_v51 }
 0xbc7   :  { %2195 = vmatpush.msrb.mxu2 %v6384_v53  ;;  %2215 = vmatpush.msrb.mxu3 %v6390_v19  ;;  %v1617_v53 = vld [vmem:[#allocation2 + $0x10] sm:$0x30] }
 0xbc8   :  { %v1623_v19 = vrot.slane %v1617_v53, 4 }
 0xbd0   :  { %v1502_v35 = vpop.permute.xlu2 %1501 }
 0xbd1   :  { %v6677_v4 = vmul.f32 %v1502_v35, %v1485_v13 }
 0xbd3   :  { %4874 = vmatmul.msk.f32.vlgmr.msrb.gmra.mxu0 %vm283_vm11, %v6677_v4  ;;  %4875 = vmatmul.msk.f32.vlgmr.msrb.gmra.mxu1 %vm283_vm11, %v6677_v4 }
 0xbd4   :  { %2083 = vmatpush.msrb.mxu0 %v6412_v20  ;;  %2103 = vmatpush.msrb.mxu1 %v6418_v29 }
 0xbd6   :  { %2084 = vmatpush.msrb.mxu0 %v6524_v27  ;;  %2104 = vmatpush.msrb.mxu1 %v6425_v14 }
 0xbd8   :  { %2085 = vmatpush.msrb.mxu0 %v6531_v24  ;;  %2105 = vmatpush.msrb.mxu1 %v6432_v16  ;;  %v1618_v16 = vld [vmem:[#allocation3 + $0x38] sm:$0xc0] }
 0xbda   :  { %2086 = vmatpush.msrb.mxu0 %v6539_v39  ;;  %2106 = vmatpush.msrb.mxu1 %v6439_v38 }
 0xbdc   :  { %2087 = vmatpush.msrb.mxu0 %v6546_v59  ;;  %2107 = vmatpush.msrb.mxu1 %v6446_v40  ;;  %v1727_v40 = vrot.slane %v1618_v16, 6 }
 0xbde   :  { %2088 = vmatpush.msrb.mxu0 %v6553_v49  ;;  %2108 = vmatpush.msrb.mxu1 %v6453_v5 }
 0xbe0   :  { %2089 = vmatpush.msrb.mxu0 %v6560_v0  ;;  %2109 = vmatpush.msrb.mxu1 %v6460_v42  ;;  %v1616_v42 = vld [vmem:[#allocation2 + $0x18] sm:$0x30] }
 0xbe1   :  { %v1622_v37 = vrot.slane %v1616_v42, 4 }
 0xbe2   :  { %2090 = vmatpush.msrb.mxu0 %v6567_v31  ;;  %2110 = vmatpush.msrb.mxu1 %v6467_v44 }
 0xc3b   :  { %v1771_v46 = vpop.f32.mrf.mxu3  ;;  %v1751_v38 = vpop.f32.mrf.mxu2 }
 0xc3c   :  { %v6699_v50 = vadd.f32 %v1771_v46, %v1728_v43  ;;  %v1752_v5 = vadd.f32 %v1751_v38, %v1727_v40 }
 0xc3e   :  { %5188 = vtanh.f32 %v6699_v50  ;;  %v4880_v44 = vmul.f32 -1.442695, %v1752_v5 }
 0xc44   :  { %v5189_v51 = vpop.eup %5188 }
 0xc45   :  { %1815 = vrot.lane.b32.xlu0 %v5189_v51, %s5694_s9 }
 0xc50   :  { %v1666_v20 = vpop.f32.mrf.mxu1  ;;  %v1646_v21 = vpop.f32.mrf.mxu0 }
 0xc51   :  { %v6703_v29 = vadd.f32 %v1666_v20, %v1623_v19  ;;  %v1647_v56 = vadd.f32 %v1646_v21, %v1622_v37 }
 0xc53   :  { %5190 = vtanh.f32 %v6703_v29  ;;  %v4876_v12 = vmul.f32 -1.442695, %v1647_v56 }
 0xc54   :  { %5192 = vpow2.f32 %v4880_v44  ;;  %v4881_v44 = vmul.f32 -1.442695, %v6699_v50 }
 0xc55   :  { %5194 = vpow2.f32 %v4876_v12 }
 0xc59   :  { %v5191_v14 = vpop.eup %5190 }
 0xc5a   :  { %1710 = vrot.lane.b32.xlu2 %v5191_v14, %s5694_s9  ;;  %v5193_v18 = vpop.eup %5192 }
 0xc5b   :  { %v1780_v10 = vadd.f32 1.0, %v5193_v18  ;;  %v5195_v7 = vpop.eup %5194 }
 0xc5c   :  { %v1675_v17 = vadd.f32 1.0, %v5195_v7 }
 0xc5d   :  { %5196 = vrcp.f32 %v1780_v10  ;;  %v1793_v63 = vand.u32 2147483648, %v1780_v10  ;;  %vm1787_vm8 = vweird.f32 %v1780_v10  ;;  %v1791_v1 = vand.u32 2147483647, %v1780_v10 }
 0xc5e   :  { %5198 = vrcp.f32 %v1675_v17  ;;  %v1688_v3 = vand.u32 2147483648, %v1675_v17  ;;  %vm1682_vm13 = vweird.f32 %v1675_v17  ;;  %v1686_v54 = vand.u32 2147483647, %v1675_v17 }
 0xc5f   :  { %v1794_v55 = vor.u32 1.1754944e-38, %v1793_v63  ;;  %vm1792_vm10 = vcmp.eq.f32.partialorder %v1791_v1, 8.507059e+37  ;;  %v6743_v1 = vld [vmem:[%s8086_s2 + $0x68] sm:$0xff] }
 0xc60   :  { %v1689_v41 = vor.u32 1.1754944e-38, %v1688_v3  ;;  %vm1687_vm15 = vcmp.eq.f32.partialorder %v1686_v54, 8.507059e+37  ;;  %v6778_v3 = vld [vmem:[%s8086_s2 + $0x18] sm:$0xff]  ;;  %v6787_v54 = vld [vmem:[%s8086_s2 + $0x8] sm:$0xff] }
 0xc63   :  { %v5197_v58 = vpop.eup %5196 }
 0xc64   :  { %v1783_v26 = vmul.f32 %v5197_v58, %v1780_v10  ;;  %v5199_v22 = vpop.eup %5198  ;;  %vm1788_vm7 = vweird.f32 %v5197_v58 }
 0xc65   :  { %v1678_v45 = vmul.f32 %v5199_v22, %v1675_v17  ;;  %vm1789_vm9 = vmor %vm1787_vm8, %vm1788_vm7  ;;  %vm1683_vm12 = vweird.f32 %v5199_v22 }
 0xc66   :  { %v1784_v47 = vsub.f32 1.0, %v1783_v26  ;;  %vm1684_vm14 = vmor %vm1682_vm13, %vm1683_vm12 }
 0xc67   :  { %v1679_v8 = vsub.f32 1.0, %v1678_v45 }
 0xc68   :  { %v1785_v23 = vmul.f32 %v5197_v58, %v1784_v47 }
 0xc69   :  { %v1680_v6 = vmul.f32 %v5199_v22, %v1679_v8  ;;  %v6730_v8 = vld [vmem:[%s8086_s2 + $0x70] sm:$0xff] }
 0xc6a   :  { %v1786_v61 = vadd.f32 %v5197_v58, %v1785_v23 }
 0xc6b   :  { %v1681_v2 = vadd.f32 %v5199_v22, %v1680_v6  ;;  %v6750_v6 = vld [vmem:[%s8086_s2 + $0x58] sm:$0xff] }
 0xc6c   :  { %v1790_v60 = vsel %vm1789_vm9, %v5197_v58, %v1786_v61  ;;  %v6736_v61 = vld [vmem:[%s8086_s2 + $0x78] sm:$0xff] }
 0xc6d   :  { %v1795_v33 = vsel %vm1792_vm10, %v1794_v55, %v1790_v60  ;;  %v1685_v13 = vsel %vm1684_vm14, %v5199_v22, %v1681_v2  ;;  %v6771_v2 = vld [vmem:[%s8086_s2 + $0x28] sm:$0xff] }
 0xc6e   :  { %v1690_v43 = vsel %vm1687_vm15, %v1689_v41, %v1685_v13  ;;  %v1813_v51 = vmul.f32 %v1795_v33, %v6644_v9  ;;  %v4877_v9 = vmul.f32 -1.442695, %v6703_v29  ;;  %v6809_v13 = vld [vmem:[%s8089_s5 + $0x60] sm:$0xff]  ;;  %v6821_v41 = vld [vmem:[%s8089_s5 + $0x50] sm:$0xff] }
 0xc6f   :  { %v1708_v20 = vmul.f32 %v1690_v43, %v6649_v11 }
 0xcb4   :  { %v1711_v35 = vpop.permute.xlu2 %1710 }
 0xcb5   :  { %v1713_v46 = vmul.f32 %v1711_v35, %v1690_v43  ;;  %v6815_v35 = vld [vmem:[%s8089_s5 + $0x68] sm:$0xff]  ;;  %v6827_v43 = vld [vmem:[%s8089_s5 + $0x58] sm:$0xff] }
 0xcb7   :  { %v1816_v32 = vpop.permute.xlu0 %1815 }
 0xcb8   :  { %v1818_v34 = vmul.f32 %v1816_v32, %v1795_v33  ;;  %v6764_v32 = vld [vmem:[%s8086_s2 + $0x38] sm:$0xff] }
 0xcba   :  { %1820 = vrot.lane.b32.xlu1 %v1818_v34, %s5694_s9 }
 0xcc2   :  { %1715 = vrot.lane.b32.xlu1 %v1713_v46, %s5694_s9  ;;  %v6833_v46 = vld [vmem:[%s8089_s5 + $0x40] sm:$0xff] }
 0xd2c   :  { %v1821_v53 = vpop.permute.xlu1 %1820 }
 0xd2d   :  { %v6710_v19 = vadd.f32 %v1821_v53, %v1813_v51  ;;  %v6839_v51 = vld [vmem:[%s8089_s5 + $0x48] sm:$0xff]  ;;  %v6845_v53 = vld [vmem:[%s8089_s5 + $0x30] sm:$0xff] }
 0xd2f   :  { %5200 = vtanh.f32 %v6710_v19 }
 0xd34   :  { %v1716_v14 = vpop.permute.xlu1 %1715 }
 0xd35   :  { %v5201_v16 = vpop.eup %5200  ;;  %v6714_v38 = vadd.f32 %v1716_v14, %v1708_v20  ;;  %v6851_v20 = vld [vmem:[%s8089_s5 + $0x38] sm:$0xff]  ;;  %v6857_v14 = vld [vmem:[%s8089_s5 + $0x20] sm:$0xff] }
 0xd36   :  { %1826 = vrot.lane.b32.xlu0 %v5201_v16, %s5694_s9  ;;  %v6863_v16 = vld [vmem:[%s8089_s5 + $0x28] sm:$0xff] }
 0xd37   :  { %5202 = vtanh.f32 %v6714_v38 }
 0xd38   :  { %5204 = vpow2.f32 %v4877_v9  ;;  %v6875_v9 = vld [vmem:[%s8089_s5 + $0x18] sm:$0xff] }
 0xd3d   :  { %v5203_v40 = vpop.eup %5202 }
 0xd3e   :  { %1721 = vrot.lane.b32.xlu2 %v5203_v40, %s5694_s9  ;;  %v5205_v5 = vpop.eup %5204  ;;  %v6869_v40 = vld [vmem:[%s8089_s5 + $0x10] sm:$0xff] }
 0xd3f   :  { %v1676_v42 = vadd.f32 1.0, %v5205_v5  ;;  %v6881_v5 = vld [vmem:[%s8089_s5] sm:$0xff] }
 0xd41   :  { %5206 = vrcp.f32 %v1676_v42  ;;  %v1703_v17 = vand.u32 2147483648, %v1676_v42  ;;  %vm1697_vm1 = vweird.f32 %v1676_v42  ;;  %v1701_v29 = vand.u32 2147483647, %v1676_v42 }
 0xd42   :  { %5208 = vpow2.f32 %v4881_v44  ;;  %v1843_v44 = vld [vmem:[#allocation2 + $0x10] sm:$0xc0] }
 0xd43   :  { %v1704_v47 = vor.u32 1.1754944e-38, %v1703_v17  ;;  %vm1702_vm3 = vcmp.eq.f32.partialorder %v1701_v29, 8.507059e+37  ;;  %v1844_v29 = vld [vmem:[#allocation3 + $0x38] sm:$0x30] }
 0xd47   :  { %v5207_v11 = vpop.eup %5206 }
 0xd48   :  { %v5209_v21 = vpop.eup %5208  ;;  %v1693_v37 = vmul.f32 %v5207_v11, %v1676_v42  ;;  %vm1698_vm0 = vweird.f32 %v5207_v11  ;;  %v6887_v42 = vld [vmem:[%s8089_s5 + $0x8] sm:$0xff] }
 0xd49   :  { %v1781_v56 = vadd.f32 1.0, %v5209_v21  ;;  %vm1699_vm2 = vmor %vm1697_vm1, %vm1698_vm0 }
 0xd4a   :  { %v1694_v12 = vsub.f32 1.0, %v1693_v37 }
 0xd4b   :  { %5210 = vrcp.f32 %v1781_v56  ;;  %v1808_v55 = vand.u32 2147483648, %v1781_v56  ;;  %vm1802_vm5 = vweird.f32 %v1781_v56 }
 0xd4c   :  { %v1695_v18 = vmul.f32 %v5207_v11, %v1694_v12  ;;  %v1845_v12 = vld [vmem:[#allocation3 + $0x8] sm:$0x30] }
 0xd4d   :  { %v1809_v33 = vor.u32 1.1754944e-38, %v1808_v55 }
 0xd4e   :  { %v1696_v10 = vadd.f32 %v5207_v11, %v1695_v18  ;;  %v1954_v18 = vrot.slane %v1845_v12, 4 }
 0xd50   :  { %v1700_v58 = vsel %vm1699_vm2, %v5207_v11, %v1696_v10  ;;  %v1849_v11 = vrot.slane %v1843_v44, 6 }
 0xd51   :  { %v5211_v7 = vpop.eup %5210  ;;  %v1705_v50 = vsel %vm1702_vm3, %v1704_v47, %v1700_v58 }
 0xd52   :  { %v1798_v26 = vmul.f32 %v5211_v7, %v1781_v56  ;;  %vm1803_vm4 = vweird.f32 %v5211_v7 }
 0xd53   :  { %vm1804_vm6 = vmor %vm1802_vm5, %vm1803_vm4 }
 0xd54   :  { %v1799_v23 = vsub.f32 1.0, %v1798_v26  ;;  %v1953_v26 = vrot.slane %v1844_v29, 4 }
 0xd56   :  { %v1800_v63 = vmul.f32 %v5211_v7, %v1799_v23 }
 0xd58   :  { %v1801_v60 = vadd.f32 %v5211_v7, %v1800_v63 }
 0xd98   :  { %v1722_v22 = vpop.permute.xlu2 %1721 }
 0xd99   :  { %v6721_v45 = vmul.f32 %v1722_v22, %v1705_v50  ;;  %v1842_v50 = vld [vmem:[#allocation2 + $0x18] sm:$0xc0] }
 0xd9a   :  { %v1848_v63 = vrot.slane %v1842_v50, 6 }
 0xd9b   :  { %8120 = vst [vmem:[#allocation15_spill] sm:$0xff] %v6721_v45  ;;  %4882 = vmatmul.msk.f32.vlgmr.msra.gmra.mxu0 %vm283_vm11, %v6721_v45  ;;  %4883 = vmatmul.msk.f32.vlgmr.msra.gmra.mxu1 %vm283_vm11, %v6721_v45 }
 0xd9c   :  { %2309 = vmatpush.msra.mxu0 %v6730_v8  ;;  %2329 = vmatpush.msra.mxu1 %v6736_v61 }
 0xd9e   :  { %2310 = vmatpush.msra.mxu0 %v6524_v27  ;;  %2330 = vmatpush.msra.mxu1 %v6743_v1  ;;  %v6757_v27 = vld [vmem:[%s8086_s2 + $0x48] sm:$0xff] }
 0xda0   :  { %2311 = vmatpush.msra.mxu0 %v6531_v24  ;;  %2331 = vmatpush.msra.mxu1 %v6750_v6  ;;  %v1806_v24 = vand.u32 2147483647, %v1781_v56 }
 0xda2   :  { %2312 = vmatpush.msra.mxu0 %v6539_v39  ;;  %2332 = vmatpush.msra.mxu1 %v6757_v27  ;;  %v1805_v39 = vsel %vm1804_vm6, %v5211_v7, %v1801_v60  ;;  %vm1807_vm7 = vcmp.eq.f32.partialorder %v1806_v24, 8.507059e+37 }
 0xda4   :  { %2313 = vmatpush.msra.mxu0 %v6546_v59  ;;  %2333 = vmatpush.msra.mxu1 %v6764_v32  ;;  %v1810_v59 = vsel %vm1807_vm7, %v1809_v33, %v1805_v39 }
 0xda6   :  { %2314 = vmatpush.msra.mxu0 %v6553_v49  ;;  %2334 = vmatpush.msra.mxu1 %v6771_v2 }
 0xda8   :  { %v1827_v34 = vpop.permute.xlu0 %1826  ;;  %2315 = vmatpush.msra.mxu0 %v6560_v0  ;;  %2335 = vmatpush.msra.mxu1 %v6778_v3  ;;  %v6797_v0 = vld [vmem:[%s8089_s5 + $0x70] sm:$0xff] }
 0xda9   :  { %v6781_v49 = vmul.f32 %v1827_v34, %v1810_v59 }
 0xdaa   :  { %2316 = vmatpush.msra.mxu0 %v6567_v31  ;;  %2336 = vmatpush.msra.mxu1 %v6787_v54  ;;  %v6803_v31 = vld [vmem:[%s8089_s5 + $0x78] sm:$0xff] }
 0xdab   :  { %8121 = vst [vmem:[#allocation16_spill] sm:$0xff] %v6781_v49  ;;  %4886 = vmatmul.msk.f32.vlgmr.msra.gmra.mxu2 %vm283_vm11, %v6781_v49  ;;  %4887 = vmatmul.msk.f32.vlgmr.msra.gmra.mxu3 %vm283_vm11, %v6781_v49 }
 0xdac   :  { %2408 = vmatpush.msra.mxu2 %v6797_v0  ;;  %2428 = vmatpush.msra.mxu3 %v6803_v31 }
 0xdae   :  { %2409 = vmatpush.msra.mxu2 %v6809_v13  ;;  %2429 = vmatpush.msra.mxu3 %v6815_v35 }
 0xdb0   :  { %2410 = vmatpush.msra.mxu2 %v6821_v41  ;;  %2430 = vmatpush.msra.mxu3 %v6827_v43 }
 0xdb2   :  { %2411 = vmatpush.msra.mxu2 %v6833_v46  ;;  %2431 = vmatpush.msra.mxu3 %v6839_v51 }
 0xdb4   :  { %2412 = vmatpush.msra.mxu2 %v6845_v53  ;;  %2432 = vmatpush.msra.mxu3 %v6851_v20 }
 0xdb6   :  { %2413 = vmatpush.msra.mxu2 %v6857_v14  ;;  %2433 = vmatpush.msra.mxu3 %v6863_v16 }
 0xdb8   :  { %2414 = vmatpush.msra.mxu2 %v6869_v40  ;;  %2434 = vmatpush.msra.mxu3 %v6875_v9 }
 0xdba   :  { %2415 = vmatpush.msra.mxu2 %v6881_v5  ;;  %2435 = vmatpush.msra.mxu3 %v6887_v42 }
 0xe18   :  { %v1892_v21 = vpop.f32.mrf.mxu1  ;;  %v1872_v23 = vpop.f32.mrf.mxu0 }
 0xe19   :  { %v6890_v37 = vadd.f32 %v1892_v21, %v1849_v11  ;;  %v1873_v60 = vadd.f32 %v1872_v23, %v1848_v63 }
 0xe1b   :  { %5212 = vtanh.f32 %v6890_v37  ;;  %v4884_v55 = vmul.f32 -1.442695, %v1873_v60 }
 0xe21   :  { %v5213_v56 = vpop.eup %5212 }
 0xe22   :  { %1936 = vrot.lane.b32.xlu2 %v5213_v56, %s5694_s9 }
 0xe2e   :  { %v1997_v10 = vpop.f32.mrf.mxu3  ;;  %v1977_v58 = vpop.f32.mrf.mxu2 }
 0xe2f   :  { %v6894_v7 = vadd.f32 %v1997_v10, %v1954_v18  ;;  %v1978_v47 = vadd.f32 %v1977_v58, %v1953_v26 }
 0xe31   :  { %5214 = vtanh.f32 %v6894_v7  ;;  %v4888_v22 = vmul.f32 -1.442695, %v1978_v47 }
 0xe33   :  { %5216 = vpow2.f32 %v4888_v22 }
 0xe34   :  { %5218 = vpow2.f32 %v4884_v55 }
 0xe37   :  { %v5215_v17 = vpop.eup %5214 }
 0xe38   :  { %2041 = vrot.lane.b32.xlu0 %v5215_v17, %s5694_s9 }
 0xe39   :  { %v5217_v24 = vpop.eup %5216 }
 0xe3a   :  { %v2006_v39 = vadd.f32 1.0, %v5217_v24  ;;  %v5219_v33 = vpop.eup %5218 }
 0xe3b   :  { %v1901_v59 = vadd.f32 1.0, %v5219_v33 }
 0xe3c   :  { %5220 = vrcp.f32 %v2006_v39  ;;  %v2019_v17 = vand.u32 2147483648, %v2006_v39  ;;  %vm2013_vm9 = vweird.f32 %v2006_v39  ;;  %v2017_v29 = vand.u32 2147483647, %v2006_v39 }
 0xe3d   :  { %5222 = vrcp.f32 %v1901_v59  ;;  %v1914_v60 = vand.u32 2147483648, %v1901_v59  ;;  %vm1908_vm14 = vweird.f32 %v1901_v59  ;;  %v1912_v55 = vand.u32 2147483647, %v1901_v59 }
 0xe3e   :  { %v2020_v47 = vor.u32 1.1754944e-38, %v2019_v17  ;;  %vm2018_vm12 = vcmp.eq.f32.partialorder %v2017_v29, 8.507059e+37 }
 0xe3f   :  { %vm1913_vm0 = vcmp.eq.f32.partialorder %v1912_v55, 8.507059e+37 }
 0xe42   :  { %v5221_v34 = vpop.eup %5220 }
 0xe43   :  { %v2009_v44 = vmul.f32 %v5221_v34, %v2006_v39  ;;  %v5223_v21 = vpop.eup %5222  ;;  %vm2014_vm8 = vweird.f32 %v5221_v34 }
 0xe44   :  { %v1904_v56 = vmul.f32 %v5223_v21, %v1901_v59  ;;  %vm2015_vm10 = vmor %vm2013_vm9, %vm2014_vm8  ;;  %vm1909_vm13 = vweird.f32 %v5223_v21 }
 0xe45   :  { %v2010_v11 = vsub.f32 1.0, %v2009_v44  ;;  %vm1910_vm15 = vmor %vm1908_vm14, %vm1909_vm13  ;;  %v1915_v44 = vor.u32 1.1754944e-38, %v1914_v60 }
 0xe46   :  { %v1905_v18 = vsub.f32 1.0, %v1904_v56 }
 0xe47   :  { %v2011_v12 = vmul.f32 %v5221_v34, %v2010_v11 }
 0xe48   :  { %v1906_v58 = vmul.f32 %v5223_v21, %v1905_v18 }
 0xe49   :  { %v2012_v10 = vadd.f32 %v5221_v34, %v2011_v12 }
 0xe4a   :  { %v1907_v23 = vadd.f32 %v5223_v21, %v1906_v58 }
 0xe4b   :  { %v2016_v26 = vsel %vm2015_vm10, %v5221_v34, %v2012_v10 }
 0xe4c   :  { %v2021_v22 = vsel %vm2018_vm12, %v2020_v47, %v2016_v26  ;;  %v1911_v24 = vsel %vm1910_vm15, %v5223_v21, %v1907_v23  ;;  %v4889_v26 = vmul.f32 -1.442695, %v6894_v7 }
 0xe4d   :  { %v1916_v39 = vsel %vm1913_vm0, %v1915_v44, %v1911_v24  ;;  %v2039_v34 = vmul.f32 %v2021_v22, %v6710_v19  ;;  %v4885_v19 = vmul.f32 -1.442695, %v6890_v37 }
 0xe4e   :  { %v1934_v59 = vmul.f32 %v1916_v39, %v6714_v38 }
 0xe7c   :  { %v1937_v33 = vpop.permute.xlu2 %1936 }
 0xe7d   :  { %v1939_v11 = vmul.f32 %v1937_v33, %v1916_v39 }
 0xeaa   :  { %v2042_v50 = vpop.permute.xlu0 %2041 }
 0xeab   :  { %v2044_v63 = vmul.f32 %v2042_v50, %v2021_v22 }
 0xead   :  { %2046 = vrot.lane.b32.xlu1 %v2044_v63, %s5694_s9 }
 0xeb5   :  { %1941 = vrot.lane.b32.xlu1 %v1939_v11, %s5694_s9 }
 0xf1f   :  { %v2047_v56 = vpop.permute.xlu1 %2046 }
 0xf20   :  { %v6901_v12 = vadd.f32 %v2047_v56, %v2039_v34 }
 0xf22   :  { %5224 = vtanh.f32 %v6901_v12 }
 0xf27   :  { %v1942_v18 = vpop.permute.xlu1 %1941 }
 0xf28   :  { %v5225_v10 = vpop.eup %5224  ;;  %v6905_v17 = vadd.f32 %v1942_v18, %v1934_v59  ;;  %v6923_v18 = vld [vmem:[%s8086_s2 + $0x60] sm:$0xff] }
 0xf29   :  { %2052 = vrot.lane.b32.xlu0 %v5225_v10, %s5694_s9  ;;  %v6930_v10 = vld [vmem:[%s8086_s2 + $0x50] sm:$0xff] }
 0xf2a   :  { %5226 = vtanh.f32 %v6905_v17 }
 0xf2b   :  { %5228 = vpow2.f32 %v4885_v19 }
 0xf30   :  { %v5227_v21 = vpop.eup %5226 }
 0xf31   :  { %1947 = vrot.lane.b32.xlu2 %v5227_v21, %s5694_s9  ;;  %v5229_v29 = vpop.eup %5228 }
 0xf32   :  { %v1902_v58 = vadd.f32 1.0, %v5229_v29  ;;  %v6937_v29 = vld [vmem:[%s8086_s2 + $0x40] sm:$0xff] }
 0xf34   :  { %5230 = vrcp.f32 %v1902_v58  ;;  %v1929_v24 = vand.u32 2147483648, %v1902_v58  ;;  %vm1923_vm2 = vweird.f32 %v1902_v58  ;;  %v1927_v37 = vand.u32 2147483647, %v1902_v58 }
 0xf35   :  { %5232 = vpow2.f32 %v4889_v26  ;;  %v6944_v26 = vld [vmem:[%s8086_s2 + $0x30] sm:$0xff] }
 0xf36   :  { %v1930_v39 = vor.u32 1.1754944e-38, %v1929_v24  ;;  %vm1928_vm4 = vcmp.eq.f32.partialorder %v1927_v37, 8.507059e+37  ;;  %v2069_v24 = vld [vmem:[#allocation2 + $0x28] sm:$0x3] }
 0xf3a   :  { %v5231_v38 = vpop.eup %5230 }
 0xf3b   :  { %v5233_v47 = vpop.eup %5232  ;;  %v1919_v50 = vmul.f32 %v5231_v38, %v1902_v58  ;;  %vm1924_vm1 = vweird.f32 %v5231_v38 }
 0xf3c   :  { %v2007_v22 = vadd.f32 1.0, %v5233_v47  ;;  %vm1925_vm3 = vmor %vm1923_vm2, %vm1924_vm1 }
 0xf3d   :  { %v1920_v23 = vsub.f32 1.0, %v1919_v50  ;;  %v6951_v50 = vld [vmem:[%s8086_s2 + $0x20] sm:$0xff] }
 0xf3e   :  { %5234 = vrcp.f32 %v2007_v22  ;;  %v2034_v19 = vand.u32 2147483648, %v2007_v22  ;;  %vm2028_vm6 = vweird.f32 %v2007_v22  ;;  %v2032_v58 = vand.u32 2147483647, %v2007_v22 }
 0xf3f   :  { %v1921_v63 = vmul.f32 %v5231_v38, %v1920_v23 }
 0xf40   :  { %v2035_v47 = vor.u32 1.1754944e-38, %v2034_v19  ;;  %vm2033_vm8 = vcmp.eq.f32.partialorder %v2032_v58, 8.507059e+37 }
 0xf41   :  { %v1922_v60 = vadd.f32 %v5231_v38, %v1921_v63  ;;  %v6958_v63 = vld [vmem:[%s8086_s2 + $0x10] sm:$0xff] }
 0xf43   :  { %v1926_v33 = vsel %vm1925_vm3, %v5231_v38, %v1922_v60 }
 0xf44   :  { %v5235_v55 = vpop.eup %5234  ;;  %v1931_v7 = vsel %vm1928_vm4, %v1930_v39, %v1926_v33  ;;  %v2071_v39 = vld [vmem:[#allocation3 + $0x8] sm:$0xc] }
 0xf45   :  { %v2024_v44 = vmul.f32 %v5235_v55, %v2007_v22  ;;  %vm2029_vm5 = vweird.f32 %v5235_v55 }
 0xf46   :  { %vm2030_vm7 = vmor %vm2028_vm6, %vm2029_vm5 }
 0xf47   :  { %v2025_v56 = vsub.f32 1.0, %v2024_v44 }
 0xf49   :  { %v2026_v59 = vmul.f32 %v5235_v55, %v2025_v56 }
 0xf4b   :  { %v2027_v21 = vadd.f32 %v5235_v55, %v2026_v59 }
 0xf4d   :  { %v2031_v38 = vsel %vm2030_vm7, %v5235_v55, %v2027_v21  ;;  %v6967_v55 = vld [vmem:[%s8086_s2] sm:$0xff]  ;;  %v2070_v21 = vld [vmem:[#allocation3 + $0x38] sm:$0xc] }
 0xf4e   :  { %v2036_v22 = vsel %vm2033_vm8, %v2035_v47, %v2031_v38  ;;  %v2173_v58 = vrot.slane %v2070_v21, 2 }
 0xf8b   :  { %v1948_v11 = vpop.permute.xlu2 %1947 }
 0xf8c   :  { %v6912_v34 = vmul.f32 %v1948_v11, %v1931_v7  ;;  %v2174_v7 = vrot.slane %v2071_v39, 2 }
 0xf8e   :  { %8122 = vst [vmem:[#allocation17_spill] sm:$0xff] %v6912_v34  ;;  %4890 = vmatmul.msk.f32.vlgmr.msrb.gmra.mxu0 %vm283_vm11, %v6912_v34  ;;  %4891 = vmatmul.msk.f32.vlgmr.msrb.gmra.mxu1 %vm283_vm11, %v6912_v34 }
 0xf8f   :  { %2529 = vmatpush.msrb.mxu0 %v6730_v8  ;;  %2549 = vmatpush.msrb.mxu1 %v6736_v61 }
 0xf91   :  { %2530 = vmatpush.msrb.mxu0 %v6923_v18  ;;  %2550 = vmatpush.msrb.mxu1 %v6743_v1 }
 0xf93   :  { %2531 = vmatpush.msrb.mxu0 %v6930_v10  ;;  %2551 = vmatpush.msrb.mxu1 %v6750_v6 }
 0xf95   :  { %2532 = vmatpush.msrb.mxu0 %v6937_v29  ;;  %2552 = vmatpush.msrb.mxu1 %v6757_v27 }
 0xf97   :  { %2533 = vmatpush.msrb.mxu0 %v6944_v26  ;;  %2553 = vmatpush.msrb.mxu1 %v6764_v32 }
 0xf99   :  { %2534 = vmatpush.msrb.mxu0 %v6951_v50  ;;  %2554 = vmatpush.msrb.mxu1 %v6771_v2 }
 0xf9b   :  { %v2053_v23 = vpop.permute.xlu0 %2052  ;;  %2535 = vmatpush.msrb.mxu0 %v6958_v63  ;;  %2555 = vmatpush.msrb.mxu1 %v6778_v3 }
 0xf9c   :  { %v6962_v60 = vmul.f32 %v2053_v23, %v2036_v22  ;;  %v2068_v23 = vld [vmem:[#allocation2 + $0x48] sm:$0x3] }
 0xf9d   :  { %2536 = vmatpush.msrb.mxu0 %v6967_v55  ;;  %2556 = vmatpush.msrb.mxu1 %v6787_v54 }
 0xf9e   :  { %8123 = vst [vmem:[#allocation18_spill] sm:$0xff] %v6962_v60  ;;  %4894 = vmatmul.msk.f32.vlgmr.msrb.gmra.mxu2 %vm283_vm11, %v6962_v60  ;;  %4895 = vmatmul.msk.f32.vlgmr.msrb.gmra.mxu3 %vm283_vm11, %v6962_v60 }
 0xf9f   :  { %2634 = vmatpush.msrb.mxu2 %v6797_v0  ;;  %2654 = vmatpush.msrb.mxu3 %v6803_v31 }
 0xfa1   :  { %2635 = vmatpush.msrb.mxu2 %v6809_v13  ;;  %2655 = vmatpush.msrb.mxu3 %v6815_v35 }
 0xfa3   :  { %2636 = vmatpush.msrb.mxu2 %v6821_v41  ;;  %2656 = vmatpush.msrb.mxu3 %v6827_v43 }
 0xfa5   :  { %2637 = vmatpush.msrb.mxu2 %v6833_v46  ;;  %2657 = vmatpush.msrb.mxu3 %v6839_v51 }
 0xfa7   :  { %2638 = vmatpush.msrb.mxu2 %v6845_v53  ;;  %2658 = vmatpush.msrb.mxu3 %v6851_v20 }
 0xfa9   :  { %2639 = vmatpush.msrb.mxu2 %v6857_v14  ;;  %2659 = vmatpush.msrb.mxu3 %v6863_v16 }
 0xfab   :  { %2640 = vmatpush.msrb.mxu2 %v6869_v40  ;;  %2660 = vmatpush.msrb.mxu3 %v6875_v9 }
 0xfad   :  { %2641 = vmatpush.msrb.mxu2 %v6881_v5  ;;  %2661 = vmatpush.msrb.mxu3 %v6887_v42 }
0x100b   :  { %v2112_v37 = vpop.f32.mrf.mxu1  ;;  %v2092_v22 = vpop.f32.mrf.mxu0 }
0x100c   :  { %v6991_v33 = vadd.f32 %v2112_v37, %v2069_v24  ;;  %v2093_v24 = vadd.f32 %v2092_v22, %v2068_v23 }
0x100e   :  { %5236 = vtanh.f32 %v6991_v33  ;;  %v4892_v37 = vmul.f32 -1.442695, %v2093_v24 }
0x1014   :  { %v5237_v44 = vpop.eup %5236 }
0x1015   :  { %2156 = vrot.lane.b32.xlu2 %v5237_v44, %s5694_s9 }
0x1021   :  { %v2217_v11 = vpop.f32.mrf.mxu3  ;;  %v2197_v19 = vpop.f32.mrf.mxu2 }
0x1022   :  { %v6995_v56 = vadd.f32 %v2217_v11, %v2174_v7  ;;  %v2198_v38 = vadd.f32 %v2197_v19, %v2173_v58 }
0x1024   :  { %5238 = vtanh.f32 %v6995_v56  ;;  %v4896_v47 = vmul.f32 -1.442695, %v2198_v38 }
0x1026   :  { %5240 = vpow2.f32 %v4896_v47 }
0x1027   :  { %5242 = vpow2.f32 %v4892_v37 }
0x102a   :  { %v5239_v59 = vpop.eup %5238 }
0x102b   :  { %2261 = vrot.lane.b32.xlu0 %v5239_v59, %s5694_s9 }
0x102c   :  { %v5241_v44 = vpop.eup %5240 }
0x102d   :  { %v2226_v39 = vadd.f32 1.0, %v5241_v44  ;;  %v5243_v7 = vpop.eup %5242 }
0x102e   :  { %v2121_v11 = vadd.f32 1.0, %v5243_v7 }
0x102f   :  { %5244 = vrcp.f32 %v2226_v39  ;;  %v2239_v38 = vand.u32 2147483648, %v2226_v39  ;;  %vm2233_vm10 = vweird.f32 %v2226_v39  ;;  %v2237_v47 = vand.u32 2147483647, %v2226_v39 }
0x1030   :  { %5246 = vrcp.f32 %v2121_v11  ;;  %vm2128_vm15 = vweird.f32 %v2121_v11  ;;  %v2132_v52 = vand.u32 2147483647, %v2121_v11 }
0x1031   :  { %v2240_v24 = vor.u32 1.1754944e-38, %v2239_v38  ;;  %vm2238_vm13 = vcmp.eq.f32.partialorder %v2237_v47, 8.507059e+37 }
0x1032   :  { %vm2133_vm1 = vcmp.eq.f32.partialorder %v2132_v52, 8.507059e+37 }
0x1035   :  { %v5245_v49 = vpop.eup %5244 }
0x1036   :  { %v2229_v60 = vmul.f32 %v5245_v49, %v2226_v39  ;;  %v5247_v34 = vpop.eup %5246  ;;  %vm2234_vm9 = vweird.f32 %v5245_v49 }
0x1037   :  { %v2124_v45 = vmul.f32 %v5247_v34, %v2121_v11  ;;  %vm2235_vm12 = vmor %vm2233_vm10, %vm2234_vm9  ;;  %vm2129_vm14 = vweird.f32 %v5247_v34 }
0x1038   :  { %v2230_v59 = vsub.f32 1.0, %v2229_v60  ;;  %v2134_v60 = vand.u32 2147483648, %v2121_v11  ;;  %vm2130_vm0 = vmor %vm2128_vm15, %vm2129_vm14 }
0x1039   :  { %v2125_v19 = vsub.f32 1.0, %v2124_v45 }
0x103a   :  { %v2231_v21 = vmul.f32 %v5245_v49, %v2230_v59 }
0x103b   :  { %v2126_v22 = vmul.f32 %v5247_v34, %v2125_v19 }
0x103c   :  { %v2232_v58 = vadd.f32 %v5245_v49, %v2231_v21  ;;  %v2135_v21 = vor.u32 1.1754944e-38, %v2134_v60 }
0x103d   :  { %v2127_v7 = vadd.f32 %v5247_v34, %v2126_v22 }
0x103e   :  { %v2236_v23 = vsel %vm2235_vm12, %v5245_v49, %v2232_v58 }
0x103f   :  { %v2241_v44 = vsel %vm2238_vm13, %v2240_v24, %v2236_v23  ;;  %v2131_v45 = vsel %vm2130_vm0, %v5247_v34, %v2127_v7  ;;  %v4897_v24 = vmul.f32 -1.442695, %v6995_v56 }
0x1040   :  { %v2136_v39 = vsel %vm2133_vm1, %v2135_v21, %v2131_v45  ;;  %v2259_v49 = vmul.f32 %v2241_v44, %v6901_v12  ;;  %v4893_v12 = vmul.f32 -1.442695, %v6991_v33 }
0x1041   :  { %v2154_v11 = vmul.f32 %v2136_v39, %v6905_v17 }
0x106f   :  { %v2157_v59 = vpop.permute.xlu2 %2156 }
0x1070   :  { %v2159_v19 = vmul.f32 %v2157_v59, %v2136_v39 }
0x109d   :  { %v2262_v37 = vpop.permute.xlu0 %2261 }
0x109e   :  { %v2264_v25 = vmul.f32 %v2262_v37, %v2241_v44 }
0x10a0   :  { %2266 = vrot.lane.b32.xlu1 %v2264_v25, %s5694_s9 }
0x10a8   :  { %2161 = vrot.lane.b32.xlu1 %v2159_v19, %s5694_s9 }
0x1112   :  { %v2267_v58 = vpop.permute.xlu1 %2266 }
0x1113   :  { %v7002_v38 = vadd.f32 %v2267_v58, %v2259_v49 }
0x1115   :  { %5248 = vtanh.f32 %v7002_v38 }
0x111a   :  { %v2162_v47 = vpop.permute.xlu1 %2161 }
0x111b   :  { %v5249_v25 = vpop.eup %5248  ;;  %v7006_v22 = vadd.f32 %v2162_v47, %v2154_v11 }
0x111c   :  { %2272 = vrot.lane.b32.xlu0 %v5249_v25, %s5694_s9 }
0x111d   :  { %5250 = vtanh.f32 %v7006_v22 }
0x111e   :  { %5252 = vpow2.f32 %v4893_v12 }
0x1123   :  { %v5251_v52 = vpop.eup %5250 }
0x1124   :  { %2167 = vrot.lane.b32.xlu2 %v5251_v52, %s5694_s9  ;;  %v5253_v34 = vpop.eup %5252 }
0x1125   :  { %v2122_v23 = vadd.f32 1.0, %v5253_v34 }
0x1127   :  { %5254 = vrcp.f32 %v2122_v23  ;;  %v2149_v39 = vand.u32 2147483648, %v2122_v23  ;;  %vm2143_vm3 = vweird.f32 %v2122_v23  ;;  %v2147_v33 = vand.u32 2147483647, %v2122_v23 }
0x1128   :  { %5256 = vpow2.f32 %v4897_v24 }
0x1129   :  { %v2150_v58 = vor.u32 1.1754944e-38, %v2149_v39  ;;  %vm2148_vm5 = vcmp.eq.f32.partialorder %v2147_v33, 8.507059e+37  ;;  %v2291_v33 = vld [vmem:[#allocation3 + $0x8] sm:$0x3] }
0x112d   :  { %v5255_v17 = vpop.eup %5254 }
0x112e   :  { %v5257_v37 = vpop.eup %5256  ;;  %v2139_v44 = vmul.f32 %v5255_v17, %v2122_v23  ;;  %vm2144_vm2 = vweird.f32 %v5255_v17 }
0x112f   :  { %v2227_v7 = vadd.f32 1.0, %v5257_v37  ;;  %vm2145_vm4 = vmor %vm2143_vm3, %vm2144_vm2 }
0x1130   :  { %v2140_v60 = vsub.f32 1.0, %v2139_v44 }
0x1131   :  { %5258 = vrcp.f32 %v2227_v7  ;;  %v2254_v34 = vand.u32 2147483648, %v2227_v7  ;;  %vm2248_vm7 = vweird.f32 %v2227_v7  ;;  %v2252_v23 = vand.u32 2147483647, %v2227_v7 }
0x1132   :  { %v2141_v45 = vmul.f32 %v5255_v17, %v2140_v60 }
0x1133   :  { %vm2253_vm9 = vcmp.eq.f32.partialorder %v2252_v23, 8.507059e+37 }
0x1134   :  { %v2142_v59 = vadd.f32 %v5255_v17, %v2141_v45 }
0x1136   :  { %v2146_v19 = vsel %vm2145_vm4, %v5255_v17, %v2142_v59  ;;  %v2255_v17 = vor.u32 1.1754944e-38, %v2254_v34 }
0x1137   :  { %v5259_v21 = vpop.eup %5258  ;;  %v2151_v56 = vsel %vm2148_vm5, %v2150_v58, %v2146_v19 }
0x1138   :  { %v2244_v49 = vmul.f32 %v5259_v21, %v2227_v7  ;;  %vm2249_vm6 = vweird.f32 %v5259_v21  ;;  %v2289_v7 = vld [vmem:[#allocation2 + $0x28] sm:$0xc] }
0x1139   :  { %vm2250_vm8 = vmor %vm2248_vm7, %vm2249_vm6  ;;  %v2295_v45 = vrot.slane %v2289_v7, 2 }
0x113a   :  { %v2245_v25 = vsub.f32 1.0, %v2244_v49 }
0x113c   :  { %v2246_v52 = vmul.f32 %v5259_v21, %v2245_v25 }
0x113e   :  { %v2247_v12 = vadd.f32 %v5259_v21, %v2246_v52  ;;  %v2288_v52 = vld [vmem:[#allocation2 + $0x48] sm:$0xc] }
0x113f   :  { %v2294_v23 = vrot.slane %v2288_v52, 2 }
0x1140   :  { %v2251_v24 = vsel %vm2250_vm8, %v5259_v21, %v2247_v12 }
0x1141   :  { %v2256_v37 = vsel %vm2253_vm9, %v2255_v17, %v2251_v24 }
0x117e   :  { %v2168_v11 = vpop.permute.xlu2 %2167 }
0x117f   :  { %v7013_v47 = vmul.f32 %v2168_v11, %v2151_v56  ;;  %v2290_v11 = vld [vmem:[#allocation3 + $0x38] sm:$0x3] }
0x1181   :  { %8124 = vst [vmem:[#allocation19_spill] sm:$0xff] %v7013_v47  ;;  %4898 = vmatmul.msk.f32.vlgmr.msra.gmra.mxu0 %vm283_vm11, %v7013_v47  ;;  %4899 = vmatmul.msk.f32.vlgmr.msra.gmra.mxu1 %vm283_vm11, %v7013_v47 }
0x1182   :  { %2755 = vmatpush.msra.mxu0 %v6730_v8  ;;  %2775 = vmatpush.msra.mxu1 %v6736_v61 }
0x1184   :  { %2756 = vmatpush.msra.mxu0 %v6923_v18  ;;  %2776 = vmatpush.msra.mxu1 %v6743_v1 }
0x1186   :  { %2757 = vmatpush.msra.mxu0 %v6930_v10  ;;  %2777 = vmatpush.msra.mxu1 %v6750_v6 }
0x1188   :  { %2758 = vmatpush.msra.mxu0 %v6937_v29  ;;  %2778 = vmatpush.msra.mxu1 %v6757_v27 }
0x118a   :  { %2759 = vmatpush.msra.mxu0 %v6944_v26  ;;  %2779 = vmatpush.msra.mxu1 %v6764_v32 }
0x118c   :  { %2760 = vmatpush.msra.mxu0 %v6951_v50  ;;  %2780 = vmatpush.msra.mxu1 %v6771_v2 }
0x118e   :  { %v2273_v44 = vpop.permute.xlu0 %2272  ;;  %2761 = vmatpush.msra.mxu0 %v6958_v63  ;;  %2781 = vmatpush.msra.mxu1 %v6778_v3 }
0x118f   :  { %v7033_v60 = vmul.f32 %v2273_v44, %v2256_v37 }
0x1190   :  { %2762 = vmatpush.msra.mxu0 %v6967_v55  ;;  %2782 = vmatpush.msra.mxu1 %v6787_v54 }
0x1191   :  { %8125 = vst [vmem:[#allocation20_spill] sm:$0xff] %v7033_v60  ;;  %4902 = vmatmul.msk.f32.vlgmr.msra.gmra.mxu2 %vm283_vm11, %v7033_v60  ;;  %4903 = vmatmul.msk.f32.vlgmr.msra.gmra.mxu3 %vm283_vm11, %v7033_v60 }
0x1192   :  { %2860 = vmatpush.msra.mxu2 %v6797_v0  ;;  %2880 = vmatpush.msra.mxu3 %v6803_v31 }
0x1194   :  { %2861 = vmatpush.msra.mxu2 %v6809_v13  ;;  %2881 = vmatpush.msra.mxu3 %v6815_v35 }
0x1196   :  { %2862 = vmatpush.msra.mxu2 %v6821_v41  ;;  %2882 = vmatpush.msra.mxu3 %v6827_v43 }
0x1198   :  { %2863 = vmatpush.msra.mxu2 %v6833_v46  ;;  %2883 = vmatpush.msra.mxu3 %v6839_v51 }
0x119a   :  { %2864 = vmatpush.msra.mxu2 %v6845_v53  ;;  %2884 = vmatpush.msra.mxu3 %v6851_v20 }
0x119c   :  { %2865 = vmatpush.msra.mxu2 %v6857_v14  ;;  %2885 = vmatpush.msra.mxu3 %v6863_v16 }
0x119e   :  { %2866 = vmatpush.msra.mxu2 %v6869_v40  ;;  %2886 = vmatpush.msra.mxu3 %v6875_v9 }
0x11a0   :  { %2867 = vmatpush.msra.mxu2 %v6881_v5  ;;  %2887 = vmatpush.msra.mxu3 %v6887_v42 }
0x11fe   :  { %v2338_v59 = vpop.f32.mrf.mxu1  ;;  %v2318_v34 = vpop.f32.mrf.mxu0 }
0x11ff   :  { %v7057_v21 = vadd.f32 %v2338_v59, %v2295_v45  ;;  %v2319_v24 = vadd.f32 %v2318_v34, %v2294_v23 }
0x1201   :  { %5260 = vtanh.f32 %v7057_v21  ;;  %v4900_v17 = vmul.f32 -1.442695, %v2319_v24 }
0x1207   :  { %v5261_v39 = vpop.eup %5260 }
0x1208   :  { %2382 = vrot.lane.b32.xlu2 %v5261_v39, %s5694_s9 }
0x1214   :  { %v2437_v19 = vpop.f32.mrf.mxu3  ;;  %v2417_v56 = vpop.f32.mrf.mxu2 }
0x1215   :  { %v7061_v49 = vadd.f32 %v2437_v19, %v2291_v33  ;;  %v2418_v25 = vadd.f32 %v2417_v56, %v2290_v11 }
0x1217   :  { %5262 = vtanh.f32 %v7061_v49  ;;  %v4904_v12 = vmul.f32 -1.442695, %v2418_v25 }
0x1219   :  { %5264 = vpow2.f32 %v4904_v12 }
0x121a   :  { %5266 = vpow2.f32 %v4900_v17 }
0x121d   :  { %v5263_v58 = vpop.eup %5262 }
0x121e   :  { %2481 = vrot.lane.b32.xlu0 %v5263_v58, %s5694_s9 }
0x121f   :  { %v5265_v37 = vpop.eup %5264 }
0x1220   :  { %v2446_v44 = vadd.f32 1.0, %v5265_v37  ;;  %v5267_v7 = vpop.eup %5266 }
0x1221   :  { %v2347_v45 = vadd.f32 1.0, %v5267_v7 }
0x1222   :  { %5268 = vrcp.f32 %v2446_v44  ;;  %v2459_v52 = vand.u32 2147483648, %v2446_v44  ;;  %vm2453_vm12 = vweird.f32 %v2446_v44  ;;  %v2457_v12 = vand.u32 2147483647, %v2446_v44 }
0x1223   :  { %5270 = vrcp.f32 %v2347_v45  ;;  %vm2354_vm0 = vweird.f32 %v2347_v45  ;;  %v2358_v60 = vand.u32 2147483647, %v2347_v45 }
0x1224   :  { %v2460_v24 = vor.u32 1.1754944e-38, %v2459_v52  ;;  %vm2458_vm14 = vcmp.eq.f32.partialorder %v2457_v12, 8.507059e+37 }
0x1225   :  { %vm2359_vm2 = vcmp.eq.f32.partialorder %v2358_v60, 8.507059e+37 }
0x1228   :  { %v5269_v59 = vpop.eup %5268 }
0x1229   :  { %v2449_v39 = vmul.f32 %v5269_v59, %v2446_v44  ;;  %v5271_v19 = vpop.eup %5270  ;;  %vm2454_vm10 = vweird.f32 %v5269_v59 }
0x122a   :  { %v2350_v58 = vmul.f32 %v5271_v19, %v2347_v45  ;;  %vm2455_vm13 = vmor %vm2453_vm12, %vm2454_vm10  ;;  %vm2355_vm15 = vweird.f32 %v5271_v19 }
0x122b   :  { %v2450_v33 = vsub.f32 1.0, %v2449_v39  ;;  %v2360_v39 = vand.u32 2147483648, %v2347_v45  ;;  %vm2356_vm1 = vmor %vm2354_vm0, %vm2355_vm15 }
0x122c   :  { %v2351_v11 = vsub.f32 1.0, %v2350_v58 }
0x122d   :  { %v2451_v56 = vmul.f32 %v5269_v59, %v2450_v33 }
0x122e   :  { %v2352_v34 = vmul.f32 %v5271_v19, %v2351_v11 }
0x122f   :  { %v2452_v25 = vadd.f32 %v5269_v59, %v2451_v56  ;;  %v2361_v56 = vor.u32 1.1754944e-38, %v2360_v39 }
0x1230   :  { %v2353_v7 = vadd.f32 %v5271_v19, %v2352_v34 }
0x1231   :  { %v2456_v23 = vsel %vm2455_vm13, %v5269_v59, %v2452_v25 }
0x1232   :  { %v2461_v37 = vsel %vm2458_vm14, %v2460_v24, %v2456_v23  ;;  %v2357_v33 = vsel %vm2356_vm1, %v5271_v19, %v2353_v7  ;;  %v4905_v24 = vmul.f32 -1.442695, %v7061_v49 }
0x1233   :  { %v2362_v44 = vsel %vm2359_vm2, %v2361_v56, %v2357_v33  ;;  %v2479_v59 = vmul.f32 %v2461_v37, %v7002_v38  ;;  %v4901_v38 = vmul.f32 -1.442695, %v7057_v21 }
0x1234   :  { %v2380_v45 = vmul.f32 %v2362_v44, %v7006_v22 }
0x1262   :  { %v2383_v58 = vpop.permute.xlu2 %2382 }
0x1263   :  { %v2385_v11 = vmul.f32 %v2383_v58, %v2362_v44 }
0x1290   :  { %v2482_v17 = vpop.permute.xlu0 %2481 }
0x1291   :  { %v2484_v47 = vmul.f32 %v2482_v17, %v2461_v37 }
0x1293   :  { %2486 = vrot.lane.b32.xlu1 %v2484_v47, %s5694_s9 }
0x129b   :  { %2387 = vrot.lane.b32.xlu1 %v2385_v11, %s5694_s9 }
0x1305   :  { %v2487_v25 = vpop.permute.xlu1 %2486 }
0x1306   :  { %v7068_v52 = vadd.f32 %v2487_v25, %v2479_v59 }
0x1308   :  { %5272 = vtanh.f32 %v7068_v52 }
0x130d   :  { %v2388_v12 = vpop.permute.xlu1 %2387 }
0x130e   :  { %v5273_v47 = vpop.eup %5272  ;;  %v7072_v34 = vadd.f32 %v2388_v12, %v2380_v45 }
0x130f   :  { %2492 = vrot.lane.b32.xlu0 %v5273_v47, %s5694_s9 }
0x1310   :  { %5274 = vtanh.f32 %v7072_v34 }
0x1311   :  { %5276 = vpow2.f32 %v4901_v38 }
0x1316   :  { %v5275_v60 = vpop.eup %5274 }
0x1317   :  { %2393 = vrot.lane.b32.xlu2 %v5275_v60, %s5694_s9  ;;  %v5277_v19 = vpop.eup %5276 }
0x1318   :  { %v2348_v23 = vadd.f32 1.0, %v5277_v19 }
0x131a   :  { %5278 = vrcp.f32 %v2348_v23  ;;  %v2375_v44 = vand.u32 2147483648, %v2348_v23  ;;  %vm2369_vm4 = vweird.f32 %v2348_v23  ;;  %v2373_v21 = vand.u32 2147483647, %v2348_v23 }
0x131b   :  { %5280 = vpow2.f32 %v4905_v24 }
0x131c   :  { %v2376_v25 = vor.u32 1.1754944e-38, %v2375_v44  ;;  %vm2374_vm6 = vcmp.eq.f32.partialorder %v2373_v21, 8.507059e+37 }
0x1320   :  { %v5279_v22 = vpop.eup %5278 }
0x1321   :  { %v5281_v17 = vpop.eup %5280  ;;  %v2365_v37 = vmul.f32 %v5279_v22, %v2348_v23  ;;  %vm2370_vm3 = vweird.f32 %v5279_v22 }
0x1322   :  { %v2447_v7 = vadd.f32 1.0, %v5281_v17  ;;  %vm2371_vm5 = vmor %vm2369_vm4, %vm2370_vm3 }
0x1323   :  { %v2366_v39 = vsub.f32 1.0, %v2365_v37 }
0x1324   :  { %5282 = vrcp.f32 %v2447_v7  ;;  %v2474_v19 = vand.u32 2147483648, %v2447_v7  ;;  %vm2468_vm8 = vweird.f32 %v2447_v7 }
0x1325   :  { %v2367_v33 = vmul.f32 %v5279_v22, %v2366_v39 }
0x1327   :  { %v2368_v58 = vadd.f32 %v5279_v22, %v2367_v33 }
0x1329   :  { %v2372_v11 = vsel %vm2371_vm5, %v5279_v22, %v2368_v58  ;;  %v2510_v22 = vld [vmem:[#allocation3 + $0x10] sm:$0xc0] }
0x132a   :  { %v5283_v56 = vpop.eup %5282  ;;  %v2377_v49 = vsel %vm2374_vm6, %v2376_v25, %v2372_v11  ;;  %v2619_v39 = vrot.slane %v2510_v22, 6 }
0x132b   :  { %v2464_v59 = vmul.f32 %v5283_v56, %v2447_v7  ;;  %vm2469_vm7 = vweird.f32 %v5283_v56 }
0x132c   :  { %vm2470_vm9 = vmor %vm2468_vm8, %vm2469_vm7 }
0x132d   :  { %v2465_v47 = vsub.f32 1.0, %v2464_v59 }
0x132f   :  { %v2466_v60 = vmul.f32 %v5283_v56, %v2465_v47 }
0x1331   :  { %v2467_v38 = vadd.f32 %v5283_v56, %v2466_v60 }
0x1371   :  { %v2394_v45 = vpop.permute.xlu2 %2393 }
0x1372   :  { %v7079_v12 = vmul.f32 %v2394_v45, %v2377_v49 }
0x1374   :  { %8126 = vst [vmem:[#allocation21_spill] sm:$0xff] %v7079_v12  ;;  %4906 = vmatmul.msk.f32.vlgmr.msrb.gmra.mxu0 %vm283_vm11, %v7079_v12  ;;  %4907 = vmatmul.msk.f32.vlgmr.msrb.gmra.mxu1 %vm283_vm11, %v7079_v12 }
0x1375   :  { %2975 = vmatpush.msrb.mxu0 %v6730_v8  ;;  %2995 = vmatpush.msrb.mxu1 %v6736_v61  ;;  %v2472_v8 = vand.u32 2147483647, %v2447_v7  ;;  %v2471_v61 = vsel %vm2470_vm9, %v5283_v56, %v2467_v38 }
0x1377   :  { %2976 = vmatpush.msrb.mxu0 %v6923_v18  ;;  %2996 = vmatpush.msrb.mxu1 %v6743_v1  ;;  %v2475_v1 = vor.u32 1.1754944e-38, %v2474_v19  ;;  %vm2473_vm10 = vcmp.eq.f32.partialorder %v2472_v8, 8.507059e+37 }
0x1379   :  { %2977 = vmatpush.msrb.mxu0 %v6930_v10  ;;  %2997 = vmatpush.msrb.mxu1 %v6750_v6  ;;  %v2476_v6 = vsel %vm2473_vm10, %v2475_v1, %v2471_v61 }
0x137b   :  { %2978 = vmatpush.msrb.mxu0 %v6937_v29  ;;  %2998 = vmatpush.msrb.mxu1 %v6757_v27 }
0x137d   :  { %2979 = vmatpush.msrb.mxu0 %v6944_v26  ;;  %2999 = vmatpush.msrb.mxu1 %v6764_v32  ;;  %v2509_v32 = vld [vmem:[#allocation2 + $0x28] sm:$0x30] }
0x137f   :  { %2980 = vmatpush.msrb.mxu0 %v6951_v50  ;;  %3000 = vmatpush.msrb.mxu1 %v6771_v2  ;;  %v2515_v2 = vrot.slane %v2509_v32, 4 }
0x1381   :  { %v2493_v23 = vpop.permute.xlu0 %2492  ;;  %2981 = vmatpush.msrb.mxu0 %v6958_v63  ;;  %3001 = vmatpush.msrb.mxu1 %v6778_v3 }
0x1382   :  { %v7099_v27 = vmul.f32 %v2493_v23, %v2476_v6 }
0x1383   :  { %2982 = vmatpush.msrb.mxu0 %v6967_v55  ;;  %3002 = vmatpush.msrb.mxu1 %v6787_v54 }
0x1384   :  { %8127 = vst [vmem:[#allocation22_spill] sm:$0xff] %v7099_v27  ;;  %4910 = vmatmul.msk.f32.vlgmr.msrb.gmra.mxu2 %vm283_vm11, %v7099_v27  ;;  %4911 = vmatmul.msk.f32.vlgmr.msrb.gmra.mxu3 %vm283_vm11, %v7099_v27 }
0x1385   :  { %3080 = vmatpush.msrb.mxu2 %v6797_v0  ;;  %3100 = vmatpush.msrb.mxu3 %v6803_v31  ;;  %v2511_v31 = vld [vmem:[#allocation3 + $0x40] sm:$0xc0] }
0x1387   :  { %3081 = vmatpush.msrb.mxu2 %v6809_v13  ;;  %3101 = vmatpush.msrb.mxu3 %v6815_v35  ;;  %v2620_v13 = vrot.slane %v2511_v31, 6 }
0x1389   :  { %3082 = vmatpush.msrb.mxu2 %v6821_v41  ;;  %3102 = vmatpush.msrb.mxu3 %v6827_v43 }
0x138b   :  { %3083 = vmatpush.msrb.mxu2 %v6833_v46  ;;  %3103 = vmatpush.msrb.mxu3 %v6839_v51  ;;  %v2508_v46 = vld [vmem:[#allocation2 + $0x48] sm:$0x30] }
0x138d   :  { %3084 = vmatpush.msrb.mxu2 %v6845_v53  ;;  %3104 = vmatpush.msrb.mxu3 %v6851_v20  ;;  %v2514_v53 = vrot.slane %v2508_v46, 4 }
0x138f   :  { %3085 = vmatpush.msrb.mxu2 %v6857_v14  ;;  %3105 = vmatpush.msrb.mxu3 %v6863_v16 }
0x1391   :  { %3086 = vmatpush.msrb.mxu2 %v6869_v40  ;;  %3106 = vmatpush.msrb.mxu3 %v6875_v9 }
0x1393   :  { %3087 = vmatpush.msrb.mxu2 %v6881_v5  ;;  %3107 = vmatpush.msrb.mxu3 %v6887_v42 }
0x13f1   :  { %v2558_v3 = vpop.f32.mrf.mxu1  ;;  %v2538_v51 = vpop.f32.mrf.mxu0 }
0x13f2   :  { %v7123_v54 = vadd.f32 %v2558_v3, %v2515_v2  ;;  %v2539_v20 = vadd.f32 %v2538_v51, %v2514_v53 }
0x13f4   :  { %5284 = vtanh.f32 %v7123_v54  ;;  %v4908_v14 = vmul.f32 -1.442695, %v2539_v20  ;;  %v4909_v20 = vmul.f32 -1.442695, %v7123_v54 }
0x13fa   :  { %v5285_v0 = vpop.eup %5284 }
0x13fb   :  { %2602 = vrot.lane.b32.xlu2 %v5285_v0, %s5694_s9 }
0x1407   :  { %v2663_v35 = vpop.f32.mrf.mxu3  ;;  %v2643_v37 = vpop.f32.mrf.mxu2 }
0x1408   :  { %v7127_v41 = vadd.f32 %v2663_v35, %v2620_v13  ;;  %v2644_v58 = vadd.f32 %v2643_v37, %v2619_v39  ;;  %v7153_v39 = vld [vmem:[%s8086_s2 + $0x70] sm:$0xff] }
0x140a   :  { %5286 = vtanh.f32 %v7127_v41  ;;  %v4912_v59 = vmul.f32 -1.442695, %v2644_v58  ;;  %v7166_v58 = vld [vmem:[%s8086_s2 + $0x68] sm:$0xff] }
0x140b   :  { %5288 = vpow2.f32 %v4908_v14 }
0x1410   :  { %v5287_v43 = vpop.eup %5286 }
0x1411   :  { %2707 = vrot.lane.b32.xlu0 %v5287_v43, %s5694_s9  ;;  %v5289_v16 = vpop.eup %5288 }
0x1412   :  { %v2567_v40 = vadd.f32 1.0, %v5289_v16 }
0x1414   :  { %5290 = vrcp.f32 %v2567_v40  ;;  %v2580_v7 = vand.u32 2147483648, %v2567_v40  ;;  %vm2574_vm13 = vweird.f32 %v2567_v40  ;;  %v2578_v33 = vand.u32 2147483647, %v2567_v40 }
0x1415   :  { %5292 = vpow2.f32 %v4912_v59 }
0x1416   :  { %v2581_v44 = vor.u32 1.1754944e-38, %v2580_v7  ;;  %vm2579_vm15 = vcmp.eq.f32.partialorder %v2578_v33, 8.507059e+37  ;;  %v7159_v33 = vld [vmem:[%s8086_s2 + $0x78] sm:$0xff] }
0x141a   :  { %v5291_v9 = vpop.eup %5290 }
0x141b   :  { %v2570_v5 = vmul.f32 %v5291_v9, %v2567_v40  ;;  %vm2575_vm12 = vweird.f32 %v5291_v9  ;;  %v5293_v49 = vpop.eup %5292 }
0x141c   :  { %vm2576_vm14 = vmor %vm2574_vm13, %vm2575_vm12  ;;  %v2672_v45 = vadd.f32 1.0, %v5293_v49 }
0x141d   :  { %v2571_v42 = vsub.f32 1.0, %v2570_v5 }
0x141e   :  { %5294 = vrcp.f32 %v2672_v45  ;;  %v2685_v61 = vand.u32 2147483648, %v2672_v45  ;;  %vm2679_vm1 = vweird.f32 %v2672_v45  ;;  %v2683_v1 = vand.u32 2147483647, %v2672_v45 }
0x141f   :  { %v2572_v24 = vmul.f32 %v5291_v9, %v2571_v42 }
0x1420   :  { %v2686_v23 = vor.u32 1.1754944e-38, %v2685_v61  ;;  %vm2684_vm3 = vcmp.eq.f32.partialorder %v2683_v1, 8.507059e+37  ;;  %v7221_v61 = vld [vmem:[%s8089_s5 + $0x70] sm:$0xff]  ;;  %v7227_v1 = vld [vmem:[%s8089_s5 + $0x78] sm:$0xff] }
0x1421   :  { %v2573_v17 = vadd.f32 %v5291_v9, %v2572_v24 }
0x1423   :  { %v2577_v56 = vsel %vm2576_vm14, %v5291_v9, %v2573_v17 }
0x1424   :  { %v2582_v11 = vsel %vm2579_vm15, %v2581_v44, %v2577_v56  ;;  %v5295_v47 = vpop.eup %5294  ;;  %v7173_v56 = vld [vmem:[%s8086_s2 + $0x58] sm:$0xff]  ;;  %v4913_v44 = vmul.f32 -1.442695, %v7127_v41 }
0x1425   :  { %v2675_v60 = vmul.f32 %v5295_v47, %v2672_v45  ;;  %vm2680_vm0 = vweird.f32 %v5295_v47  ;;  %v2600_v0 = vmul.f32 %v2582_v11, %v7072_v34 }
0x1426   :  { %vm2681_vm2 = vmor %vm2679_vm1, %vm2680_vm0 }
0x1427   :  { %v2676_v38 = vsub.f32 1.0, %v2675_v60 }
0x1429   :  { %v2677_v19 = vmul.f32 %v5295_v47, %v2676_v38 }
0x142b   :  { %v2678_v8 = vadd.f32 %v5295_v47, %v2677_v19 }
0x142d   :  { %v2682_v6 = vsel %vm2681_vm2, %v5295_v47, %v2678_v8 }
0x142e   :  { %v2687_v2 = vsel %vm2684_vm3, %v2686_v23, %v2682_v6  ;;  %v7233_v6 = vld [vmem:[%s8089_s5 + $0x60] sm:$0xff]  ;;  %v7239_v23 = vld [vmem:[%s8089_s5 + $0x68] sm:$0xff] }
0x142f   :  { %v2705_v43 = vmul.f32 %v2687_v2, %v7068_v52 }
0x1455   :  { %v2603_v21 = vpop.permute.xlu2 %2602 }
0x1456   :  { %v2605_v25 = vmul.f32 %v2603_v21, %v2582_v11 }
0x1458   :  { %2607 = vrot.lane.b32.xlu0 %v2605_v25, %s5694_s9 }
0x1483   :  { %v2708_v32 = vpop.permute.xlu0 %2707 }
0x1484   :  { %v2710_v3 = vmul.f32 %v2708_v32, %v2687_v2  ;;  %v7245_v32 = vld [vmem:[%s8089_s5 + $0x50] sm:$0xff]  ;;  %v7251_v2 = vld [vmem:[%s8089_s5 + $0x58] sm:$0xff] }
0x1486   :  { %2712 = vrot.lane.b32.xlu1 %v2710_v3, %s5694_s9  ;;  %v7257_v3 = vld [vmem:[%s8089_s5 + $0x40] sm:$0xff] }
0x14ca   :  { %v2608_v31 = vpop.permute.xlu0 %2607 }
0x14cb   :  { %v7134_v13 = vadd.f32 %v2608_v31, %v2600_v0  ;;  %v7263_v0 = vld [vmem:[%s8089_s5 + $0x48] sm:$0xff]  ;;  %v7269_v31 = vld [vmem:[%s8089_s5 + $0x30] sm:$0xff] }
0x14cd   :  { %5296 = vtanh.f32 %v7134_v13 }
0x14d3   :  { %v5297_v35 = vpop.eup %5296 }
0x14d4   :  { %2613 = vrot.lane.b32.xlu2 %v5297_v35, %s5694_s9  ;;  %v7275_v35 = vld [vmem:[%s8089_s5 + $0x38] sm:$0xff] }
0x14f8   :  { %v2713_v46 = vpop.permute.xlu1 %2712 }
0x14f9   :  { %v7139_v51 = vadd.f32 %v2713_v46, %v2705_v43  ;;  %v7281_v43 = vld [vmem:[%s8089_s5 + $0x20] sm:$0xff]  ;;  %v7287_v46 = vld [vmem:[%s8089_s5 + $0x28] sm:$0xff] }
0x14fb   :  { %5298 = vtanh.f32 %v7139_v51 }
0x14fc   :  { %5300 = vpow2.f32 %v4909_v20  ;;  %v7299_v20 = vld [vmem:[%s8089_s5 + $0x18] sm:$0xff] }
0x1501   :  { %v5299_v53 = vpop.eup %5298 }
0x1502   :  { %2718 = vrot.lane.b32.xlu1 %v5299_v53, %s5694_s9  ;;  %v5301_v34 = vpop.eup %5300  ;;  %v7293_v53 = vld [vmem:[%s8089_s5 + $0x10] sm:$0xff] }
0x1503   :  { %v2568_v14 = vadd.f32 1.0, %v5301_v34  ;;  %v7305_v34 = vld [vmem:[%s8089_s5] sm:$0xff] }
0x1505   :  { %5302 = vrcp.f32 %v2568_v14  ;;  %v2595_v52 = vand.u32 2147483648, %v2568_v14  ;;  %vm2589_vm5 = vweird.f32 %v2568_v14  ;;  %v2593_v24 = vand.u32 2147483647, %v2568_v14 }
0x1506   :  { %5304 = vpow2.f32 %v4913_v44 }
0x1507   :  { %v2596_v17 = vor.u32 1.1754944e-38, %v2595_v52  ;;  %vm2594_vm7 = vcmp.eq.f32.partialorder %v2593_v24, 8.507059e+37  ;;  %v2734_v52 = vld [vmem:[#allocation2 + $0x48] sm:$0xc0] }
0x150b   :  { %v5303_v16 = vpop.eup %5302 }
0x150c   :  { %v2585_v40 = vmul.f32 %v5303_v16, %v2568_v14  ;;  %vm2590_vm4 = vweird.f32 %v5303_v16  ;;  %v7311_v14 = vld [vmem:[%s8089_s5 + $0x8] sm:$0xff] }
0x150d   :  { %vm2591_vm6 = vmor %vm2589_vm5, %vm2590_vm4 }
0x150e   :  { %v2586_v9 = vsub.f32 1.0, %v2585_v40 }
0x1510   :  { %v2587_v5 = vmul.f32 %v5303_v16, %v2586_v9 }
0x1512   :  { %v2588_v42 = vadd.f32 %v5303_v16, %v2587_v5 }
0x1514   :  { %v2592_v22 = vsel %vm2591_vm6, %v5303_v16, %v2588_v42  ;;  %v2735_v16 = vld [vmem:[#allocation2 + $0x28] sm:$0xc0] }
0x1515   :  { %v2597_v54 = vsel %vm2594_vm7, %v2596_v17, %v2592_v22  ;;  %v2741_v40 = vrot.slane %v2735_v16, 6  ;;  %v2737_v22 = vld [vmem:[#allocation3 + $0x40] sm:$0x30]  ;;  %v2740_v17 = vrot.slane %v2734_v52, 6  ;;  %v2736_v52 = vld [vmem:[#allocation3 + $0x10] sm:$0x30] }
0x152e   :  { %v2614_v37 = vpop.permute.xlu2 %2613 }
0x152f   :  { %v7144_v7 = vmul.f32 %v2614_v37, %v2597_v54  ;;  %v2846_v37 = vrot.slane %v2737_v22, 4  ;;  %v2845_v22 = vrot.slane %v2736_v52, 4 }
0x1531   :  { %8128 = vst [vmem:[#allocation23_spill] sm:$0xff] %v7144_v7  ;;  %4914 = vmatmul.msk.f32.vlgmr.msra.gmra.mxu0 %vm283_vm11, %v7144_v7  ;;  %4915 = vmatmul.msk.f32.vlgmr.msra.gmra.mxu1 %vm283_vm11, %v7144_v7 }
0x1532   :  { %3201 = vmatpush.msra.mxu0 %v7153_v39  ;;  %3221 = vmatpush.msra.mxu1 %v7159_v33 }
0x1534   :  { %3202 = vmatpush.msra.mxu0 %v6923_v18  ;;  %3222 = vmatpush.msra.mxu1 %v7166_v58  ;;  %v7180_v18 = vld [vmem:[%s8086_s2 + $0x48] sm:$0xff] }
0x1536   :  { %3203 = vmatpush.msra.mxu0 %v6930_v10  ;;  %3223 = vmatpush.msra.mxu1 %v7173_v56  ;;  %v7187_v10 = vld [vmem:[%s8086_s2 + $0x38] sm:$0xff] }
0x1538   :  { %3204 = vmatpush.msra.mxu0 %v6937_v29  ;;  %3224 = vmatpush.msra.mxu1 %v7180_v18  ;;  %v7194_v29 = vld [vmem:[%s8086_s2 + $0x28] sm:$0xff] }
0x153a   :  { %3205 = vmatpush.msra.mxu0 %v6944_v26  ;;  %3225 = vmatpush.msra.mxu1 %v7187_v10  ;;  %v7201_v26 = vld [vmem:[%s8086_s2 + $0x18] sm:$0xff] }
0x153c   :  { %3206 = vmatpush.msra.mxu0 %v6951_v50  ;;  %3226 = vmatpush.msra.mxu1 %v7194_v29  ;;  %v7208_v50 = vld [vmem:[%s8086_s2 + $0x8] sm:$0xff] }
0x153e   :  { %3207 = vmatpush.msra.mxu0 %v6958_v63  ;;  %3227 = vmatpush.msra.mxu1 %v7201_v26  ;;  %v5305_v63 = vpop.eup %5304 }
0x153f   :  { %v2673_v21 = vadd.f32 1.0, %v5305_v63 }
0x1540   :  { %3208 = vmatpush.msra.mxu0 %v6967_v55  ;;  %3228 = vmatpush.msra.mxu1 %v7208_v50 }
0x1541   :  { %5306 = vrcp.f32 %v2673_v21  ;;  %v2700_v55 = vand.u32 2147483648, %v2673_v21  ;;  %vm2694_vm9 = vweird.f32 %v2673_v21  ;;  %v2698_v47 = vand.u32 2147483647, %v2673_v21 }
0x1543   :  { %v2701_v38 = vor.u32 1.1754944e-38, %v2700_v55  ;;  %vm2699_vm12 = vcmp.eq.f32.partialorder %v2698_v47, 8.507059e+37 }
0x1547   :  { %v5307_v11 = vpop.eup %5306 }
0x1548   :  { %v2690_v59 = vmul.f32 %v5307_v11, %v2673_v21  ;;  %vm2695_vm8 = vweird.f32 %v5307_v11 }
0x1549   :  { %vm2696_vm10 = vmor %vm2694_vm9, %vm2695_vm8 }
0x154a   :  { %v2691_v25 = vsub.f32 1.0, %v2690_v59 }
0x154c   :  { %v2692_v49 = vmul.f32 %v5307_v11, %v2691_v25 }
0x154e   :  { %v2693_v45 = vadd.f32 %v5307_v11, %v2692_v49 }
0x1550   :  { %v2697_v60 = vsel %vm2696_vm10, %v5307_v11, %v2693_v45 }
0x1551   :  { %v2702_v19 = vsel %vm2699_vm12, %v2701_v38, %v2697_v60 }
0x1574   :  { %v2719_v8 = vpop.permute.xlu1 %2718 }
0x1575   :  { %v7212_v41 = vmul.f32 %v2719_v8, %v2702_v19 }
0x1577   :  { %4918 = vmatmul.msk.f32.vlgmr.msra.gmra.mxu2 %vm283_vm11, %v7212_v41  ;;  %4919 = vmatmul.msk.f32.vlgmr.msra.gmra.mxu3 %vm283_vm11, %v7212_v41 }
0x1578   :  { %3300 = vmatpush.msra.mxu2 %v7221_v61  ;;  %3320 = vmatpush.msra.mxu3 %v7227_v1 }
0x157a   :  { %3301 = vmatpush.msra.mxu2 %v7233_v6  ;;  %3321 = vmatpush.msra.mxu3 %v7239_v23 }
0x157c   :  { %3302 = vmatpush.msra.mxu2 %v7245_v32  ;;  %3322 = vmatpush.msra.mxu3 %v7251_v2 }
0x157e   :  { %3303 = vmatpush.msra.mxu2 %v7257_v3  ;;  %3323 = vmatpush.msra.mxu3 %v7263_v0 }
0x1580   :  { %3304 = vmatpush.msra.mxu2 %v7269_v31  ;;  %3324 = vmatpush.msra.mxu3 %v7275_v35 }
0x1582   :  { %3305 = vmatpush.msra.mxu2 %v7281_v43  ;;  %3325 = vmatpush.msra.mxu3 %v7287_v46 }
0x1584   :  { %3306 = vmatpush.msra.mxu2 %v7293_v53  ;;  %3326 = vmatpush.msra.mxu3 %v7299_v20 }
0x1586   :  { %3307 = vmatpush.msra.mxu2 %v7305_v34  ;;  %3327 = vmatpush.msra.mxu3 %v7311_v14 }
0x15ae   :  { %v2784_v9 = vpop.f32.mrf.mxu1  ;;  %v2764_v24 = vpop.f32.mrf.mxu0 }
0x15af   :  { %v7314_v5 = vadd.f32 %v2784_v9, %v2741_v40  ;;  %v2765_v54 = vadd.f32 %v2764_v24, %v2740_v17 }
0x15b1   :  { %5308 = vtanh.f32 %v7314_v5  ;;  %v4916_v21 = vmul.f32 -1.442695, %v2765_v54 }
0x15b7   :  { %v5309_v42 = vpop.eup %5308 }
0x15b8   :  { %2828 = vrot.lane.b32.xlu1 %v5309_v42, %s5694_s9 }
0x15fa   :  { %v2889_v44 = vpop.f32.mrf.mxu3  ;;  %v2869_v24 = vpop.f32.mrf.mxu2 }
0x15fb   :  { %v7318_v63 = vadd.f32 %v2889_v44, %v2846_v37  ;;  %v2870_v17 = vadd.f32 %v2869_v24, %v2845_v22 }
0x15fd   :  { %5310 = vtanh.f32 %v7318_v63  ;;  %v4920_v54 = vmul.f32 -1.442695, %v2870_v17 }
0x15fe   :  { %5312 = vpow2.f32 %v4916_v21 }
0x1603   :  { %v5311_v11 = vpop.eup %5310 }
0x1604   :  { %2933 = vrot.lane.b32.xlu0 %v5311_v11, %s5694_s9  ;;  %v5313_v59 = vpop.eup %5312 }
0x1605   :  { %v2793_v25 = vadd.f32 1.0, %v5313_v59 }
0x1607   :  { %5314 = vrcp.f32 %v2793_v25  ;;  %v2806_v38 = vand.u32 2147483648, %v2793_v25  ;;  %vm2800_vm14 = vweird.f32 %v2793_v25  ;;  %v2804_v19 = vand.u32 2147483647, %v2793_v25 }
0x1608   :  { %5316 = vpow2.f32 %v4920_v54  ;;  %v4917_v54 = vmul.f32 -1.442695, %v7314_v5 }
0x1609   :  { %v2807_v16 = vor.u32 1.1754944e-38, %v2806_v38  ;;  %vm2805_vm0 = vcmp.eq.f32.partialorder %v2804_v19, 8.507059e+37 }
0x160d   :  { %v5315_v49 = vpop.eup %5314 }
0x160e   :  { %v2796_v45 = vmul.f32 %v5315_v49, %v2793_v25  ;;  %vm2801_vm13 = vweird.f32 %v5315_v49  ;;  %v5317_v37 = vpop.eup %5316 }
0x160f   :  { %vm2802_vm15 = vmor %vm2800_vm14, %vm2801_vm13  ;;  %v2898_v44 = vadd.f32 1.0, %v5317_v37 }
0x1610   :  { %v2797_v55 = vsub.f32 1.0, %v2796_v45 }
0x1611   :  { %5318 = vrcp.f32 %v2898_v44  ;;  %v2911_v45 = vand.u32 2147483648, %v2898_v44  ;;  %vm2905_vm2 = vweird.f32 %v2898_v44 }
0x1612   :  { %v2798_v47 = vmul.f32 %v5315_v49, %v2797_v55  ;;  %v2909_v55 = vand.u32 2147483647, %v2898_v44 }
0x1614   :  { %v2799_v60 = vadd.f32 %v5315_v49, %v2798_v47  ;;  %vm2910_vm4 = vcmp.eq.f32.partialorder %v2909_v55, 8.507059e+37 }
0x1616   :  { %v2803_v8 = vsel %vm2802_vm15, %v5315_v49, %v2799_v60  ;;  %v2912_v60 = vor.u32 1.1754944e-38, %v2911_v45 }
0x1617   :  { %v2808_v9 = vsel %vm2805_vm0, %v2807_v16, %v2803_v8  ;;  %v5319_v21 = vpop.eup %5318 }
0x1618   :  { %v2901_v11 = vmul.f32 %v5319_v21, %v2898_v44  ;;  %vm2906_vm1 = vweird.f32 %v5319_v21  ;;  %v2826_v16 = vmul.f32 %v2808_v9, %v7134_v13 }
0x1619   :  { %vm2907_vm3 = vmor %vm2905_vm2, %vm2906_vm1 }
0x161a   :  { %v2902_v59 = vsub.f32 1.0, %v2901_v11 }
0x161c   :  { %v2903_v25 = vmul.f32 %v5319_v21, %v2902_v59 }
0x161e   :  { %v2904_v49 = vadd.f32 %v5319_v21, %v2903_v25 }
0x1620   :  { %v2908_v47 = vsel %vm2907_vm3, %v5319_v21, %v2904_v49 }
0x1621   :  { %v2913_v38 = vsel %vm2910_vm4, %v2912_v60, %v2908_v47 }
0x1622   :  { %v2931_v24 = vmul.f32 %v2913_v38, %v7139_v51 }
0x162a   :  { %v2829_v40 = vpop.permute.xlu1 %2828 }
0x162b   :  { %v2831_v42 = vmul.f32 %v2829_v40, %v2808_v9 }
0x162d   :  { %2833 = vrot.lane.b32.xlu0 %v2831_v42, %s5694_s9 }
0x1676   :  { %v2934_v19 = vpop.permute.xlu0 %2933 }
0x1677   :  { %v2936_v8 = vmul.f32 %v2934_v19, %v2913_v38  ;;  %v7346_v38 = vld [vmem:[%s8086_s2 + $0x60] sm:$0xff]  ;;  %v7353_v19 = vld [vmem:[%s8086_s2 + $0x50] sm:$0xff] }
0x1679   :  { %2938 = vrot.lane.b32.xlu2 %v2936_v8, %s5694_s9  ;;  %v7360_v8 = vld [vmem:[%s8086_s2 + $0x40] sm:$0xff] }
0x169f   :  { %v2834_v40 = vpop.permute.xlu0 %2833 }
0x16a0   :  { %v7325_v42 = vadd.f32 %v2834_v40, %v2826_v16  ;;  %v7367_v16 = vld [vmem:[%s8086_s2 + $0x30] sm:$0xff]  ;;  %v7374_v40 = vld [vmem:[%s8086_s2 + $0x20] sm:$0xff] }
0x16a2   :  { %5320 = vtanh.f32 %v7325_v42 }
0x16a8   :  { %v5321_v52 = vpop.eup %5320 }
0x16a9   :  { %2839 = vrot.lane.b32.xlu2 %v5321_v52, %s5694_s9  ;;  %v7381_v52 = vld [vmem:[%s8086_s2 + $0x10] sm:$0xff] }
0x16d3   :  { %v2939_v22 = vpop.permute.xlu2 %2938 }
0x16d4   :  { %v7330_v17 = vadd.f32 %v2939_v22, %v2931_v24  ;;  %v7388_v24 = vld [vmem:[%s8086_s2] sm:$0xff]  ;;  %v4921_v22 = vmul.f32 -1.442695, %v7318_v63 }
0x16d6   :  { %5322 = vtanh.f32 %v7330_v17 }
0x16d7   :  { %5324 = vpow2.f32 %v4917_v54 }
0x16dc   :  { %v5323_v37 = vpop.eup %5322 }
0x16dd   :  { %2944 = vrot.lane.b32.xlu1 %v5323_v37, %s5694_s9  ;;  %v5325_v13 = vpop.eup %5324 }
0x16de   :  { %v2794_v9 = vadd.f32 1.0, %v5325_v13 }
0x16e0   :  { %5326 = vrcp.f32 %v2794_v9  ;;  %v2821_v51 = vand.u32 2147483648, %v2794_v9  ;;  %vm2815_vm6 = vweird.f32 %v2794_v9  ;;  %v2819_v49 = vand.u32 2147483647, %v2794_v9 }
0x16e1   :  { %5328 = vpow2.f32 %v4921_v22 }
0x16e2   :  { %v2822_v45 = vor.u32 1.1754944e-38, %v2821_v51  ;;  %vm2820_vm8 = vcmp.eq.f32.partialorder %v2819_v49, 8.507059e+37 }
0x16e6   :  { %v5327_v44 = vpop.eup %5326 }
0x16e7   :  { %v2811_v21 = vmul.f32 %v5327_v44, %v2794_v9  ;;  %vm2816_vm5 = vweird.f32 %v5327_v44  ;;  %v5329_v54 = vpop.eup %5328 }
0x16e8   :  { %vm2817_vm7 = vmor %vm2815_vm6, %vm2816_vm5  ;;  %v2899_v37 = vadd.f32 1.0, %v5329_v54 }
0x16e9   :  { %v2812_v11 = vsub.f32 1.0, %v2811_v21 }
0x16ea   :  { %5330 = vrcp.f32 %v2899_v37  ;;  %vm2920_vm10 = vweird.f32 %v2899_v37 }
0x16eb   :  { %v2813_v59 = vmul.f32 %v5327_v44, %v2812_v11 }
0x16ed   :  { %v2814_v25 = vadd.f32 %v5327_v44, %v2813_v59  ;;  %v2926_v59 = vand.u32 2147483648, %v2899_v37 }
0x16ef   :  { %v2818_v5 = vsel %vm2817_vm7, %v5327_v44, %v2814_v25  ;;  %v2924_v25 = vand.u32 2147483647, %v2899_v37  ;;  %v2927_v49 = vor.u32 1.1754944e-38, %v2926_v59 }
0x16f0   :  { %v2823_v55 = vsel %vm2820_vm8, %v2822_v45, %v2818_v5  ;;  %v5331_v13 = vpop.eup %5330 }
0x16f1   :  { %v2916_v9 = vmul.f32 %v5331_v13, %v2899_v37  ;;  %vm2921_vm9 = vweird.f32 %v5331_v13  ;;  %vm2925_vm13 = vcmp.eq.f32.partialorder %v2924_v25, 8.507059e+37 }
0x16f2   :  { %vm2922_vm12 = vmor %vm2920_vm10, %vm2921_vm9 }
0x16f3   :  { %v2917_v44 = vsub.f32 1.0, %v2916_v9 }
0x16f5   :  { %v2918_v21 = vmul.f32 %v5331_v13, %v2917_v44  ;;  %v2963_v44 = vld [vmem:[#allocation3 + $0x40] sm:$0xc] }
0x16f7   :  { %v2919_v11 = vadd.f32 %v5331_v13, %v2918_v21 }
0x16f9   :  { %v2923_v51 = vsel %vm2922_vm12, %v5331_v13, %v2919_v11  ;;  %v2960_v13 = vld [vmem:[#allocation2 + $0x8] sm:$0x3]  ;;  %v3066_v11 = vrot.slane %v2963_v44, 2 }
0x16fa   :  { %v2928_v5 = vsel %vm2925_vm13, %v2927_v49, %v2923_v51 }
0x1703   :  { %v2840_v47 = vpop.permute.xlu2 %2839 }
0x1704   :  { %v7335_v60 = vmul.f32 %v2840_v47, %v2823_v55  ;;  %v2961_v55 = vld [vmem:[#allocation2 + $0x20] sm:$0x3] }
0x1706   :  { %8129 = vst [vmem:[#allocation24_spill] sm:$0xff] %v7335_v60  ;;  %4922 = vmatmul.msk.f32.vlgmr.msrb.gmra.mxu0 %vm283_vm11, %v7335_v60  ;;  %4923 = vmatmul.msk.f32.vlgmr.msrb.gmra.mxu1 %vm283_vm11, %v7335_v60 }
0x1707   :  { %3421 = vmatpush.msrb.mxu0 %v7153_v39  ;;  %3441 = vmatpush.msrb.mxu1 %v7159_v33 }
0x1709   :  { %3422 = vmatpush.msrb.mxu0 %v7346_v38  ;;  %3442 = vmatpush.msrb.mxu1 %v7166_v58 }
0x170b   :  { %3423 = vmatpush.msrb.mxu0 %v7353_v19  ;;  %3443 = vmatpush.msrb.mxu1 %v7173_v56 }
0x170d   :  { %3424 = vmatpush.msrb.mxu0 %v7360_v8  ;;  %3444 = vmatpush.msrb.mxu1 %v7180_v18 }
0x170f   :  { %3425 = vmatpush.msrb.mxu0 %v7367_v16  ;;  %3445 = vmatpush.msrb.mxu1 %v7187_v10 }
0x1711   :  { %3426 = vmatpush.msrb.mxu0 %v7374_v40  ;;  %3446 = vmatpush.msrb.mxu1 %v7194_v29 }
0x1713   :  { %3427 = vmatpush.msrb.mxu0 %v7381_v52  ;;  %3447 = vmatpush.msrb.mxu1 %v7201_v26 }
0x1715   :  { %3428 = vmatpush.msrb.mxu0 %v7388_v24  ;;  %3448 = vmatpush.msrb.mxu1 %v7208_v50 }
0x174f   :  { %v2945_v45 = vpop.permute.xlu1 %2944 }
0x1750   :  { %v7393_v63 = vmul.f32 %v2945_v45, %v2928_v5 }
0x1752   :  { %8130 = vst [vmem:[#allocation25_spill] sm:$0xff] %v7393_v63  ;;  %4926 = vmatmul.msk.f32.vlgmr.msrb.gmra.mxu2 %vm283_vm11, %v7393_v63  ;;  %4927 = vmatmul.msk.f32.vlgmr.msrb.gmra.mxu3 %vm283_vm11, %v7393_v63 }
0x1753   :  { %3526 = vmatpush.msrb.mxu2 %v7221_v61  ;;  %3546 = vmatpush.msrb.mxu3 %v7227_v1 }
0x1755   :  { %3527 = vmatpush.msrb.mxu2 %v7233_v6  ;;  %3547 = vmatpush.msrb.mxu3 %v7239_v23 }
0x1757   :  { %3528 = vmatpush.msrb.mxu2 %v7245_v32  ;;  %3548 = vmatpush.msrb.mxu3 %v7251_v2 }
0x1759   :  { %3529 = vmatpush.msrb.mxu2 %v7257_v3  ;;  %3549 = vmatpush.msrb.mxu3 %v7263_v0 }
0x175b   :  { %3530 = vmatpush.msrb.mxu2 %v7269_v31  ;;  %3550 = vmatpush.msrb.mxu3 %v7275_v35 }
0x175d   :  { %3531 = vmatpush.msrb.mxu2 %v7281_v43  ;;  %3551 = vmatpush.msrb.mxu3 %v7287_v46 }
0x175f   :  { %3532 = vmatpush.msrb.mxu2 %v7293_v53  ;;  %3552 = vmatpush.msrb.mxu3 %v7299_v20 }
0x1761   :  { %3533 = vmatpush.msrb.mxu2 %v7305_v34  ;;  %3553 = vmatpush.msrb.mxu3 %v7311_v14 }
0x1783   :  { %v3004_v47 = vpop.f32.mrf.mxu1  ;;  %v2984_v37 = vpop.f32.mrf.mxu0 }
0x1784   :  { %v7415_v22 = vadd.f32 %v3004_v47, %v2961_v55  ;;  %v2985_v9 = vadd.f32 %v2984_v37, %v2960_v13 }
0x1786   :  { %5332 = vtanh.f32 %v7415_v22  ;;  %v4924_v21 = vmul.f32 -1.442695, %v2985_v9 }
0x1788   :  { %5334 = vpow2.f32 %v4924_v21 }
0x178c   :  { %v5333_v54 = vpop.eup %5332 }
0x178d   :  { %3048 = vrot.lane.b32.xlu1 %v5333_v54, %s5694_s9 }
0x178e   :  { %v5335_v51 = vpop.eup %5334 }
0x178f   :  { %v3013_v5 = vadd.f32 1.0, %v5335_v51  ;;  %v2962_v51 = vld [vmem:[#allocation3 + $0x10] sm:$0xc] }
0x1790   :  { %v3065_v7 = vrot.slane %v2962_v51, 2 }
0x1791   :  { %v3026_v13 = vand.u32 2147483648, %v3013_v5  ;;  %vm3020_vm15 = vweird.f32 %v3013_v5  ;;  %v3024_v9 = vand.u32 2147483647, %v3013_v5 }
0x1793   :  { %v3027_v21 = vor.u32 1.1754944e-38, %v3026_v13  ;;  %vm3025_vm1 = vcmp.eq.f32.partialorder %v3024_v9, 8.507059e+37 }
0x17d5   :  { %v3109_v59 = vpop.f32.mrf.mxu3 }
0x17d6   :  { %v7419_v25 = vadd.f32 %v3109_v59, %v3066_v11 }
0x17d8   :  { %5336 = vtanh.f32 %v7419_v25 }
0x17d9   :  { %5338 = vrcp.f32 %v3013_v5 }
0x17de   :  { %v5337_v49 = vpop.eup %5336 }
0x17df   :  { %3153 = vrot.lane.b32.xlu0 %v5337_v49, %s5694_s9  ;;  %v5339_v45 = vpop.eup %5338  ;;  %v3089_v49 = vpop.f32.mrf.mxu2 }
0x17e0   :  { %v3016_v55 = vmul.f32 %v5339_v45, %v3013_v5  ;;  %vm3021_vm14 = vweird.f32 %v5339_v45  ;;  %v3090_v27 = vadd.f32 %v3089_v49, %v3065_v7 }
0x17e1   :  { %vm3022_vm0 = vmor %vm3020_vm15, %vm3021_vm14 }
0x17e2   :  { %v3017_v47 = vsub.f32 1.0, %v3016_v55  ;;  %v4928_v55 = vmul.f32 -1.442695, %v3090_v27 }
0x17e4   :  { %v3018_v54 = vmul.f32 %v5339_v45, %v3017_v47  ;;  %5340 = vpow2.f32 %v4928_v55  ;;  %v4925_v55 = vmul.f32 -1.442695, %v7415_v22 }
0x17e6   :  { %v3019_v37 = vadd.f32 %v5339_v45, %v3018_v54 }
0x17e8   :  { %v3023_v44 = vsel %vm3022_vm0, %v5339_v45, %v3019_v37 }
0x17e9   :  { %v3028_v59 = vsel %vm3025_vm1, %v3027_v21, %v3023_v44 }
0x17ea   :  { %v5341_v47 = vpop.eup %5340 }
0x17eb   :  { %v3118_v54 = vadd.f32 1.0, %v5341_v47 }
0x17ed   :  { %5342 = vrcp.f32 %v3118_v54  ;;  %v3131_v13 = vand.u32 2147483648, %v3118_v54  ;;  %vm3125_vm3 = vweird.f32 %v3118_v54  ;;  %v3129_v9 = vand.u32 2147483647, %v3118_v54 }
0x17ef   :  { %v3132_v44 = vor.u32 1.1754944e-38, %v3131_v13  ;;  %vm3130_vm5 = vcmp.eq.f32.partialorder %v3129_v9, 8.507059e+37 }
0x17f3   :  { %v5343_v63 = vpop.eup %5342 }
0x17f4   :  { %v3121_v5 = vmul.f32 %v5343_v63, %v3118_v54  ;;  %vm3126_vm2 = vweird.f32 %v5343_v63 }
0x17f5   :  { %vm3127_vm4 = vmor %vm3125_vm3, %vm3126_vm2 }
0x17f6   :  { %v3122_v12 = vsub.f32 1.0, %v3121_v5 }
0x17f8   :  { %v3123_v45 = vmul.f32 %v5343_v63, %v3122_v12 }
0x17fa   :  { %v3124_v37 = vadd.f32 %v5343_v63, %v3123_v45 }
0x17ff   :  { %v3049_v11 = vpop.permute.xlu1 %3048 }
0x1800   :  { %v3051_v60 = vmul.f32 %v3049_v11, %v3028_v59  ;;  %v3046_v11 = vmul.f32 %v3028_v59, %v7325_v42 }
0x1802   :  { %3053 = vrot.lane.b32.xlu0 %v3051_v60, %s5694_s9  ;;  %v3128_v60 = vsel %vm3127_vm4, %v5343_v63, %v3124_v37 }
0x1803   :  { %v3133_v7 = vsel %vm3130_vm5, %v3132_v44, %v3128_v60 }
0x1804   :  { %v3151_v63 = vmul.f32 %v3133_v7, %v7330_v17 }
0x1851   :  { %v3154_v21 = vpop.permute.xlu0 %3153 }
0x1852   :  { %v3156_v27 = vmul.f32 %v3154_v21, %v3133_v7 }
0x1854   :  { %3158 = vrot.lane.b32.xlu2 %v3156_v27, %s5694_s9 }
0x1874   :  { %v3054_v51 = vpop.permute.xlu0 %3053 }
0x1875   :  { %v7426_v49 = vadd.f32 %v3054_v51, %v3046_v11  ;;  %v4929_v51 = vmul.f32 -1.442695, %v7419_v25 }
0x1877   :  { %5344 = vtanh.f32 %v7426_v49 }
0x1878   :  { %5346 = vpow2.f32 %v4925_v55 }
0x187d   :  { %v5345_v12 = vpop.eup %5344 }
0x187e   :  { %3059 = vrot.lane.b32.xlu2 %v5345_v12, %s5694_s9  ;;  %v5347_v5 = vpop.eup %5346 }
0x187f   :  { %v3014_v59 = vadd.f32 1.0, %v5347_v5 }
0x1881   :  { %v3041_v22 = vand.u32 2147483648, %v3014_v59  ;;  %vm3035_vm7 = vweird.f32 %v3014_v59  ;;  %v3039_v17 = vand.u32 2147483647, %v3014_v59 }
0x1883   :  { %v3042_v21 = vor.u32 1.1754944e-38, %v3041_v22  ;;  %vm3040_vm9 = vcmp.eq.f32.partialorder %v3039_v17, 8.507059e+37  ;;  %v3181_v17 = vld [vmem:[#allocation2 + $0x20] sm:$0xc] }
0x18ae   :  { %v3159_v47 = vpop.permute.xlu2 %3158 }
0x18af   :  { %v7432_v54 = vadd.f32 %v3159_v47, %v3151_v63 }
0x18b1   :  { %5348 = vtanh.f32 %v7432_v54 }
0x18b2   :  { %5350 = vrcp.f32 %v3014_v59 }
0x18b3   :  { %5352 = vpow2.f32 %v4929_v51  ;;  %v3180_v51 = vld [vmem:[#allocation2 + $0x8] sm:$0xc] }
0x18b7   :  { %v5349_v42 = vpop.eup %5348 }
0x18b8   :  { %3164 = vrot.lane.b32.xlu1 %v5349_v42, %s5694_s9  ;;  %v5351_v45 = vpop.eup %5350 }
0x18b9   :  { %v3031_v37 = vmul.f32 %v5351_v45, %v3014_v59  ;;  %vm3036_vm6 = vweird.f32 %v5351_v45  ;;  %v5353_v12 = vpop.eup %5352 }
0x18ba   :  { %vm3037_vm8 = vmor %vm3035_vm7, %vm3036_vm6  ;;  %v3119_v55 = vadd.f32 1.0, %v5353_v12 }
0x18bb   :  { %v3032_v13 = vsub.f32 1.0, %v3031_v37 }
0x18bc   :  { %5354 = vrcp.f32 %v3119_v55  ;;  %vm3140_vm12 = vweird.f32 %v3119_v55  ;;  %v3144_v37 = vand.u32 2147483647, %v3119_v55 }
0x18bd   :  { %v3033_v9 = vmul.f32 %v5351_v45, %v3032_v13 }
0x18be   :  { %vm3145_vm14 = vcmp.eq.f32.partialorder %v3144_v37, 8.507059e+37 }
0x18bf   :  { %v3034_v60 = vadd.f32 %v5351_v45, %v3033_v9 }
0x18c1   :  { %v3038_v44 = vsel %vm3037_vm8, %v5351_v45, %v3034_v60  ;;  %v3146_v45 = vand.u32 2147483648, %v3119_v55 }
0x18c2   :  { %v3043_v7 = vsel %vm3040_vm9, %v3042_v21, %v3038_v44  ;;  %v5355_v63 = vpop.eup %5354  ;;  %v3187_v44 = vrot.slane %v3181_v17, 2 }
0x18c3   :  { %v3136_v47 = vmul.f32 %v5355_v63, %v3119_v55  ;;  %vm3141_vm10 = vweird.f32 %v5355_v63  ;;  %v3147_v9 = vor.u32 1.1754944e-38, %v3146_v45  ;;  %v3186_v55 = vrot.slane %v3180_v51, 2 }
0x18c4   :  { %vm3142_vm13 = vmor %vm3140_vm12, %vm3141_vm10 }
0x18c5   :  { %v3137_v5 = vsub.f32 1.0, %v3136_v47 }
0x18c7   :  { %v3138_v42 = vmul.f32 %v5355_v63, %v3137_v5  ;;  %v3183_v5 = vld [vmem:[#allocation3 + $0x40] sm:$0x3] }
0x18c9   :  { %v3139_v59 = vadd.f32 %v5355_v63, %v3138_v42 }
0x18cb   :  { %v3143_v13 = vsel %vm3142_vm13, %v5355_v63, %v3139_v59 }
0x18cc   :  { %v3148_v60 = vsel %vm3145_vm14, %v3147_v9, %v3143_v13 }
0x18d8   :  { %v3060_v27 = vpop.permute.xlu2 %3059 }
0x18d9   :  { %v7436_v11 = vmul.f32 %v3060_v27, %v3043_v7 }
0x18db   :  { %8131 = vst [vmem:[#allocation26_spill] sm:$0xff] %v7436_v11  ;;  %4930 = vmatmul.msk.f32.vlgmr.msra.gmra.mxu0 %vm283_vm11, %v7436_v11  ;;  %4931 = vmatmul.msk.f32.vlgmr.msra.gmra.mxu1 %vm283_vm11, %v7436_v11 }
0x18dc   :  { %3647 = vmatpush.msra.mxu0 %v7153_v39  ;;  %3667 = vmatpush.msra.mxu1 %v7159_v33 }
0x18de   :  { %3648 = vmatpush.msra.mxu0 %v7346_v38  ;;  %3668 = vmatpush.msra.mxu1 %v7166_v58 }
0x18e0   :  { %3649 = vmatpush.msra.mxu0 %v7353_v19  ;;  %3669 = vmatpush.msra.mxu1 %v7173_v56 }
0x18e2   :  { %3650 = vmatpush.msra.mxu0 %v7360_v8  ;;  %3670 = vmatpush.msra.mxu1 %v7180_v18 }
0x18e4   :  { %3651 = vmatpush.msra.mxu0 %v7367_v16  ;;  %3671 = vmatpush.msra.mxu1 %v7187_v10 }
0x18e6   :  { %3652 = vmatpush.msra.mxu0 %v7374_v40  ;;  %3672 = vmatpush.msra.mxu1 %v7194_v29 }
0x18e8   :  { %3653 = vmatpush.msra.mxu0 %v7381_v52  ;;  %3673 = vmatpush.msra.mxu1 %v7201_v26 }
0x18ea   :  { %3654 = vmatpush.msra.mxu0 %v7388_v24  ;;  %3674 = vmatpush.msra.mxu1 %v7208_v50 }
0x192a   :  { %v3165_v22 = vpop.permute.xlu1 %3164 }
0x192b   :  { %v7459_v25 = vmul.f32 %v3165_v22, %v3148_v60 }
0x192d   :  { %8132 = vst [vmem:[#allocation27_spill] sm:$0xff] %v7459_v25  ;;  %4934 = vmatmul.msk.f32.vlgmr.msra.gmra.mxu2 %vm283_vm11, %v7459_v25  ;;  %4935 = vmatmul.msk.f32.vlgmr.msra.gmra.mxu3 %vm283_vm11, %v7459_v25 }
0x192e   :  { %3752 = vmatpush.msra.mxu2 %v7221_v61  ;;  %3772 = vmatpush.msra.mxu3 %v7227_v1 }
0x1930   :  { %3753 = vmatpush.msra.mxu2 %v7233_v6  ;;  %3773 = vmatpush.msra.mxu3 %v7239_v23 }
0x1932   :  { %3754 = vmatpush.msra.mxu2 %v7245_v32  ;;  %3774 = vmatpush.msra.mxu3 %v7251_v2 }
0x1934   :  { %3755 = vmatpush.msra.mxu2 %v7257_v3  ;;  %3775 = vmatpush.msra.mxu3 %v7263_v0 }
0x1936   :  { %3756 = vmatpush.msra.mxu2 %v7269_v31  ;;  %3776 = vmatpush.msra.mxu3 %v7275_v35 }
0x1938   :  { %3757 = vmatpush.msra.mxu2 %v7281_v43  ;;  %3777 = vmatpush.msra.mxu3 %v7287_v46 }
0x193a   :  { %3758 = vmatpush.msra.mxu2 %v7293_v53  ;;  %3778 = vmatpush.msra.mxu3 %v7299_v20 }
0x193c   :  { %3759 = vmatpush.msra.mxu2 %v7305_v34  ;;  %3779 = vmatpush.msra.mxu3 %v7311_v14 }
0x1958   :  { %v3230_v21 = vpop.f32.mrf.mxu1  ;;  %v3210_v12 = vpop.f32.mrf.mxu0 }
0x1959   :  { %v7481_v7 = vadd.f32 %v3230_v21, %v3187_v44  ;;  %v3211_v63 = vadd.f32 %v3210_v12, %v3186_v55 }
0x195b   :  { %5356 = vtanh.f32 %v7481_v7  ;;  %v4932_v47 = vmul.f32 -1.442695, %v3211_v63 }
0x195d   :  { %5358 = vpow2.f32 %v4932_v47 }
0x1961   :  { %v5357_v27 = vpop.eup %5356 }
0x1962   :  { %3274 = vrot.lane.b32.xlu1 %v5357_v27, %s5694_s9 }
0x1963   :  { %v5359_v59 = vpop.eup %5358 }
0x1964   :  { %v3239_v37 = vadd.f32 1.0, %v5359_v59 }
0x1966   :  { %v3252_v21 = vand.u32 2147483648, %v3239_v37  ;;  %vm3246_vm0 = vweird.f32 %v3239_v37  ;;  %v3250_v27 = vand.u32 2147483647, %v3239_v37 }
0x1968   :  { %v3253_v12 = vor.u32 1.1754944e-38, %v3252_v21  ;;  %vm3251_vm2 = vcmp.eq.f32.partialorder %v3250_v27, 8.507059e+37 }
0x19b0   :  { %v3329_v42 = vpop.f32.mrf.mxu3 }
0x19b1   :  { %v7485_v45 = vadd.f32 %v3329_v42, %v3183_v5  ;;  %v3309_v5 = vpop.f32.mrf.mxu2  ;;  %v3182_v42 = vld [vmem:[#allocation3 + $0x10] sm:$0x3] }
0x19b2   :  { %v3310_v59 = vadd.f32 %v3309_v5, %v3182_v42 }
0x19b3   :  { %5360 = vtanh.f32 %v7485_v45 }
0x19b4   :  { %5362 = vrcp.f32 %v3239_v37 }
0x19b9   :  { %v5361_v13 = vpop.eup %5360 }
0x19ba   :  { %3373 = vrot.lane.b32.xlu0 %v5361_v13, %s5694_s9  ;;  %v5363_v9 = vpop.eup %5362  ;;  %v4936_v13 = vmul.f32 -1.442695, %v3310_v59 }
0x19bb   :  { %v3242_v60 = vmul.f32 %v5363_v9, %v3239_v37  ;;  %vm3247_vm15 = vweird.f32 %v5363_v9 }
0x19bc   :  { %vm3248_vm1 = vmor %vm3246_vm0, %vm3247_vm15  ;;  %5364 = vpow2.f32 %v4936_v13 }
0x19bd   :  { %v3243_v22 = vsub.f32 1.0, %v3242_v60 }
0x19bf   :  { %v3244_v17 = vmul.f32 %v5363_v9, %v3243_v22 }
0x19c1   :  { %v3245_v44 = vadd.f32 %v5363_v9, %v3244_v17 }
0x19c2   :  { %v5365_v60 = vpop.eup %5364 }
0x19c3   :  { %v3249_v51 = vsel %vm3248_vm1, %v5363_v9, %v3245_v44  ;;  %v3338_v22 = vadd.f32 1.0, %v5365_v60 }
0x19c4   :  { %v3254_v63 = vsel %vm3251_vm2, %v3253_v12, %v3249_v51 }
0x19c5   :  { %5366 = vrcp.f32 %v3338_v22  ;;  %v3351_v44 = vand.u32 2147483648, %v3338_v22  ;;  %vm3345_vm4 = vweird.f32 %v3338_v22  ;;  %v3349_v21 = vand.u32 2147483647, %v3338_v22 }
0x19c6   :  { %v3272_v5 = vmul.f32 %v3254_v63, %v7426_v49 }
0x19c7   :  { %v3352_v51 = vor.u32 1.1754944e-38, %v3351_v44  ;;  %vm3350_vm6 = vcmp.eq.f32.partialorder %v3349_v21, 8.507059e+37 }
0x19cb   :  { %v5367_v17 = vpop.eup %5366 }
0x19cc   :  { %v3341_v25 = vmul.f32 %v5367_v17, %v3338_v22  ;;  %vm3346_vm3 = vweird.f32 %v5367_v17 }
0x19cd   :  { %vm3347_vm5 = vmor %vm3345_vm4, %vm3346_vm3 }
0x19ce   :  { %v3342_v37 = vsub.f32 1.0, %v3341_v25  ;;  %v4933_v25 = vmul.f32 -1.442695, %v7481_v7 }
0x19d0   :  { %v3343_v11 = vmul.f32 %v5367_v17, %v3342_v37 }
0x19d2   :  { %v3344_v9 = vadd.f32 %v5367_v17, %v3343_v11 }
0x19d4   :  { %v3275_v55 = vpop.permute.xlu1 %3274  ;;  %v3348_v27 = vsel %vm3347_vm5, %v5367_v17, %v3344_v9 }
0x19d5   :  { %v3277_v47 = vmul.f32 %v3275_v55, %v3254_v63  ;;  %v3353_v55 = vsel %vm3350_vm6, %v3352_v51, %v3348_v27 }
0x19d6   :  { %v3371_v13 = vmul.f32 %v3353_v55, %v7432_v54 }
0x19d7   :  { %3279 = vrot.lane.b32.xlu0 %v3277_v47, %s5694_s9 }
0x1a2c   :  { %v3374_v12 = vpop.permute.xlu0 %3373 }
0x1a2d   :  { %v3376_v47 = vmul.f32 %v3374_v12, %v3353_v55 }
0x1a2f   :  { %3378 = vrot.lane.b32.xlu2 %v3376_v47, %s5694_s9 }
0x1a49   :  { %v3280_v42 = vpop.permute.xlu0 %3279 }
0x1a4a   :  { %v7492_v59 = vadd.f32 %v3280_v42, %v3272_v5 }
0x1a4c   :  { %5368 = vtanh.f32 %v7492_v59 }
0x1a4d   :  { %5370 = vpow2.f32 %v4933_v25 }
0x1a52   :  { %v5369_v11 = vpop.eup %5368 }
0x1a53   :  { %3285 = vrot.lane.b32.xlu2 %v5369_v11, %s5694_s9  ;;  %v5371_v22 = vpop.eup %5370 }
0x1a54   :  { %v3240_v49 = vadd.f32 1.0, %v5371_v22 }
0x1a56   :  { %v3267_v7 = vand.u32 2147483648, %v3240_v49  ;;  %vm3261_vm8 = vweird.f32 %v3240_v49  ;;  %v3265_v54 = vand.u32 2147483647, %v3240_v49 }
0x1a58   :  { %v3268_v12 = vor.u32 1.1754944e-38, %v3267_v7  ;;  %vm3266_vm10 = vcmp.eq.f32.partialorder %v3265_v54, 8.507059e+37 }
0x1a89   :  { %v3379_v60 = vpop.permute.xlu2 %3378 }
0x1a8a   :  { %v7498_v17 = vadd.f32 %v3379_v60, %v3371_v13 }
0x1a8c   :  { %5372 = vtanh.f32 %v7498_v17 }
0x1a8d   :  { %5374 = vrcp.f32 %v3240_v49 }
0x1a92   :  { %v5373_v63 = vpop.eup %5372 }
0x1a93   :  { %3384 = vrot.lane.b32.xlu1 %v5373_v63, %s5694_s9  ;;  %v5375_v37 = vpop.eup %5374 }
0x1a94   :  { %v3257_v9 = vmul.f32 %v5375_v37, %v3240_v49  ;;  %vm3262_vm7 = vweird.f32 %v5375_v37 }
0x1a95   :  { %vm3263_vm9 = vmor %vm3261_vm8, %vm3262_vm7 }
0x1a96   :  { %v3258_v44 = vsub.f32 1.0, %v3257_v9 }
0x1a98   :  { %v3259_v21 = vmul.f32 %v5375_v37, %v3258_v44 }
0x1a9a   :  { %v3260_v27 = vadd.f32 %v5375_v37, %v3259_v21 }
0x1a9c   :  { %v3264_v51 = vsel %vm3263_vm9, %v5375_v37, %v3260_v27 }
0x1a9d   :  { %v3269_v55 = vsel %vm3266_vm10, %v3268_v12, %v3264_v51 }
0x1aad   :  { %v3286_v47 = vpop.permute.xlu2 %3285 }
0x1aae   :  { %v7502_v5 = vmul.f32 %v3286_v47, %v3269_v55  ;;  %v3402_v47 = vld [vmem:[#allocation3 + $0x48] sm:$0xc0] }
0x1ab0   :  { %4938 = vmatmul.msk.f32.vlgmr.msrb.gmra.mxu0 %vm283_vm11, %v7502_v5  ;;  %4939 = vmatmul.msk.f32.vlgmr.msrb.gmra.mxu1 %vm283_vm11, %v7502_v5 }
0x1ab1   :  { %3867 = vmatpush.msrb.mxu0 %v7153_v39  ;;  %3887 = vmatpush.msrb.mxu1 %v7159_v33  ;;  %v4937_v39 = vmul.f32 -1.442695, %v7485_v45 }
0x1ab3   :  { %3868 = vmatpush.msrb.mxu0 %v7346_v38  ;;  %3888 = vmatpush.msrb.mxu1 %v7166_v58  ;;  %5376 = vpow2.f32 %v4937_v39 }
0x1ab5   :  { %3869 = vmatpush.msrb.mxu0 %v7353_v19  ;;  %3889 = vmatpush.msrb.mxu1 %v7173_v56 }
0x1ab7   :  { %3870 = vmatpush.msrb.mxu0 %v7360_v8  ;;  %3890 = vmatpush.msrb.mxu1 %v7180_v18 }
0x1ab9   :  { %3871 = vmatpush.msrb.mxu0 %v7367_v16  ;;  %3891 = vmatpush.msrb.mxu1 %v7187_v10  ;;  %v5377_v33 = vpop.eup %5376 }
0x1aba   :  { %v3339_v58 = vadd.f32 1.0, %v5377_v33  ;;  %v3511_v33 = vrot.slane %v3402_v47, 6  ;;  %v5645_v47 = vld [vmem:[%s8086_s2 + $0x58] sm:$0xff] }
0x1abb   :  { %3872 = vmatpush.msrb.mxu0 %v7374_v40  ;;  %3892 = vmatpush.msrb.mxu1 %v7194_v29 }
0x1abc   :  { %5378 = vrcp.f32 %v3339_v58  ;;  %v3366_v29 = vand.u32 2147483648, %v3339_v58  ;;  %vm3360_vm13 = vweird.f32 %v3339_v58  ;;  %v3364_v25 = vand.u32 2147483647, %v3339_v58 }
0x1abd   :  { %3873 = vmatpush.msrb.mxu0 %v7381_v52  ;;  %3893 = vmatpush.msrb.mxu1 %v7201_v26 }
0x1abe   :  { %v3367_v13 = vor.u32 1.1754944e-38, %v3366_v29  ;;  %vm3365_vm15 = vcmp.eq.f32.partialorder %v3364_v25, 8.507059e+37 }
0x1abf   :  { %3874 = vmatpush.msrb.mxu0 %v7388_v24  ;;  %3894 = vmatpush.msrb.mxu1 %v7208_v50 }
0x1ac2   :  { %v5379_v56 = vpop.eup %5378 }
0x1ac3   :  { %v3356_v18 = vmul.f32 %v5379_v56, %v3339_v58  ;;  %vm3361_vm12 = vweird.f32 %v5379_v56 }
0x1ac4   :  { %vm3362_vm14 = vmor %vm3360_vm13, %vm3361_vm12 }
0x1ac5   :  { %v3357_v10 = vsub.f32 1.0, %v3356_v18 }
0x1ac7   :  { %v3358_v42 = vmul.f32 %v5379_v56, %v3357_v10 }
0x1ac9   :  { %v3359_v11 = vadd.f32 %v5379_v56, %v3358_v42 }
0x1acb   :  { %v3363_v26 = vsel %vm3362_vm14, %v5379_v56, %v3359_v11 }
0x1acc   :  { %v3368_v50 = vsel %vm3365_vm15, %v3367_v13, %v3363_v26 }
0x1b05   :  { %v3385_v60 = vpop.permute.xlu1 %3384 }
0x1b06   :  { %v7525_v45 = vmul.f32 %v3385_v60, %v3368_v50 }
0x1b08   :  { %4942 = vmatmul.msk.f32.vlgmr.msrb.gmra.mxu2 %vm283_vm11, %v7525_v45  ;;  %4943 = vmatmul.msk.f32.vlgmr.msrb.gmra.mxu3 %vm283_vm11, %v7525_v45 }
0x1b09   :  { %3972 = vmatpush.msrb.mxu2 %v7221_v61  ;;  %3992 = vmatpush.msrb.mxu3 %v7227_v1  ;;  %v3401_v61 = vld [vmem:[#allocation2 + $0x20] sm:$0x30] }
0x1b0a   :  { %v3407_v1 = vrot.slane %v3401_v61, 4 }
0x1b0b   :  { %3973 = vmatpush.msrb.mxu2 %v7233_v6  ;;  %3993 = vmatpush.msrb.mxu3 %v7239_v23 }
0x1b0d   :  { %3974 = vmatpush.msrb.mxu2 %v7245_v32  ;;  %3994 = vmatpush.msrb.mxu3 %v7251_v2  ;;  %v3400_v2 = vld [vmem:[#allocation2 + $0x8] sm:$0x30] }
0x1b0f   :  { %3975 = vmatpush.msrb.mxu2 %v7257_v3  ;;  %3995 = vmatpush.msrb.mxu3 %v7263_v0  ;;  %v3406_v0 = vrot.slane %v3400_v2, 4 }
0x1b11   :  { %3976 = vmatpush.msrb.mxu2 %v7269_v31  ;;  %3996 = vmatpush.msrb.mxu3 %v7275_v35 }
0x1b13   :  { %3977 = vmatpush.msrb.mxu2 %v7281_v43  ;;  %3997 = vmatpush.msrb.mxu3 %v7287_v46  ;;  %v3403_v46 = vld [vmem:[#allocation3] sm:$0xc0] }
0x1b15   :  { %3978 = vmatpush.msrb.mxu2 %v7293_v53  ;;  %3998 = vmatpush.msrb.mxu3 %v7299_v20  ;;  %v3512_v20 = vrot.slane %v3403_v46, 6 }
0x1b17   :  { %3979 = vmatpush.msrb.mxu2 %v7305_v34  ;;  %3999 = vmatpush.msrb.mxu3 %v7311_v14 }
0x1b2d   :  { %v3450_v6 = vpop.f32.mrf.mxu1  ;;  %v3430_v3 = vpop.f32.mrf.mxu0 }
0x1b2e   :  { %v7547_v23 = vadd.f32 %v3450_v6, %v3407_v1  ;;  %v3431_v31 = vadd.f32 %v3430_v3, %v3406_v0 }
0x1b30   :  { %5380 = vtanh.f32 %v7547_v23  ;;  %v4940_v35 = vmul.f32 -1.442695, %v3431_v31 }
0x1b32   :  { %5382 = vpow2.f32 %v4940_v35  ;;  %v4941_v35 = vmul.f32 -1.442695, %v7547_v23 }
0x1b36   :  { %v5381_v32 = vpop.eup %5380 }
0x1b37   :  { %3494 = vrot.lane.b32.xlu1 %v5381_v32, %s5694_s9 }
0x1b38   :  { %v5383_v43 = vpop.eup %5382 }
0x1b39   :  { %v3459_v53 = vadd.f32 1.0, %v5383_v43 }
0x1b3b   :  { %5384 = vrcp.f32 %v3459_v53  ;;  %v3472_v21 = vand.u32 2147483648, %v3459_v53  ;;  %vm3466_vm1 = vweird.f32 %v3459_v53  ;;  %v3470_v27 = vand.u32 2147483647, %v3459_v53 }
0x1b3d   :  { %v3473_v54 = vor.u32 1.1754944e-38, %v3472_v21  ;;  %vm3471_vm3 = vcmp.eq.f32.partialorder %v3470_v27, 8.507059e+37 }
0x1b41   :  { %v5385_v22 = vpop.eup %5384 }
0x1b42   :  { %v3462_v63 = vmul.f32 %v5385_v22, %v3459_v53  ;;  %vm3467_vm0 = vweird.f32 %v5385_v22 }
0x1b43   :  { %vm3468_vm2 = vmor %vm3466_vm1, %vm3467_vm0 }
0x1b44   :  { %v3463_v37 = vsub.f32 1.0, %v3462_v63 }
0x1b46   :  { %v3464_v9 = vmul.f32 %v5385_v22, %v3463_v37 }
0x1b48   :  { %v3465_v44 = vadd.f32 %v5385_v22, %v3464_v9 }
0x1b4a   :  { %v3469_v7 = vsel %vm3468_vm2, %v5385_v22, %v3465_v44 }
0x1b4b   :  { %v3474_v12 = vsel %vm3471_vm3, %v3473_v54, %v3469_v7 }
0x1b4c   :  { %v3492_v2 = vmul.f32 %v3474_v12, %v7492_v59 }
0x1b8b   :  { %v3555_v34 = vpop.f32.mrf.mxu3  ;;  %v3535_v39 = vpop.f32.mrf.mxu2 }
0x1b8c   :  { %v7551_v14 = vadd.f32 %v3555_v34, %v3512_v20  ;;  %v3536_v58 = vadd.f32 %v3535_v39, %v3511_v33  ;;  %v5646_v39 = vld [vmem:[%s8086_s2 + $0x48] sm:$0xff] }
0x1b8e   :  { %5386 = vtanh.f32 %v7551_v14  ;;  %v4944_v56 = vmul.f32 -1.442695, %v3536_v58 }
0x1b90   :  { %5388 = vpow2.f32 %v4944_v56 }
0x1b94   :  { %v5387_v49 = vpop.eup %5386 }
0x1b95   :  { %3599 = vrot.lane.b32.xlu0 %v5387_v49, %s5694_s9 }
0x1b96   :  { %v5389_v18 = vpop.eup %5388 }
0x1b97   :  { %v3564_v10 = vadd.f32 1.0, %v5389_v18 }
0x1b99   :  { %5390 = vrcp.f32 %v3564_v10  ;;  %v3577_v13 = vand.u32 2147483648, %v3564_v10  ;;  %vm3571_vm5 = vweird.f32 %v3564_v10  ;;  %v3575_v50 = vand.u32 2147483647, %v3564_v10 }
0x1b9b   :  { %v3578_v61 = vor.u32 1.1754944e-38, %v3577_v13  ;;  %vm3576_vm7 = vcmp.eq.f32.partialorder %v3575_v50, 8.507059e+37  ;;  %v5651_v50 = vld [vmem:[%s8089_s5 + $0x70] sm:$0xff] }
0x1b9f   :  { %v5391_v42 = vpop.eup %5390 }
0x1ba0   :  { %v3567_v11 = vmul.f32 %v5391_v42, %v3564_v10  ;;  %vm3572_vm4 = vweird.f32 %v5391_v42 }
0x1ba1   :  { %vm3573_vm6 = vmor %vm3571_vm5, %vm3572_vm4 }
0x1ba2   :  { %v3568_v29 = vsub.f32 1.0, %v3567_v11 }
0x1ba4   :  { %v3569_v25 = vmul.f32 %v5391_v42, %v3568_v29 }
0x1ba6   :  { %v3570_v26 = vadd.f32 %v5391_v42, %v3569_v25 }
0x1ba8   :  { %v3574_v60 = vsel %vm3573_vm6, %v5391_v42, %v3570_v26 }
0x1ba9   :  { %v3495_v51 = vpop.permute.xlu1 %3494  ;;  %v3579_v6 = vsel %vm3576_vm7, %v3578_v61, %v3574_v60  ;;  %v5652_v60 = vld [vmem:[%s8089_s5 + $0x78] sm:$0xff]  ;;  %v5653_v61 = vld [vmem:[%s8089_s5 + $0x60] sm:$0xff] }
0x1baa   :  { %v3497_v55 = vmul.f32 %v3495_v51, %v3474_v12  ;;  %v3597_v53 = vmul.f32 %v3579_v6, %v7498_v17  ;;  %v5642_v51 = vld [vmem:[%s8086_s2 + $0x70] sm:$0xff]  ;;  %v5643_v12 = vld [vmem:[%s8086_s2 + $0x78] sm:$0xff] }
0x1bac   :  { %3499 = vrot.lane.b32.xlu0 %v3497_v55, %s5694_s9  ;;  %v5644_v55 = vld [vmem:[%s8086_s2 + $0x68] sm:$0xff] }
0x1c07   :  { %v3600_v1 = vpop.permute.xlu0 %3599 }
0x1c08   :  { %v3602_v32 = vmul.f32 %v3600_v1, %v3579_v6  ;;  %v5654_v1 = vld [vmem:[%s8089_s5 + $0x68] sm:$0xff]  ;;  %v5655_v6 = vld [vmem:[%s8089_s5 + $0x50] sm:$0xff] }
0x1c0a   :  { %3604 = vrot.lane.b32.xlu2 %v3602_v32, %s5694_s9  ;;  %v5656_v32 = vld [vmem:[%s8089_s5 + $0x58] sm:$0xff] }
0x1c1e   :  { %v3500_v3 = vpop.permute.xlu0 %3499 }
0x1c1f   :  { %v7558_v0 = vadd.f32 %v3500_v3, %v3492_v2  ;;  %v5657_v2 = vld [vmem:[%s8089_s5 + $0x40] sm:$0xff]  ;;  %v5658_v3 = vld [vmem:[%s8089_s5 + $0x48] sm:$0xff] }
0x1c21   :  { %5392 = vtanh.f32 %v7558_v0 }
0x1c22   :  { %5394 = vpow2.f32 %v4941_v35  ;;  %v5660_v35 = vld [vmem:[%s8089_s5 + $0x38] sm:$0xff] }
0x1c27   :  { %v5393_v31 = vpop.eup %5392 }
0x1c28   :  { %3505 = vrot.lane.b32.xlu2 %v5393_v31, %s5694_s9  ;;  %v5395_v43 = vpop.eup %5394  ;;  %v5659_v31 = vld [vmem:[%s8089_s5 + $0x30] sm:$0xff] }
0x1c29   :  { %v3460_v46 = vadd.f32 1.0, %v5395_v43  ;;  %v5661_v43 = vld [vmem:[%s8089_s5 + $0x20] sm:$0xff] }
0x1c2b   :  { %5396 = vrcp.f32 %v3460_v46  ;;  %v3487_v23 = vand.u32 2147483648, %v3460_v46  ;;  %vm3481_vm9 = vweird.f32 %v3460_v46  ;;  %v3485_v44 = vand.u32 2147483647, %v3460_v46 }
0x1c2d   :  { %v3488_v21 = vor.u32 1.1754944e-38, %v3487_v23  ;;  %vm3486_vm12 = vcmp.eq.f32.partialorder %v3485_v44, 8.507059e+37  ;;  %v3626_v44 = vld [vmem:[#allocation2 + $0x8] sm:$0xc0] }
0x1c31   :  { %v5397_v59 = vpop.eup %5396 }
0x1c32   :  { %v3477_v49 = vmul.f32 %v5397_v59, %v3460_v46  ;;  %vm3482_vm8 = vweird.f32 %v5397_v59  ;;  %v5662_v46 = vld [vmem:[%s8089_s5 + $0x28] sm:$0xff] }
0x1c33   :  { %vm3483_vm10 = vmor %vm3481_vm9, %vm3482_vm8 }
0x1c34   :  { %v3478_v63 = vsub.f32 1.0, %v3477_v49  ;;  %v3627_v49 = vld [vmem:[#allocation2 + $0x20] sm:$0xc0] }
0x1c36   :  { %v3479_v37 = vmul.f32 %v5397_v59, %v3478_v63  ;;  %v3633_v63 = vrot.slane %v3627_v49, 6 }
0x1c38   :  { %v3480_v9 = vadd.f32 %v5397_v59, %v3479_v37 }
0x1c3a   :  { %v3484_v17 = vsel %vm3483_vm10, %v5397_v59, %v3480_v9  ;;  %v5665_v59 = vld [vmem:[%s8089_s5] sm:$0xff] }
0x1c3b   :  { %v3489_v27 = vsel %vm3486_vm12, %v3488_v21, %v3484_v17  ;;  %v3632_v21 = vrot.slane %v3626_v44, 6 }
0x1c64   :  { %v3605_v20 = vpop.permute.xlu2 %3604 }
0x1c65   :  { %v7564_v34 = vadd.f32 %v3605_v20, %v3597_v53  ;;  %v5663_v53 = vld [vmem:[%s8089_s5 + $0x10] sm:$0xff]  ;;  %v5664_v20 = vld [vmem:[%s8089_s5 + $0x18] sm:$0xff] }
0x1c67   :  { %5398 = vtanh.f32 %v7564_v34 }
0x1c6d   :  { %v5399_v22 = vpop.eup %5398 }
0x1c6e   :  { %3610 = vrot.lane.b32.xlu1 %v5399_v22, %s5694_s9  ;;  %v5666_v22 = vld [vmem:[%s8089_s5 + $0x8] sm:$0xff] }
0x1c82   :  { %v3506_v7 = vpop.permute.xlu2 %3505 }
0x1c83   :  { %v7568_v54 = vmul.f32 %v3506_v7, %v3489_v27 }
0x1c85   :  { %4946 = vmatmul.msk.f32.vlgmr.msra.gmra.mxu0 %vm283_vm11, %v7568_v54  ;;  %4947 = vmatmul.msk.f32.vlgmr.msra.gmra.mxu1 %vm283_vm11, %v7568_v54 }
0x1c86   :  { %4093 = vmatpush.msra.mxu0 %v5642_v51  ;;  %4113 = vmatpush.msra.mxu1 %v5643_v12 }
0x1c88   :  { %4094 = vmatpush.msra.mxu0 %v7346_v38  ;;  %4114 = vmatpush.msra.mxu1 %v5644_v55  ;;  %v5647_v38 = vld [vmem:[%s8086_s2 + $0x38] sm:$0xff]  ;;  %v3629_v55 = vld [vmem:[#allocation3] sm:$0x30] }
0x1c8a   :  { %4095 = vmatpush.msra.mxu0 %v7353_v19  ;;  %4115 = vmatpush.msra.mxu1 %v5645_v47  ;;  %v5648_v19 = vld [vmem:[%s8086_s2 + $0x28] sm:$0xff]  ;;  %v3738_v47 = vrot.slane %v3629_v55, 4 }
0x1c8c   :  { %4096 = vmatpush.msra.mxu0 %v7360_v8  ;;  %4116 = vmatpush.msra.mxu1 %v5646_v39  ;;  %v5649_v8 = vld [vmem:[%s8086_s2 + $0x18] sm:$0xff] }
0x1c8e   :  { %4097 = vmatpush.msra.mxu0 %v7367_v16  ;;  %4117 = vmatpush.msra.mxu1 %v5647_v38  ;;  %v5650_v16 = vld [vmem:[%s8086_s2 + $0x8] sm:$0xff]  ;;  %s4801_s2 = sshll.u32 %s8097_s14, 4  ;;  %s4802_s2 = int_to_ptr.hbm [resolvable:$true] %s4801_s2 }
0x1c90   :  { %4098 = vmatpush.msra.mxu0 %v7374_v40  ;;  %4118 = vmatpush.msra.mxu1 %v5648_v19  ;;  %v4945_v40 = vmul.f32 -1.442695, %v7551_v14 }
0x1c92   :  { %4099 = vmatpush.msra.mxu0 %v7381_v52  ;;  %4119 = vmatpush.msra.mxu1 %v5649_v8  ;;  %5400 = vpow2.f32 %v4945_v40 }
0x1c94   :  { %4100 = vmatpush.msra.mxu0 %v7388_v24  ;;  %4120 = vmatpush.msra.mxu1 %v5650_v16 }
0x1c98   :  { %v5401_v33 = vpop.eup %5400 }
0x1c99   :  { %v3565_v58 = vadd.f32 1.0, %v5401_v33 }
0x1c9b   :  { %5402 = vrcp.f32 %v3565_v58  ;;  %v3592_v11 = vand.u32 2147483648, %v3565_v58  ;;  %vm3586_vm14 = vweird.f32 %v3565_v58  ;;  %v3590_v24 = vand.u32 2147483647, %v3565_v58 }
0x1c9d   :  { %v3593_v25 = vor.u32 1.1754944e-38, %v3592_v11  ;;  %vm3591_vm0 = vcmp.eq.f32.partialorder %v3590_v24, 8.507059e+37 }
0x1ca1   :  { %v5403_v56 = vpop.eup %5402 }
0x1ca2   :  { %v3582_v52 = vmul.f32 %v5403_v56, %v3565_v58  ;;  %vm3587_vm13 = vweird.f32 %v5403_v56 }
0x1ca3   :  { %vm3588_vm15 = vmor %vm3586_vm14, %vm3587_vm13 }
0x1ca4   :  { %v3583_v18 = vsub.f32 1.0, %v3582_v52 }
0x1ca6   :  { %v3584_v10 = vmul.f32 %v5403_v56, %v3583_v18 }
0x1ca8   :  { %v3585_v42 = vadd.f32 %v5403_v56, %v3584_v10 }
0x1caa   :  { %v3589_v29 = vsel %vm3588_vm15, %v5403_v56, %v3585_v42 }
0x1cab   :  { %v3594_v26 = vsel %vm3591_vm0, %v3593_v25, %v3589_v29  ;;  %v3628_v29 = vld [vmem:[#allocation3 + $0x48] sm:$0x30] }
0x1ce0   :  { %v3611_v13 = vpop.permute.xlu1 %3610 }
0x1ce1   :  { %v7609_v14 = vmul.f32 %v3611_v13, %v3594_v26  ;;  %v3737_v26 = vrot.slane %v3628_v29, 4 }
0x1ce3   :  { %4950 = vmatmul.msk.f32.vlgmr.msra.gmra.mxu2 %vm283_vm11, %v7609_v14  ;;  %4951 = vmatmul.msk.f32.vlgmr.msra.gmra.mxu3 %vm283_vm11, %v7609_v14 }
0x1ce4   :  { %4192 = vmatpush.msra.mxu2 %v5651_v50  ;;  %4212 = vmatpush.msra.mxu3 %v5652_v60 }
0x1ce6   :  { %4193 = vmatpush.msra.mxu2 %v5653_v61  ;;  %4213 = vmatpush.msra.mxu3 %v5654_v1 }
0x1ce8   :  { %4194 = vmatpush.msra.mxu2 %v5655_v6  ;;  %4214 = vmatpush.msra.mxu3 %v5656_v32 }
0x1cea   :  { %4195 = vmatpush.msra.mxu2 %v5657_v2  ;;  %4215 = vmatpush.msra.mxu3 %v5658_v3 }
0x1cec   :  { %4196 = vmatpush.msra.mxu2 %v5659_v31  ;;  %4216 = vmatpush.msra.mxu3 %v5660_v35 }
0x1cee   :  { %4197 = vmatpush.msra.mxu2 %v5661_v43  ;;  %4217 = vmatpush.msra.mxu3 %v5662_v46 }
0x1cf0   :  { %4198 = vmatpush.msra.mxu2 %v5663_v53  ;;  %4218 = vmatpush.msra.mxu3 %v5664_v20 }
0x1cf2   :  { %4199 = vmatpush.msra.mxu2 %v5665_v59  ;;  %4219 = vmatpush.msra.mxu3 %v5666_v22 }
0x1d02   :  { %v3676_v37 = vpop.f32.mrf.mxu1  ;;  %v3656_v17 = vpop.f32.mrf.mxu0 }
0x1d03   :  { %v7663_v9 = vadd.f32 %v3676_v37, %v3633_v63  ;;  %v3657_v27 = vadd.f32 %v3656_v17, %v3632_v21 }
0x1d05   :  { %5404 = vtanh.f32 %v7663_v9  ;;  %v4948_v7 = vmul.f32 -1.442695, %v3657_v27 }
0x1d07   :  { %5406 = vpow2.f32 %v4948_v7 }
0x1d0b   :  { %v5405_v23 = vpop.eup %5404 }
0x1d0c   :  { %3720 = vrot.lane.b32.xlu1 %v5405_v23, %s5694_s9  ;;  %v4949_v23 = vmul.f32 -1.442695, %v7663_v9 }
0x1d0d   :  { %v5407_v51 = vpop.eup %5406 }
0x1d0e   :  { %v3685_v12 = vadd.f32 1.0, %v5407_v51 }
0x1d10   :  { %5408 = vrcp.f32 %v3685_v12  ;;  %v3698_v56 = vand.u32 2147483648, %v3685_v12  ;;  %vm3692_vm2 = vweird.f32 %v3685_v12  ;;  %v3696_v52 = vand.u32 2147483647, %v3685_v12 }
0x1d12   :  { %v3699_v10 = vor.u32 1.1754944e-38, %v3698_v56  ;;  %vm3697_vm4 = vcmp.eq.f32.partialorder %v3696_v52, 8.507059e+37 }
0x1d16   :  { %v5409_v19 = vpop.eup %5408 }
0x1d17   :  { %v3688_v8 = vmul.f32 %v5409_v19, %v3685_v12  ;;  %vm3693_vm1 = vweird.f32 %v5409_v19 }
0x1d18   :  { %vm3694_vm3 = vmor %vm3692_vm2, %vm3693_vm1 }
0x1d19   :  { %v3689_v40 = vsub.f32 1.0, %v3688_v8 }
0x1d1b   :  { %v3690_v33 = vmul.f32 %v5409_v19, %v3689_v40 }
0x1d1d   :  { %v3691_v58 = vadd.f32 %v5409_v19, %v3690_v33 }
0x1d1f   :  { %v3695_v18 = vsel %vm3694_vm3, %v5409_v19, %v3691_v58 }
0x1d20   :  { %v3700_v11 = vsel %vm3697_vm4, %v3699_v10, %v3695_v18 }
0x1d21   :  { %v3718_v22 = vmul.f32 %v3700_v11, %v7558_v0 }
0x1d66   :  { %v3781_v39 = vpop.f32.mrf.mxu3  ;;  %v3761_v25 = vpop.f32.mrf.mxu2 }
0x1d67   :  { %v7667_v38 = vadd.f32 %v3781_v39, %v3738_v47  ;;  %v3762_v13 = vadd.f32 %v3761_v25, %v3737_v26 }
0x1d69   :  { %5410 = vtanh.f32 %v7667_v38  ;;  %v4952_v50 = vmul.f32 -1.442695, %v3762_v13  ;;  %v4953_v58 = vmul.f32 -1.442695, %v7667_v38 }
0x1d6b   :  { %5412 = vpow2.f32 %v4952_v50 }
0x1d6f   :  { %v5411_v16 = vpop.eup %5410 }
0x1d70   :  { %3825 = vrot.lane.b32.xlu0 %v5411_v16, %s5694_s9 }
0x1d71   :  { %v5413_v60 = vpop.eup %5412 }
0x1d72   :  { %v3790_v61 = vadd.f32 1.0, %v5413_v60 }
0x1d74   :  { %5414 = vrcp.f32 %v3790_v61  ;;  %v3803_v31 = vand.u32 2147483648, %v3790_v61  ;;  %vm3797_vm6 = vweird.f32 %v3790_v61  ;;  %v3801_v35 = vand.u32 2147483647, %v3790_v61 }
0x1d76   :  { %v3804_v46 = vor.u32 1.1754944e-38, %v3803_v31  ;;  %vm3802_vm8 = vcmp.eq.f32.partialorder %v3801_v35, 8.507059e+37 }
0x1d7a   :  { %v5415_v1 = vpop.eup %5414 }
0x1d7b   :  { %v3793_v6 = vmul.f32 %v5415_v1, %v3790_v61  ;;  %vm3798_vm5 = vweird.f32 %v5415_v1  ;;  %v3853_v61 = vld [vmem:[#allocation2 + $0x38] sm:$0x3] }
0x1d7c   :  { %vm3799_vm7 = vmor %vm3797_vm6, %vm3798_vm5  ;;  %vm489_vm6 = vcmask 517120  }
0x1d7d   :  { %v3794_v32 = vsub.f32 1.0, %v3793_v6 }
0x1d7e   :  { %v3721_v42 = vpop.permute.xlu1 %3720 }
0x1d7f   :  { %v3723_v24 = vmul.f32 %v3721_v42, %v3700_v11  ;;  %v3795_v2 = vmul.f32 %v5415_v1, %v3794_v32 }
0x1d81   :  { %3725 = vrot.lane.b32.xlu0 %v3723_v24, %s5694_s9  ;;  %v3796_v3 = vadd.f32 %v5415_v1, %v3795_v2 }
0x1d83   :  { %v3800_v43 = vsel %vm3799_vm7, %v5415_v1, %v3796_v3  ;;  %v3852_v3 = vld [vmem:[#allocation2 + $0x40] sm:$0x3] }
0x1d84   :  { %v3805_v20 = vsel %vm3802_vm8, %v3804_v46, %v3800_v43 }
0x1d85   :  { %v3823_v21 = vmul.f32 %v3805_v20, %v7564_v34 }
0x1de2   :  { %v3826_v53 = vpop.permute.xlu0 %3825 }
0x1de3   :  { %v3828_v59 = vmul.f32 %v3826_v53, %v3805_v20  ;;  %v3855_v20 = vld [vmem:[#allocation3] sm:$0xc] }
0x1de5   :  { %3830 = vrot.lane.b32.xlu2 %v3828_v59, %s5694_s9  ;;  %v3958_v59 = vrot.slane %v3855_v20, 2 }
0x1df3   :  { %v3726_v49 = vpop.permute.xlu0 %3725 }
0x1df4   :  { %v7674_v63 = vadd.f32 %v3726_v49, %v3718_v22 }
0x1df6   :  { %5416 = vtanh.f32 %v7674_v63 }
0x1df7   :  { %5418 = vpow2.f32 %v4949_v23 }
0x1dfc   :  { %v5417_v37 = vpop.eup %5416 }
0x1dfd   :  { %3731 = vrot.lane.b32.xlu2 %v5417_v37, %s5694_s9  ;;  %v5419_v44 = vpop.eup %5418 }
0x1dfe   :  { %v3686_v17 = vadd.f32 1.0, %v5419_v44 }
0x1e00   :  { %5420 = vrcp.f32 %v3686_v17  ;;  %v3713_v9 = vand.u32 2147483648, %v3686_v17  ;;  %vm3707_vm10 = vweird.f32 %v3686_v17  ;;  %v3711_v19 = vand.u32 2147483647, %v3686_v17 }
0x1e02   :  { %v3714_v34 = vor.u32 1.1754944e-38, %v3713_v9  ;;  %vm3712_vm13 = vcmp.eq.f32.partialorder %v3711_v19, 8.507059e+37  ;;  %v7709_v9 = vld [vmem:[%s8091_s7] ss:$0 sm:$0xff] }
0x1e03   :  { %v488_v19 = vmul.f32 %v7709_v9, %v6191_v48 }
0x1e06   :  { %v5421_v0 = vpop.eup %5420 }
0x1e07   :  { %v3703_v51 = vmul.f32 %v5421_v0, %v3686_v17  ;;  %vm3708_vm9 = vweird.f32 %v5421_v0 }
0x1e08   :  { %vm3709_vm12 = vmor %vm3707_vm10, %vm3708_vm9 }
0x1e09   :  { %v3704_v55 = vsub.f32 1.0, %v3703_v51 }
0x1e0b   :  { %v3705_v47 = vmul.f32 %v5421_v0, %v3704_v55 }
0x1e0d   :  { %v3706_v39 = vadd.f32 %v5421_v0, %v3705_v47 }
0x1e0f   :  { %v3710_v8 = vsel %vm3709_vm12, %v5421_v0, %v3706_v39  ;;  %vm493_vm12 = vcmask 1024  }
0x1e10   :  { %v3715_v16 = vsel %vm3712_vm13, %v3714_v34, %v3710_v8  ;;  %v490_v8 = vsel %vm489_vm6, %v488_v19, 0.0  ;;  %v3854_v34 = vld [vmem:[#allocation3 + $0x48] sm:$0xc] }
0x1e3f   :  { %v3831_v27 = vpop.permute.xlu2 %3830 }
0x1e40   :  { %v7680_v7 = vadd.f32 %v3831_v27, %v3823_v21 }
0x1e42   :  { %5422 = vtanh.f32 %v7680_v7 }
0x1e43   :  { %5424 = vpow2.f32 %v4953_v58 }
0x1e48   :  { %v5423_v12 = vpop.eup %5422 }
0x1e49   :  { %3836 = vrot.lane.b32.xlu1 %v5423_v12, %s5694_s9  ;;  %v5425_v56 = vpop.eup %5424 }
0x1e4a   :  { %v3791_v52 = vadd.f32 1.0, %v5425_v56 }
0x1e4c   :  { %5426 = vrcp.f32 %v3791_v52  ;;  %v3818_v29 = vand.u32 2147483648, %v3791_v52  ;;  %vm3812_vm15 = vweird.f32 %v3791_v52  ;;  %v3816_v25 = vand.u32 2147483647, %v3791_v52 }
0x1e4e   :  { %v3819_v13 = vor.u32 1.1754944e-38, %v3818_v29  ;;  %vm3817_vm1 = vcmp.eq.f32.partialorder %v3816_v25, 8.507059e+37 }
0x1e52   :  { %v5427_v18 = vpop.eup %5426 }
0x1e53   :  { %v3808_v10 = vmul.f32 %v5427_v18, %v3791_v52  ;;  %vm3813_vm14 = vweird.f32 %v5427_v18 }
0x1e54   :  { %vm3814_vm0 = vmor %vm3812_vm15, %vm3813_vm14 }
0x1e55   :  { %v3809_v42 = vsub.f32 1.0, %v3808_v10 }
0x1e57   :  { %v3732_v40 = vpop.permute.xlu2 %3731  ;;  %v3810_v11 = vmul.f32 %v5427_v18, %v3809_v42 }
0x1e58   :  { %v7684_v33 = vmul.f32 %v3732_v40, %v3715_v16  ;;  %v3957_v40 = vrot.slane %v3854_v34, 2 }
0x1e59   :  { %v3811_v24 = vadd.f32 %v5427_v18, %v3810_v11 }
0x1e5a   :  { %4954 = vmatmul.msk.f32.vlgmr.msrb.gmra.mxu0 %vm283_vm11, %v7684_v33  ;;  %4955 = vmatmul.msk.f32.vlgmr.msrb.gmra.mxu1 %vm283_vm11, %v7684_v33 }
0x1e5b   :  { %v3815_v26 = vsel %vm3814_vm0, %v5427_v18, %v3811_v24 }
0x1e5c   :  { %v3820_v50 = vsel %vm3817_vm1, %v3819_v13, %v3815_v26 }
0x1ebb   :  { %v3837_v60 = vpop.permute.xlu1 %3836 }
0x1ebc   :  { %v7691_v38 = vmul.f32 %v3837_v60, %v3820_v50 }
0x1ebe   :  { %4958 = vmatmul.msk.f32.vlgmr.msrb.gmra.mxu2 %vm283_vm11, %v7691_v38  ;;  %4959 = vmatmul.msk.f32.vlgmr.msrb.gmra.mxu3 %vm283_vm11, %v7691_v38 }
0x1ed7   :  { %v3896_v1 = vpop.f32.mrf.mxu1  ;;  %v3876_v2 = vpop.f32.mrf.mxu0 }
0x1ed8   :  { %v7697_v6 = vadd.f32 %v3896_v1, %v3853_v61  ;;  %v3877_v31 = vadd.f32 %v3876_v2, %v3852_v3 }
0x1eda   :  { %5428 = vtanh.f32 %v7697_v6  ;;  %v4956_v35 = vmul.f32 -1.442695, %v3877_v31 }
0x1edc   :  { %5430 = vpow2.f32 %v4956_v35  ;;  %v712_v35 = vmul.f32 %v7709_v9, %v6257_v36  ;;  %v938_v36 = vmul.f32 %v7709_v9, %v6403_v28 }
0x1ee0   :  { %v5429_v32 = vpop.eup %5428 }
0x1ee1   :  { %3940 = vrot.lane.b32.xlu1 %v5429_v32, %s5694_s9 }
0x1ee2   :  { %v5431_v43 = vpop.eup %5430 }
0x1ee3   :  { %v3905_v46 = vadd.f32 1.0, %v5431_v43  ;;  %v713_v43 = vsel %vm489_vm6, %v712_v35, 0.0 }
0x1ee5   :  { %5432 = vrcp.f32 %v3905_v46  ;;  %v3918_v27 = vand.u32 2147483648, %v3905_v46  ;;  %vm3912_vm3 = vweird.f32 %v3905_v46  ;;  %v3916_v0 = vand.u32 2147483647, %v3905_v46 }
0x1ee7   :  { %v3919_v12 = vor.u32 1.1754944e-38, %v3918_v27  ;;  %vm3917_vm5 = vcmp.eq.f32.partialorder %v3916_v0, 8.507059e+37 }
0x1eeb   :  { %v5433_v53 = vpop.eup %5432 }
0x1eec   :  { %v3908_v22 = vmul.f32 %v5433_v53, %v3905_v46  ;;  %vm3913_vm2 = vweird.f32 %v5433_v53 }
0x1eed   :  { %vm3914_vm4 = vmor %vm3912_vm3, %vm3913_vm2 }
0x1eee   :  { %v3909_v23 = vsub.f32 1.0, %v3908_v22  ;;  %v939_v22 = vsel %vm489_vm6, %v938_v36, 0.0 }
0x1ef0   :  { %v3910_v44 = vmul.f32 %v5433_v53, %v3909_v23 }
0x1ef2   :  { %v3911_v21 = vadd.f32 %v5433_v53, %v3910_v44 }
0x1ef4   :  { %v3915_v51 = vsel %vm3914_vm4, %v5433_v53, %v3911_v21  ;;  %v4957_v53 = vmul.f32 -1.442695, %v7697_v6 }
0x1ef5   :  { %v3920_v47 = vsel %vm3917_vm5, %v3919_v12, %v3915_v51 }
0x1ef6   :  { %v3938_v1 = vmul.f32 %v3920_v47, %v7674_v63  ;;  %v7727_v63 = vld [vmem:[%s8092_s8] ss:$0 sm:$0xff] }
0x1ef7   :  { %v718_v46 = vmul.f32 %v7727_v63, %v6225_v57  ;;  %v944_v23 = vmul.f32 %v7727_v63, %v6291_v30  ;;  %v1170_v44 = vmul.f32 %v7727_v63, %v6482_v15  ;;  %v1390_v51 = vmul.f32 %v7727_v63, %v6588_v62 }
0x1ef9   :  { %v719_v20 = vsel %vm489_vm6, %v718_v46, 0.0  ;;  %v945_v57 = vsel %vm489_vm6, %v944_v23, 0.0  ;;  %v1171_v27 = vsel %vm489_vm6, %v1170_v44, 0.0  ;;  %v4073_v44 = vld [vmem:[#allocation2 + $0x38] sm:$0xc] }
0x1f41   :  { %v4001_v49 = vpop.f32.mrf.mxu3  ;;  %v3981_v16 = vpop.f32.mrf.mxu2 }
0x1f42   :  { %v7701_v37 = vadd.f32 %v4001_v49, %v3958_v59  ;;  %v3982_v58 = vadd.f32 %v3981_v16, %v3957_v40 }
0x1f44   :  { %5434 = vtanh.f32 %v7701_v37  ;;  %v4960_v56 = vmul.f32 -1.442695, %v3982_v58 }
0x1f46   :  { %5436 = vpow2.f32 %v4960_v56  ;;  %v8133_v56 = vld [vmem:[#allocation20_spill] sm:$0xff] }
0x1f4a   :  { %v5435_v17 = vpop.eup %5434 }
0x1f4b   :  { %4045 = vrot.lane.b32.xlu0 %v5435_v17, %s5694_s9 }
0x1f4c   :  { %v5437_v52 = vpop.eup %5436 }
0x1f4d   :  { %v4010_v18 = vadd.f32 1.0, %v5437_v52  ;;  %v2282_v52 = vmul.f32 %v7727_v63, %v8133_v56  ;;  %v8139_v56 = vld [vmem:[#allocation18_spill] sm:$0xff] }
0x1f4f   :  { %5438 = vrcp.f32 %v4010_v18  ;;  %v4023_v48 = vand.u32 2147483648, %v4010_v18  ;;  %vm4017_vm8 = vweird.f32 %v4010_v18  ;;  %v4021_v25 = vand.u32 2147483647, %v4010_v18 }
0x1f51   :  { %v4024_v13 = vor.u32 1.1754944e-38, %v4023_v48  ;;  %vm4022_vm10 = vcmp.eq.f32.partialorder %v4021_v25, 8.507059e+37  ;;  %v4363_v25 = vld [vmem:[#allocation6] sm:$0x1] }
0x1f52   :  { %4993 = vpush %v4363_v25 }
0x1f53   :  { %v3941_v55 = vpop.permute.xlu1 %3940 }
0x1f54   :  { %v3943_v39 = vmul.f32 %v3941_v55, %v3920_v47  ;;  %v1391_v55 = vsel %vm489_vm6, %v1390_v51, 0.0 }
0x1f55   :  { %v5439_v10 = vpop.eup %5438 }
0x1f56   :  { %3945 = vrot.lane.b32.xlu0 %v3943_v39, %s5694_s9  ;;  %v4013_v42 = vmul.f32 %v5439_v10, %v4010_v18  ;;  %vm4018_vm7 = vweird.f32 %v5439_v10  ;;  %v2728_v18 = vmul.f32 %v7727_v63, %v7212_v41 }
0x1f57   :  { %vm4019_vm9 = vmor %vm4017_vm8, %vm4018_vm7 }
0x1f58   :  { %v4014_v11 = vsub.f32 1.0, %v4013_v42 }
0x1f5a   :  { %v4015_v24 = vmul.f32 %v5439_v10, %v4014_v11 }
0x1f5c   :  { %v4016_v29 = vadd.f32 %v5439_v10, %v4015_v24  ;;  %v8134_v24 = vld [vmem:[#allocation11_spill] sm:$0xff] }
0x1f5e   :  { %v4020_v26 = vsel %vm4019_vm9, %v5439_v10, %v4016_v29  ;;  %v2729_v10 = vsel %vm489_vm6, %v2728_v18, 0.0  ;;  %v498_v29 = vmul.f32 %v7727_v63, %v8134_v24  ;;  %v8140_v18 = vld [vmem:[#allocation19_spill] sm:$0xff] }
0x1f5f   :  { %v4025_v60 = vsel %vm4022_vm10, %v4024_v13, %v4020_v26  ;;  %v4961_v26 = vmul.f32 -1.442695, %v7701_v37 }
0x1f60   :  { %v4043_v17 = vmul.f32 %v4025_v60, %v7680_v7  ;;  %v1604_v7 = vmul.f32 %v7709_v9, %v6677_v4  ;;  %v2283_v4 = vsel %vm489_vm6, %v2282_v52, 0.0  ;;  %v499_v48 = vsel %vm489_vm6, %v498_v29, 0.0 }
0x1f61   :  { %v2062_v52 = vmul.f32 %v7727_v63, %v8139_v56 }
0x1f62   :  { %v1605_v34 = vsel %vm489_vm6, %v1604_v7, 0.0  ;;  %v8136_v7 = vld [vmem:[#allocation14_spill] sm:$0xff] }
0x1f80   :  { %491 = vadd.xlane.f32.xlu0 %v490_v8 }
0x1f83   :  { %s4994_s23 = spop %4993 }
0x1fbd   :  { %v4046_v50 = vpop.permute.xlu0 %4045 }
0x1fbe   :  { %v4048_v61 = vmul.f32 %v4046_v50, %v4025_v60 }
0x1fc0   :  { %4050 = vrot.lane.b32.xlu2 %v4048_v61, %s5694_s9 }
0x1fc8   :  { %v3946_v32 = vpop.permute.xlu0 %3945 }
0x1fc9   :  { %v7716_v2 = vadd.f32 %v3946_v32, %v3938_v1 }
0x1fcb   :  { %5440 = vtanh.f32 %v7716_v2 }
0x1fcc   :  { %5442 = vpow2.f32 %v4957_v53 }
0x1fd1   :  { %v5441_v3 = vpop.eup %5440 }
0x1fd2   :  { %3951 = vrot.lane.b32.xlu2 %v5441_v3, %s5694_s9  ;;  %v5443_v59 = vpop.eup %5442 }
0x1fd3   :  { %v3906_v49 = vadd.f32 1.0, %v5443_v59 }
0x1fd5   :  { %5444 = vrcp.f32 %v3906_v49  ;;  %v3933_v39 = vand.u32 2147483648, %v3906_v49  ;;  %vm3927_vm14 = vweird.f32 %v3906_v49  ;;  %v3931_v19 = vand.u32 2147483647, %v3906_v49 }
0x1fd7   :  { %v3934_v62 = vor.u32 1.1754944e-38, %v3933_v39  ;;  %vm3932_vm0 = vcmp.eq.f32.partialorder %v3931_v19, 8.507059e+37  ;;  %v1610_v39 = vmul.f32 %v7727_v63, %v8136_v7  ;;  %v4074_v7 = vld [vmem:[#allocation3 + $0x48] sm:$0x3] }
0x1fd9   :  { %v1611_v19 = vsel %vm489_vm6, %v1610_v39, 0.0 }
0x1fdb   :  { %v5445_v6 = vpop.eup %5444 }
0x1fdc   :  { %v3923_v21 = vmul.f32 %v5445_v6, %v3906_v49  ;;  %vm3928_vm13 = vweird.f32 %v5445_v6 }
0x1fdd   :  { %vm3929_vm15 = vmor %vm3927_vm14, %vm3928_vm13 }
0x1fde   :  { %v3924_v30 = vsub.f32 1.0, %v3923_v21 }
0x1fe0   :  { %v3925_v12 = vmul.f32 %v5445_v6, %v3924_v30 }
0x1fe2   :  { %v3926_v15 = vadd.f32 %v5445_v6, %v3925_v12 }
0x1fe4   :  { %v3930_v8 = vsel %vm3929_vm15, %v5445_v6, %v3926_v15 }
0x1fe5   :  { %v3935_v16 = vsel %vm3932_vm0, %v3934_v62, %v3930_v8  ;;  %v8137_v8 = vld [vmem:[#allocation15_spill] sm:$0xff] }
0x1ff3   :  { %v492_v31 = vpop.xlane.xlu0 %491 }
0x1ff4   :  { %494 = vst.msk [vmem:[#allocation4] sm:$0x3] %vm493_vm12, %v492_v31 }
0x1ffb   :  { %714 = vadd.xlane.f32.xlu2 %v713_v43 }
0x2003   :  { %720 = vadd.xlane.f32.xlu2 %v719_v20 }
0x200b   :  { %940 = vadd.xlane.f32.xlu2 %v939_v22 }
0x2013   :  { %946 = vadd.xlane.f32.xlu2 %v945_v57 }
0x201a   :  { %v4051_v28 = vpop.permute.xlu2 %4050 }
0x201b   :  { %v7743_v0 = vadd.f32 %v4051_v28, %v4043_v17  ;;  %1172 = vadd.xlane.f32.xlu2 %v1171_v27  ;;  %v4079_v17 = vrot.slane %v4073_v44, 2 }
0x201d   :  { %5446 = vtanh.f32 %v7743_v0 }
0x201e   :  { %5448 = vpow2.f32 %v4961_v26 }
0x2023   :  { %v5447_v47 = vpop.eup %5446  ;;  %1392 = vadd.xlane.f32.xlu2 %v1391_v55  ;;  %v8135_v55 = vld [vmem:[#allocation13_spill] sm:$0xff] }
0x2024   :  { %4056 = vrot.lane.b32.xlu1 %v5447_v47, %s5694_s9  ;;  %v5449_v13 = vpop.eup %5448  ;;  %v1384_v47 = vmul.f32 %v7709_v9, %v8135_v55 }
0x2025   :  { %v4011_v50 = vadd.f32 1.0, %v5449_v13  ;;  %v4075_v13 = vld [vmem:[#allocation3] sm:$0x3] }
0x2026   :  { %v1385_v15 = vsel %vm489_vm6, %v1384_v47, 0.0 }
0x2027   :  { %5450 = vrcp.f32 %v4011_v50  ;;  %v4038_v46 = vand.u32 2147483648, %v4011_v50  ;;  %vm4032_vm2 = vweird.f32 %v4011_v50  ;;  %v4036_v53 = vand.u32 2147483647, %v4011_v50 }
0x2029   :  { %v4039_v36 = vor.u32 1.1754944e-38, %v4038_v46  ;;  %vm4037_vm4 = vcmp.eq.f32.partialorder %v4036_v53, 8.507059e+37 }
0x202b   :  { %1606 = vadd.xlane.f32.xlu2 %v1605_v34  ;;  %v1830_v34 = vmul.f32 %v7709_v9, %v8137_v8 }
0x202c   :  { %v3952_v40 = vpop.permute.xlu2 %3951 }
0x202d   :  { %v3954_v58 = vmul.f32 %v3952_v40, %v3935_v16  ;;  %v5451_v1 = vpop.eup %5450  ;;  %v1831_v62 = vsel %vm489_vm6, %v1830_v34, 0.0  ;;  %v8138_v16 = vld [vmem:[#allocation17_spill] sm:$0xff] }
0x202e   :  { %v4028_v32 = vmul.f32 %v5451_v1, %v4011_v50  ;;  %vm4033_vm1 = vweird.f32 %v5451_v1  ;;  %v2056_v40 = vmul.f32 %v7709_v9, %v8138_v16 }
0x202f   :  { %4962 = vmatmul.msk.f32.vlgmr.msra.gmra.mxu0 %vm283_vm11, %v3954_v58  ;;  %4963 = vmatmul.msk.f32.vlgmr.msra.gmra.mxu1 %vm283_vm11, %v3954_v58  ;;  %v4060_v42 = vmul.f32 %v7709_v9, %v3954_v58  ;;  %vm4034_vm3 = vmor %vm4032_vm2, %vm4033_vm1 }
0x2030   :  { %v4029_v31 = vsub.f32 1.0, %v4028_v32  ;;  %v2057_v58 = vsel %vm489_vm6, %v2056_v40, 0.0  ;;  %v4072_v32 = vld [vmem:[#allocation2 + $0x40] sm:$0xc] }
0x2031   :  { %v4061_v11 = vsel %vm489_vm6, %v4060_v42, 0.0 }
0x2032   :  { %v4030_v37 = vmul.f32 %v5451_v1, %v4029_v31  ;;  %v4078_v31 = vrot.slane %v4072_v32, 2 }
0x2033   :  { %2284 = vadd.xlane.f32.xlu2 %v2283_v4  ;;  %v2063_v4 = vsel %vm489_vm6, %v2062_v52, 0.0 }
0x2034   :  { %v4031_v43 = vadd.f32 %v5451_v1, %v4030_v37 }
0x2036   :  { %v4035_v20 = vsel %vm4034_vm3, %v5451_v1, %v4031_v43 }
0x2037   :  { %v4040_v59 = vsel %vm4037_vm4, %v4039_v36, %v4035_v20  ;;  %v8143_v20 = vld [vmem:[#allocation12_spill] sm:$0xff] }
0x2038   :  { %v1164_v36 = vmul.f32 %v7709_v9, %v8143_v20  ;;  %v8148_v20 = vld [vmem:[#allocation26_spill] sm:$0xff] }
0x203b   :  { %2730 = vadd.xlane.f32.xlu2 %v2729_v10  ;;  %v2276_v10 = vmul.f32 %v7709_v9, %v8140_v18 }
0x203d   :  { %v2277_v42 = vsel %vm489_vm6, %v2276_v10, 0.0 }
0x2043   :  { %4062 = vadd.xlane.f32.xlu2 %v4061_v11  ;;  %v8141_v11 = vld [vmem:[#allocation21_spill] sm:$0xff] }
0x2044   :  { %v2496_v24 = vmul.f32 %v7709_v9, %v8141_v11 }
0x2046   :  { %v2497_v29 = vsel %vm489_vm6, %v2496_v24, 0.0 }
0x204e   :  { %500 = vadd.xlane.f32.xlu1 %v499_v48  ;;  %v8142_v48 = vld [vmem:[#allocation25_spill] sm:$0xff] }
0x204f   :  { %v2954_v25 = vmul.f32 %v7727_v63, %v8142_v48 }
0x2051   :  { %v2955_v26 = vsel %vm489_vm6, %v2954_v25, 0.0 }
0x206e   :  { %v715_v41 = vpop.xlane.xlu2 %714 }
0x206f   :  { %717 = vst.msk [vmem:[#allocation4 + $0x2] sm:$0x3] %vm493_vm12, %v715_v41  ;;  %v3620_v41 = vmul.f32 %v7727_v63, %v7609_v14 }
0x2076   :  { %v721_v60 = vpop.xlane.xlu2 %720 }
0x2077   :  { %723 = vst.msk [vmem:[#allocation5 + $0x20] sm:$0x3] %vm493_vm12, %v721_v60 }
0x207e   :  { %v941_v61 = vpop.xlane.xlu2 %940 }
0x207f   :  { %943 = vst.msk [vmem:[#allocation4 + $0x4] sm:$0x3] %vm493_vm12, %v941_v61  ;;  %v3621_v61 = vsel %vm489_vm6, %v3620_v41, 0.0 }
0x2086   :  { %v947_v3 = vpop.xlane.xlu2 %946 }
0x2087   :  { %949 = vst.msk [vmem:[#allocation5 + $0x1e] sm:$0x3] %vm493_vm12, %v947_v3 }
0x208e   :  { %v1173_v35 = vpop.xlane.xlu2 %1172 }
0x208f   :  { %1175 = vst.msk [vmem:[#allocation5 + $0x1c] sm:$0x3] %vm493_vm12, %v1173_v35 }
0x2096   :  { %v4057_v22 = vpop.permute.xlu1 %4056  ;;  %v1393_v49 = vpop.xlane.xlu2 %1392 }
0x2097   :  { %v7772_v23 = vmul.f32 %v4057_v22, %v4040_v59  ;;  %1395 = vst.msk [vmem:[#allocation5 + $0x1a] sm:$0x3] %vm493_vm12, %v1393_v49  ;;  %v1165_v22 = vsel %vm489_vm6, %v1164_v36, 0.0  ;;  %v3168_v36 = vmul.f32 %v7709_v9, %v8148_v20 }
0x2099   :  { %4966 = vmatmul.msk.f32.vlgmr.msra.gmra.mxu2 %vm283_vm11, %v7772_v23  ;;  %4967 = vmatmul.msk.f32.vlgmr.msra.gmra.mxu3 %vm283_vm11, %v7772_v23 }
0x209e   :  { %v1607_v57 = vpop.xlane.xlu2 %1606 }
0x209f   :  { %1609 = vst.msk [vmem:[#allocation4 + $0xa] sm:$0x3] %vm493_vm12, %v1607_v57 }
0x20a6   :  { %v2285_v6 = vpop.xlane.xlu2 %2284 }
0x20a7   :  { %2287 = vst.msk [vmem:[#allocation5 + $0x12] sm:$0x3] %vm493_vm12, %v2285_v6 }
0x20ac   :  { %v4122_v21 = vpop.f32.mrf.mxu1  ;;  %v4102_v3 = vpop.f32.mrf.mxu0 }
0x20ad   :  { %v7781_v28 = vadd.f32 %v4122_v21, %v4079_v17  ;;  %v4103_v37 = vadd.f32 %v4102_v3, %v4078_v31 }
0x20ae   :  { %v2731_v27 = vpop.xlane.xlu2 %2730 }
0x20af   :  { %5452 = vtanh.f32 %v7781_v28  ;;  %2733 = vst.msk [vmem:[#allocation5 + $0xe] sm:$0x3] %vm493_vm12, %v2731_v27  ;;  %v4964_v35 = vmul.f32 -1.442695, %v4103_v37  ;;  %v8146_v37 = vld [vmem:[#allocation23_spill] sm:$0xff] }
0x20b5   :  { %v5453_v30 = vpop.eup %5452 }
0x20b6   :  { %4166 = vrot.lane.b32.xlu1 %v5453_v30, %s5694_s9  ;;  %v4063_v51 = vpop.xlane.xlu2 %4062 }
0x20b7   :  { %4065 = vst.msk [vmem:[#allocation4 + $0x20] sm:$0x3] %vm493_vm12, %v4063_v51 }
0x20c1   :  { %v501_v12 = vpop.xlane.xlu1 %500 }
0x20c2   :  { %503 = vst.msk [vmem:[#allocation5 + $0x22] sm:$0x3] %vm493_vm12, %v501_v12 }
0x20e0   :  { %1386 = vadd.xlane.f32.xlu1 %v1385_v15 }
0x20e8   :  { %1612 = vadd.xlane.f32.xlu1 %v1611_v19 }
0x20f0   :  { %1832 = vadd.xlane.f32.xlu1 %v1831_v62 }
0x20f8   :  { %2058 = vadd.xlane.f32.xlu1 %v2057_v58 }
0x2100   :  { %2064 = vadd.xlane.f32.xlu1 %v2063_v4  ;;  %v8144_v4 = vld [vmem:[#allocation16_spill] sm:$0xff] }
0x2101   :  { %v1836_v18 = vmul.f32 %v7727_v63, %v8144_v4 }
0x2103   :  { %v1837_v11 = vsel %vm489_vm6, %v1836_v18, 0.0 }
0x2108   :  { %2278 = vadd.xlane.f32.xlu1 %v2277_v42 }
0x2110   :  { %2498 = vadd.xlane.f32.xlu1 %v2497_v29  ;;  %v8145_v29 = vld [vmem:[#allocation22_spill] sm:$0xff] }
0x2111   :  { %v2502_v48 = vmul.f32 %v7727_v63, %v8145_v29  ;;  %v4419_v29 = vld [vmem:[%s8095_s11 + $0x8] sm:$0xff] }
0x2118   :  { %2956 = vadd.xlane.f32.xlu1 %v2955_v26 }
0x211c   :  { %v4221_v50 = vpop.f32.mrf.mxu3  ;;  %v4201_v15 = vpop.f32.mrf.mxu2 }
0x211d   :  { %v7814_v60 = vadd.f32 %v4221_v50, %v4075_v13  ;;  %v4202_v39 = vadd.f32 %v4201_v15, %v4074_v7  ;;  %v2503_v50 = vsel %vm489_vm6, %v2502_v48, 0.0 }
0x211f   :  { %5454 = vtanh.f32 %v7814_v60  ;;  %v4968_v19 = vmul.f32 -1.442695, %v4202_v39 }
0x2120   :  { %3622 = vadd.xlane.f32.xlu1 %v3621_v61  ;;  %5456 = vpow2.f32 %v4964_v35  ;;  %v2722_v35 = vmul.f32 %v7709_v9, %v8146_v37 }
0x2125   :  { %v5455_v1 = vpop.eup %5454 }
0x2126   :  { %4265 = vrot.lane.b32.xlu0 %v5455_v1, %s5694_s9  ;;  %v5457_v43 = vpop.eup %5456 }
0x2127   :  { %v4131_v14 = vadd.f32 1.0, %v5457_v43  ;;  %v2723_v43 = vsel %vm489_vm6, %v2722_v35, 0.0 }
0x2128   :  { %v4167_v53 = vpop.permute.xlu1 %4166 }
0x2129   :  { %5458 = vrcp.f32 %v4131_v14  ;;  %v4144_v17 = vand.u32 2147483648, %v4131_v14  ;;  %vm4138_vm5 = vweird.f32 %v4131_v14  ;;  %v4142_v27 = vand.u32 2147483647, %v4131_v14 }
0x212a   :  { %5460 = vpow2.f32 %v4968_v19 }
0x212b   :  { %v4145_v51 = vor.u32 1.1754944e-38, %v4144_v17  ;;  %vm4143_vm8 = vcmp.eq.f32.partialorder %v4142_v27, 8.507059e+37  ;;  %v4066_v17 = vmul.f32 %v7727_v63, %v7772_v23 }
0x212d   :  { %v4067_v27 = vsel %vm489_vm6, %v4066_v17, 0.0 }
0x212f   :  { %v5459_v46 = vpop.eup %5458 }
0x2130   :  { %v4134_v59 = vmul.f32 %v5459_v46, %v4131_v14  ;;  %vm4139_vm11 = vweird.f32 %v5459_v46  ;;  %v5461_v62 = vpop.eup %5460  ;;  %v8147_v14 = vld [vmem:[#allocation24_spill] sm:$0xff] }
0x2131   :  { %vm4140_vm7 = vmor %vm4138_vm5, %vm4139_vm11  ;;  %v4230_v16 = vadd.f32 1.0, %v5461_v62  ;;  %v5695_v62 = vmov 0  }
0x2132   :  { %v4135_v49 = vsub.f32 1.0, %v4134_v59  ;;  %v3169_v59 = vsel %vm489_vm6, %v3168_v36, 0.0  ;;  %5000 = vset.pattern.permute.xlu2 %v5695_v62  ;;  %4999 = vset.pattern.permute.xlu1 %v5695_v62 }
0x2133   :  { %5462 = vrcp.f32 %v4230_v16  ;;  %v4243_v26 = vand.u32 2147483648, %v4230_v16  ;;  %vm4237_vm10 = vweird.f32 %v4230_v16  ;;  %v4241_v13 = vand.u32 2147483647, %v4230_v16  ;;  %5001 = vset.pattern.permute.xlu0 %v5695_v62  ;;  %v4325_v62 = vld [vmem:[#allocation5 + $0x20] sm:$0x3] }
0x2134   :  { %v4136_v6 = vmul.f32 %v5459_v46, %v4135_v49 }
0x2135   :  { %v4244_v1 = vor.u32 1.1754944e-38, %v4243_v26  ;;  %vm4242_vm14 = vcmp.eq.f32.partialorder %v4241_v13, 8.507059e+37 }
0x2136   :  { %v4137_v44 = vadd.f32 %v5459_v46, %v4136_v6  ;;  %v3388_v6 = vmul.f32 %v7709_v9, %v7502_v5 }
0x2138   :  { %v4141_v30 = vsel %vm4140_vm7, %v5459_v46, %v4137_v44  ;;  %v2948_v46 = vmul.f32 %v7709_v9, %v8147_v14  ;;  %v3389_v44 = vsel %vm489_vm6, %v3388_v6, 0.0  ;;  %vm4608_vm7 = vcmask 1042434  }
0x2139   :  { %v7824_v12 = vsel %vm4143_vm8, %v4145_v51, %v4141_v30  ;;  %v5463_v58 = vpop.eup %5462  ;;  %v3846_v30 = vmul.f32 %v7727_v63, %v7691_v38  ;;  %vm4610_vm8 = vcmask 1043459  }
0x213a   :  { %v4169_v55 = vmul.f32 %v4167_v53, %v7824_v12  ;;  %v4233_v52 = vmul.f32 %v5463_v58, %v4230_v16  ;;  %vm4238_vm9 = vweird.f32 %v5463_v58  ;;  %v2949_v53 = vsel %vm489_vm6, %v2948_v46, 0.0 }
0x213b   :  { %vm4239_vm13 = vmor %vm4237_vm10, %vm4238_vm9  ;;  %v3847_v51 = vsel %vm489_vm6, %v3846_v30, 0.0  ;;  %v4164_v5 = vmul.f32 %v7824_v12, %v7716_v2  ;;  %v3394_v2 = vmul.f32 %v7727_v63, %v7525_v45  ;;  %v4418_v45 = vld [vmem:[%s8095_s11] sm:$0xff]  ;;  %vm4612_vm9 = vcmask 1044484  }
0x213c   :  { %v4234_v10 = vsub.f32 1.0, %v4233_v52  ;;  %v4421_v52 = vld [vmem:[%s8095_s11 + $0x18] sm:$0xff]  ;;  %vm4614_vm10 = vcmask 1045509  }
0x213e   :  { %v4235_v24 = vmul.f32 %v5463_v58, %v4234_v10 }
0x2140   :  { %v4236_v25 = vadd.f32 %v5463_v58, %v4235_v24 }
0x2142   :  { %v4240_v61 = vsel %vm4239_vm13, %v5463_v58, %v4236_v25  ;;  %v4965_v58 = vmul.f32 -1.442695, %v7781_v28  ;;  %vm4616_vm13 = vcmask 1046534  }
0x2143   :  { %v4245_v3 = vsel %vm4242_vm14, %v4244_v1, %v4240_v61  ;;  %v7895_v1 = vstv %s4994_s23  ;;  %vm4618_vm14 = vcmask 1047559  }
0x2144   :  { %v4263_v23 = vmul.f32 %v4245_v3, %v7743_v0 }
0x2150   :  { %1166 = vadd.xlane.f32.xlu0 %v1165_v22  ;;  %v8149_v22 = vld [vmem:[#allocation27_spill] sm:$0xff] }
0x2151   :  { %v3174_v49 = vmul.f32 %v7727_v63, %v8149_v22 }
0x2153   :  { %v1387_v57 = vpop.xlane.xlu1 %1386 }
0x2154   :  { %1389 = vst.msk [vmem:[#allocation4 + $0x8] sm:$0x3] %vm493_vm12, %v1387_v57  ;;  %v3175_v57 = vsel %vm489_vm6, %v3174_v49, 0.0 }
0x215b   :  { %v1613_v21 = vpop.xlane.xlu1 %1612 }
0x215c   :  { %1615 = vst.msk [vmem:[#allocation5 + $0x18] sm:$0x3] %vm493_vm12, %v1613_v21 }
0x2163   :  { %v1833_v47 = vpop.xlane.xlu1 %1832  ;;  %v4321_v13 = vld [vmem:[#allocation5 + $0x18] sm:$0x3] }
0x2164   :  { %1835 = vst.msk [vmem:[#allocation4 + $0xc] sm:$0x3] %vm493_vm12, %v1833_v47  ;;  %4171 = vrot.lane.b32.xlu0 %v4169_v55, %s5694_s9 }
0x216b   :  { %v2059_v8 = vpop.xlane.xlu1 %2058 }
0x216c   :  { %2061 = vst.msk [vmem:[#allocation4 + $0xe] sm:$0x3] %vm493_vm12, %v2059_v8  ;;  %v3395_v8 = vsel %vm489_vm6, %v3394_v2, 0.0 }
0x2173   :  { %v2065_v34 = vpop.xlane.xlu1 %2064 }
0x2174   :  { %2067 = vst.msk [vmem:[#allocation5 + $0x14] sm:$0x3] %vm493_vm12, %v2065_v34 }
0x217b   :  { %v2279_v40 = vpop.xlane.xlu1 %2278 }
0x217c   :  { %2281 = vst.msk [vmem:[#allocation4 + $0x10] sm:$0x3] %vm493_vm12, %v2279_v40  ;;  %v3614_v40 = vmul.f32 %v7709_v9, %v7568_v54  ;;  %v4969_v54 = vmul.f32 -1.442695, %v7814_v60 }
0x2183   :  { %v2499_v56 = vpop.xlane.xlu1 %2498 }
0x2184   :  { %2501 = vst.msk [vmem:[#allocation4 + $0x12] sm:$0x3] %vm493_vm12, %v2499_v56  ;;  %v3615_v56 = vsel %vm489_vm6, %v3614_v40, 0.0  ;;  %v4318_v40 = vld [vmem:[#allocation5 + $0x12] sm:$0x3] }
0x218b   :  { %v2957_v42 = vpop.xlane.xlu1 %2956 }
0x218c   :  { %2959 = vst.msk [vmem:[#allocation5 + $0xc] sm:$0x3] %vm493_vm12, %v2957_v42 }
0x218e   :  { %1838 = vadd.xlane.f32.xlu0 %v1837_v11 }
0x2193   :  { %v3623_v41 = vpop.xlane.xlu1 %3622 }
0x2194   :  { %3625 = vst.msk [vmem:[#allocation5 + $0x6] sm:$0x3] %vm493_vm12, %v3623_v41 }
0x2196   :  { %2504 = vadd.xlane.f32.xlu0 %v2503_v50 }
0x2198   :  { %v4266_v32 = vpop.permute.xlu0 %4265 }
0x2199   :  { %v4268_v31 = vmul.f32 %v4266_v32, %v4245_v3  ;;  %v4293_v3 = vld [vmem:[#allocation4 + $0x4] sm:$0x3] }
0x219b   :  { %4270 = vrot.lane.b32.xlu2 %v4268_v31, %s5694_s9 }
0x219e   :  { %2724 = vadd.xlane.f32.xlu0 %v2723_v43 }
0x21a6   :  { %2950 = vadd.xlane.f32.xlu0 %v2949_v53 }
0x21ae   :  { %3170 = vadd.xlane.f32.xlu0 %v3169_v59 }
0x21b6   :  { %3176 = vadd.xlane.f32.xlu0 %v3175_v57 }
0x21be   :  { %3390 = vadd.xlane.f32.xlu0 %v3389_v44 }
0x21c3   :  { %v1167_v21 = vpop.xlane.xlu0 %1166 }
0x21c4   :  { %1169 = vst.msk [vmem:[#allocation4 + $0x6] sm:$0x3] %vm493_vm12, %v1167_v21 }
0x21c6   :  { %4068 = vadd.xlane.f32.xlu0 %v4067_v27 }
0x21ce   :  { %3848 = vadd.xlane.f32.xlu0 %v3847_v51 }
0x21d6   :  { %v4172_v55 = vpop.permute.xlu0 %4171 }
0x21d7   :  { %v4174_v47 = vadd.f32 %v4172_v55, %v4164_v5 }
0x21d9   :  { %5464 = vtanh.f32 %v4174_v47 }
0x21df   :  { %v5465_v15 = vpop.eup %5464 }
0x21e0   :  { %4177 = vrot.lane.b32.xlu1 %v5465_v15, %s5694_s9  ;;  %v3840_v15 = vmul.f32 %v7709_v9, %v7684_v33  ;;  %v4300_v33 = vld [vmem:[#allocation4 + $0x12] sm:$0x3] }
0x21f5   :  { %v4271_v7 = vpop.permute.xlu2 %4270 }
0x21f6   :  { %v4273_v39 = vadd.f32 %v4271_v7, %v4263_v23 }
0x21f8   :  { %5466 = vtanh.f32 %v4273_v39 }
0x21f9   :  { %5468 = vpow2.f32 %v4965_v58  ;;  %v4336_v58 = vadd.f32 %v4318_v40, %v4300_v33  ;;  %v4324_v33 = vld [vmem:[#allocation5 + $0x1e] sm:$0x3] }
0x21fe   :  { %v5467_v19 = vpop.eup %5466 }
0x21ff   :  { %4276 = vrot.lane.b32.xlu2 %v5467_v19, %s5694_s9  ;;  %v5469_v18 = vpop.eup %5468 }
0x2200   :  { %v4132_v10 = vadd.f32 1.0, %v5469_v18  ;;  %v4375_v18 = vadd.f32 %v7895_v1, %v4336_v58 }
0x2201   :  { %v1839_v38 = vpop.xlane.xlu0 %1838 }
0x2202   :  { %1841 = vst.msk [vmem:[#allocation5 + $0x16] sm:$0x3] %vm493_vm12, %v1839_v38  ;;  %5470 = vrcp.f32 %v4132_v10  ;;  %v4159_v14 = vand.u32 2147483648, %v4132_v10  ;;  %vm4153_vm0 = vweird.f32 %v4132_v10  ;;  %v4157_v20 = vand.u32 2147483647, %v4132_v10 }
0x2203   :  { %5472 = vpow2.f32 %v4969_v54  ;;  %v3841_v38 = vsel %vm489_vm6, %v3840_v15, 0.0  ;;  %v4428_v15 = vld [vmem:[%s8095_s11 + $0x50] sm:$0xff] }
0x2204   :  { %v4160_v59 = vor.u32 1.1754944e-38, %v4159_v14  ;;  %vm4158_vm2 = vcmp.eq.f32.partialorder %v4157_v20, 8.507059e+37 }
0x2208   :  { %v5471_v11 = vpop.eup %5470 }
0x2209   :  { %v2505_v12 = vpop.xlane.xlu0 %2504  ;;  %v5473_v24 = vpop.eup %5472  ;;  %v4149_v25 = vmul.f32 %v5471_v11, %v4132_v10  ;;  %vm4154_vm15 = vweird.f32 %v5471_v11  ;;  %v4292_v10 = vld [vmem:[#allocation4 + $0x2] sm:$0x3] }
0x220a   :  { %2507 = vst.msk [vmem:[#allocation5 + $0x10] sm:$0x3] %vm493_vm12, %v2505_v12  ;;  %3396 = vadd.xlane.f32.xlu1 %v3395_v8  ;;  %v4231_v48 = vadd.f32 1.0, %v5473_v24  ;;  %vm4155_vm1 = vmor %vm4153_vm0, %vm4154_vm15  ;;  %vm4630_vm15 = vcmask 146432   ;;  %vm4792_vm0 = vcmask 8192  }
0x220b   :  { %v4150_v41 = vsub.f32 1.0, %v4149_v25 }
0x220c   :  { %5474 = vrcp.f32 %v4231_v48  ;;  %v4258_v55 = vand.u32 2147483648, %v4231_v48  ;;  %vm4252_vm4 = vweird.f32 %v4231_v48  ;;  %v4256_v47 = vand.u32 2147483647, %v4231_v48 }
0x220d   :  { %v4151_v61 = vmul.f32 %v5471_v11, %v4150_v41  ;;  %v4294_v41 = vld [vmem:[#allocation4 + $0x6] sm:$0x3] }
0x220e   :  { %v4259_v7 = vor.u32 1.1754944e-38, %v4258_v55  ;;  %vm4257_vm5 = vcmp.eq.f32.partialorder %v4256_v47, 8.507059e+37  ;;  %v4422_v55 = vld [vmem:[%s8095_s11 + $0x20] sm:$0xff]  ;;  %v4425_v47 = vld [vmem:[%s8095_s11 + $0x38] sm:$0xff] }
0x220f   :  { %v4152_v43 = vadd.f32 %v5471_v11, %v4151_v61 }
0x2211   :  { %v2725_v34 = vpop.xlane.xlu0 %2724  ;;  %v4156_v36 = vsel %vm4155_vm1, %v5471_v11, %v4152_v43 }
0x2212   :  { %2727 = vst.msk [vmem:[#allocation4 + $0x14] sm:$0x3] %vm493_vm12, %v2725_v34  ;;  %v5475_v32 = vpop.eup %5474  ;;  %v4161_v49 = vsel %vm4158_vm2, %v4160_v59, %v4156_v36  ;;  %v4307_v34 = vld [vmem:[#allocation4 + $0x20] sm:$0x3] }
0x2213   :  { %v4248_v53 = vmul.f32 %v5475_v32, %v4231_v48  ;;  %vm4253_vm3 = vweird.f32 %v5475_v32 }
0x2214   :  { %vm4254_vm11 = vmor %vm4252_vm4, %vm4253_vm3 }
0x2215   :  { %v4249_v22 = vsub.f32 1.0, %v4248_v53 }
0x2217   :  { %v4250_v21 = vmul.f32 %v5475_v32, %v4249_v22 }
0x2219   :  { %v2951_v0 = vpop.xlane.xlu0 %2950  ;;  %v4251_v5 = vadd.f32 %v5475_v32, %v4250_v21 }
0x221a   :  { %2953 = vst.msk [vmem:[#allocation4 + $0x16] sm:$0x3] %vm493_vm12, %v2951_v0  ;;  %v4317_v0 = vld [vmem:[#allocation5 + $0x10] sm:$0x3] }
0x221b   :  { %v4255_v23 = vsel %vm4254_vm11, %v5475_v32, %v4251_v5 }
0x221c   :  { %v4260_v19 = vsel %vm4257_vm5, %v4259_v7, %v4255_v23  ;;  %v4431_v7 = vld [vmem:[%s8095_s11 + $0x68] sm:$0xff] }
0x2221   :  { %v3171_v16 = vpop.xlane.xlu0 %3170 }
0x2222   :  { %3173 = vst.msk [vmem:[#allocation4 + $0x18] sm:$0x3] %vm493_vm12, %v3171_v16  ;;  %v4343_v16 = vadd.f32 %v4325_v62, %v4307_v34  ;;  %v4764_v34 = vld [vmem:[#allocation7] sm:$0x1]  ;;  %v4296_v62 = vld [vmem:[#allocation4 + $0xa] sm:$0x3] }
0x2223   :  { %4436 = vperm.xlu1 %4999, %v4418_v45   ;;  %v4299_v45 = vld [vmem:[#allocation4 + $0x10] sm:$0x3] }
0x2228   :  { %3616 = vadd.xlane.f32.xlu2 %v3615_v56  ;;  %v4420_v56 = vld [vmem:[%s8095_s11 + $0x10] sm:$0xff] }
0x2229   :  { %v3177_v4 = vpop.xlane.xlu0 %3176  ;;  %v4303_v60 = vld [vmem:[#allocation4 + $0x18] sm:$0x3] }
0x222a   :  { %3179 = vst.msk [vmem:[#allocation5 + $0xa] sm:$0x3] %vm493_vm12, %v3177_v4  ;;  %v4339_v50 = vadd.f32 %v4321_v13, %v4303_v60  ;;  %v4322_v13 = vld [vmem:[#allocation5 + $0x1a] sm:$0x3] }
0x222b   :  { %4451 = vperm.xlu1 %4999, %v4421_v52   ;;  %v4382_v52 = vadd.f32 %v7895_v1, %v4343_v16 }
0x222c   :  { %v4378_v37 = vadd.f32 %v7895_v1, %v4339_v50 }
0x222e   :  { %5476 = vtanh.f32 %v4378_v37 }
0x2231   :  { %v3391_v42 = vpop.xlane.xlu0 %3390 }
0x2232   :  { %3393 = vst.msk [vmem:[#allocation4 + $0x1a] sm:$0x3] %vm493_vm12, %v3391_v42  ;;  %v4302_v42 = vld [vmem:[#allocation4 + $0x16] sm:$0x3] }
0x2234   :  { %v5477_v6 = vpop.eup %5476 }
0x2239   :  { %v4069_v28 = vpop.xlane.xlu0 %4068  ;;  %v4304_v48 = vld [vmem:[#allocation4 + $0x1a] sm:$0x3] }
0x223a   :  { %4071 = vst.msk [vmem:[#allocation5 + $0x2] sm:$0x3] %vm493_vm12, %v4069_v28  ;;  %v4320_v28 = vld [vmem:[#allocation5 + $0x16] sm:$0x3]  ;;  %v4340_v61 = vadd.f32 %v4322_v13, %v4304_v48  ;;  %v4297_v48 = vld [vmem:[#allocation4 + $0xc] sm:$0x3] }
0x223b   :  { %v4338_v11 = vadd.f32 %v4320_v28, %v4302_v42  ;;  %v4315_v28 = vld [vmem:[#allocation5 + $0xc] sm:$0x3]  ;;  %v4316_v13 = vld [vmem:[#allocation5 + $0xe] sm:$0x3] }
0x223c   :  { %v4379_v37 = vadd.f32 %v7895_v1, %v4340_v61 }
0x2240   :  { %4441 = vperm.xlu2 %5000, %v4419_v29  }
0x2241   :  { %v3849_v26 = vpop.xlane.xlu0 %3848  ;;  %v4310_v4 = vld [vmem:[#allocation5 + $0x2] sm:$0x3] }
0x2242   :  { %3851 = vst.msk [vmem:[#allocation5 + $0x4] sm:$0x3] %vm493_vm12, %v3849_v26  ;;  %v4328_v54 = vadd.f32 %v4310_v4, %v4292_v10  ;;  %v4377_v26 = vadd.f32 %v7895_v1, %v4338_v11  ;;  %v4319_v4 = vld [vmem:[#allocation5 + $0x14] sm:$0x3]  ;;  %v4291_v10 = vld [vmem:[#allocation4] sm:$0x3] }
0x2244   :  { %v4367_v24 = vadd.f32 %v7895_v1, %v4328_v54 }
0x2249   :  { %v4311_v31 = vld [vmem:[#allocation5 + $0x4] sm:$0x3] }
0x224a   :  { %v4329_v35 = vadd.f32 %v4311_v31, %v4293_v3  ;;  %v4312_v3 = vld [vmem:[#allocation5 + $0x6] sm:$0x3] }
0x224b   :  { %v4330_v31 = vadd.f32 %v4312_v3, %v4294_v41  ;;  %v4333_v41 = vadd.f32 %v4315_v28, %v4297_v48 }
0x224c   :  { %v4368_v46 = vadd.f32 %v7895_v1, %v4329_v35 }
0x224d   :  { %v4369_v43 = vadd.f32 %v7895_v1, %v4330_v31  ;;  %v4372_v61 = vadd.f32 %v7895_v1, %v4333_v41  ;;  %v4423_v31 = vld [vmem:[%s8095_s11 + $0x28] sm:$0xff] }
0x224e   :  { %5478 = vtanh.f32 %v4368_v46 }
0x224f   :  { %5480 = vtanh.f32 %v4382_v52 }
0x2252   :  { %v4178_v57 = vpop.permute.xlu1 %4177 }
0x2253   :  { %v4180_v44 = vmul.f32 %v4178_v57, %v4161_v49  ;;  %v4295_v49 = vld [vmem:[#allocation4 + $0x8] sm:$0x3] }
0x2254   :  { %v5479_v17 = vpop.eup %5478 }
0x2255   :  { %v5012_v27 = vpack.i.bf16 %v5477_v6, %v5479_v17  ;;  %v4280_v30 = vmul.f32 %v7709_v9, %v4180_v44  ;;  %v4335_v9 = vadd.f32 %v4317_v0, %v4299_v45  ;;  %v5481_v29 = vpop.eup %5480  ;;  %v4323_v44 = vld [vmem:[#allocation5 + $0x1c] sm:$0x3] }
0x2257   :  { %5013 = vperm.xlu1 %4999, %v5012_v27   ;;  %v4281_v51 = vsel %vm489_vm6, %v4280_v30, 0.0 }
0x2258   :  { %4282 = vadd.xlane.f32.xlu0 %v4281_v51 }
0x2259   :  { %v4277_v39 = vpop.permute.xlu2 %4276 }
0x225a   :  { %v4279_v2 = vmul.f32 %v4277_v39, %v4260_v19 }
0x225c   :  { %v4286_v12 = vmul.f32 %v7727_v63, %v4279_v2  ;;  %v4374_v63 = vadd.f32 %v7895_v1, %v4335_v9 }
0x225e   :  { %v4287_v8 = vsel %vm489_vm6, %v4286_v12, 0.0  ;;  %5482 = vtanh.f32 %v4374_v63  ;;  %vm4679_vm6 = vcmask 1041408  }
0x225f   :  { %5484 = vtanh.f32 %v4375_v18 }
0x2260   :  { %3842 = vadd.xlane.f32.xlu0 %v3841_v38  ;;  %5486 = vtanh.f32 %v4367_v24  ;;  %v4326_v38 = vld [vmem:[#allocation5 + $0x22] sm:$0x3] }
0x2261   :  { %5488 = vtanh.f32 %v4377_v26 }
0x2262   :  { %5490 = vtanh.f32 %v4379_v37 }
0x2263   :  { %5492 = vtanh.f32 %v4369_v43 }
0x2264   :  { %v5483_v25 = vpop.eup %5482 }
0x2265   :  { %v5485_v50 = vpop.eup %5484 }
0x2266   :  { %v5002_v32 = vpack.i.bf16 %v5485_v50, %v5483_v25  ;;  %v5487_v35 = vpop.eup %5486  ;;  %v4298_v25 = vld [vmem:[#allocation4 + $0xe] sm:$0x3] }
0x2267   :  { %v5489_v14 = vpop.eup %5488  ;;  %v4334_v50 = vadd.f32 %v4316_v13, %v4298_v25 }
0x2268   :  { %v5007_v46 = vpack.i.bf16 %v5489_v14, %v5487_v35  ;;  %v5491_v53 = vpop.eup %5490  ;;  %v4426_v14 = vld [vmem:[%s8095_s11 + $0x40] sm:$0xff] }
0x2269   :  { %4288 = vadd.xlane.f32.xlu2 %v4287_v8  ;;  %v5493_v20 = vpop.eup %5492  ;;  %v4314_v8 = vld [vmem:[#allocation5 + $0xa] sm:$0x3] }
0x226a   :  { %v5017_v36 = vpack.i.bf16 %v5491_v53, %v5493_v20  ;;  %v4332_v16 = vadd.f32 %v4314_v8, %v4296_v62  ;;  %v4424_v20 = vld [vmem:[%s8095_s11 + $0x30] sm:$0xff] }
0x226c   :  { %v4371_v9 = vadd.f32 %v7895_v1, %v4332_v16 }
0x2274   :  { %4446 = vperm.xlu0 %5001, %v4420_v56   ;;  %v4301_v56 = vld [vmem:[#allocation4 + $0x14] sm:$0x3] }
0x2275   :  { %v4337_v18 = vadd.f32 %v4319_v4, %v4301_v56 }
0x2277   :  { %v4376_v54 = vadd.f32 %v7895_v1, %v4337_v18 }
0x227c   :  { %4581 = vperm.xlu0 %5001, %v5481_v29  }
0x227d   :  { %v3397_v60 = vpop.xlane.xlu1 %3396 }
0x227e   :  { %3399 = vst.msk [vmem:[#allocation5 + $0x8] sm:$0x3] %vm493_vm12, %v3397_v60 }
0x2281   :  { %5003 = vperm.xlu2 %5000, %v5002_v32   ;;  %v4373_v32 = vadd.f32 %v7895_v1, %v4334_v50 }
0x2285   :  { %v4313_v22 = vld [vmem:[#allocation5 + $0x8] sm:$0x3] }
0x2286   :  { %v4331_v57 = vadd.f32 %v4313_v22, %v4295_v49  ;;  %v4430_v22 = vld [vmem:[%s8095_s11 + $0x60] sm:$0xff]  ;;  %v4433_v49 = vld [vmem:[%s8095_s11 + $0x78] sm:$0xff] }
0x2288   :  { %v4370_v17 = vadd.f32 %v7895_v1, %v4331_v57 }
0x2289   :  { %5008 = vperm.xlu2 %5000, %v5007_v46  }
0x228a   :  { %5494 = vtanh.f32 %v4370_v17 }
0x2290   :  { %v5495_v30 = vpop.eup %5494 }
0x2291   :  { %5018 = vperm.xlu2 %5000, %v5017_v36   ;;  %v4432_v36 = vld [vmem:[%s8095_s11 + $0x70] sm:$0xff] }
0x2295   :  { %v7968_v57 = vpop.permute.xlu1 %4436 }
0x229b   :  { %v3617_v59 = vpop.xlane.xlu2 %3616 }
0x229c   :  { %3619 = vst.msk [vmem:[#allocation4 + $0x1c] sm:$0x3] %vm493_vm12, %v3617_v59  ;;  %v4427_v59 = vld [vmem:[%s8095_s11 + $0x48] sm:$0xff] }
0x22a3   :  { %v4305_v6 = vld [vmem:[#allocation4 + $0x1c] sm:$0x3]  ;;  %v7933_v2 = vpop.permute.xlu2 %4441 }
0x22a4   :  { %v4341_v21 = vadd.f32 %v4323_v44, %v4305_v6  ;;  %v7970_v6 = vpop.permute.xlu1 %4451 }
0x22a6   :  { %v4380_v27 = vadd.f32 %v7895_v1, %v4341_v21 }
0x22a8   :  { %5496 = vtanh.f32 %v4380_v27  ;;  %v4586_v27 = vlaneseq }
0x22ae   :  { %v5497_v51 = vpop.eup %5496 }
0x22af   :  { %v5022_v5 = vpack.i.bf16 %v5497_v51, %v5495_v30  ;;  %v7974_v51 = vand.u32 127, %v4586_v27  ;;  %v4407_v27 = vld [vmem:[%s8094_s10 + $0x28] sm:$0xff] }
0x22b1   :  { %5023 = vperm.xlu2 %5000, %v5022_v5  }
0x22b9   :  { %4456 = vperm.xlu2 %5000, %v4422_v55  }
0x22c1   :  { %4471 = vperm.xlu2 %5000, %v4425_v47  }
0x22c9   :  { %4486 = vperm.xlu2 %5000, %v4428_v15   ;;  %v5014_v21 = vpop.permute.xlu1 %5013 }
0x22cb   :  { %v4283_v23 = vpop.xlane.xlu0 %4282 }
0x22cc   :  { %4285 = vst.msk [vmem:[#allocation4 + $0x22] sm:$0x3] %vm493_vm12, %v4283_v23 }
0x22d1   :  { %4501 = vperm.xlu2 %5000, %v4431_v7  }
0x22d3   :  { %v3843_v39 = vpop.xlane.xlu0 %3842  ;;  %v4308_v19 = vld [vmem:[#allocation4 + $0x22] sm:$0x3] }
0x22d4   :  { %3845 = vst.msk [vmem:[#allocation4 + $0x1e] sm:$0x3] %vm493_vm12, %v3843_v39  ;;  %v4344_v12 = vadd.f32 %v4326_v38, %v4308_v19  ;;  %v5016_v38 = vunpack.i.h.bf16 %v5014_v21 }
0x22d6   :  { %v4383_v0 = vadd.f32 %v7895_v1, %v4344_v12  ;;  %v5015_v12 = vunpack.i.l.bf16 %v5014_v21 }
0x22d8   :  { %5498 = vtanh.f32 %v4383_v0 }
0x22d9   :  { %4767 = vperm.xlu2 %5000, %v4764_v34   ;;  %5500 = vtanh.f32 %v4371_v9 }
0x22db   :  { %v4306_v45 = vld [vmem:[#allocation4 + $0x1e] sm:$0x3] }
0x22dc   :  { %v4289_v40 = vpop.xlane.xlu2 %4288  ;;  %v4342_v58 = vadd.f32 %v4324_v33, %v4306_v45  ;;  %v4600_v45 = vperm.slane %v5016_v38, %v7974_v51  ;;  %v4406_v38 = vld [vmem:[%s8094_s10 + $0x20] sm:$0xff] }
0x22dd   :  { %4290 = vst.msk [vmem:[#allocation5] sm:$0x3] %vm493_vm12, %v4289_v40  ;;  %vm4606_vm12 = vcmask 1041409  }
0x22de   :  { %v5499_v52 = vpop.eup %5498  ;;  %v4381_v63 = vadd.f32 %v7895_v1, %v4342_v58  ;;  %v4590_v58 = vperm.slane %v5015_v12, %v7974_v51  ;;  %v4411_v12 = vld [vmem:[%s8094_s10 + $0x48] sm:$0xff] }
0x22df   :  { %4584 = vperm.xlu1 %4999, %v5499_v52   ;;  %v5501_v11 = vpop.eup %5500 }
0x22e0   :  { %5502 = vtanh.f32 %v4381_v63 }
0x22e1   :  { %5504 = vtanh.f32 %v4376_v54 }
0x22e4   :  { %v4309_v42 = vld [vmem:[#allocation5] sm:$0x3]  ;;  %v5004_v17 = vpop.permute.xlu2 %5003 }
0x22e5   :  { %v4327_v24 = vadd.f32 %v4309_v42, %v4291_v10  ;;  %v5006_v39 = vunpack.i.h.bf16 %v5004_v17  ;;  %v5005_v19 = vunpack.i.l.bf16 %v5004_v17  ;;  %v4402_v17 = vld [vmem:[%s8094_s10] sm:$0xff] }
0x22e6   :  { %v5503_v29 = vpop.eup %5502  ;;  %v7972_v44 = vpop.permute.xlu0 %4446 }
0x22e7   :  { %v5027_v26 = vpack.i.bf16 %v5503_v29, %v5501_v11  ;;  %v4366_v60 = vadd.f32 %v7895_v1, %v4327_v24  ;;  %v5505_v3 = vpop.eup %5504  ;;  %v4429_v1 = vld [vmem:[%s8095_s11 + $0x58] sm:$0xff]  ;;  %v4597_v8 = vperm.slane %v5006_v39, %v7974_v51  ;;  %v4596_v34 = vperm.slane %v5005_v19, %v7974_v51  ;;  %v4410_v39 = vld [vmem:[%s8094_s10 + $0x40] sm:$0xff]  ;;  %v4415_v19 = vld [vmem:[%s8094_s10 + $0x68] sm:$0xff] }
0x22e9   :  { %5028 = vperm.xlu0 %5001, %v5027_v26   ;;  %5506 = vtanh.f32 %v4366_v60  ;;  %v4620_v42 = vsel %vm4606_vm12, %v4597_v8, %v4596_v34  ;;  %v4416_v8 = vld [vmem:[%s8094_s10 + $0x70] sm:$0xff]  ;;  %v4417_v34 = vld [vmem:[%s8094_s10 + $0x78] sm:$0xff] }
0x22ea   :  { %5508 = vtanh.f32 %v4372_v61 }
0x22eb   :  { %5510 = vtanh.f32 %v4373_v32 }
0x22ec   :  { %v5009_v5 = vpop.permute.xlu2 %5008 }
0x22ed   :  { %v5011_v0 = vunpack.i.h.bf16 %v5009_v5  ;;  %v5010_v62 = vunpack.i.l.bf16 %v5009_v5  ;;  %v4408_v5 = vld [vmem:[%s8094_s10 + $0x30] sm:$0xff] }
0x22ee   :  { %v4582_v30 = vpop.permute.xlu0 %4581 }
0x22ef   :  { %v5507_v37 = vpop.eup %5506  ;;  %v4604_v47 = vperm.slane %v4582_v30, %v7974_v51  ;;  %v4599_v18 = vperm.slane %v5011_v0, %v7974_v51  ;;  %v4589_v10 = vperm.slane %v5010_v62, %v7974_v51  ;;  %v4412_v30 = vld [vmem:[%s8094_s10 + $0x50] sm:$0xff] }
0x22f0   :  { %v5032_v35 = vpack.i.bf16 %v5507_v37, %v5505_v3  ;;  %v5509_v43 = vpop.eup %5508 }
0x22f1   :  { %4461 = vperm.xlu0 %5001, %v4423_v31   ;;  %v5511_v46 = vpop.eup %5510 }
0x22f2   :  { %5033 = vperm.xlu1 %4999, %v5032_v35   ;;  %v5037_v53 = vpack.i.bf16 %v5511_v46, %v5509_v43 }
0x22f4   :  { %v5019_v7 = vpop.permute.xlu2 %5018 }
0x22f5   :  { %v5021_v33 = vunpack.i.h.bf16 %v5019_v7  ;;  %v5020_v9 = vunpack.i.l.bf16 %v5019_v7  ;;  %v4405_v7 = vld [vmem:[%s8094_s10 + $0x18] sm:$0xff] }
0x22f7   :  { %v4601_v24 = vperm.slane %v5021_v33, %v7974_v51  ;;  %v4591_v29 = vperm.slane %v5020_v9, %v7974_v51 }
0x22f9   :  { %4476 = vperm.xlu0 %5001, %v4426_v14  }
0x22fa   :  { %5038 = vperm.xlu1 %4999, %v5037_v53  }
0x2301   :  { %4491 = vperm.xlu0 %5001, %v4429_v1  }
0x2302   :  { %4466 = vperm.xlu1 %4999, %v4424_v20  }
0x2309   :  { %4506 = vperm.xlu0 %5001, %v4432_v36  }
0x230a   :  { %4481 = vperm.xlu1 %4999, %v4427_v59  }
0x230b   :  { %v5024_v16 = vpop.permute.xlu2 %5023 }
0x230c   :  { %v5026_v56 = vunpack.i.h.bf16 %v5024_v16  ;;  %v5025_v54 = vunpack.i.l.bf16 %v5024_v16 }
0x230e   :  { %v4602_v25 = vperm.slane %v5026_v56, %v7974_v51  ;;  %v4592_v61 = vperm.slane %v5025_v54, %v7974_v51 }
0x2312   :  { %4496 = vperm.xlu1 %4999, %v4430_v22  }
0x2313   :  { %v4457_v9 = vpop.permute.xlu2 %4456 }
0x231a   :  { %4511 = vperm.xlu1 %4999, %v4433_v49  }
0x2351   :  { %v4585_v55 = vpop.permute.xlu1 %4584 }
0x2352   :  { %v4605_v15 = vperm.slane %v4585_v55, %v7974_v51  ;;  %v4413_v55 = vld [vmem:[%s8094_s10 + $0x58] sm:$0xff] }
0x2354   :  { %v4627_v23 = vsel %vm4606_vm12, %v4605_v15, %v4604_v47  ;;  %v4404_v47 = vld [vmem:[%s8094_s10 + $0x10] sm:$0xff]  ;;  %v4409_v15 = vld [vmem:[%s8094_s10 + $0x38] sm:$0xff] }
0x2355   :  { %4970 = vmatpush.msk.msrb.mxu0 %vm4679_vm6, %v4627_v23  ;;  %4987 = vmatpush.msk.msrb.mxu2 %vm4679_vm6, %v4627_v23 }
0x2356   :  { %4988 = vmatpush.msk.msrb.mxu3 %vm4679_vm6, %v4627_v23  ;;  %v4414_v23 = vld [vmem:[%s8094_s10 + $0x60] sm:$0xff] }
0x235b   :  { %v5029_v52 = vpop.permute.xlu0 %5028 }
0x235c   :  { %v5031_v48 = vunpack.i.h.bf16 %v5029_v52  ;;  %v5030_v41 = vunpack.i.l.bf16 %v5029_v52 }
0x235e   :  { %v4603_v31 = vperm.slane %v5031_v48, %v7974_v51  ;;  %v4593_v1 = vperm.slane %v5030_v41, %v7974_v51 }
0x2364   :  { %v5034_v40 = vpop.permute.xlu1 %5033 }
0x2365   :  { %v5036_v63 = vunpack.i.h.bf16 %v5034_v40  ;;  %v5035_v4 = vunpack.i.l.bf16 %v5034_v40 }
0x2367   :  { %v4588_v28 = vperm.slane %v5036_v63, %v7974_v51  ;;  %v4598_v11 = vperm.slane %v5035_v4, %v7974_v51  ;;  %v4472_v4 = vpop.permute.xlu2 %4471 }
0x2369   :  { %v4607_v26 = vsel %vm4606_vm12, %v4589_v10, %v4588_v28  ;;  %v4621_v60 = vsel %vm4608_vm7, %v4598_v11, %v4620_v42 }
0x236a   :  { %v4609_v13 = vsel %vm4608_vm7, %v4590_v58, %v4607_v26  ;;  %v4622_v50 = vsel %vm4610_vm8, %v4599_v18, %v4621_v60 }
0x236b   :  { %v4623_v32 = vsel %vm4612_vm9, %v4600_v45, %v4622_v50  ;;  %v4611_v3 = vsel %vm4610_vm8, %v4591_v29, %v4609_v13  ;;  %v4462_v45 = vpop.permute.xlu0 %4461 }
0x236c   :  { %v5039_v37 = vpop.permute.xlu1 %5038  ;;  %v4624_v35 = vsel %vm4614_vm10, %v4601_v24, %v4623_v32  ;;  %v4613_v53 = vsel %vm4612_vm9, %v4592_v61, %v4611_v3 }
0x236d   :  { %v5041_v43 = vunpack.i.h.bf16 %v5039_v37  ;;  %v5040_v14 = vunpack.i.l.bf16 %v5039_v37  ;;  %v4625_v46 = vsel %vm4616_vm13, %v4602_v25, %v4624_v35  ;;  %v4615_v22 = vsel %vm4614_vm10, %v4593_v1, %v4613_v53 }
0x236e   :  { %v4626_v20 = vsel %vm4618_vm14, %v4603_v31, %v4625_v46 }
0x236f   :  { %v4595_v36 = vperm.slane %v5041_v43, %v7974_v51  ;;  %v4594_v59 = vperm.slane %v5040_v14, %v7974_v51  ;;  %4696 = vmatpush.msrb.mxu0 %v4626_v20  ;;  %4989 = vmatpush.msrb.mxu2 %v4626_v20  ;;  %v4403_v51 = vld [vmem:[%s8094_s10 + $0x8] sm:$0xff]  ;;  %v4487_v11 = vpop.permute.xlu2 %4486 }
0x2370   :  { %4990 = vmatpush.msrb.mxu3 %v4626_v20 }
0x2371   :  { %v4617_v49 = vsel %vm4616_vm13, %v4594_v59, %v4615_v22 }
0x2372   :  { %v4619_v21 = vsel %vm4618_vm14, %v4595_v36, %v4617_v49 }
0x2373   :  { %4697 = vmatpush.msrb.mxu0 %v4619_v21  ;;  %4991 = vmatpush.msrb.mxu2 %v4619_v21  ;;  %v4477_v52 = vpop.permute.xlu0 %4476 }
0x2374   :  { %4992 = vmatpush.msrb.mxu3 %v4619_v21  ;;  %4971 = vmatmul.msk.f32.vlgmr.msrb.gmra.mxu0 %vm4630_vm15, %v4402_v17  ;;  %v4467_v33 = vpop.permute.xlu1 %4466 }
0x2375   :  { %4976 = vmatmul.msk.f32.vlgmr.msrb.gmra.mxu2 %vm4630_vm15, %v4407_v27  ;;  %4981 = vmatmul.msk.f32.vlgmr.msrb.gmra.mxu3 %vm4630_vm15, %v4412_v30 }
0x2377   :  { %v4502_v50 = vpop.permute.xlu2 %4501 }
0x237b   :  { %v4492_v54 = vpop.permute.xlu0 %4491 }
0x237c   :  { %4972 = vmatmul.msk.f32.gmra.mxu0 %vm4630_vm15, %v4403_v51  ;;  %v4482_v63 = vpop.permute.xlu1 %4481 }
0x237d   :  { %4977 = vmatmul.msk.f32.gmra.mxu2 %vm4630_vm15, %v4408_v5  ;;  %4982 = vmatmul.msk.f32.gmra.mxu3 %vm4630_vm15, %v4413_v55 }
0x2383   :  { %v4507_v25 = vpop.permute.xlu0 %4506 }
0x2384   :  { %4973 = vmatmul.msk.f32.gmra.mxu0 %vm4630_vm15, %v4404_v47  ;;  %v4497_v28 = vpop.permute.xlu1 %4496 }
0x2385   :  { %4978 = vmatmul.msk.f32.gmra.mxu2 %vm4630_vm15, %v4409_v15  ;;  %4983 = vmatmul.msk.f32.gmra.mxu3 %vm4630_vm15, %v4414_v23 }
0x238c   :  { %4974 = vmatmul.msk.f32.gmra.mxu0 %vm4630_vm15, %v4405_v7  ;;  %v4512_v26 = vpop.permute.xlu1 %4511 }
0x238d   :  { %4979 = vmatmul.msk.f32.gmra.mxu2 %vm4630_vm15, %v4410_v39  ;;  %4984 = vmatmul.msk.f32.gmra.mxu3 %vm4630_vm15, %v4415_v19 }
0x2394   :  { %4975 = vmatmul.msk.f32.gmra.mxu0 %vm4630_vm15, %v4406_v38 }
0x2395   :  { %4980 = vmatmul.msk.f32.gmra.mxu2 %vm4630_vm15, %v4411_v12  ;;  %4985 = vmatmul.msk.f32.gmra.mxu3 %vm4630_vm15, %v4416_v8 }
0x239d   :  { %4986 = vmatmul.msk.f32.gmra.mxu3 %vm4630_vm15, %v4417_v34 }
0x23f1   :  { %v8071_v58 = vpop.f32.mrf.mxu0 }
0x23f2   :  { %v4700_v39 = vadd.f32 %v8071_v58, %v7968_v57  ;;  %v4768_v57 = vpop.permute.xlu2 %4767 }
0x23f3   :  { %v4770_v8 = vperm.slane %v4768_v57, 0 }
0x23f8   :  { %v4729_v0 = vpop.f32.mrf.mxu3  ;;  %v4714_v62 = vpop.f32.mrf.mxu2 }
0x23f9   :  { %v4702_v10 = vpop.f32.mrf.mxu0  ;;  %v4730_v43 = vadd.f32 %v4729_v0, %v4487_v11  ;;  %v4715_v21 = vadd.f32 %v4714_v62, %v4462_v45 }
0x23fa   :  { %v4703_v23 = vadd.f32 %v4702_v10, %v7933_v2  ;;  %v4763_v2 = vld [vmem:[%s8096_s12] sm:$0x1] }
0x2400   :  { %v4732_v16 = vpop.f32.mrf.mxu3  ;;  %v4717_v56 = vpop.f32.mrf.mxu2 }
0x2401   :  { %v4705_v29 = vpop.f32.mrf.mxu0  ;;  %v4733_v3 = vadd.f32 %v4732_v16, %v4492_v54  ;;  %v4718_v22 = vadd.f32 %v4717_v56, %v4467_v33 }
0x2402   :  { %v4706_v47 = vadd.f32 %v4705_v29, %v7972_v44 }
0x2408   :  { %v4735_v40 = vpop.f32.mrf.mxu3  ;;  %v4720_v42 = vpop.f32.mrf.mxu2 }
0x2409   :  { %v4736_v32 = vadd.f32 %v4735_v40, %v4497_v28  ;;  %v4708_v31 = vpop.f32.mrf.mxu0  ;;  %v4721_v36 = vadd.f32 %v4720_v42, %v4472_v4 }
0x240a   :  { %v4709_v5 = vadd.f32 %v4708_v31, %v7970_v6 }
0x2410   :  { %v4738_v18 = vpop.f32.mrf.mxu3  ;;  %v4723_v48 = vpop.f32.mrf.mxu2 }
0x2411   :  { %v4739_v61 = vadd.f32 %v4738_v18, %v4502_v50  ;;  %v4724_v1 = vadd.f32 %v4723_v48, %v4477_v52  ;;  %v4711_v49 = vpop.f32.mrf.mxu0 }
0x2412   :  { %v4712_v30 = vadd.f32 %v4711_v49, %v4457_v9 }
0x2418   :  { %v4741_v24 = vpop.f32.mrf.mxu3  ;;  %v4726_v37 = vpop.f32.mrf.mxu2 }
0x2419   :  { %v4742_v41 = vadd.f32 %v4741_v24, %v4507_v25  ;;  %v4727_v46 = vadd.f32 %v4726_v37, %v4482_v63 }
0x2420   :  { %v4744_v60 = vpop.f32.mrf.mxu3 }
0x2421   :  { %v4745_v13 = vadd.f32 %v4744_v60, %v4512_v26 }
0x2423   :  { %5512 = vtanh.f32 %v4745_v13 }
0x2424   :  { %5514 = vtanh.f32 %v4742_v41 }
0x2425   :  { %5516 = vtanh.f32 %v4739_v61 }
0x2426   :  { %5518 = vtanh.f32 %v4736_v32 }
0x2427   :  { %5520 = vtanh.f32 %v4733_v3 }
0x2428   :  { %5522 = vtanh.f32 %v4730_v43 }
0x2429   :  { %v5513_v35 = vpop.eup %5512  ;;  %5524 = vtanh.f32 %v4727_v46 }
0x242a   :  { %4771 = vmatpush.msrb.mxu1 %v5513_v35  ;;  %v5515_v14 = vpop.eup %5514  ;;  %5526 = vtanh.f32 %v4724_v1 }
0x242b   :  { %v5517_v53 = vpop.eup %5516  ;;  %5528 = vtanh.f32 %v4721_v36 }
0x242c   :  { %4772 = vmatpush.msrb.mxu1 %v5515_v14  ;;  %v5519_v20 = vpop.eup %5518  ;;  %5530 = vtanh.f32 %v4718_v22 }
0x242d   :  { %v5521_v59 = vpop.eup %5520  ;;  %5532 = vtanh.f32 %v4715_v21 }
0x242e   :  { %4773 = vmatpush.msrb.mxu1 %v5517_v53  ;;  %v5523_v17 = vpop.eup %5522  ;;  %5534 = vtanh.f32 %v4712_v30 }
0x242f   :  { %v5525_v27 = vpop.eup %5524  ;;  %5536 = vtanh.f32 %v4709_v5 }
0x2430   :  { %4774 = vmatpush.msrb.mxu1 %v5519_v20  ;;  %v5527_v51 = vpop.eup %5526  ;;  %5538 = vtanh.f32 %v4706_v47 }
0x2431   :  { %v5529_v55 = vpop.eup %5528  ;;  %5540 = vtanh.f32 %v4703_v23 }
0x2432   :  { %4775 = vmatpush.msrb.mxu1 %v5521_v59  ;;  %v5531_v15 = vpop.eup %5530  ;;  %5542 = vtanh.f32 %v4700_v39 }
0x2433   :  { %v5533_v7 = vpop.eup %5532 }
0x2434   :  { %4776 = vmatpush.msrb.mxu1 %v5523_v17  ;;  %v5535_v19 = vpop.eup %5534 }
0x2435   :  { %v5537_v6 = vpop.eup %5536 }
0x2436   :  { %4777 = vmatpush.msrb.mxu1 %v5525_v27  ;;  %v5539_v44 = vpop.eup %5538 }
0x2437   :  { %v5541_v38 = vpop.eup %5540 }
0x2438   :  { %4778 = vmatpush.msrb.mxu1 %v5527_v51  ;;  %v5543_v12 = vpop.eup %5542 }
0x243a   :  { %4779 = vmatpush.msrb.mxu1 %v5529_v55 }
0x243c   :  { %4780 = vmatpush.msrb.mxu1 %v5531_v15 }
0x243e   :  { %4781 = vmatpush.msrb.mxu1 %v5533_v7 }
0x2440   :  { %4782 = vmatpush.msrb.mxu1 %v5535_v19 }
0x2442   :  { %4783 = vmatpush.msrb.mxu1 %v5537_v6 }
0x2444   :  { %4784 = vmatpush.msrb.mxu1 %v5539_v44 }
0x2446   :  { %4785 = vmatpush.msrb.mxu1 %v5541_v38 }
0x2448   :  { %4786 = vmatpush.msrb.mxu1 %v5543_v12 }
0x2449   :  { %4787 = vmatmul.f32.vlgmr.msrb.gmra.mxu1 %v4763_v2 }
0x24c6   :  { %v4788_v34 = vpop.f32.mrf.mxu1 }
0x24c7   :  { %v4789_v0 = vadd.f32 %v4788_v34, %v4770_v8 }
0x24c9   :  { %5544 = vtanh.f32 %v4789_v0 }
0x24cf   :  { %v5545_v62 = vpop.eup %5544 }
0x24d0   :  { %4793 = vst.msk [vmem:[#allocation8] sm:$0x1] %vm4792_vm0, %v5545_v62 }
0x24d1   :  { %4804 = dma.vmem_to_hbm [thread:$0]  %s4800_s1, 16, %s4802_s2, [#allocation9]  }
0x24d2   :  { %5691 = dma.done.wait [#allocation9], 16  }
0x24d3   :  { %5692 = vsyncadd [#allocation9], 4294967280 }
0x24d4   :  { %4809 = vsyncpa [#allocation9], 1 }

</bundles_post_ra>
